<compile_context>
chip_gen: v7x
topology: tpu7x:2x2x1
jax: 0.10.0
libtpu: 0.0.40
codegen_flags: <defaults>
</compile_context>

<pallas_src>
import jax
import jax.numpy as jnp
from jax import lax
from jax.experimental import pallas as pl
from jax.experimental.pallas import tpu as pltpu


def ncn_kernel(ei0_ref, ei1_ref, adj_ref, x_ref,
               w1c_ref, b1c_ref, w1j_ref, b1j_ref,
               w2c_ref, w2j_ref, b2_ref,
               l0w_ref, l0b_ref, l1w_ref, l1b_ref,
               l2wt_ref, l2b_ref, out_ref):
    f32 = jnp.float32
    bf16 = jnp.bfloat16
    te = ei0_ref.shape[0]
    n = adj_ref.shape[0]

    # ---- in-kernel row gather via one-hot MXU matmuls -----------------------
    # One-hot selectors built from the per-tile edge indices (cheap VPU work);
    # 0/1 values are exact in bf16, so the gathers below are exact row selects.
    lane_ids = lax.broadcasted_iota(jnp.int32, (te, n), 1)
    oh_i = (lane_ids == ei0_ref[...]).astype(bf16)                   # [TE, N]
    oh_j = (lane_ids == ei1_ref[...]).astype(bf16)                   # [TE, N]

    ai = jnp.dot(oh_i, adj_ref[...], preferred_element_type=f32)     # [TE, N] exact 0/1
    aj = jnp.dot(oh_j, adj_ref[...], preferred_element_type=f32)     # [TE, N] exact 0/1
    cn = (ai * aj).astype(bf16)                                      # exact 0/1
    xcn = jnp.dot(cn, x_ref[...], preferred_element_type=f32)        # [TE, Fin] f32 accum

    xi = jnp.dot(oh_i, x_ref[...], preferred_element_type=f32)       # [TE, Fin] = bf16(x[i])
    xj = jnp.dot(oh_j, x_ref[...], preferred_element_type=f32)
    xij = xi * xj                                                     # [TE, Fin] f32

    # ---- xcnlin / xijlin: Linear + ReLU + (dropout=id) + Linear -------------
    # beta is folded into the xcn branch's layer-2 weights/bias at prep time,
    # so the branch merge is just the sum of the two layer-2 matmuls.
    hc = jnp.maximum(
        jnp.dot(xcn, w1c_ref[...], preferred_element_type=f32) + b1c_ref[...], 0.0)
    hj = jnp.maximum(
        jnp.dot(xij, w1j_ref[...], preferred_element_type=f32) + b1j_ref[...], 0.0)
    h = (jnp.dot(hc, w2c_ref[...], preferred_element_type=f32)
         + jnp.dot(hj, w2j_ref[...], preferred_element_type=f32)
         + b2_ref[...])                                               # [TE, H]

    # ---- self.lin[:-1] : Linear + ReLU (res=False, norm=False, eval) --------
    h = jnp.maximum(
        jnp.dot(h, l0w_ref[...], preferred_element_type=f32) + l0b_ref[...], 0.0)
    h = jnp.maximum(
        jnp.dot(h, l1w_ref[...], preferred_element_type=f32) + l1b_ref[...], 0.0)

    # ---- self.lin[-1], computed transposed (A @ B^T) for a lane-dense store:
    # out_t[c, e] = sum_h l2wt[c, h] * h[e, h]
    out_t = lax.dot_general(l2wt_ref[...], h, (((1,), (1,)), ((), ())),
                            preferred_element_type=f32)              # [Cout, TE]
    out_ref[...] = (out_t + l2b_ref[...]).astype(out_ref.dtype)


def ncn_predictor(x, adj, tar_ei, params, *, beta=1.0, tile_e=512):
    """Forward pass of NCNPredictor. Returns shape [E] (out_channels=1 squeezed).

    tile_e=512 works on all generations here: per-step VMEM use is a few MiB
    and HBM traffic per step is only the index tile + output tile.
    """
    assert tile_e % 128 == 0, "tile_e must be a multiple of 128 (lane-dense tiles)"
    f32 = jnp.float32
    N, Fin = x.shape
    E = tar_ei.shape[1]
    H = params["w1c"].shape[1]
    Cout = params["l2w"].shape[1]

    # ---- pad the edge axis; round the tile count up to an even number so the
    # parallel grid axis shards evenly over v7x's two TensorCores. ------------
    n_tiles = -(-E // tile_e)
    n_tiles += n_tiles % 2
    e_pad = n_tiles * tile_e
    ei = tar_ei.astype(jnp.int32)
    if e_pad != E:
        ei = jnp.pad(ei, ((0, 0), (0, e_pad - E)))   # pad with node 0; sliced off below
    ei0 = ei[0][:, None]                              # [E_pad, 1]
    ei1 = ei[1][:, None]                              # [E_pad, 1]

    # Single bf16 copy of adjacency (0/1 -> exact) and features, kept resident
    # in VMEM and gathered in-kernel.
    adj_bf16 = adj.astype(jnp.bfloat16)
    x_bf16 = x.astype(jnp.bfloat16)

    # ---- one-time weight prep (plain JAX): fold beta into the xcn branch ----
    w2c_beta = beta * params["w2c"]                                   # [H, H]
    b2_sum = beta * params["b2c"] + params["b2j"]                     # [1, H]
    l2wt = params["l2w"].T                                            # [Cout, H]
    l2b_col = params["l2b"].T                                         # [Cout, 1]

    weights = [params["w1c"], params["b1c"], params["w1j"], params["b1j"],
               w2c_beta, params["w2j"], b2_sum,
               params["l0w"], params["l0b"], params["l1w"], params["l1b"],
               l2wt, l2b_col]

    def idx_spec():
        return pl.BlockSpec((tile_e, 1), lambda i: (i, 0))

    def full_spec(a):
        # Grid-invariant block (constant index map): DMA'd once, never re-fetched.
        return pl.BlockSpec(a.shape, lambda i: (0,) * a.ndim)

    grid_spec = pltpu.PrefetchScalarGridSpec(
        num_scalar_prefetch=0,
        grid=(n_tiles,),
        in_specs=([idx_spec(), idx_spec(), full_spec(adj_bf16), full_spec(x_bf16)]
                  + [full_spec(w) for w in weights]),
        # Lane-dense output: [Cout, tile_e] block of a [Cout, E_pad] result.
        out_specs=pl.BlockSpec((Cout, tile_e), lambda i: (0, i)),
    )

    out = pl.pallas_call(
        ncn_kernel,
        out_shape=jax.ShapeDtypeStruct((Cout, e_pad), f32),
        grid_spec=grid_spec,
        compiler_params=pltpu.CompilerParams(
            dimension_semantics=("parallel",),       # edge tiles are independent
            # Actual footprint is a few MiB; 32 MiB is within scoped/physical
            # limits on v5e, v6e and v7x (64 MiB physical) with headroom.
            vmem_limit_bytes=32 * 1024 * 1024),
    )(ei0, ei1, adj_bf16, x_bf16, *weights)

    # Drop padded edges, restore [E, Cout] orientation, squeeze like PyTorch.
    return jnp.squeeze(out[:, :E].T)


def init_params(key, in_channels, hidden_channels, out_channels):
    """Deterministic synthetic parameters; Linear weights stored as [in, out]."""
    ks = jax.random.split(key, 7)
    s = 0.1

    def lin(k, fan_in, fan_out):
        kw, kb = jax.random.split(k)
        w = jax.random.normal(kw, (fan_in, fan_out), jnp.float32) * s
        b = jax.random.normal(kb, (1, fan_out), jnp.float32) * s
        return w, b

    w1c, b1c = lin(ks[0], in_channels, hidden_channels)
    w2c, b2c = lin(ks[1], hidden_channels, hidden_channels)
    w1j, b1j = lin(ks[2], in_channels, hidden_channels)
    w2j, b2j = lin(ks[3], hidden_channels, hidden_channels)
    l0w, l0b = lin(ks[4], hidden_channels, hidden_channels)
    l1w, l1b = lin(ks[5], hidden_channels, hidden_channels)
    l2w, l2b = lin(ks[6], hidden_channels, out_channels)
    return dict(w1c=w1c, b1c=b1c, w2c=w2c, b2c=b2c,
                w1j=w1j, b1j=b1j, w2j=w2j, b2j=b2j,
                l0w=l0w, l0b=l0b, l1w=l1w, l1b=l1b, l2w=l2w, l2b=l2b)


def reference_forward(x, adj, tar_ei, p, beta=1.0):
    """Pure-JAX f32 reference of the same forward (for sanity check)."""
    xi, xj = x[tar_ei[0]], x[tar_ei[1]]
    cn = adj[tar_ei[0]] * adj[tar_ei[1]]
    xcn = cn @ x

    def mlp2(h, w1, b1, w2, b2):
        return jnp.maximum(h @ w1 + b1, 0.0) @ w2 + b2

    xij_h = mlp2(xi * xj, p["w1j"], p["b1j"], p["w2j"], p["b2j"])
    xcn_h = mlp2(xcn, p["w1c"], p["b1c"], p["w2c"], p["b2c"])
    h = beta * xcn_h + xij_h
    h = jnp.maximum(h @ p["l0w"] + p["l0b"], 0.0)
    h = jnp.maximum(h @ p["l1w"] + p["l1b"], 0.0)
    return jnp.squeeze(h @ p["l2w"] + p["l2b"])


if __name__ == "__main__":
    N, Fin, H, Cout = 256, 32, 64, 1   # nodes, in_channels, hidden, out_channels
    E = 1000                            # target edges -> padded to two 512-edge tiles

    key = jax.random.PRNGKey(0)
    k_x, k_adj, k_ei, k_p = jax.random.split(key, 4)

    x = jax.random.normal(k_x, (N, Fin), jnp.float32)

    # Symmetric binary adjacency (densified adj_t), no self loops.
    a = (jax.random.uniform(k_adj, (N, N)) < 0.05).astype(jnp.float32)
    adj = jnp.clip(a + a.T, 0.0, 1.0) * (1.0 - jnp.eye(N, dtype=jnp.float32))

    tar_ei = jax.random.randint(k_ei, (2, E), 0, N, dtype=jnp.int32)

    params = init_params(k_p, Fin, H, Cout)

    out = ncn_predictor(x, adj, tar_ei, params, beta=1.0, tile_e=512)
    out = jax.block_until_ready(out)

    ref = reference_forward(x, adj, tar_ei, params, beta=1.0)
    assert out.shape == (E,), out.shape
    # x is rounded to bf16 for the in-kernel gathers and the cn @ x matmul
    # (f32 accumulation); adjacency / one-hot arithmetic is exact in bf16.
    assert jnp.allclose(out, ref, atol=2e-2, rtol=2e-2), (
        float(jnp.max(jnp.abs(out - ref))))

    print("KERNEL_OK")
</pallas_src>

<mosaic_0001>
module attributes {stable_mosaic.version = 11 : i64} {
  func.func @ncn_kernel(%arg0: i32, %arg1: memref<512x1xi32, #tpu.memory_space<vmem>>, %arg2: memref<512x1xi32, #tpu.memory_space<vmem>>, %arg3: memref<256x256xbf16, #tpu.memory_space<vmem>>, %arg4: memref<256x32xbf16, #tpu.memory_space<vmem>>, %arg5: memref<32x64xf32, #tpu.memory_space<vmem>>, %arg6: memref<1x64xf32, #tpu.memory_space<vmem>>, %arg7: memref<32x64xf32, #tpu.memory_space<vmem>>, %arg8: memref<1x64xf32, #tpu.memory_space<vmem>>, %arg9: memref<64x64xf32, #tpu.memory_space<vmem>>, %arg10: memref<64x64xf32, #tpu.memory_space<vmem>>, %arg11: memref<1x64xf32, #tpu.memory_space<vmem>>, %arg12: memref<64x64xf32, #tpu.memory_space<vmem>>, %arg13: memref<1x64xf32, #tpu.memory_space<vmem>>, %arg14: memref<64x64xf32, #tpu.memory_space<vmem>>, %arg15: memref<1x64xf32, #tpu.memory_space<vmem>>, %arg16: memref<1x64xf32, #tpu.memory_space<vmem>>, %arg17: memref<1x1xf32, #tpu.memory_space<vmem>>, %arg18: memref<1x512xf32, #tpu.memory_space<vmem>>) attributes {dimension_semantics = [#tpu.dimension_semantics<parallel>], iteration_bounds = array<i64: 2>, scalar_prefetch = 0 : i64, scratch_operands = 0 : i64, tpu.core_type = #tpu.core_type<tc>, window_params = [{transform_indices = @transform_0, window_bounds = array<i64: 512, 1>}, {transform_indices = @transform_1, window_bounds = array<i64: 512, 1>}, {pipeline_mode = #tpu.pipeline_mode<synchronous>, transform_indices = @transform_2, window_bounds = array<i64: 256, 256>}, {pipeline_mode = #tpu.pipeline_mode<synchronous>, transform_indices = @transform_3, window_bounds = array<i64: 256, 32>}, {pipeline_mode = #tpu.pipeline_mode<synchronous>, transform_indices = @transform_4, window_bounds = array<i64: 32, 64>}, {pipeline_mode = #tpu.pipeline_mode<synchronous>, transform_indices = @transform_5, window_bounds = array<i64: 1, 64>}, {pipeline_mode = #tpu.pipeline_mode<synchronous>, transform_indices = @transform_6, window_bounds = array<i64: 32, 64>}, {pipeline_mode = #tpu.pipeline_mode<synchronous>, transform_indices = @transform_7, window_bounds = array<i64: 1, 64>}, {pipeline_mode = #tpu.pipeline_mode<synchronous>, transform_indices = @transform_8, window_bounds = array<i64: 64, 64>}, {pipeline_mode = #tpu.pipeline_mode<synchronous>, transform_indices = @transform_9, window_bounds = array<i64: 64, 64>}, {pipeline_mode = #tpu.pipeline_mode<synchronous>, transform_indices = @transform_10, window_bounds = array<i64: 1, 64>}, {pipeline_mode = #tpu.pipeline_mode<synchronous>, transform_indices = @transform_11, window_bounds = array<i64: 64, 64>}, {pipeline_mode = #tpu.pipeline_mode<synchronous>, transform_indices = @transform_12, window_bounds = array<i64: 1, 64>}, {pipeline_mode = #tpu.pipeline_mode<synchronous>, transform_indices = @transform_13, window_bounds = array<i64: 64, 64>}, {pipeline_mode = #tpu.pipeline_mode<synchronous>, transform_indices = @transform_14, window_bounds = array<i64: 1, 64>}, {pipeline_mode = #tpu.pipeline_mode<synchronous>, transform_indices = @transform_15, window_bounds = array<i64: 1, 64>}, {pipeline_mode = #tpu.pipeline_mode<synchronous>, transform_indices = @transform_16, window_bounds = array<i64: 1, 1>}, {transform_indices = @transform_17, window_bounds = array<i64: 1, 512>}]} {
    %0 = tpu.iota {dimensions = array<i32: 1>} : vector<512x256xi32>
    %c0 = arith.constant 0 : index
    %c0_0 = arith.constant 0 : index
    %1 = vector.load %arg1[%c0, %c0_0] : memref<512x1xi32, #tpu.memory_space<vmem>>, vector<512x1xi32>
    %2 = vector.broadcast %1 : vector<512x1xi32> to vector<512x256xi32>
    %3 = arith.cmpi eq, %0, %2 : vector<512x256xi32>
    %4 = arith.extui %3 : vector<512x256xi1> to vector<512x256xi32>
    %5 = arith.sitofp %4 : vector<512x256xi32> to vector<512x256xf32>
    %6 = arith.truncf %5 : vector<512x256xf32> to vector<512x256xbf16>
    %c0_1 = arith.constant 0 : index
    %c0_2 = arith.constant 0 : index
    %7 = vector.load %arg2[%c0_1, %c0_2] : memref<512x1xi32, #tpu.memory_space<vmem>>, vector<512x1xi32>
    %8 = vector.broadcast %7 : vector<512x1xi32> to vector<512x256xi32>
    %9 = arith.cmpi eq, %0, %8 : vector<512x256xi32>
    %10 = arith.extui %9 : vector<512x256xi1> to vector<512x256xi32>
    %11 = arith.sitofp %10 : vector<512x256xi32> to vector<512x256xf32>
    %12 = arith.truncf %11 : vector<512x256xf32> to vector<512x256xbf16>
    %c0_3 = arith.constant 0 : index
    %c0_4 = arith.constant 0 : index
    %13 = vector.load %arg3[%c0_3, %c0_4] : memref<256x256xbf16, #tpu.memory_space<vmem>>, vector<256x256xbf16>
    %cst = arith.constant dense<0.000000e+00> : vector<512x256xf32>
    %14 = tpu.matmul %6, %13, %cst {dimension_numbers = #tpu.dot_dimension_numbers<[1], [0], [0], [1], [0, 0, 1, 1], [], []>} : vector<512x256xbf16>, vector<256x256xbf16>, vector<512x256xf32> -> vector<512x256xf32>
    %c0_5 = arith.constant 0 : index
    %c0_6 = arith.constant 0 : index
    %15 = vector.load %arg3[%c0_5, %c0_6] : memref<256x256xbf16, #tpu.memory_space<vmem>>, vector<256x256xbf16>
    %cst_7 = arith.constant dense<0.000000e+00> : vector<512x256xf32>
    %16 = tpu.matmul %12, %15, %cst_7 {dimension_numbers = #tpu.dot_dimension_numbers<[1], [0], [0], [1], [0, 0, 1, 1], [], []>} : vector<512x256xbf16>, vector<256x256xbf16>, vector<512x256xf32> -> vector<512x256xf32>
    %17 = arith.mulf %14, %16 : vector<512x256xf32>
    %18 = arith.truncf %17 : vector<512x256xf32> to vector<512x256xbf16>
    %c0_8 = arith.constant 0 : index
    %c0_9 = arith.constant 0 : index
    %19 = vector.load %arg4[%c0_8, %c0_9] : memref<256x32xbf16, #tpu.memory_space<vmem>>, vector<256x32xbf16>
    %cst_10 = arith.constant dense<0.000000e+00> : vector<512x32xf32>
    %20 = tpu.matmul %18, %19, %cst_10 {dimension_numbers = #tpu.dot_dimension_numbers<[1], [0], [0], [1], [0, 0, 1, 1], [], []>} : vector<512x256xbf16>, vector<256x32xbf16>, vector<512x32xf32> -> vector<512x32xf32>
    %c0_11 = arith.constant 0 : index
    %c0_12 = arith.constant 0 : index
    %21 = vector.load %arg4[%c0_11, %c0_12] : memref<256x32xbf16, #tpu.memory_space<vmem>>, vector<256x32xbf16>
    %cst_13 = arith.constant dense<0.000000e+00> : vector<512x32xf32>
    %22 = tpu.matmul %6, %21, %cst_13 {dimension_numbers = #tpu.dot_dimension_numbers<[1], [0], [0], [1], [0, 0, 1, 1], [], []>} : vector<512x256xbf16>, vector<256x32xbf16>, vector<512x32xf32> -> vector<512x32xf32>
    %c0_14 = arith.constant 0 : index
    %c0_15 = arith.constant 0 : index
    %23 = vector.load %arg4[%c0_14, %c0_15] : memref<256x32xbf16, #tpu.memory_space<vmem>>, vector<256x32xbf16>
    %cst_16 = arith.constant dense<0.000000e+00> : vector<512x32xf32>
    %24 = tpu.matmul %12, %23, %cst_16 {dimension_numbers = #tpu.dot_dimension_numbers<[1], [0], [0], [1], [0, 0, 1, 1], [], []>} : vector<512x256xbf16>, vector<256x32xbf16>, vector<512x32xf32> -> vector<512x32xf32>
    %25 = arith.mulf %22, %24 : vector<512x32xf32>
    %c0_17 = arith.constant 0 : index
    %c0_18 = arith.constant 0 : index
    %26 = vector.load %arg5[%c0_17, %c0_18] : memref<32x64xf32, #tpu.memory_space<vmem>>, vector<32x64xf32>
    %cst_19 = arith.constant dense<0.000000e+00> : vector<512x64xf32>
    %27 = tpu.matmul %20, %26, %cst_19 {dimension_numbers = #tpu.dot_dimension_numbers<[1], [0], [0], [1], [0, 0, 1, 1], [], []>} : vector<512x32xf32>, vector<32x64xf32>, vector<512x64xf32> -> vector<512x64xf32>
    %c0_20 = arith.constant 0 : index
    %c0_21 = arith.constant 0 : index
    %28 = vector.load %arg6[%c0_20, %c0_21] : memref<1x64xf32, #tpu.memory_space<vmem>>, vector<1x64xf32>
    %29 = vector.broadcast %28 : vector<1x64xf32> to vector<512x64xf32>
    %30 = arith.addf %27, %29 : vector<512x64xf32>
    %cst_22 = arith.constant 0.000000e+00 : f32
    %31 = vector.broadcast %cst_22 : f32 to vector<512x64xf32>
    %32 = arith.maximumf %30, %31 : vector<512x64xf32>
    %c0_23 = arith.constant 0 : index
    %c0_24 = arith.constant 0 : index
    %33 = vector.load %arg7[%c0_23, %c0_24] : memref<32x64xf32, #tpu.memory_space<vmem>>, vector<32x64xf32>
    %cst_25 = arith.constant dense<0.000000e+00> : vector<512x64xf32>
    %34 = tpu.matmul %25, %33, %cst_25 {dimension_numbers = #tpu.dot_dimension_numbers<[1], [0], [0], [1], [0, 0, 1, 1], [], []>} : vector<512x32xf32>, vector<32x64xf32>, vector<512x64xf32> -> vector<512x64xf32>
    %c0_26 = arith.constant 0 : index
    %c0_27 = arith.constant 0 : index
    %35 = vector.load %arg8[%c0_26, %c0_27] : memref<1x64xf32, #tpu.memory_space<vmem>>, vector<1x64xf32>
    %36 = vector.broadcast %35 : vector<1x64xf32> to vector<512x64xf32>
    %37 = arith.addf %34, %36 : vector<512x64xf32>
    %cst_28 = arith.constant 0.000000e+00 : f32
    %38 = vector.broadcast %cst_28 : f32 to vector<512x64xf32>
    %39 = arith.maximumf %37, %38 : vector<512x64xf32>
    %c0_29 = arith.constant 0 : index
    %c0_30 = arith.constant 0 : index
    %40 = vector.load %arg9[%c0_29, %c0_30] : memref<64x64xf32, #tpu.memory_space<vmem>>, vector<64x64xf32>
    %cst_31 = arith.constant dense<0.000000e+00> : vector<512x64xf32>
    %41 = tpu.matmul %32, %40, %cst_31 {dimension_numbers = #tpu.dot_dimension_numbers<[1], [0], [0], [1], [0, 0, 1, 1], [], []>} : vector<512x64xf32>, vector<64x64xf32>, vector<512x64xf32> -> vector<512x64xf32>
    %c0_32 = arith.constant 0 : index
    %c0_33 = arith.constant 0 : index
    %42 = vector.load %arg10[%c0_32, %c0_33] : memref<64x64xf32, #tpu.memory_space<vmem>>, vector<64x64xf32>
    %cst_34 = arith.constant dense<0.000000e+00> : vector<512x64xf32>
    %43 = tpu.matmul %39, %42, %cst_34 {dimension_numbers = #tpu.dot_dimension_numbers<[1], [0], [0], [1], [0, 0, 1, 1], [], []>} : vector<512x64xf32>, vector<64x64xf32>, vector<512x64xf32> -> vector<512x64xf32>
    %44 = arith.addf %41, %43 : vector<512x64xf32>
    %c0_35 = arith.constant 0 : index
    %c0_36 = arith.constant 0 : index
    %45 = vector.load %arg11[%c0_35, %c0_36] : memref<1x64xf32, #tpu.memory_space<vmem>>, vector<1x64xf32>
    %46 = vector.broadcast %45 : vector<1x64xf32> to vector<512x64xf32>
    %47 = arith.addf %44, %46 : vector<512x64xf32>
    %c0_37 = arith.constant 0 : index
    %c0_38 = arith.constant 0 : index
    %48 = vector.load %arg12[%c0_37, %c0_38] : memref<64x64xf32, #tpu.memory_space<vmem>>, vector<64x64xf32>
    %cst_39 = arith.constant dense<0.000000e+00> : vector<512x64xf32>
    %49 = tpu.matmul %47, %48, %cst_39 {dimension_numbers = #tpu.dot_dimension_numbers<[1], [0], [0], [1], [0, 0, 1, 1], [], []>} : vector<512x64xf32>, vector<64x64xf32>, vector<512x64xf32> -> vector<512x64xf32>
    %c0_40 = arith.constant 0 : index
    %c0_41 = arith.constant 0 : index
    %50 = vector.load %arg13[%c0_40, %c0_41] : memref<1x64xf32, #tpu.memory_space<vmem>>, vector<1x64xf32>
    %51 = vector.broadcast %50 : vector<1x64xf32> to vector<512x64xf32>
    %52 = arith.addf %49, %51 : vector<512x64xf32>
    %cst_42 = arith.constant 0.000000e+00 : f32
    %53 = vector.broadcast %cst_42 : f32 to vector<512x64xf32>
    %54 = arith.maximumf %52, %53 : vector<512x64xf32>
    %c0_43 = arith.constant 0 : index
    %c0_44 = arith.constant 0 : index
    %55 = vector.load %arg14[%c0_43, %c0_44] : memref<64x64xf32, #tpu.memory_space<vmem>>, vector<64x64xf32>
    %cst_45 = arith.constant dense<0.000000e+00> : vector<512x64xf32>
    %56 = tpu.matmul %54, %55, %cst_45 {dimension_numbers = #tpu.dot_dimension_numbers<[1], [0], [0], [1], [0, 0, 1, 1], [], []>} : vector<512x64xf32>, vector<64x64xf32>, vector<512x64xf32> -> vector<512x64xf32>
    %c0_46 = arith.constant 0 : index
    %c0_47 = arith.constant 0 : index
    %57 = vector.load %arg15[%c0_46, %c0_47] : memref<1x64xf32, #tpu.memory_space<vmem>>, vector<1x64xf32>
    %58 = vector.broadcast %57 : vector<1x64xf32> to vector<512x64xf32>
    %59 = arith.addf %56, %58 : vector<512x64xf32>
    %cst_48 = arith.constant 0.000000e+00 : f32
    %60 = vector.broadcast %cst_48 : f32 to vector<512x64xf32>
    %61 = arith.maximumf %59, %60 : vector<512x64xf32>
    %c0_49 = arith.constant 0 : index
    %c0_50 = arith.constant 0 : index
    %62 = vector.load %arg16[%c0_49, %c0_50] : memref<1x64xf32, #tpu.memory_space<vmem>>, vector<1x64xf32>
    %cst_51 = arith.constant dense<0.000000e+00> : vector<1x512xf32>
    %63 = tpu.matmul %62, %61, %cst_51 {dimension_numbers = #tpu.dot_dimension_numbers<[1], [1], [0], [0], [0, 0, 1, 0], [], []>} : vector<1x64xf32>, vector<512x64xf32>, vector<1x512xf32> -> vector<1x512xf32>
    %c0_52 = arith.constant 0 : index
    %c0_53 = arith.constant 0 : index
    %64 = vector.load %arg17[%c0_52, %c0_53] : memref<1x1xf32, #tpu.memory_space<vmem>>, vector<1x1xf32>
    %65 = vector.broadcast %64 : vector<1x1xf32> to vector<1x512xf32>
    %66 = arith.addf %63, %65 : vector<1x512xf32>
    %c0_54 = arith.constant 0 : index
    %c0_55 = arith.constant 0 : index
    %67 = vector.load %arg18[%c0_54, %c0_55] : memref<1x512xf32, #tpu.memory_space<vmem>>, vector<1x512xf32>
    tpu.vector_store %arg18[%c0_54, %c0_55], %66 {strides = array<i32>} : memref<1x512xf32, #tpu.memory_space<vmem>>, vector<1x512xf32>,
    return
  }
  func.func @transform_0(%arg0: i32) -> (i32, i32) {
    %c0_i32 = arith.constant 0 : i32
    %c0_i32_0 = arith.constant 0 : i32
    return %arg0, %c0_i32 : i32, i32
  }
  func.func @transform_1(%arg0: i32) -> (i32, i32) {
    %c0_i32 = arith.constant 0 : i32
    %c0_i32_0 = arith.constant 0 : i32
    return %arg0, %c0_i32 : i32, i32
  }
  func.func @transform_2(%arg0: i32) -> (i32, i32) {
    %c0_i32 = arith.constant 0 : i32
    %c0_i32_0 = arith.constant 0 : i32
    %c0_i32_1 = arith.constant 0 : i32
    return %c0_i32, %c0_i32_0 : i32, i32
  }
  func.func @transform_3(%arg0: i32) -> (i32, i32) {
    %c0_i32 = arith.constant 0 : i32
    %c0_i32_0 = arith.constant 0 : i32
    %c0_i32_1 = arith.constant 0 : i32
    return %c0_i32, %c0_i32_0 : i32, i32
  }
  func.func @transform_4(%arg0: i32) -> (i32, i32) {
    %c0_i32 = arith.constant 0 : i32
    %c0_i32_0 = arith.constant 0 : i32
    %c0_i32_1 = arith.constant 0 : i32
    return %c0_i32, %c0_i32_0 : i32, i32
  }
  func.func @transform_5(%arg0: i32) -> (i32, i32) {
    %c0_i32 = arith.constant 0 : i32
    %c0_i32_0 = arith.constant 0 : i32
    %c0_i32_1 = arith.constant 0 : i32
    return %c0_i32, %c0_i32_0 : i32, i32
  }
  func.func @transform_6(%arg0: i32) -> (i32, i32) {
    %c0_i32 = arith.constant 0 : i32
    %c0_i32_0 = arith.constant 0 : i32
    %c0_i32_1 = arith.constant 0 : i32
    return %c0_i32, %c0_i32_0 : i32, i32
  }
  func.func @transform_7(%arg0: i32) -> (i32, i32) {
    %c0_i32 = arith.constant 0 : i32
    %c0_i32_0 = arith.constant 0 : i32
    %c0_i32_1 = arith.constant 0 : i32
    return %c0_i32, %c0_i32_0 : i32, i32
  }
  func.func @transform_8(%arg0: i32) -> (i32, i32) {
    %c0_i32 = arith.constant 0 : i32
    %c0_i32_0 = arith.constant 0 : i32
    %c0_i32_1 = arith.constant 0 : i32
    return %c0_i32, %c0_i32_0 : i32, i32
  }
  func.func @transform_9(%arg0: i32) -> (i32, i32) {
    %c0_i32 = arith.constant 0 : i32
    %c0_i32_0 = arith.constant 0 : i32
    %c0_i32_1 = arith.constant 0 : i32
    return %c0_i32, %c0_i32_0 : i32, i32
  }
  func.func @transform_10(%arg0: i32) -> (i32, i32) {
    %c0_i32 = arith.constant 0 : i32
    %c0_i32_0 = arith.constant 0 : i32
    %c0_i32_1 = arith.constant 0 : i32
    return %c0_i32, %c0_i32_0 : i32, i32
  }
  func.func @transform_11(%arg0: i32) -> (i32, i32) {
    %c0_i32 = arith.constant 0 : i32
    %c0_i32_0 = arith.constant 0 : i32
    %c0_i32_1 = arith.constant 0 : i32
    return %c0_i32, %c0_i32_0 : i32, i32
  }
  func.func @transform_12(%arg0: i32) -> (i32, i32) {
    %c0_i32 = arith.constant 0 : i32
    %c0_i32_0 = arith.constant 0 : i32
    %c0_i32_1 = arith.constant 0 : i32
    return %c0_i32, %c0_i32_0 : i32, i32
  }
  func.func @transform_13(%arg0: i32) -> (i32, i32) {
    %c0_i32 = arith.constant 0 : i32
    %c0_i32_0 = arith.constant 0 : i32
    %c0_i32_1 = arith.constant 0 : i32
    return %c0_i32, %c0_i32_0 : i32, i32
  }
  func.func @transform_14(%arg0: i32) -> (i32, i32) {
    %c0_i32 = arith.constant 0 : i32
    %c0_i32_0 = arith.constant 0 : i32
    %c0_i32_1 = arith.constant 0 : i32
    return %c0_i32, %c0_i32_0 : i32, i32
  }
  func.func @transform_15(%arg0: i32) -> (i32, i32) {
    %c0_i32 = arith.constant 0 : i32
    %c0_i32_0 = arith.constant 0 : i32
    %c0_i32_1 = arith.constant 0 : i32
    return %c0_i32, %c0_i32_0 : i32, i32
  }
  func.func @transform_16(%arg0: i32) -> (i32, i32) {
    %c0_i32 = arith.constant 0 : i32
    %c0_i32_0 = arith.constant 0 : i32
    %c0_i32_1 = arith.constant 0 : i32
    return %c0_i32, %c0_i32_0 : i32, i32
  }
  func.func @transform_17(%arg0: i32) -> (i32, i32) {
    %c0_i32 = arith.constant 0 : i32
    %c0_i32_0 = arith.constant 0 : i32
    return %c0_i32, %arg0 : i32, i32
  }
}

</mosaic_0001>

<bundles_post_ra>
// kernel: tpu_custom_call.1
= control target key start
LH: loop header
LB: loop body
LE: loop exit
PB: predicated region body
PF: predicated region fallthrough
CT: control target
= control target key end

     0   :  { %s15346_s0 = inlined_call_operand.vmem [shape: s32[1024,1], index: 0, kind: input, shape index: {}]   ;;  %s15347_s1 = inlined_call_operand.vmem [shape: s32[1024,1], index: 1, kind: input, shape index: {}]   ;;  %s15348_s2 = inlined_call_operand.vmem [shape: bf16[256,256], index: 2, kind: input, shape index: {}]   ;;  %s15349_s3 = inlined_call_operand.vmem [shape: bf16[256,32], index: 3, kind: input, shape index: {}]   ;;  %s15350_s4 = inlined_call_operand.vmem [shape: f32[32,64], index: 4, kind: input, shape index: {}]   ;;  %s15351_s5 = inlined_call_operand.vmem [shape: f32[1,64], index: 5, kind: input, shape index: {}]   ;;  %s15352_s6 = inlined_call_operand.vmem [shape: f32[32,64], index: 6, kind: input, shape index: {}]   ;;  %s15353_s7 = inlined_call_operand.vmem [shape: f32[1,64], index: 7, kind: input, shape index: {}]   ;;  %s15354_s8 = inlined_call_operand.vmem [shape: f32[64,64], index: 8, kind: input, shape index: {}]   ;;  %s15355_s9 = inlined_call_operand.vmem [shape: f32[64,64], index: 9, kind: input, shape index: {}]   ;;  %s15356_s10 = inlined_call_operand.vmem [shape: f32[1,64], index: 10, kind: input, shape index: {}]   ;;  %s15357_s11 = inlined_call_operand.vmem [shape: f32[64,64], index: 11, kind: input, shape index: {}]   ;;  %s15358_s12 = inlined_call_operand.vmem [shape: f32[1,64], index: 12, kind: input, shape index: {}]   ;;  %s15359_s13 = inlined_call_operand.vmem [shape: f32[64,64], index: 13, kind: input, shape index: {}]   ;;  %s15360_s14 = inlined_call_operand.vmem [shape: f32[1,64], index: 14, kind: input, shape index: {}]   ;;  %s15361_s15 = inlined_call_operand.vmem [shape: f32[1,64], index: 15, kind: input, shape index: {}]   ;;  %s15362_s16 = inlined_call_operand.<no memory space> [shape: f32[1,1], index: 16, kind: input, shape index: {}]   ;;  %s15363_s17 = inlined_call_operand.hbm [shape: f32[1,1024], index: 17, kind: output, shape index: {}]  }
   0x1   :  { %15587 = sst [smem:[#allocation108_spill]] %s15346_s0  ;;  %v22_v0 = vstv %s15362_s16 }
   0x2   :  { %15588 = sst [smem:[#allocation109_spill]] %s15347_s1  ;;  %23 = vst [vmem:[#allocation2] sm:$0x1] %v22_v0 }
   0x3   :  { %24 = vsyncpa [#allocation4], 0 }
   0x4   :  { %26 = vsyncpa [#allocation4 + $0x1], 0  ;;  %s11421_s26 = smov 0   ;;  %s11423_s27 = smov 0  }
   0x5   :  { %s11425_s28 = smov 0   ;;  %s11427_s29 = smov 0  }
   0x6 LB: > { %15589 = sst [smem:[#allocation6_spill]] %s11310_s26  ;;  %s8461_s16 = sadd.s32 4294967295, %s11322_s29   ;;  %s11322_s29 = sphi %s11427_s29, %s16274_s29   ;;  %s11318_s28 = sphi %s11425_s28, %s16276_s28   ;;  %s11314_s27 = sphi %s11423_s27, %s16278_s27   ;;  %s11310_s26 = sphi %s11421_s26, %s16277_s26  }
   0x7   : > { %15590 = sst [smem:[#allocation7_spill]] %s11318_s28  ;;  %s8462_s0 = sadd.s32 4294967294, %s11322_s29  }
   0x8   : > { %s11444_s30 = sadd.s32 1, %s11322_s29   ;;  %s406_s18 = sadd.s32 1, %s11318_s28 }
   0x9   : > { %15591 = sst [smem:[#allocation8_spill]] %s11444_s30  ;;  %s403_s19 = ssub.s32 %s11322_s29, %s11444_s30 }
   0xa   : > { %p416_p0 = scmp.ne.s32.totalorder %s11318_s28, %s11314_s27  ;;  %p404_p1 = scmp.eq.s32.totalorder %s403_s19, 0 }
   0xb   : > { %p417_p2 = scmp.eq.s32.totalorder %s8461_s16, 1  ;;  %p422_p3 = scmp.ne.s32.totalorder %s11314_s27, %s11310_s26 }
   0xc   : > { %p423_p4 = scmp.eq.s32.totalorder %s8462_s0, 1  ;;  %p8465_p7 = scmp.ge.s32.totalorder %s11322_s29, 1 }
   0xd   : > { %s11454_s1 = scalar_select %p404_p1, %s11318_s28, %s406_s18  }
   0xe   : > { %p11456_p5 = por %p417_p2, %p416_p0  ;;  %p11460_p6 = por %p423_p4, %p422_p3 }
   0xf   : > { %15592 = sst [smem:[#allocation9_spill]] %s11454_s1  ;;  %p504_p8 = scmp.lt.s32.totalorder %s11322_s29, 3 }
  0x10   : > { %s15594_s21 = scalar_select %p11460_p6, 1, 0 }
  0x11   : > { %p505_p9 = pnand %p8465_p7, %p504_p8 }
  0x12   : > { %15595 = sst [smem:[#allocation10_spill]] %s15594_s21 }
  0x13   : > { %508 = sbr.rel (%p505_p9) target bundleno = 2419 (0x973), region = 88 }
  0x1a   : > { %s11466_s22 = sshll.u32 %s8461_s16, 6  ;;  %v11180_v1 = vld [vmem:[%s15348_s2 + $0x4] ss:$8 sps:$4 sm:$0xff]   ;;  %v15409_v2 = vmov 0   ;;  %v11182_v3 = vld [vmem:[%s15348_s2] ss:$8 sps:$4 sm:$0xff]  }
  0x1b   : > { %11179 = vset.pattern.permute.xlu1 %v15409_v2  ;;  %11178 = vset.pattern.permute.xlu0 %v15409_v2  ;;  %p562_p10 = scmp.lt.s32.totalorder %s11466_s22, 127  ;;  %v11183_v4 = vld [vmem:[%s15348_s2 + $0x14] ss:$8 sps:$4 sm:$0xff]   ;;  %v11185_v5 = vld [vmem:[%s15348_s2 + $0x10] ss:$8 sps:$4 sm:$0xff]   ;;  %s15596_s28 = sld [smem:[#allocation108_spill]] }
  0x1c   : > { %2178 = vmatprep.subr.bf16.mxu0 %v11180_v1  ;;  %2531 = vmatprep.subr.bf16.mxu1 %v11180_v1  ;;  %v11186_v6 = vld [vmem:[%s15348_s2 + $0x24] ss:$8 sps:$4 sm:$0xff]   ;;  %v11188_v9 = vld [vmem:[%s15348_s2 + $0x20] ss:$8 sps:$4 sm:$0xff]   ;;  %v11189_v12 = vld [vmem:[%s15348_s2 + $0x34] ss:$8 sps:$4 sm:$0xff]   ;;  %s15304_s23 = scalar_lea.hbm %s15363_s17, %s11466_s22 }
  0x1d   : > { %s11481_s19 = scalar_select %p562_p10, %s11466_s22, 127  ;;  %2179 = vmatpush1.bf16.msra.mxu0 %v11182_v3  ;;  %2532 = vmatpush1.bf16.msra.mxu1 %v11182_v3  ;;  %v11191_v13 = vld [vmem:[%s15348_s2 + $0x30] ss:$8 sps:$4 sm:$0xff]   ;;  %v11192_v16 = vld [vmem:[%s15348_s2 + $0x44] ss:$8 sps:$4 sm:$0xff]  }
  0x1e   : > { %2180 = vmatprep.subr.bf16.mxu0 %v11183_v4  ;;  %2533 = vmatprep.subr.bf16.mxu1 %v11183_v4  ;;  %v11194_v17 = vld [vmem:[%s15348_s2 + $0x40] ss:$8 sps:$4 sm:$0xff]   ;;  %s15597_s18 = sld [smem:[#allocation109_spill]]  ;;  %v11195_v22 = vld [vmem:[%s15348_s2 + $0x54] ss:$8 sps:$4 sm:$0xff]   ;;  %s558_s1 = sand.u32 1, %s11314_s27  }
  0x1f   : > { %s8468_s25 = sshll.u32 %s11481_s19, 3  ;;  %v11197_v23 = vld [vmem:[%s15348_s2 + $0x50] ss:$8 sps:$4 sm:$0xff]   ;;  %v11198_v24 = vld [vmem:[%s15348_s2 + $0x64] ss:$8 sps:$4 sm:$0xff]   ;;  %s8466_s21 = sshll.u32 %s558_s1, 2 }
  0x20   : > { %v11200_v27 = vld [vmem:[%s15348_s2 + $0x60] ss:$8 sps:$4 sm:$0xff]   ;;  %v11201_v28 = vld [vmem:[%s15348_s2 + $0x74] ss:$8 sps:$4 sm:$0xff]   ;;  %v11203_v31 = vld [vmem:[%s15348_s2 + $0x70] ss:$8 sps:$4 sm:$0xff]  }
  0x21   : > { %s11495_s30 = scalar_lea.vmem %s15596_s28, %s8468_s25  ;;  %2181 = vmatpush1.bf16.msra.mxu0 %v11185_v5  ;;  %2534 = vmatpush1.bf16.msra.mxu1 %v11185_v5  ;;  %v11204_v32 = vld [vmem:[%s15348_s2 + $0x84] ss:$8 sps:$4 sm:$0xff]   ;;  %v11206_v35 = vld [vmem:[%s15348_s2 + $0x80] ss:$8 sps:$4 sm:$0xff]   ;;  %v11207_v36 = vld [vmem:[%s15348_s2 + $0x94] ss:$8 sps:$4 sm:$0xff]  }
  0x22   : > { %v580_v7 = vld [vmem:[%s11495_s30 + $0x10] sm:$0xff]  ;;  %v578_v8 = vld [vmem:[%s11495_s30] sm:$0xff]  ;;  %v581_v10 = vld [vmem:[%s11495_s30 + $0x18] sm:$0xff]  ;;  %2182 = vmatprep.subr.bf16.mxu0 %v11186_v6  ;;  %2535 = vmatprep.subr.bf16.mxu1 %v11186_v6  ;;  %s8377_s24 = scalar_lea.sflag [#allocation4], %s558_s1  ;;  %s11327_s28 = smov [#allocation3]  }
  0x23   : > { %649 = vperm.xlu1 %11179, %v580_v7   ;;  %643 = vperm.xlu0 %11178, %v578_v8   ;;  %v579_v11 = vld [vmem:[%s11495_s30 + $0x8] sm:$0xff]  ;;  %v582_v15 = vld [vmem:[%s11495_s30 + $0x20] sm:$0xff]  ;;  %v585_v18 = vld [vmem:[%s11495_s30 + $0x38] sm:$0xff]  ;;  %s11264_s19 = sshll.u32 %s11327_s28, 4  ;;  %s11265_s19 = int_to_ptr.vmem [resolvable:$false] %s11264_s19 }
  0x24   : > { %v583_v14 = vld [vmem:[%s11495_s30 + $0x28] sm:$0xff]  ;;  %v584_v19 = vld [vmem:[%s11495_s30 + $0x30] sm:$0xff]  ;;  %v586_v21 = vld [vmem:[%s11495_s30 + $0x40] sm:$0xff]  ;;  %s11527_s16 = scalar_lea.vmem %s15597_s18, %s8468_s25  ;;  %s11266_s25 = scalar_lea.vmem %s11265_s19, 128 }
  0x25   : > { %2183 = vmatpush1.bf16.msra.mxu0 %v11188_v9  ;;  %2536 = vmatpush1.bf16.msra.mxu1 %v11188_v9  ;;  %v587_v20 = vld [vmem:[%s11495_s30 + $0x48] sm:$0xff]  ;;  %v1282_v26 = vld [vmem:[%s11527_s16] sm:$0xff]  ;;  %v589_v29 = vld [vmem:[%s11495_s30 + $0x58] sm:$0xff] }
  0x26   : > { %2184 = vmatprep.subr.bf16.mxu0 %v11189_v12  ;;  %2537 = vmatprep.subr.bf16.mxu1 %v11189_v12  ;;  %v1283_v25 = vld [vmem:[%s11527_s16 + $0x8] sm:$0xff]  ;;  %v588_v30 = vld [vmem:[%s11495_s30 + $0x50] sm:$0xff]  ;;  %v1285_v33 = vld [vmem:[%s11527_s16 + $0x18] sm:$0xff] }
  0x27   : > { %652 = vperm.xlu1 %11179, %v581_v10   ;;  %646 = vperm.xlu0 %11178, %v579_v11   ;;  %v1284_v34 = vld [vmem:[%s11527_s16 + $0x10] sm:$0xff]  ;;  %v591_v37 = vld [vmem:[%s11495_s30 + $0x68] sm:$0xff]  ;;  %v590_v38 = vld [vmem:[%s11495_s30 + $0x60] sm:$0xff] }
  0x28   : > { %v11209_v39 = vld [vmem:[%s15348_s2 + $0x90] ss:$8 sps:$4 sm:$0xff]   ;;  %v11210_v40 = vld [vmem:[%s15348_s2 + $0xa4] ss:$8 sps:$4 sm:$0xff]   ;;  %v11212_v43 = vld [vmem:[%s15348_s2 + $0xa0] ss:$8 sps:$4 sm:$0xff]  }
  0x29   : > { %2185 = vmatpush1.bf16.msra.mxu0 %v11191_v13  ;;  %2538 = vmatpush1.bf16.msra.mxu1 %v11191_v13  ;;  %v1287_v41 = vld [vmem:[%s11527_s16 + $0x28] sm:$0xff]  ;;  %v1286_v42 = vld [vmem:[%s11527_s16 + $0x20] sm:$0xff]  ;;  %v11213_v44 = vld [vmem:[%s15348_s2 + $0xb4] ss:$8 sps:$4 sm:$0xff]  }
  0x2a   : > { %2186 = vmatprep.subr.bf16.mxu0 %v11192_v16  ;;  %2539 = vmatprep.subr.bf16.mxu1 %v11192_v16  ;;  %v593_v45 = vld [vmem:[%s11495_s30 + $0x78] sm:$0xff]  ;;  %v592_v46 = vld [vmem:[%s11495_s30 + $0x70] sm:$0xff]  ;;  %v11216_v48 = vld [vmem:[%s15348_s2 + $0xc4] ss:$8 sps:$4 sm:$0xff]  }
  0x2b   : > { %658 = vperm.xlu1 %11179, %v583_v14   ;;  %655 = vperm.xlu0 %11178, %v582_v15   ;;  %v11215_v47 = vld [vmem:[%s15348_s2 + $0xb0] ss:$8 sps:$4 sm:$0xff]   ;;  %v11218_v51 = vld [vmem:[%s15348_s2 + $0xc0] ss:$8 sps:$4 sm:$0xff]   ;;  %v11219_v52 = vld [vmem:[%s15348_s2 + $0xd4] ss:$8 sps:$4 sm:$0xff]  }
  0x2c   : > { %v1289_v49 = vld [vmem:[%s11527_s16 + $0x38] sm:$0xff]  ;;  %v1288_v50 = vld [vmem:[%s11527_s16 + $0x30] sm:$0xff]  ;;  %v595_v53 = vld [vmem:[%s11495_s30 + $0x88] sm:$0xff] }
  0x2d   : > { %2187 = vmatpush1.bf16.msra.mxu0 %v11194_v17  ;;  %2540 = vmatpush1.bf16.msra.mxu1 %v11194_v17  ;;  %v594_v54 = vld [vmem:[%s11495_s30 + $0x80] sm:$0xff]  ;;  %v11221_v55 = vld [vmem:[%s15348_s2 + $0xd0] ss:$8 sps:$4 sm:$0xff]   ;;  %v1291_v57 = vld [vmem:[%s11527_s16 + $0x48] sm:$0xff] }
  0x2e   : > { %2188 = vmatprep.subr.bf16.mxu0 %v11195_v22  ;;  %2541 = vmatprep.subr.bf16.mxu1 %v11195_v22  ;;  %v11222_v56 = vld [vmem:[%s15348_s2 + $0xe4] ss:$8 sps:$4 sm:$0xff]   ;;  %v11224_v59 = vld [vmem:[%s15348_s2 + $0xe0] ss:$8 sps:$4 sm:$0xff]   ;;  %v11225_v60 = vld [vmem:[%s15348_s2 + $0xf4] ss:$8 sps:$4 sm:$0xff]  }
  0x2f   : > { %664 = vperm.xlu1 %11179, %v585_v18   ;;  %661 = vperm.xlu0 %11178, %v584_v19   ;;  %v1290_v58 = vld [vmem:[%s11527_s16 + $0x40] sm:$0xff]  ;;  %v597_v61 = vld [vmem:[%s11495_s30 + $0x98] sm:$0xff]  ;;  %v596_v62 = vld [vmem:[%s11495_s30 + $0x90] sm:$0xff] }
  0x30   : > { %v11227_v63 = vld [vmem:[%s15348_s2 + $0xf0] ss:$8 sps:$4 sm:$0xff]   ;;  %v599_v3 = vld [vmem:[%s11495_s30 + $0xa8] sm:$0xff]  ;;  %v598_v4 = vld [vmem:[%s11495_s30 + $0xa0] sm:$0xff] }
  0x31   : > { %2189 = vmatpush1.bf16.msra.mxu0 %v11197_v23  ;;  %2542 = vmatpush1.bf16.msra.mxu1 %v11197_v23  ;;  %v1293_v0 = vld [vmem:[%s11527_s16 + $0x58] sm:$0xff]  ;;  %v1292_v1 = vld [vmem:[%s11527_s16 + $0x50] sm:$0xff]  ;;  %v1295_v5 = vld [vmem:[%s11527_s16 + $0x68] sm:$0xff] }
  0x32   : > { %2190 = vmatprep.subr.bf16.mxu0 %v11198_v24  ;;  %2543 = vmatprep.subr.bf16.mxu1 %v11198_v24  ;;  %v1294_v6 = vld [vmem:[%s11527_s16 + $0x60] sm:$0xff]  ;;  %v601_v7 = vld [vmem:[%s11495_s30 + $0xb8] sm:$0xff]  ;;  %v600_v8 = vld [vmem:[%s11495_s30 + $0xb0] sm:$0xff] }
  0x33   : > { %670 = vperm.xlu1 %11179, %v587_v20   ;;  %667 = vperm.xlu0 %11178, %v586_v21   ;;  %v1297_v9 = vld [vmem:[%s11527_s16 + $0x78] sm:$0xff]  ;;  %v1296_v10 = vld [vmem:[%s11527_s16 + $0x70] sm:$0xff]  ;;  %v603_v11 = vld [vmem:[%s11495_s30 + $0xc8] sm:$0xff] }
  0x34   : > { %v602_v12 = vld [vmem:[%s11495_s30 + $0xc0] sm:$0xff]  ;;  %v1299_v13 = vld [vmem:[%s11527_s16 + $0x88] sm:$0xff]  ;;  %v605_v15 = vld [vmem:[%s11495_s30 + $0xd8] sm:$0xff] }
  0x35   : > { %2191 = vmatpush1.bf16.msra.mxu0 %v11200_v27  ;;  %2544 = vmatpush1.bf16.msra.mxu1 %v11200_v27  ;;  %v1298_v14 = vld [vmem:[%s11527_s16 + $0x80] sm:$0xff]  ;;  %v604_v16 = vld [vmem:[%s11495_s30 + $0xd0] sm:$0xff]  ;;  %v1301_v17 = vld [vmem:[%s11527_s16 + $0x98] sm:$0xff] }
  0x36   : > { %2192 = vmatprep.subr.bf16.mxu0 %v11201_v28  ;;  %2545 = vmatprep.subr.bf16.mxu1 %v11201_v28  ;;  %v1300_v18 = vld [vmem:[%s11527_s16 + $0x90] sm:$0xff]  ;;  %v607_v19 = vld [vmem:[%s11495_s30 + $0xe8] sm:$0xff]  ;;  %v606_v20 = vld [vmem:[%s11495_s30 + $0xe0] sm:$0xff] }
  0x37   : > { %1350 = vperm.xlu1 %11179, %v1283_v25   ;;  %1347 = vperm.xlu0 %11178, %v1282_v26   ;;  %v1303_v21 = vld [vmem:[%s11527_s16 + $0xa8] sm:$0xff]  ;;  %v1302_v22 = vld [vmem:[%s11527_s16 + $0xa0] sm:$0xff]  ;;  %v609_v23 = vld [vmem:[%s11495_s30 + $0xf8] sm:$0xff] }
  0x38   : > { %v608_v24 = vld [vmem:[%s11495_s30 + $0xf0] sm:$0xff]  ;;  %v1305_v25 = vld [vmem:[%s11527_s16 + $0xb8] sm:$0xff]  ;;  %v611_v27 = vld [vmem:[%s11495_s30 + $0x108] sm:$0xff] }
  0x39   : > { %2193 = vmatpush1.bf16.msra.mxu0 %v11203_v31  ;;  %2546 = vmatpush1.bf16.msra.mxu1 %v11203_v31  ;;  %v1304_v26 = vld [vmem:[%s11527_s16 + $0xb0] sm:$0xff]  ;;  %v610_v28 = vld [vmem:[%s11495_s30 + $0x100] sm:$0xff]  ;;  %v613_v31 = vld [vmem:[%s11495_s30 + $0x118] sm:$0xff] }
  0x3a   : > { %2194 = vmatprep.subr.bf16.mxu0 %v11204_v32  ;;  %2547 = vmatprep.subr.bf16.mxu1 %v11204_v32  ;;  %v612_v32 = vld [vmem:[%s11495_s30 + $0x110] sm:$0xff] }
  0x3b   : > { %676 = vperm.xlu1 %11179, %v589_v29   ;;  %673 = vperm.xlu0 %11178, %v588_v30   ;;  %v1307_v29 = vld [vmem:[%s11527_s16 + $0xc8] sm:$0xff]  ;;  %v1306_v30 = vld [vmem:[%s11527_s16 + $0xc0] sm:$0xff] }
  0x3d   : > { %2195 = vmatpush1.bf16.msra.mxu0 %v11206_v35  ;;  %2548 = vmatpush1.bf16.msra.mxu1 %v11206_v35  ;;  %v15407_v35 = vlaneseq }
  0x3e   : > { %2196 = vmatprep.subr.bf16.mxu0 %v11207_v36  ;;  %2549 = vmatprep.subr.bf16.mxu1 %v11207_v36 }
  0x3f   : > { %1356 = vperm.xlu1 %11179, %v1285_v33   ;;  %1353 = vperm.xlu0 %11178, %v1284_v34   ;;  %v1309_v33 = vld [vmem:[%s11527_s16 + $0xd8] sm:$0xff]  ;;  %v1308_v34 = vld [vmem:[%s11527_s16 + $0xd0] sm:$0xff]  ;;  %v11652_v36 = vand.u32 127, %v15407_v35 }
  0x41   : > { %2197 = vmatpush1.bf16.msra.mxu0 %v11209_v39  ;;  %2550 = vmatpush1.bf16.msra.mxu1 %v11209_v39 }
  0x42   : > { %2198 = vmatprep.subr.bf16.mxu0 %v11210_v40  ;;  %2551 = vmatprep.subr.bf16.mxu1 %v11210_v40 }
  0x43   : > { %682 = vperm.xlu1 %11179, %v591_v37   ;;  %679 = vperm.xlu0 %11178, %v590_v38   ;;  %v615_v37 = vld [vmem:[%s11495_s30 + $0x128] sm:$0xff]  ;;  %v614_v38 = vld [vmem:[%s11495_s30 + $0x120] sm:$0xff] }
  0x45   : > { %2199 = vmatpush1.bf16.msra.mxu0 %v11212_v43  ;;  %2552 = vmatpush1.bf16.msra.mxu1 %v11212_v43  ;;  %v1310_v43 = vld [vmem:[%s11527_s16 + $0xe0] sm:$0xff] }
  0x46   : > { %2200 = vmatprep.subr.bf16.mxu0 %v11213_v44  ;;  %2553 = vmatprep.subr.bf16.mxu1 %v11213_v44 }
  0x47   : > { %1362 = vperm.xlu1 %11179, %v1287_v41   ;;  %1359 = vperm.xlu0 %11178, %v1286_v42   ;;  %v11657_v41 = vadd.s32 128, %v11652_v36  ;;  %v1311_v42 = vld [vmem:[%s11527_s16 + $0xe8] sm:$0xff] }
  0x49   : > { %2201 = vmatpush1.bf16.msra.mxu0 %v11215_v47  ;;  %2554 = vmatpush1.bf16.msra.mxu1 %v11215_v47  ;;  %v617_v47 = vld [vmem:[%s11495_s30 + $0x138] sm:$0xff] }
  0x4a   : > { %2202 = vmatprep.subr.bf16.mxu0 %v11216_v48  ;;  %2555 = vmatprep.subr.bf16.mxu1 %v11216_v48 }
  0x4b   : > { %688 = vperm.xlu1 %11179, %v593_v45   ;;  %685 = vperm.xlu0 %11178, %v592_v46  }
  0x4d   : > { %2203 = vmatpush1.bf16.msra.mxu0 %v11218_v51  ;;  %2556 = vmatpush1.bf16.msra.mxu1 %v11218_v51  ;;  %v15430_v51 = vmov 1.0|1.0  }
  0x4e   : > { %2204 = vmatprep.subr.bf16.mxu0 %v11219_v52  ;;  %2557 = vmatprep.subr.bf16.mxu1 %v11219_v52 }
  0x4f   : > { %1368 = vperm.xlu1 %11179, %v1289_v49   ;;  %1365 = vperm.xlu0 %11178, %v1288_v50   ;;  %v616_v49 = vld [vmem:[%s11495_s30 + $0x130] sm:$0xff]  ;;  %v11680_v50 = vld [vmem:[%s15349_s3] sm:$0xff]  }
  0x51   : > { %2205 = vmatpush1.bf16.msra.mxu0 %v11221_v55  ;;  %2558 = vmatpush1.bf16.msra.mxu1 %v11221_v55  ;;  %v1313_v55 = vld [vmem:[%s11527_s16 + $0xf8] sm:$0xff] }
  0x52   : > { %2206 = vmatprep.subr.bf16.mxu0 %v11222_v56  ;;  %2559 = vmatprep.subr.bf16.mxu1 %v11222_v56  ;;  %v1312_v56 = vld [vmem:[%s11527_s16 + $0xf0] sm:$0xff] }
  0x53   : > { %694 = vperm.xlu1 %11179, %v595_v53   ;;  %691 = vperm.xlu0 %11178, %v594_v54  }
  0x55   : > { %2207 = vmatpush1.bf16.msra.mxu0 %v11224_v59  ;;  %2560 = vmatpush1.bf16.msra.mxu1 %v11224_v59 }
  0x56   : > { %2208 = vmatprep.subr.bf16.mxu0 %v11225_v60  ;;  %2561 = vmatprep.subr.bf16.mxu1 %v11225_v60  ;;  %v619_v60 = vld [vmem:[%s11495_s30 + $0x148] sm:$0xff] }
  0x57   : > { %1374 = vperm.xlu1 %11179, %v1291_v57   ;;  %1371 = vperm.xlu0 %11178, %v1290_v58   ;;  %v11705_v57 = vld [vmem:[%s15349_s3 + $0x8] sm:$0xff]  }
  0x59   : > { %2209 = vmatpush1.bf16.msra.mxu0 %v11227_v63  ;;  %2562 = vmatpush1.bf16.msra.mxu1 %v11227_v63 }
  0x5a   : > { %3204 = vmatprep.subr.bf16.mxu0 %v15409_v2  ;;  %3493 = vmatprep.subr.bf16.mxu1 %v15409_v2 }
  0x5b   : > { %700 = vperm.xlu1 %11179, %v597_v61   ;;  %697 = vperm.xlu0 %11178, %v596_v62   ;;  %v618_v61 = vld [vmem:[%s11495_s30 + $0x140] sm:$0xff]  ;;  %v11722_v62 = vld [vmem:[%s15349_s3 + $0x10] sm:$0xff]  }
  0x5f   : > { %1380 = vperm.xlu1 %11179, %v1293_v0   ;;  %1377 = vperm.xlu0 %11178, %v1292_v1  }
  0x63   : > { %706 = vperm.xlu1 %11179, %v599_v3   ;;  %703 = vperm.xlu0 %11178, %v598_v4   ;;  %v1315_v4 = vld [vmem:[%s11527_s16 + $0x108] sm:$0xff] }
  0x67   : > { %1386 = vperm.xlu1 %11179, %v1295_v5   ;;  %1383 = vperm.xlu0 %11178, %v1294_v6   ;;  %v1314_v5 = vld [vmem:[%s11527_s16 + $0x100] sm:$0xff]  ;;  %v11749_v6 = vld [vmem:[%s15349_s3 + $0x18] sm:$0xff]  }
  0x6b   : > { %712 = vperm.xlu1 %11179, %v601_v7   ;;  %709 = vperm.xlu0 %11178, %v600_v8  }
  0x6f   : > { %1392 = vperm.xlu1 %11179, %v1297_v9   ;;  %1389 = vperm.xlu0 %11178, %v1296_v10   ;;  %v15608_v9 = vmov 0  ;;  %v621_v10 = vld [vmem:[%s11495_s30 + $0x158] sm:$0xff] }
  0x73   : > { %718 = vperm.xlu1 %11179, %v603_v11   ;;  %715 = vperm.xlu0 %11178, %v602_v12   ;;  %v15611_v11 = vmov 0  ;;  %v620_v12 = vld [vmem:[%s11495_s30 + $0x150] sm:$0xff] }
  0x77   : > { %1398 = vperm.xlu1 %11179, %v1299_v13   ;;  %1395 = vperm.xlu0 %11178, %v1298_v14   ;;  %v11779_v13 = vld [vmem:[%s15349_s3 + $0x20] sm:$0xff]  }
  0x7b   : > { %724 = vperm.xlu1 %11179, %v605_v15   ;;  %721 = vperm.xlu0 %11178, %v604_v16   ;;  %v15614_v15 = vmov 0 }
  0x7f   : > { %1404 = vperm.xlu1 %11179, %v1301_v17   ;;  %1401 = vperm.xlu0 %11178, %v1300_v18   ;;  %v15616_v17 = vmov 0  ;;  %v1317_v18 = vld [vmem:[%s11527_s16 + $0x118] sm:$0xff] }
  0x83   : > { %730 = vperm.xlu1 %11179, %v607_v19   ;;  %727 = vperm.xlu0 %11178, %v606_v20   ;;  %v1316_v19 = vld [vmem:[%s11527_s16 + $0x110] sm:$0xff] }
  0x87   : > { %1410 = vperm.xlu1 %11179, %v1303_v21   ;;  %1407 = vperm.xlu0 %11178, %v1302_v22   ;;  %v11821_v22 = vld [vmem:[%s15349_s3 + $0x28] sm:$0xff]  }
  0x8b   : > { %736 = vperm.xlu1 %11179, %v609_v23   ;;  %733 = vperm.xlu0 %11178, %v608_v24   ;;  %v15618_v23 = vmov 0  ;;  %v15621_v24 = vmov 0 }
  0x8f   : > { %1416 = vperm.xlu1 %11179, %v1305_v25   ;;  %1413 = vperm.xlu0 %11178, %v1304_v26   ;;  %v623_v25 = vld [vmem:[%s11495_s30 + $0x168] sm:$0xff]  ;;  %v622_v26 = vld [vmem:[%s11495_s30 + $0x160] sm:$0xff] }
  0x93   : > { %742 = vperm.xlu1 %11179, %v611_v27   ;;  %739 = vperm.xlu0 %11178, %v610_v28   ;;  %v15626_v28 = vmov 0 }
  0x97   : > { %1422 = vperm.xlu1 %11179, %v1307_v29   ;;  %1419 = vperm.xlu0 %11178, %v1306_v30   ;;  %v15629_v30 = vmov 0 }
  0x9b   : > { %748 = vperm.xlu1 %11179, %v613_v31   ;;  %745 = vperm.xlu0 %11178, %v612_v32   ;;  %v1319_v31 = vld [vmem:[%s11527_s16 + $0x128] sm:$0xff]  ;;  %v1318_v32 = vld [vmem:[%s11527_s16 + $0x120] sm:$0xff] }
  0x9f   : > { %1428 = vperm.xlu1 %11179, %v1309_v33   ;;  %1425 = vperm.xlu0 %11178, %v1308_v34  }
  0xa2   : > { %v650_v39 = vpop.permute.xlu1 %649  ;;  %v644_v40 = vpop.permute.xlu0 %643 }
  0xa3   : > { %754 = vperm.xlu1 %11179, %v615_v37   ;;  %751 = vperm.xlu0 %11178, %v614_v38   ;;  %vm839_vm0 = vcmp.eq.s32.totalorder %v11657_v41, %v650_v39  ;;  %vm834_vm1 = vcmp.eq.s32.totalorder %v11652_v36, %v644_v40  ;;  %vm835_vm4 = vcmp.eq.s32.totalorder %v11657_v41, %v644_v40  ;;  %v15631_v37 = vmov 0  ;;  %v624_v40 = vld [vmem:[%s11495_s30 + $0x170] sm:$0xff] }
  0xa4   : > { %vm838_vm9 = vcmp.eq.s32.totalorder %v11652_v36, %v650_v39  ;;  %v15634_v38 = vmov 0  ;;  %v625_v39 = vld [vmem:[%s11495_s30 + $0x178] sm:$0xff] }
  0xa6   : > { %v653_v44 = vpop.permute.xlu1 %652  ;;  %v647_v45 = vpop.permute.xlu0 %646 }
  0xa7   : > { %vm841_vm2 = vcmp.eq.s32.totalorder %v11657_v41, %v653_v44  ;;  %vm836_vm3 = vcmp.eq.s32.totalorder %v11652_v36, %v647_v45  ;;  %1434 = vperm.xlu1 %11179, %v1311_v42   ;;  %1431 = vperm.xlu0 %11178, %v1310_v43   ;;  %vm837_vm5 = vcmp.eq.s32.totalorder %v11657_v41, %v647_v45  ;;  %v15639_v43 = vmov 0 }
  0xa8   : > { %vm11667_vm6 = vmpackc.low %vm836_vm3, %vm834_vm1  ;;  %vm840_vm10 = vcmp.eq.s32.totalorder %v11652_v36, %v653_v44  ;;  %v15642_v45 = vmov 0 }
  0xa9   : > { %vm11672_vm7 = vmpackc.low %vm837_vm5, %vm835_vm4 }
  0xaa   : > { %8760 = vmatprep.mubr.msk.bf16.mxu0 %vm11672_vm7, %v15430_v51  ;;  %v659_v52 = vpop.permute.xlu1 %658  ;;  %v656_v53 = vpop.permute.xlu0 %655  ;;  %vm11689_vm8 = vmpackc.low %vm841_vm2, %vm839_vm0 }
  0xab   : > { %8762 = vmatmul.mubr.msk.bf16.vlgmr.msra.gmra.mrb[0].mxu0 %vm11667_vm6, %v15430_v51  ;;  %760 = vperm.xlu1 %11179, %v617_v47   ;;  %vm845_vm11 = vcmp.eq.s32.totalorder %v11657_v41, %v659_v52  ;;  %vm843_vm12 = vcmp.eq.s32.totalorder %v11657_v41, %v656_v53  ;;  %vm11726_vm13 = vmpackc.low %vm840_vm10, %vm838_vm9  ;;  %vm844_vm15 = vcmp.eq.s32.totalorder %v11652_v36, %v659_v52  ;;  %v1321_v47 = vld [vmem:[%s11527_s16 + $0x138] sm:$0xff] }
  0xac   : > { %757 = vperm.xlu0 %11178, %v616_v49   ;;  %8764 = vmatprep.mubr.msk.bf16.mxu0 %vm11689_vm8, %v15430_v51  ;;  %vm11736_vm14 = vmpackc.low %vm845_vm11, %vm843_vm12  ;;  %vm842_vm0 = vcmp.eq.s32.totalorder %v11652_v36, %v656_v53  ;;  %v1320_v49 = vld [vmem:[%s11527_s16 + $0x130] sm:$0xff] }
  0xad   : > { %3205 = vmatpush1.bf16.msra.mxu0 %v11680_v50  ;;  %vm11787_vm12 = vmpackc.low %vm844_vm15, %vm842_vm0  ;;  %v11234_v53 = vld [vmem:[%s15349_s3 + $0x30] sm:$0xff]  }
  0xae   : > { %v11707_v58 = vpop.permute.xlu1 %664  ;;  %v11709_v59 = vpop.permute.xlu0 %661  ;;  %3206 = vmatprep.subr.bf16.mxu0 %v15409_v2  ;;  %v15615_v15 = vsel %vm11787_vm12, 4294967295, %v15614_v15 }
  0xaf   : > { %1440 = vperm.xlu1 %11179, %v1313_v55   ;;  %vm849_vm9 = vcmp.eq.s32.totalorder %v11657_v41, %v11707_v58  ;;  %vm847_vm10 = vcmp.eq.s32.totalorder %v11657_v41, %v11709_v59  ;;  %v15644_v55 = vmov 0 }
  0xb0   : > { %1437 = vperm.xlu0 %11178, %v1312_v56   ;;  %vm11803_vm15 = vmpackc.low %vm849_vm9, %vm847_vm10  ;;  %v15647_v56 = vmov 0 }
  0xb1   : > { %3207 = vmatpush1.bf16.msra.mxu0 %v11705_v57  ;;  %v15617_v17 = vsel %vm11803_vm15, 4294967295, %v15616_v17 }
  0xb2   : > { %v11724_v63 = vpop.permute.xlu1 %670  ;;  %v11730_v1 = vpop.permute.xlu0 %667  ;;  %3208 = vmatprep.subr.bf16.mxu0 %v15409_v2 }
  0xb3   : > { %8766 = vmatmul.mubr.msk.bf16.gmra.mrb[4].mxu0 %vm11726_vm13, %v15430_v51  ;;  %766 = vperm.xlu1 %11179, %v619_v60   ;;  %v15652_v60 = vmov 0 }
  0xb4   : > { %763 = vperm.xlu0 %11178, %v618_v61   ;;  %8768 = vmatprep.mubr.msk.bf16.mxu0 %vm11736_vm14, %v15430_v51 }
  0xb5   : > { %3209 = vmatpush1.bf16.msra.mxu0 %v11722_v62 }
  0xb6   : > { %v1351_v7 = vpop.permute.xlu1 %1350  ;;  %v1348_v8 = vpop.permute.xlu0 %1347  ;;  %3210 = vmatprep.subr.bf16.mxu0 %v15409_v2 }
  0xb7   : > { %vm1540_vm1 = vcmp.eq.s32.totalorder %v11652_v36, %v1351_v7  ;;  %vm1538_vm2 = vcmp.eq.s32.totalorder %v11652_v36, %v1348_v8  ;;  %vm1539_vm3 = vcmp.eq.s32.totalorder %v11657_v41, %v1348_v8  ;;  %vm1541_vm4 = vcmp.eq.s32.totalorder %v11657_v41, %v1351_v7  ;;  %1446 = vperm.xlu1 %11179, %v1315_v4   ;;  %v629_v8 = vld [vmem:[%s11495_s30 + $0x198] sm:$0xff] }
  0xb8   : > { %1443 = vperm.xlu0 %11178, %v1314_v5   ;;  %vm11758_vm5 = vmpackc.low %vm1541_vm4, %vm1539_vm3  ;;  %v15660_v7 = vmov 0 }
  0xb9   : > { %v15609_v9 = vsel %vm11758_vm5, 4294967295, %v15608_v9  ;;  %8888 = vmatprep.mubr.msk.bf16.mxu1 %vm11758_vm5, %v15430_v51  ;;  %vm11770_vm11 = vmpackc.low %vm1540_vm1, %vm1538_vm2  ;;  %3211 = vmatpush1.bf16.msra.mxu0 %v11749_v6  ;;  %vm851_vm1 = vcmp.eq.s32.totalorder %v11657_v41, %v11730_v1 }
  0xba   : > { %15610 = vst [vmem:[#allocation11_spill] sm:$0xff] %v15609_v9  ;;  %v15612_v11 = vsel %vm11770_vm11, 4294967295, %v15611_v11  ;;  %v11781_v14 = vpop.permute.xlu1 %676  ;;  %8890 = vmatmul.mubr.msk.bf16.vlgmr.msra.gmra.mrb[0].mxu1 %vm11770_vm11, %v15430_v51  ;;  %v11794_v16 = vpop.permute.xlu0 %673  ;;  %3212 = vmatprep.subr.bf16.mxu0 %v15409_v2 }
  0xbb   : > { %15613 = vst [vmem:[#allocation12_spill] sm:$0xff] %v15612_v11  ;;  %8770 = vmatmul.mubr.msk.bf16.gmra.mrb[8].mxu0 %vm11787_vm12, %v15430_v51  ;;  %772 = vperm.xlu1 %11179, %v621_v10   ;;  %vm855_vm5 = vcmp.eq.s32.totalorder %v11657_v41, %v11794_v16  ;;  %v628_v10 = vld [vmem:[%s11495_s30 + $0x190] sm:$0xff]  ;;  %v15885_v11 = vmov 0 }
  0xbc   : > { %769 = vperm.xlu0 %11178, %v620_v12   ;;  %8772 = vmatprep.mubr.msk.bf16.mxu0 %vm11803_vm15, %v15430_v51 }
  0xbd   : > { %3213 = vmatpush1.bf16.msra.mxu0 %v11779_v13  ;;  %3494 = vmatpush1.bf16.msra.mxu1 %v11680_v50 }
  0xbe   : > { %v1357_v20 = vpop.permute.xlu1 %1356  ;;  %v1354_v21 = vpop.permute.xlu0 %1353  ;;  %3214 = vmatprep.subr.bf16.mxu0 %v15409_v2  ;;  %3495 = vmatprep.subr.bf16.mxu1 %v15409_v2 }
  0xbf   : > { %vm1544_vm2 = vcmp.eq.s32.totalorder %v11652_v36, %v1357_v20  ;;  %vm1545_vm3 = vcmp.eq.s32.totalorder %v11657_v41, %v1357_v20  ;;  %vm1542_vm4 = vcmp.eq.s32.totalorder %v11652_v36, %v1354_v21  ;;  %vm1543_vm9 = vcmp.eq.s32.totalorder %v11657_v41, %v1354_v21  ;;  %1452 = vperm.xlu1 %11179, %v1317_v18   ;;  %v1325_v18 = vld [vmem:[%s11527_s16 + $0x158] sm:$0xff] }
  0xc0   : > { %1449 = vperm.xlu0 %11178, %v1316_v19   ;;  %vm11829_vm10 = vmpackc.low %vm1545_vm3, %vm1543_vm9  ;;  %vm15624_vm3 = vcmp.eq.s32.totalorder %v11652_v36, %v11709_v59  ;;  %vm15625_vm9 = vcmp.eq.s32.totalorder %v11652_v36, %v11707_v58  ;;  %v626_v58 = vld [vmem:[%s11495_s30 + $0x180] sm:$0xff]  ;;  %v1324_v19 = vld [vmem:[%s11527_s16 + $0x150] sm:$0xff] }
  0xc1   : > { %v15619_v23 = vsel %vm11829_vm10, 4294967295, %v15618_v23  ;;  %8892 = vmatprep.mubr.msk.bf16.mxu1 %vm11829_vm10, %v15430_v51  ;;  %vm11840_vm11 = vmpackc.low %vm1544_vm2, %vm1542_vm4  ;;  %3215 = vmatpush1.bf16.msra.mxu0 %v11821_v22  ;;  %vm15628_vm2 = vcmp.eq.s32.totalorder %v11657_v41, %v11724_v63 }
  0xc2   : > { %15620 = vst [vmem:[#allocation13_spill] sm:$0xff] %v15619_v23  ;;  %v15622_v24 = vsel %vm11840_vm11, 4294967295, %v15621_v24  ;;  %v11847_v27 = vpop.permute.xlu1 %682  ;;  %vm11855_vm0 = vmpackc.low %vm15625_vm9, %vm15624_vm3  ;;  %8894 = vmatmul.mubr.msk.bf16.gmra.mrb[4].mxu1 %vm11840_vm11, %v15430_v51  ;;  %v11862_v29 = vpop.permute.xlu0 %679  ;;  %3216 = vmatprep.subr.bf16.mxu0 %v15409_v2 }
  0xc3   : > { %15623 = vst [vmem:[#allocation14_spill] sm:$0xff] %v15622_v24  ;;  %v15627_v28 = vsel %vm11855_vm0, 4294967295, %v15626_v28  ;;  %8774 = vmatmul.mubr.msk.bf16.gmra.mrb[12].mxu0 %vm11855_vm0, %v15430_v51  ;;  %778 = vperm.xlu1 %11179, %v623_v25   ;;  %vm11871_vm4 = vmpackc.low %vm15628_vm2, %vm851_vm1  ;;  %v15670_v25 = vmov 0  ;;  %v15873_v24 = vmov 0 }
  0xc4   : > { %775 = vperm.xlu0 %11178, %v622_v26   ;;  %v15630_v30 = vsel %vm11871_vm4, 4294967295, %v15629_v30  ;;  %8776 = vmatprep.mubr.msk.bf16.mxu0 %vm11871_vm4, %v15430_v51  ;;  %v15673_v26 = vmov 0 }
  0xc5   : > { %3496 = vmatpush1.bf16.msra.mxu1 %v11705_v57  ;;  %v627_v57 = vld [vmem:[%s11495_s30 + $0x188] sm:$0xff]  ;;  %3217 = vmatpush1.bf16.msra.mxu0 %v11234_v53 }
  0xc6   : > { %v1363_v33 = vpop.permute.xlu1 %1362  ;;  %v1360_v34 = vpop.permute.xlu0 %1359  ;;  %3497 = vmatprep.subr.bf16.mxu1 %v15409_v2  ;;  %3218 = vmatprep.subr.bf16.mxu0 %v15409_v2 }
  0xc7   : > { %vm1548_vm1 = vcmp.eq.s32.totalorder %v11652_v36, %v1363_v33  ;;  %vm1549_vm2 = vcmp.eq.s32.totalorder %v11657_v41, %v1363_v33  ;;  %vm1546_vm11 = vcmp.eq.s32.totalorder %v11652_v36, %v1360_v34  ;;  %vm1547_vm10 = vcmp.eq.s32.totalorder %v11657_v41, %v1360_v34  ;;  %1458 = vperm.xlu1 %11179, %v1319_v31  }
  0xc8   : > { %1455 = vperm.xlu0 %11178, %v1318_v32   ;;  %vm11890_vm3 = vmpackc.low %vm1549_vm2, %vm1547_vm10  ;;  %vm15637_vm10 = vcmp.eq.s32.totalorder %v11652_v36, %v11730_v1  ;;  %vm15638_vm2 = vcmp.eq.s32.totalorder %v11652_v36, %v11724_v63  ;;  %v1323_v63 = vld [vmem:[%s11527_s16 + $0x148] sm:$0xff]  ;;  %v1322_v1 = vld [vmem:[%s11527_s16 + $0x140] sm:$0xff]  ;;  %v15678_v32 = vmov 0  ;;  %v15681_v34 = vmov 0 }
  0xc9   : > { %v15632_v37 = vsel %vm11890_vm3, 4294967295, %v15631_v37  ;;  %8896 = vmatprep.mubr.msk.bf16.mxu1 %vm11890_vm3, %v15430_v51  ;;  %vm11901_vm4 = vmpackc.low %vm1548_vm1, %vm1546_vm11  ;;  %3498 = vmatpush1.bf16.msra.mxu1 %v11722_v62  ;;  %vm15641_vm11 = vcmp.eq.s32.totalorder %v11657_v41, %v11781_v14  ;;  %v15655_v62 = vmov 0 }
  0xca   : > { %15633 = vst [vmem:[#allocation15_spill] sm:$0xff] %v15632_v37  ;;  %v15635_v38 = vsel %vm11901_vm4, 4294967295, %v15634_v38  ;;  %v11908_v42 = vpop.permute.xlu1 %688  ;;  %vm11916_vm9 = vmpackc.low %vm15638_vm2, %vm15637_vm10  ;;  %8898 = vmatmul.mubr.msk.bf16.gmra.mrb[8].mxu1 %vm11901_vm4, %v15430_v51  ;;  %v11923_v44 = vpop.permute.xlu0 %685  ;;  %3499 = vmatprep.subr.bf16.mxu1 %v15409_v2 }
  0xcb   : > { %15636 = vst [vmem:[#allocation16_spill] sm:$0xff] %v15635_v38  ;;  %v15640_v43 = vsel %vm11916_vm9, 4294967295, %v15639_v43  ;;  %8778 = vmatmul.mubr.msk.bf16.gmra.mrb[16].mxu0 %vm11916_vm9, %v15430_v51  ;;  %784 = vperm.xlu1 %11179, %v625_v39   ;;  %vm11932_vm1 = vmpackc.low %vm15641_vm11, %vm855_vm5  ;;  %v1327_v39 = vld [vmem:[%s11527_s16 + $0x168] sm:$0xff]  ;;  %v15861_v38 = vmov 0 }
  0xcc   : > { %781 = vperm.xlu0 %11178, %v624_v40   ;;  %v15643_v45 = vsel %vm11932_vm1, 4294967295, %v15642_v45  ;;  %8780 = vmatprep.mubr.msk.bf16.mxu0 %vm11932_vm1, %v15430_v51  ;;  %vm859_vm1 = vcmp.eq.s32.totalorder %v11657_v41, %v11862_v29  ;;  %v1326_v40 = vld [vmem:[%s11527_s16 + $0x160] sm:$0xff] }
  0xcd   : > { %3500 = vmatpush1.bf16.msra.mxu1 %v11749_v6  ;;  %v15657_v6 = vmov 0 }
  0xce   : > { %v1369_v50 = vpop.permute.xlu1 %1368  ;;  %v1366_v52 = vpop.permute.xlu0 %1365  ;;  %3501 = vmatprep.subr.bf16.mxu1 %v15409_v2 }
  0xcf   : > { %vm1552_vm5 = vcmp.eq.s32.totalorder %v11652_v36, %v1369_v50  ;;  %vm1553_vm11 = vcmp.eq.s32.totalorder %v11657_v41, %v1369_v50  ;;  %vm1550_vm4 = vcmp.eq.s32.totalorder %v11652_v36, %v1366_v52  ;;  %vm1551_vm10 = vcmp.eq.s32.totalorder %v11657_v41, %v1366_v52  ;;  %1464 = vperm.xlu1 %11179, %v1321_v47   ;;  %v633_v50 = vld [vmem:[%s11495_s30 + $0x1b8] sm:$0xff]  ;;  %v632_v52 = vld [vmem:[%s11495_s30 + $0x1b0] sm:$0xff] }
  0xd0   : > { %1461 = vperm.xlu0 %11178, %v1320_v49   ;;  %vm11954_vm2 = vmpackc.low %vm1553_vm11, %vm1551_vm10  ;;  %vm15650_vm10 = vcmp.eq.s32.totalorder %v11652_v36, %v11794_v16  ;;  %vm15651_vm11 = vcmp.eq.s32.totalorder %v11652_v36, %v11781_v14  ;;  %v15668_v16 = vmov 0  ;;  %v15683_v47 = vmov 0 }
  0xd1   : > { %v15645_v55 = vsel %vm11954_vm2, 4294967295, %v15644_v55  ;;  %8900 = vmatprep.mubr.msk.bf16.mxu1 %vm11954_vm2, %v15430_v51  ;;  %vm11965_vm9 = vmpackc.low %vm1552_vm5, %vm1550_vm4  ;;  %vm15654_vm4 = vcmp.eq.s32.totalorder %v11657_v41, %v11847_v27  ;;  %3502 = vmatpush1.bf16.msra.mxu1 %v11779_v13  ;;  %v15665_v13 = vmov 0  ;;  %v15686_v49 = vmov 0 }
  0xd2   : > { %15646 = vst [vmem:[#allocation17_spill] sm:$0xff] %v15645_v55  ;;  %v15648_v56 = vsel %vm11965_vm9, 4294967295, %v15647_v56  ;;  %v11971_v59 = vpop.permute.xlu1 %694  ;;  %vm11979_vm3 = vmpackc.low %vm15651_vm11, %vm15650_vm10  ;;  %8902 = vmatmul.mubr.msk.bf16.gmra.mrb[12].mxu1 %vm11965_vm9, %v15430_v51  ;;  %v11986_v61 = vpop.permute.xlu0 %691  ;;  %3503 = vmatprep.subr.bf16.mxu1 %v15409_v2 }
  0xd3   : > { %15649 = vst [vmem:[#allocation18_spill] sm:$0xff] %v15648_v56  ;;  %v15653_v60 = vsel %vm11979_vm3, 4294967295, %v15652_v60  ;;  %8782 = vmatmul.mubr.msk.bf16.gmra.mrb[20].mxu0 %vm11979_vm3, %v15430_v51  ;;  %790 = vperm.xlu1 %11179, %v627_v57   ;;  %vm11995_vm5 = vmpackc.low %vm15654_vm4, %vm859_vm1  ;;  %v15691_v57 = vmov 0  ;;  %v15849_v56 = vmov 0 }
  0xd4   : > { %787 = vperm.xlu0 %11178, %v626_v58   ;;  %v15656_v62 = vsel %vm11995_vm5, 4294967295, %v15655_v62  ;;  %8784 = vmatprep.mubr.msk.bf16.mxu0 %vm11995_vm5, %v15430_v51  ;;  %vm863_vm5 = vcmp.eq.s32.totalorder %v11657_v41, %v11923_v44 }
  0xd5   : > { %3504 = vmatpush1.bf16.msra.mxu1 %v11821_v22  ;;  %v11235_v22 = vld [vmem:[%s15349_s3 + $0x38] sm:$0xff]  }
  0xd6   : > { %v1375_v4 = vpop.permute.xlu1 %1374  ;;  %v1372_v5 = vpop.permute.xlu0 %1371  ;;  %3505 = vmatprep.subr.bf16.mxu1 %v15409_v2  ;;  %3219 = vmatpush1.bf16.msra.mxu0 %v11235_v22 }
  0xd7   : > { %vm1556_vm1 = vcmp.eq.s32.totalorder %v11652_v36, %v1375_v4  ;;  %vm1557_vm4 = vcmp.eq.s32.totalorder %v11657_v41, %v1375_v4  ;;  %vm1554_vm9 = vcmp.eq.s32.totalorder %v11652_v36, %v1372_v5  ;;  %vm1555_vm2 = vcmp.eq.s32.totalorder %v11657_v41, %v1372_v5  ;;  %1470 = vperm.xlu1 %11179, %v1323_v63   ;;  %v1328_v63 = vld [vmem:[%s11527_s16 + $0x170] sm:$0xff]  ;;  %v11236_v5 = vld [vmem:[%s15349_s3 + $0x40] sm:$0xff]  }
  0xd8   : > { %1467 = vperm.xlu0 %11178, %v1322_v1   ;;  %vm12014_vm10 = vmpackc.low %vm1557_vm4, %vm1555_vm2  ;;  %vm15663_vm2 = vcmp.eq.s32.totalorder %v11652_v36, %v11862_v29  ;;  %vm15664_vm4 = vcmp.eq.s32.totalorder %v11652_v36, %v11847_v27  ;;  %v631_v27 = vld [vmem:[%s11495_s30 + $0x1a8] sm:$0xff]  ;;  %v630_v29 = vld [vmem:[%s11495_s30 + $0x1a0] sm:$0xff]  ;;  %3220 = vmatprep.subr.bf16.mxu0 %v15409_v2 }
  0xd9   : > { %v15658_v6 = vsel %vm12014_vm10, 4294967295, %v15657_v6  ;;  %8904 = vmatprep.mubr.msk.bf16.mxu1 %vm12014_vm10, %v15430_v51  ;;  %vm12025_vm3 = vmpackc.low %vm1556_vm1, %vm1554_vm9  ;;  %vm15667_vm9 = vcmp.eq.s32.totalorder %v11657_v41, %v11908_v42  ;;  %3506 = vmatpush1.bf16.msra.mxu1 %v11234_v53 }
  0xda   : > { %15659 = vst [vmem:[#allocation19_spill] sm:$0xff] %v15658_v6  ;;  %v15661_v7 = vsel %vm12025_vm3, 4294967295, %v15660_v7  ;;  %v12032_v12 = vpop.permute.xlu1 %700  ;;  %vm12040_vm11 = vmpackc.low %vm15664_vm4, %vm15663_vm2  ;;  %8906 = vmatmul.mubr.msk.bf16.gmra.mrb[16].mxu1 %vm12025_vm3, %v15430_v51  ;;  %v12047_v14 = vpop.permute.xlu0 %697  ;;  %3507 = vmatprep.subr.bf16.mxu1 %v15409_v2 }
  0xdb   : > { %15662 = vst [vmem:[#allocation20_spill] sm:$0xff] %v15661_v7  ;;  %v15666_v13 = vsel %vm12040_vm11, 4294967295, %v15665_v13  ;;  %8786 = vmatmul.mubr.msk.bf16.gmra.mrb[24].mxu0 %vm12040_vm11, %v15430_v51  ;;  %796 = vperm.xlu1 %11179, %v629_v8   ;;  %vm12056_vm1 = vmpackc.low %vm15667_vm9, %vm863_vm5  ;;  %v15695_v8 = vmov 0  ;;  %v15837_v7 = vmov 0 }
  0xdc   : > { %793 = vperm.xlu0 %11178, %v628_v10   ;;  %v15669_v16 = vsel %vm12056_vm1, 4294967295, %v15668_v16  ;;  %8788 = vmatprep.mubr.msk.bf16.mxu0 %vm12056_vm1, %v15430_v51  ;;  %vm867_vm1 = vcmp.eq.s32.totalorder %v11657_v41, %v11986_v61  ;;  %v15698_v10 = vmov 0 }
  0xdd   : > { %3508 = vmatpush1.bf16.msra.mxu1 %v11235_v22  ;;  %3221 = vmatpush1.bf16.msra.mxu0 %v11236_v5 }
  0xde   : > { %v1381_v20 = vpop.permute.xlu1 %1380  ;;  %v1378_v21 = vpop.permute.xlu0 %1377  ;;  %3509 = vmatprep.subr.bf16.mxu1 %v15409_v2  ;;  %3222 = vmatprep.subr.bf16.mxu0 %v15409_v2 }
  0xdf   : > { %vm1560_vm5 = vcmp.eq.s32.totalorder %v11652_v36, %v1381_v20  ;;  %vm1561_vm9 = vcmp.eq.s32.totalorder %v11657_v41, %v1381_v20  ;;  %vm1558_vm3 = vcmp.eq.s32.totalorder %v11652_v36, %v1378_v21  ;;  %vm1559_vm2 = vcmp.eq.s32.totalorder %v11657_v41, %v1378_v21  ;;  %1476 = vperm.xlu1 %11179, %v1325_v18   ;;  %v635_v18 = vld [vmem:[%s11495_s30 + $0x1c8] sm:$0xff] }
  0xe0   : > { %1473 = vperm.xlu0 %11178, %v1324_v19   ;;  %vm12077_vm4 = vmpackc.low %vm1561_vm9, %vm1559_vm2  ;;  %vm15676_vm2 = vcmp.eq.s32.totalorder %v11652_v36, %v11923_v44  ;;  %vm15677_vm9 = vcmp.eq.s32.totalorder %v11652_v36, %v11908_v42  ;;  %v634_v19 = vld [vmem:[%s11495_s30 + $0x1c0] sm:$0xff]  ;;  %v15703_v21 = vmov 0 }
  0xe1   : > { %v15671_v25 = vsel %vm12077_vm4, 4294967295, %v15670_v25  ;;  %8908 = vmatprep.mubr.msk.bf16.mxu1 %vm12077_vm4, %v15430_v51  ;;  %vm12088_vm11 = vmpackc.low %vm1560_vm5, %vm1558_vm3  ;;  %vm15680_vm3 = vcmp.eq.s32.totalorder %v11657_v41, %v11971_v59  ;;  %3510 = vmatpush1.bf16.msra.mxu1 %v11236_v5 }
  0xe2   : > { %15672 = vst [vmem:[#allocation21_spill] sm:$0xff] %v15671_v25  ;;  %v15674_v26 = vsel %vm12088_vm11, 4294967295, %v15673_v26  ;;  %v12094_v31 = vpop.permute.xlu1 %706  ;;  %vm12102_vm10 = vmpackc.low %vm15677_vm9, %vm15676_vm2  ;;  %8910 = vmatmul.mubr.msk.bf16.gmra.mrb[20].mxu1 %vm12088_vm11, %v15430_v51  ;;  %v12109_v33 = vpop.permute.xlu0 %703  ;;  %vm873_vm2 = vcmp.eq.s32.totalorder %v11657_v41, %v12032_v12  ;;  %vm871_vm9 = vcmp.eq.s32.totalorder %v11657_v41, %v12047_v14  ;;  %3511 = vmatprep.subr.bf16.mxu1 %v15409_v2 }
  0xe3   : > { %15675 = vst [vmem:[#allocation22_spill] sm:$0xff] %v15674_v26  ;;  %v15679_v32 = vsel %vm12102_vm10, 4294967295, %v15678_v32  ;;  %8790 = vmatmul.mubr.msk.bf16.gmra.mrb[28].mxu0 %vm12102_vm10, %v15430_v51  ;;  %802 = vperm.xlu1 %11179, %v631_v27   ;;  %vm12118_vm5 = vmpackc.low %vm15680_vm3, %vm867_vm1  ;;  %v1330_v27 = vld [vmem:[%s11527_s16 + $0x180] sm:$0xff]  ;;  %v15825_v26 = vmov 0 }
  0xe4   : > { %799 = vperm.xlu0 %11178, %v630_v29   ;;  %v15682_v34 = vsel %vm12118_vm5, 4294967295, %v15681_v34  ;;  %8792 = vmatprep.mubr.msk.bf16.mxu0 %vm12118_vm5, %v15430_v51 }
  0xe6   : > { %v1387_v42 = vpop.permute.xlu1 %1386  ;;  %v1384_v44 = vpop.permute.xlu0 %1383 }
  0xe7   : > { %vm1564_vm1 = vcmp.eq.s32.totalorder %v11652_v36, %v1387_v42  ;;  %vm1565_vm3 = vcmp.eq.s32.totalorder %v11657_v41, %v1387_v42  ;;  %vm1562_vm11 = vcmp.eq.s32.totalorder %v11652_v36, %v1384_v44  ;;  %vm1563_vm4 = vcmp.eq.s32.totalorder %v11657_v41, %v1384_v44  ;;  %1482 = vperm.xlu1 %11179, %v1327_v39   ;;  %v637_v44 = vld [vmem:[%s11495_s30 + $0x1d8] sm:$0xff] }
  0xe8   : > { %vm12136_vm5 = vmpackc.low %vm1565_vm3, %vm1563_vm4  ;;  %1479 = vperm.xlu0 %11178, %v1326_v40   ;;  %vm15689_vm4 = vcmp.eq.s32.totalorder %v11652_v36, %v11986_v61  ;;  %vm15690_vm3 = vcmp.eq.s32.totalorder %v11652_v36, %v11971_v59  ;;  %v15693_v61 = vmov 0  ;;  %v1329_v59 = vld [vmem:[%s11527_s16 + $0x178] sm:$0xff]  ;;  %v15707_v40 = vmov 0 }
  0xe9   : > { %v15684_v47 = vsel %vm12136_vm5, 4294967295, %v15683_v47  ;;  %vm12144_vm10 = vmpackc.low %vm1564_vm1, %vm1562_vm11  ;;  %8912 = vmatprep.mubr.msk.bf16.mxu1 %vm12136_vm5, %v15430_v51  ;;  %vm875_vm5 = vcmp.eq.s32.totalorder %v11657_v41, %v12109_v33  ;;  %v15710_v42 = vmov 0 }
  0xea   : > { %15685 = vst [vmem:[#allocation23_spill] sm:$0xff] %v15684_v47  ;;  %v15687_v49 = vsel %vm12144_vm10, 4294967295, %v15686_v49  ;;  %v12153_v53 = vpop.permute.xlu1 %712  ;;  %vm12161_vm0 = vmpackc.low %vm15690_vm3, %vm15689_vm4  ;;  %8914 = vmatmul.mubr.msk.bf16.gmra.mrb[24].mxu1 %vm12144_vm10, %v15430_v51  ;;  %v12168_v58 = vpop.permute.xlu0 %709  ;;  %vm877_vm4 = vcmp.eq.s32.totalorder %v11657_v41, %v12094_v31 }
  0xeb   : > { %15688 = vst [vmem:[#allocation24_spill] sm:$0xff] %v15687_v49  ;;  %v15692_v57 = vsel %vm12161_vm0, 4294967295, %v15691_v57  ;;  %8794 = vmatmul.mubr.msk.bf16.gmra.mrb[32].mxu0 %vm12161_vm0, %v15430_v51  ;;  %808 = vperm.xlu1 %11179, %v633_v50   ;;  %vm12173_vm11 = vmpackc.low %vm873_vm2, %vm871_vm9  ;;  %v636_v50 = vld [vmem:[%s11495_s30 + $0x1d0] sm:$0xff]  ;;  %v15822_v49 = vmov 0 }
  0xec   : > { %805 = vperm.xlu0 %11178, %v632_v52   ;;  %v15694_v61 = vsel %vm12173_vm11, 4294967295, %v15693_v61  ;;  %8796 = vmatprep.mubr.msk.bf16.mxu0 %vm12173_vm11, %v15430_v51  ;;  %v15715_v52 = vmov 0 }
  0xee   : > { %v1393_v1 = vpop.permute.xlu1 %1392  ;;  %v1390_v4 = vpop.permute.xlu0 %1389 }
  0xef   : > { %vm1568_vm2 = vcmp.eq.s32.totalorder %v11652_v36, %v1393_v1  ;;  %vm1569_vm9 = vcmp.eq.s32.totalorder %v11657_v41, %v1393_v1  ;;  %vm1566_vm3 = vcmp.eq.s32.totalorder %v11652_v36, %v1390_v4  ;;  %vm1567_vm10 = vcmp.eq.s32.totalorder %v11657_v41, %v1390_v4  ;;  %1488 = vperm.xlu1 %11179, %v1329_v59   ;;  %v1332_v1 = vld [vmem:[%s11527_s16 + $0x190] sm:$0xff] }
  0xf0   : > { %vm12193_vm1 = vmpackc.low %vm1569_vm9, %vm1567_vm10  ;;  %1485 = vperm.xlu0 %11178, %v1328_v63   ;;  %vm15701_vm10 = vcmp.eq.s32.totalorder %v11652_v36, %v12047_v14  ;;  %vm15702_vm9 = vcmp.eq.s32.totalorder %v11652_v36, %v12032_v12  ;;  %v15705_v14 = vmov 0  ;;  %v1331_v12 = vld [vmem:[%s11527_s16 + $0x188] sm:$0xff] }
  0xf1   : > { %v15696_v8 = vsel %vm12193_vm1, 4294967295, %v15695_v8  ;;  %vm12201_vm11 = vmpackc.low %vm1568_vm2, %vm1566_vm3  ;;  %8916 = vmatprep.mubr.msk.bf16.mxu1 %vm12193_vm1, %v15430_v51 }
  0xf2   : > { %15697 = vst [vmem:[#allocation25_spill] sm:$0xff] %v15696_v8  ;;  %v15699_v10 = vsel %vm12201_vm11, 4294967295, %v15698_v10  ;;  %v12210_v20 = vpop.permute.xlu1 %718  ;;  %vm12218_vm2 = vmpackc.low %vm15702_vm9, %vm15701_vm10  ;;  %8918 = vmatmul.mubr.msk.bf16.gmra.mrb[28].mxu1 %vm12201_vm11, %v15430_v51  ;;  %v12225_v22 = vpop.permute.xlu0 %715  ;;  %vm881_vm10 = vcmp.eq.s32.totalorder %v11657_v41, %v12153_v53  ;;  %vm879_vm9 = vcmp.eq.s32.totalorder %v11657_v41, %v12168_v58  ;;  %v15798_v8 = vmov 0 }
  0xf3   : > { %15700 = vst [vmem:[#allocation26_spill] sm:$0xff] %v15699_v10  ;;  %v15704_v21 = vsel %vm12218_vm2, 4294967295, %v15703_v21  ;;  %8798 = vmatmul.mubr.msk.bf16.gmra.mrb[36].mxu0 %vm12218_vm2, %v15430_v51  ;;  %vm12231_vm3 = vmpackc.low %vm877_vm4, %vm875_vm5  ;;  %814 = vperm.xlu1 %11179, %v635_v18   ;;  %v11237_v18 = vld [vmem:[%s15349_s3 + $0x48] sm:$0xff]  }
  0xf4   : > { %v15706_v14 = vsel %vm12231_vm3, 4294967295, %v15705_v14  ;;  %811 = vperm.xlu0 %11178, %v634_v19   ;;  %8800 = vmatprep.mubr.msk.bf16.mxu0 %vm12231_vm3, %v15430_v51  ;;  %v15719_v19 = vmov 0 }
  0xf5   : > { %3223 = vmatpush1.bf16.msra.mxu0 %v11237_v18  ;;  %3512 = vmatpush1.bf16.msra.mxu1 %v11237_v18  ;;  %v15734_v18 = vmov 0 }
  0xf6   : > { %v1399_v29 = vpop.permute.xlu1 %1398  ;;  %v1396_v39 = vpop.permute.xlu0 %1395  ;;  %3224 = vmatprep.subr.bf16.mxu0 %v15409_v2  ;;  %3513 = vmatprep.subr.bf16.mxu1 %v15409_v2 }
  0xf7   : > { %vm1572_vm5 = vcmp.eq.s32.totalorder %v11652_v36, %v1399_v29  ;;  %vm1573_vm4 = vcmp.eq.s32.totalorder %v11657_v41, %v1399_v29  ;;  %vm1570_vm11 = vcmp.eq.s32.totalorder %v11652_v36, %v1396_v39  ;;  %vm1571_vm1 = vcmp.eq.s32.totalorder %v11657_v41, %v1396_v39  ;;  %1494 = vperm.xlu1 %11179, %v1331_v12   ;;  %v638_v29 = vld [vmem:[%s11495_s30 + $0x1e0] sm:$0xff] }
  0xf8   : > { %vm12249_vm3 = vmpackc.low %vm1573_vm4, %vm1571_vm1  ;;  %1491 = vperm.xlu0 %11178, %v1330_v27   ;;  %vm15713_vm1 = vcmp.eq.s32.totalorder %v11652_v36, %v12109_v33  ;;  %vm15714_vm4 = vcmp.eq.s32.totalorder %v11652_v36, %v12094_v31  ;;  %v15717_v33 = vmov 0  ;;  %v1333_v31 = vld [vmem:[%s11527_s16 + $0x198] sm:$0xff]  ;;  %v15722_v12 = vmov 0  ;;  %v639_v27 = vld [vmem:[%s11495_s30 + $0x1e8] sm:$0xff] }
  0xf9   : > { %v15708_v40 = vsel %vm12249_vm3, 4294967295, %v15707_v40  ;;  %vm12257_vm2 = vmpackc.low %vm1572_vm5, %vm1570_vm11  ;;  %8920 = vmatprep.mubr.msk.bf16.mxu1 %vm12249_vm3, %v15430_v51  ;;  %vm883_vm3 = vcmp.eq.s32.totalorder %v11657_v41, %v12225_v22  ;;  %v15727_v39 = vmov 0 }
  0xfa   : > { %15709 = vst [vmem:[#allocation27_spill] sm:$0xff] %v15708_v40  ;;  %v15711_v42 = vsel %vm12257_vm2, 4294967295, %v15710_v42  ;;  %vm12272_vm0 = vmpackc.low %vm15714_vm4, %vm15713_vm1  ;;  %v12276_v59 = vpop.permute.xlu1 %724  ;;  %8922 = vmatmul.mubr.msk.bf16.gmra.mrb[32].mxu1 %vm12257_vm2, %v15430_v51  ;;  %v12281_v63 = vpop.permute.xlu0 %721  ;;  %vm885_vm1 = vcmp.eq.s32.totalorder %v11657_v41, %v12210_v20  ;;  %v7995_v40 = vld [vmem:[#allocation2] sm:$0x1] }
  0xfb   : > { %15712 = vst [vmem:[#allocation28_spill] sm:$0xff] %v15711_v42  ;;  %v15716_v52 = vsel %vm12272_vm0, 4294967295, %v15715_v52  ;;  %8802 = vmatmul.mubr.msk.bf16.gmra.mrb[40].mxu0 %vm12272_vm0, %v15430_v51  ;;  %vm12286_vm11 = vmpackc.low %vm881_vm10, %vm879_vm9  ;;  %820 = vperm.xlu1 %11179, %v637_v44   ;;  %v1344_v42 = vld [vmem:[%s11527_s16 + $0x1f0] sm:$0xff] }
  0xfc   : > { %v15718_v33 = vsel %vm12286_vm11, 4294967295, %v15717_v33  ;;  %817 = vperm.xlu0 %11178, %v636_v50   ;;  %8804 = vmatprep.mubr.msk.bf16.mxu0 %vm12286_vm11, %v15430_v51 }
  0xfe   : > { %v1405_v4 = vpop.permute.xlu1 %1404  ;;  %v1402_v5 = vpop.permute.xlu0 %1401 }
  0xff   : > { %vm1576_vm10 = vcmp.eq.s32.totalorder %v11652_v36, %v1405_v4  ;;  %vm1577_vm9 = vcmp.eq.s32.totalorder %v11657_v41, %v1405_v4  ;;  %vm1574_vm4 = vcmp.eq.s32.totalorder %v11652_v36, %v1402_v5  ;;  %vm1575_vm2 = vcmp.eq.s32.totalorder %v11657_v41, %v1402_v5  ;;  %1500 = vperm.xlu1 %11179, %v1333_v31   ;;  %v1334_v31 = vld [vmem:[%s11527_s16 + $0x1a0] sm:$0xff] }
 0x100   : > { %vm12306_vm5 = vmpackc.low %vm1577_vm9, %vm1575_vm2  ;;  %1497 = vperm.xlu0 %11178, %v1332_v1   ;;  %vm15725_vm2 = vcmp.eq.s32.totalorder %v11652_v36, %v12168_v58  ;;  %vm15726_vm9 = vcmp.eq.s32.totalorder %v11652_v36, %v12153_v53  ;;  %v15729_v53 = vmov 0  ;;  %v1335_v58 = vld [vmem:[%s11527_s16 + $0x1a8] sm:$0xff]  ;;  %v15731_v5 = vmov 0 }
 0x101   : > { %v15720_v19 = vsel %vm12306_vm5, 4294967295, %v15719_v19  ;;  %vm12314_vm11 = vmpackc.low %vm1576_vm10, %vm1574_vm4  ;;  %8924 = vmatprep.mubr.msk.bf16.mxu1 %vm12306_vm5, %v15430_v51  ;;  %vm889_vm4 = vcmp.eq.s32.totalorder %v11657_v41, %v12276_v59 }
 0x102   : > { %15721 = vst [vmem:[#allocation29_spill] sm:$0xff] %v15720_v19  ;;  %v15723_v12 = vsel %vm12314_vm11, 4294967295, %v15722_v12  ;;  %vm12329_vm0 = vmpackc.low %vm15726_vm9, %vm15725_vm2  ;;  %v12333_v44 = vpop.permute.xlu1 %730  ;;  %8926 = vmatmul.mubr.msk.bf16.gmra.mrb[36].mxu1 %vm12314_vm11, %v15430_v51  ;;  %v12338_v50 = vpop.permute.xlu0 %727  ;;  %vm887_vm2 = vcmp.eq.s32.totalorder %v11657_v41, %v12281_v63 }
 0x103   : > { %15724 = vst [vmem:[#allocation30_spill] sm:$0xff] %v15723_v12  ;;  %v15728_v39 = vsel %vm12329_vm0, 4294967295, %v15727_v39  ;;  %8806 = vmatmul.mubr.msk.bf16.gmra.mrb[44].mxu0 %vm12329_vm0, %v15430_v51  ;;  %vm12344_vm10 = vmpackc.low %vm885_vm1, %vm883_vm3  ;;  %826 = vperm.xlu1 %11179, %v639_v27   ;;  %v641_v27 = vld [vmem:[%s11495_s30 + $0x1f8] sm:$0xff] }
 0x104   : > { %v15730_v53 = vsel %vm12344_vm10, 4294967295, %v15729_v53  ;;  %823 = vperm.xlu0 %11178, %v638_v29   ;;  %8808 = vmatprep.mubr.msk.bf16.mxu0 %vm12344_vm10, %v15430_v51  ;;  %v640_v29 = vld [vmem:[%s11495_s30 + $0x1f0] sm:$0xff] }
 0x106   : > { %v1411_v1 = vpop.permute.xlu1 %1410  ;;  %v1408_v4 = vpop.permute.xlu0 %1407 }
 0x107   : > { %vm1580_vm3 = vcmp.eq.s32.totalorder %v11652_v36, %v1411_v1  ;;  %vm1581_vm1 = vcmp.eq.s32.totalorder %v11657_v41, %v1411_v1  ;;  %vm1578_vm9 = vcmp.eq.s32.totalorder %v11652_v36, %v1408_v4  ;;  %vm1579_vm11 = vcmp.eq.s32.totalorder %v11657_v41, %v1408_v4  ;;  %1506 = vperm.xlu1 %11179, %v1335_v58   ;;  %v1336_v4 = vld [vmem:[%s11527_s16 + $0x1b0] sm:$0xff] }
 0x108   : > { %vm12362_vm5 = vmpackc.low %vm1581_vm1, %vm1579_vm11  ;;  %1503 = vperm.xlu0 %11178, %v1334_v31   ;;  %vm15737_vm11 = vcmp.eq.s32.totalorder %v11652_v36, %v12225_v22  ;;  %vm15738_vm1 = vcmp.eq.s32.totalorder %v11652_v36, %v12210_v20  ;;  %v15739_v58 = vmov 0  ;;  %v15741_v22 = vmov 0  ;;  %v1337_v20 = vld [vmem:[%s11527_s16 + $0x1b8] sm:$0xff] }
 0x109   : > { %v15732_v5 = vsel %vm12362_vm5, 4294967295, %v15731_v5  ;;  %vm12370_vm10 = vmpackc.low %vm1580_vm3, %vm1578_vm9  ;;  %8928 = vmatprep.mubr.msk.bf16.mxu1 %vm12362_vm5, %v15430_v51  ;;  %vm891_vm5 = vcmp.eq.s32.totalorder %v11657_v41, %v12338_v50 }
 0x10a   : > { %15733 = vst [vmem:[#allocation31_spill] sm:$0xff] %v15732_v5  ;;  %v15735_v18 = vsel %vm12370_vm10, 4294967295, %v15734_v18  ;;  %vm12385_vm0 = vmpackc.low %vm15738_vm1, %vm15737_vm11  ;;  %v12389_v31 = vpop.permute.xlu1 %736  ;;  %8930 = vmatmul.mubr.msk.bf16.gmra.mrb[40].mxu1 %vm12370_vm10, %v15430_v51  ;;  %v12394_v1 = vpop.permute.xlu0 %733  ;;  %vm893_vm11 = vcmp.eq.s32.totalorder %v11657_v41, %v12333_v44  ;;  %v15753_v5 = vmov 0  }
 0x10b   : > { %15736 = vst [vmem:[#allocation32_spill] sm:$0xff] %v15735_v18  ;;  %v15740_v58 = vsel %vm12385_vm0, 4294967295, %v15739_v58  ;;  %8810 = vmatmul.mubr.msk.bf16.gmra.mrb[48].mxu0 %vm12385_vm0, %v15430_v51  ;;  %vm12399_vm3 = vmpackc.low %vm889_vm4, %vm887_vm2  ;;  %832 = vperm.xlu1 %11179, %v641_v27   ;;  %v11238_v27 = vld [vmem:[%s15349_s3 + $0x50] sm:$0xff]   ;;  %v1338_v18 = vld [vmem:[%s11527_s16 + $0x1c0] sm:$0xff] }
 0x10c   : > { %v15742_v22 = vsel %vm12399_vm3, 4294967295, %v15741_v22  ;;  %829 = vperm.xlu0 %11178, %v640_v29   ;;  %8812 = vmatprep.mubr.msk.bf16.mxu0 %vm12399_vm3, %v15430_v51  ;;  %v15743_v29 = vmov 0 }
 0x10d   : > { %3225 = vmatpush1.bf16.msra.mxu0 %v11238_v27  ;;  %3514 = vmatpush1.bf16.msra.mxu1 %v11238_v27  ;;  %v11239_v27 = vld [vmem:[%s15349_s3 + $0x58] sm:$0xff]  }
 0x10e   : > { %v1417_v35 = vpop.permute.xlu1 %1416  ;;  %v1414_v2 = vpop.permute.xlu0 %1413  ;;  %3226 = vmatprep.subr.bf16.mxu0 %v15753_v5  ;;  %3515 = vmatprep.subr.bf16.mxu1 %v15753_v5 }
 0x10f   : > { %vm1584_vm4 = vcmp.eq.s32.totalorder %v11652_v36, %v1417_v35  ;;  %vm1585_vm2 = vcmp.eq.s32.totalorder %v11657_v41, %v1417_v35  ;;  %vm1582_vm1 = vcmp.eq.s32.totalorder %v11652_v36, %v1414_v2  ;;  %vm1583_vm10 = vcmp.eq.s32.totalorder %v11657_v41, %v1414_v2  ;;  %1512 = vperm.xlu1 %11179, %v1337_v20   ;;  %v1339_v2 = vld [vmem:[%s11527_s16 + $0x1c8] sm:$0xff] }
 0x110   : > { %vm12419_vm9 = vmpackc.low %vm1585_vm2, %vm1583_vm10  ;;  %1509 = vperm.xlu0 %11178, %v1336_v4   ;;  %v15746_v35 = vmov 0  ;;  %vm15749_vm10 = vcmp.eq.s32.totalorder %v11652_v36, %v12281_v63  ;;  %vm15750_vm2 = vcmp.eq.s32.totalorder %v11652_v36, %v12276_v59  ;;  %v15751_v20 = vmov 0  ;;  %v1341_v63 = vld [vmem:[%s11527_s16 + $0x1d8] sm:$0xff] }
 0x111   : > { %v15744_v29 = vsel %vm12419_vm9, 4294967295, %v15743_v29  ;;  %vm12427_vm3 = vmpackc.low %vm1584_vm4, %vm1582_vm1  ;;  %8932 = vmatprep.mubr.msk.bf16.mxu1 %vm12419_vm9, %v15430_v51  ;;  %v15754_v59 = vmov 0  ;;  %vm897_vm1 = vcmp.eq.s32.totalorder %v11657_v41, %v12389_v31  ;;  %3227 = vmatpush1.bf16.msra.mxu0 %v11239_v27 }
 0x112   : > { %15745 = vst [vmem:[#allocation33_spill] sm:$0xff] %v15744_v29  ;;  %v15747_v35 = vsel %vm12427_vm3, 4294967295, %v15746_v35  ;;  %vm12442_vm0 = vmpackc.low %vm15750_vm2, %vm15749_vm10  ;;  %v12446_v4 = vpop.permute.xlu1 %742  ;;  %8934 = vmatmul.mubr.msk.bf16.gmra.mrb[44].mxu1 %vm12427_vm3, %v15430_v51  ;;  %v12451_v29 = vpop.permute.xlu0 %739  ;;  %vm895_vm10 = vcmp.eq.s32.totalorder %v11657_v41, %v12394_v1  ;;  %3228 = vmatprep.subr.bf16.mxu0 %v15753_v5 }
 0x113   : > { %15748 = vst [vmem:[#allocation34_spill] sm:$0xff] %v15747_v35  ;;  %v15752_v20 = vsel %vm12442_vm0, 4294967295, %v15751_v20  ;;  %8814 = vmatmul.mubr.msk.bf16.gmra.mrb[52].mxu0 %vm12442_vm0, %v15430_v51  ;;  %vm12457_vm4 = vmpackc.low %vm893_vm11, %vm891_vm5  ;;  %1518 = vperm.xlu1 %11179, %v1339_v2   ;;  %v1340_v35 = vld [vmem:[%s11527_s16 + $0x1d0] sm:$0xff]  ;;  %v15765_v2 = vmov 0 }
 0x114   : > { %v15755_v59 = vsel %vm12457_vm4, 4294967295, %v15754_v59  ;;  %1515 = vperm.xlu0 %11178, %v1338_v18   ;;  %8816 = vmatprep.mubr.msk.bf16.mxu0 %vm12457_vm4, %v15430_v51  ;;  %v15757_v18 = vmov 0 }
 0x115   : > { %15756 = vst [vmem:[#allocation35_spill] sm:$0xff] %v15755_v59  ;;  %3516 = vmatpush1.bf16.msra.mxu1 %v11239_v27  ;;  %v11241_v27 = vld [vmem:[%s15349_s3 + $0x68] sm:$0xff]  }
 0x116   : > { %v1423_v12 = vpop.permute.xlu1 %1422  ;;  %v1420_v19 = vpop.permute.xlu0 %1419  ;;  %3517 = vmatprep.subr.bf16.mxu1 %v15753_v5 }
 0x117   : > { %vm1588_vm5 = vcmp.eq.s32.totalorder %v11652_v36, %v1423_v12  ;;  %vm1589_vm11 = vcmp.eq.s32.totalorder %v11657_v41, %v1423_v12  ;;  %vm1586_vm2 = vcmp.eq.s32.totalorder %v11652_v36, %v1420_v19  ;;  %vm1587_vm3 = vcmp.eq.s32.totalorder %v11657_v41, %v1420_v19  ;;  %1524 = vperm.xlu1 %11179, %v1341_v63   ;;  %v1343_v19 = vld [vmem:[%s11527_s16 + $0x1e8] sm:$0xff] }
 0x118   : > { %vm12475_vm9 = vmpackc.low %vm1589_vm11, %vm1587_vm3  ;;  %1521 = vperm.xlu0 %11178, %v1340_v35   ;;  %v15760_v12 = vmov 0  ;;  %v1342_v35 = vld [vmem:[%s11527_s16 + $0x1e0] sm:$0xff]  ;;  %vm15763_vm3 = vcmp.eq.s32.totalorder %v11652_v36, %v12338_v50  ;;  %vm15764_vm11 = vcmp.eq.s32.totalorder %v11652_v36, %v12333_v44  ;;  %v15768_v50 = vmov 0 }
 0x119   : > { %v15758_v18 = vsel %vm12475_vm9, 4294967295, %v15757_v18  ;;  %vm12486_vm4 = vmpackc.low %vm1588_vm5, %vm1586_vm2  ;;  %8936 = vmatprep.mubr.msk.bf16.mxu1 %vm12475_vm9, %v15430_v51  ;;  %v11240_v44 = vld [vmem:[%s15349_s3 + $0x60] sm:$0xff]  }
 0x11a   : > { %15759 = vst [vmem:[#allocation36_spill] sm:$0xff] %v15758_v18  ;;  %v15761_v12 = vsel %vm12486_vm4, 4294967295, %v15760_v12  ;;  %vm12501_vm0 = vmpackc.low %vm15764_vm11, %vm15763_vm3  ;;  %v12505_v63 = vpop.permute.xlu1 %748  ;;  %8938 = vmatmul.mubr.msk.bf16.gmra.mrb[48].mxu1 %vm12486_vm4, %v15430_v51  ;;  %v12510_v18 = vpop.permute.xlu0 %745  ;;  %3229 = vmatpush1.bf16.msra.mxu0 %v11240_v44 }
 0x11b   : > { %15762 = vst [vmem:[#allocation37_spill] sm:$0xff] %v15761_v12  ;;  %v15766_v2 = vsel %vm12501_vm0, 4294967295, %v15765_v2  ;;  %8818 = vmatmul.mubr.msk.bf16.gmra.mrb[56].mxu0 %vm12501_vm0, %v15430_v51  ;;  %vm12515_vm5 = vmpackc.low %vm897_vm1, %vm895_vm10  ;;  %1530 = vperm.xlu1 %11179, %v1343_v19   ;;  %v1345_v12 = vld [vmem:[%s11527_s16 + $0x1f8] sm:$0xff]  ;;  %vm899_vm10 = vcmp.eq.s32.totalorder %v11657_v41, %v12451_v29  ;;  %vm15793_vm0 = vcmp.eq.s32.totalorder %v11652_v36, %v12451_v29  ;;  %s560_s16 = scalar_lea.vmem [#allocation3], %s8466_s21 }
 0x11c   : > { %15767 = vst [vmem:[#allocation38_spill] sm:$0xff] %v15766_v2  ;;  %v15769_v50 = vsel %vm12515_vm5, 4294967295, %v15768_v50  ;;  %1527 = vperm.xlu0 %11178, %v1342_v35   ;;  %8820 = vmatprep.mubr.msk.bf16.mxu0 %vm12515_vm5, %v15430_v51  ;;  %v15771_v51 = vmov 0  ;;  %s8391_s0 = sshll.u32 %s560_s16, 4  ;;  %s15306_s0 = int_to_ptr.vmem [resolvable:$true] %s8391_s0 }
 0x11d   : > { %15770 = vst [vmem:[#allocation39_spill] sm:$0xff] %v15769_v50  ;;  %3230 = vmatprep.subr.bf16.mxu0 %v15753_v5  ;;  %3518 = vmatpush1.bf16.msra.mxu1 %v11240_v44  ;;  %v11243_v44 = vld [vmem:[%s15349_s3 + $0x78] sm:$0xff]   ;;  %s11260_s30 = scalar_lea.vmem %s15306_s0, 64  ;;  %p11267_p0 = scmp.lt.s32.totalorder %s15306_s0, %s11265_s19 }
 0x11e   : > { %v1429_v19 = vpop.permute.xlu1 %1428  ;;  %v1426_v35 = vpop.permute.xlu0 %1425  ;;  %3231 = vmatpush1.bf16.msra.mxu0 %v11241_v27  ;;  %3519 = vmatprep.subr.bf16.mxu1 %v15753_v5  ;;  %p11261_p11 = scmp.ne.s32.totalorder %s15306_s0, %s11260_s30  ;;  %p11268_p1 = scmp.lt.s32.totalorder %s11266_s25, %s11260_s30 }
 0x11f   : > { %vm1592_vm2 = vcmp.eq.s32.totalorder %v11652_v36, %v1429_v19  ;;  %vm1593_vm3 = vcmp.eq.s32.totalorder %v11657_v41, %v1429_v19  ;;  %vm1590_vm11 = vcmp.eq.s32.totalorder %v11652_v36, %v1426_v35  ;;  %vm1591_vm4 = vcmp.eq.s32.totalorder %v11657_v41, %v1426_v35  ;;  %1536 = vperm.xlu1 %11179, %v1345_v12  }
 0x120   : > { %vm12541_vm9 = vmpackc.low %vm1593_vm3, %vm1591_vm4  ;;  %1533 = vperm.xlu0 %11178, %v1344_v42   ;;  %v15774_v19 = vmov 0  ;;  %v15777_v35 = vmov 1.0|1.0   ;;  %vm15778_vm4 = vcmp.eq.s32.totalorder %v11652_v36, %v12394_v1  ;;  %vm15779_vm3 = vcmp.eq.s32.totalorder %v11652_v36, %v12389_v31  ;;  %v11242_v31 = vld [vmem:[%s15349_s3 + $0x70] sm:$0xff]   ;;  %3232 = vmatprep.subr.bf16.mxu0 %v15753_v5  ;;  %p11262_p12 = pnand %p11261_p11, %p11456_p5  ;;  %p11269_p2 = por %p11268_p1, %p11267_p0 }
 0x121   : > { %v15772_v51 = vsel %vm12541_vm9, 4294967295, %v15771_v51  ;;  %vm12548_vm5 = vmpackc.low %vm1592_vm2, %vm1590_vm11  ;;  %8940 = vmatprep.mubr.msk.bf16.mxu1 %vm12541_vm9, %v15777_v35  ;;  %v15780_v42 = vmov 0  ;;  %vm15783_vm2 = vcmp.eq.s32.totalorder %v11657_v41, %v12446_v4  ;;  %v15784_v1 = vmov 0  ;;  %3520 = vmatpush1.bf16.msra.mxu1 %v11241_v27 }
 0x122   : > { %15773 = vst [vmem:[#allocation40_spill] sm:$0xff] %v15772_v51  ;;  %v15775_v19 = vsel %vm12548_vm5, 4294967295, %v15774_v19  ;;  %vm12562_vm1 = vmpackc.low %vm15779_vm3, %vm15778_vm4  ;;  %v12566_v12 = vpop.permute.xlu1 %754  ;;  %8942 = vmatmul.mubr.msk.bf16.gmra.mrb[52].mxu1 %vm12548_vm5, %v15777_v35  ;;  %v12571_v51 = vpop.permute.xlu0 %751  ;;  %3233 = vmatpush1.bf16.msra.mxu0 %v11242_v31  ;;  %vm903_vm4 = vcmp.eq.s32.totalorder %v11657_v41, %v12510_v18  ;;  %p11263_p13 = pneg %p11262_p12 }
 0x123   : > { %15776 = vst [vmem:[#allocation41_spill] sm:$0xff] %v15775_v19  ;;  %v15781_v42 = vsel %vm12562_vm1, 4294967295, %v15780_v42  ;;  %vm12576_vm11 = vmpackc.low %vm15783_vm2, %vm899_vm10  ;;  %8822 = vmatmul.mubr.msk.bf16.gmra.mrb[60].mxu0 %vm12562_vm1, %v15777_v35  ;;  %3234 = vmatprep.subr.bf16.mxu0 %v15753_v5  ;;  %vm905_vm10 = vcmp.eq.s32.totalorder %v11657_v41, %v12505_v63 }
 0x124   : > { %15782 = vst [vmem:[#allocation42_spill] sm:$0xff] %v15781_v42  ;;  %v15785_v1 = vsel %vm12576_vm11, 4294967295, %v15784_v1  ;;  %7998 = vperm.xlu0 %11178, %v7995_v40   ;;  %8824 = vmatprep.mubr.msk.bf16.mxu0 %vm12576_vm11, %v15777_v35  ;;  %v15787_v40 = vmov 0  ;;  %p11270_p3 = pnand %p11269_p2, %p11263_p13 }
 0x125   : > { %15786 = vst [vmem:[#allocation43_spill] sm:$0xff] %v15785_v1  ;;  %3521 = vmatprep.subr.bf16.mxu1 %v15753_v5 }
 0x126   : > { %v1435_v19 = vpop.permute.xlu1 %1434  ;;  %v1432_v10 = vpop.permute.xlu0 %1431  ;;  %3235 = vmatpush1.bf16.msra.mxu0 %v11243_v44  ;;  %3522 = vmatpush1.bf16.msra.mxu1 %v11242_v31  ;;  %v15810_v31 = vmov 0 }
 0x127   : > { %vm1596_vm3 = vcmp.eq.s32.totalorder %v11652_v36, %v1435_v19  ;;  %vm1597_vm2 = vcmp.eq.s32.totalorder %v11657_v41, %v1435_v19  ;;  %vm1594_vm5 = vcmp.eq.s32.totalorder %v11652_v36, %v1432_v10  ;;  %vm1595_vm9 = vcmp.eq.s32.totalorder %v11657_v41, %v1432_v10  ;;  %3782 = vmatprep.subr.bf16.mxu0 %v15753_v5 }
 0x128   : > { %vm12604_vm11 = vmpackc.low %vm1597_vm2, %vm1595_vm9  ;;  %v15790_v19 = vmov 0  ;;  %vm15794_vm9 = vcmp.eq.s32.totalorder %v11652_v36, %v12446_v4  ;;  %v15795_v10 = vmov 0  ;;  %3523 = vmatprep.subr.bf16.mxu1 %v15753_v5 }
 0x129   : > { %v15788_v40 = vsel %vm12604_vm11, 4294967295, %v15787_v40  ;;  %vm12611_vm1 = vmpackc.low %vm1596_vm3, %vm1594_vm5  ;;  %8944 = vmatprep.mubr.msk.bf16.mxu1 %vm12604_vm11, %v15777_v35  ;;  %vm907_vm3 = vcmp.eq.s32.totalorder %v11657_v41, %v12571_v51 }
 0x12a   : > { %15789 = vst [vmem:[#allocation44_spill] sm:$0xff] %v15788_v40  ;;  %v15791_v19 = vsel %vm12611_vm1, 4294967295, %v15790_v19  ;;  %vm12624_vm2 = vmpackc.low %vm15794_vm9, %vm15793_vm0  ;;  %8946 = vmatmul.mubr.msk.bf16.gmra.mrb[56].mxu1 %vm12611_vm1, %v15777_v35  ;;  %v761_v27 = vpop.permute.xlu1 %760  ;;  %vm904_vm0 = vcmp.eq.s32.totalorder %v11652_v36, %v12505_v63  ;;  %v15801_v40 = vmov 0  ;;  %v15807_v63 = vmov 0 }
 0x12b   : > { %15792 = vst [vmem:[#allocation45_spill] sm:$0xff] %v15791_v19  ;;  %v15796_v10 = vsel %vm12624_vm2, 4294967295, %v15795_v10  ;;  %vm12631_vm5 = vmpackc.low %vm905_vm10, %vm903_vm4  ;;  %8826 = vmatmul.mubr.msk.bf16.gmra.mrb[64].mxu0 %vm12624_vm2, %v15777_v35  ;;  %v758_v29 = vpop.permute.xlu0 %757  ;;  %vm902_vm10 = vcmp.eq.s32.totalorder %v11652_v36, %v12510_v18  ;;  %vm909_vm4 = vcmp.eq.s32.totalorder %v11657_v41, %v12566_v12  ;;  %v15804_v18 = vmov 0  ;;  %3524 = vmatpush1.bf16.msra.mxu1 %v11243_v44 }
 0x12c   : > { %15797 = vst [vmem:[#allocation46_spill] sm:$0xff] %v15796_v10  ;;  %v15799_v8 = vsel %vm12631_vm5, 4294967295, %v15798_v8  ;;  %8828 = vmatprep.mubr.msk.bf16.mxu0 %vm12631_vm5, %v15777_v35  ;;  %vm12652_vm9 = vmpackc.low %vm904_vm0, %vm902_vm10  ;;  %v15970_v10 = vmov 0 }
 0x12d   : > { %15800 = vst [vmem:[#allocation47_spill] sm:$0xff] %v15799_v8  ;;  %v15802_v40 = vsel %vm12652_vm9, 4294967295, %v15801_v40  ;;  %vm12671_vm0 = vmpackc.low %vm909_vm4, %vm907_vm3 }
 0x12e   : > { %v1441_v4 = vpop.permute.xlu1 %1440  ;;  %15803 = vst [vmem:[#allocation48_spill] sm:$0xff] %v15802_v40  ;;  %v15811_v31 = vsel %vm12671_vm0, 4294967295, %v15810_v31 }
 0x12f   : > { %v1438_v19 = vpop.permute.xlu0 %1437  ;;  %vm1600_vm1 = vcmp.eq.s32.totalorder %v11652_v36, %v1441_v4  ;;  %vm1601_vm11 = vcmp.eq.s32.totalorder %v11657_v41, %v1441_v4  ;;  %15812 = vst [vmem:[#allocation51_spill] sm:$0xff] %v15811_v31  ;;  %v15954_v31 = vmov 0 }
 0x130   : > { %vm1598_vm5 = vcmp.eq.s32.totalorder %v11652_v36, %v1438_v19  ;;  %vm1599_vm2 = vcmp.eq.s32.totalorder %v11657_v41, %v1438_v19 }
 0x131   : > { %vm12660_vm15 = vmpackc.low %vm1601_vm11, %vm1599_vm2  ;;  %vm906_vm11 = vcmp.eq.s32.totalorder %v11652_v36, %v12571_v51  ;;  %vm913_vm2 = vcmp.eq.s32.totalorder %v11657_v41, %v761_v27  ;;  %v15816_v51 = vmov 0 }
 0x132   : > { %v15805_v18 = vsel %vm12660_vm15, 4294967295, %v15804_v18  ;;  %vm12664_vm12 = vmpackc.low %vm1600_vm1, %vm1598_vm5  ;;  %8948 = vmatprep.mubr.msk.bf16.mxu1 %vm12660_vm15, %v15777_v35  ;;  %v767_v4 = vpop.permute.xlu1 %766  ;;  %vm908_vm1 = vcmp.eq.s32.totalorder %v11652_v36, %v12566_v12  ;;  %vm911_vm5 = vcmp.eq.s32.totalorder %v11657_v41, %v758_v29  ;;  %v15819_v12 = vmov 0 }
 0x133   : > { %15806 = vst [vmem:[#allocation49_spill] sm:$0xff] %v15805_v18  ;;  %v15808_v63 = vsel %vm12664_vm12, 4294967295, %v15807_v63  ;;  %8830 = vmatmul.mubr.msk.bf16.gmra.mrb[68].mxu0 %vm12652_vm9, %v15777_v35  ;;  %8950 = vmatmul.mubr.msk.bf16.gmra.mrb[60].mxu1 %vm12664_vm12, %v15777_v35  ;;  %v764_v44 = vpop.permute.xlu0 %763  ;;  %vm12690_vm10 = vmpackc.low %vm908_vm1, %vm906_vm11  ;;  %vm917_vm11 = vcmp.eq.s32.totalorder %v11657_v41, %v767_v4 }
 0x134   : > { %15809 = vst [vmem:[#allocation50_spill] sm:$0xff] %v15808_v63  ;;  %8832 = vmatprep.mubr.msk.bf16.mxu0 %vm12671_vm0, %v15777_v35  ;;  %v15813_v63 = vmov 0  ;;  %vm12709_vm1 = vmpackc.low %vm913_vm2, %vm911_vm5  ;;  %vm915_vm2 = vcmp.eq.s32.totalorder %v11657_v41, %v764_v44 }
 0x135   : > { %v15814_v63 = vsel %vm12690_vm10, 4294967295, %v15813_v63  ;;  %v15823_v49 = vsel %vm12709_vm1, 4294967295, %v15822_v49 }
 0x136   : > { %v1447_v19 = vpop.permute.xlu1 %1446  ;;  %15815 = vst [vmem:[#allocation52_spill] sm:$0xff] %v15814_v63  ;;  %15824 = vst [vmem:[#allocation55_spill] sm:$0xff] %v15823_v49 }
 0x137   : > { %v1444_v18 = vpop.permute.xlu0 %1443  ;;  %vm1604_vm4 = vcmp.eq.s32.totalorder %v11652_v36, %v1447_v19  ;;  %vm1605_vm3 = vcmp.eq.s32.totalorder %v11657_v41, %v1447_v19 }
 0x138   : > { %vm1602_vm12 = vcmp.eq.s32.totalorder %v11652_v36, %v1444_v18  ;;  %vm1603_vm15 = vcmp.eq.s32.totalorder %v11657_v41, %v1444_v18 }
 0x139   : > { %vm12698_vm0 = vmpackc.low %vm1605_vm3, %vm1603_vm15  ;;  %vm910_vm15 = vcmp.eq.s32.totalorder %v11652_v36, %v758_v29  ;;  %v15831_v29 = vmov 0 }
 0x13a   : > { %v15817_v51 = vsel %vm12698_vm0, 4294967295, %v15816_v51  ;;  %vm12702_vm9 = vmpackc.low %vm1604_vm4, %vm1602_vm12  ;;  %8952 = vmatprep.mubr.msk.bf16.mxu1 %vm12698_vm0, %v15777_v35  ;;  %v773_v19 = vpop.permute.xlu1 %772  ;;  %vm912_vm12 = vcmp.eq.s32.totalorder %v11652_v36, %v761_v27  ;;  %v15828_v27 = vmov 0 }
 0x13b   : > { %15818 = vst [vmem:[#allocation53_spill] sm:$0xff] %v15817_v51  ;;  %v15820_v12 = vsel %vm12702_vm9, 4294967295, %v15819_v12  ;;  %8834 = vmatmul.mubr.msk.bf16.gmra.mrb[72].mxu0 %vm12690_vm10, %v15777_v35  ;;  %8954 = vmatmul.mubr.msk.bf16.gmra.mrb[64].mxu1 %vm12702_vm9, %v15777_v35  ;;  %v770_v18 = vpop.permute.xlu0 %769  ;;  %vm12726_vm5 = vmpackc.low %vm912_vm12, %vm910_vm15  ;;  %vm921_vm15 = vcmp.eq.s32.totalorder %v11657_v41, %v773_v19 }
 0x13c   : > { %15821 = vst [vmem:[#allocation54_spill] sm:$0xff] %v15820_v12  ;;  %8836 = vmatprep.mubr.msk.bf16.mxu0 %vm12709_vm1, %v15777_v35  ;;  %v15826_v26 = vsel %vm12726_vm5, 4294967295, %v15825_v26  ;;  %vm12745_vm12 = vmpackc.low %vm917_vm11, %vm915_vm2  ;;  %v15834_v12 = vmov 0  ;;  %vm919_vm11 = vcmp.eq.s32.totalorder %v11657_v41, %v770_v18 }
 0x13d   : > { %15827 = vst [vmem:[#allocation56_spill] sm:$0xff] %v15826_v26  ;;  %v15835_v12 = vsel %vm12745_vm12, 4294967295, %v15834_v12 }
 0x13e   : > { %v1453_v51 = vpop.permute.xlu1 %1452  ;;  %15836 = vst [vmem:[#allocation59_spill] sm:$0xff] %v15835_v12 }
 0x13f   : > { %v1450_v47 = vpop.permute.xlu0 %1449  ;;  %vm1608_vm4 = vcmp.eq.s32.totalorder %v11652_v36, %v1453_v51  ;;  %vm1609_vm3 = vcmp.eq.s32.totalorder %v11657_v41, %v1453_v51 }
 0x140   : > { %vm1606_vm9 = vcmp.eq.s32.totalorder %v11652_v36, %v1450_v47  ;;  %vm1607_vm0 = vcmp.eq.s32.totalorder %v11657_v41, %v1450_v47 }
 0x141   : > { %vm12734_vm1 = vmpackc.low %vm1609_vm3, %vm1607_vm0  ;;  %vm914_vm0 = vcmp.eq.s32.totalorder %v11652_v36, %v764_v44  ;;  %v15843_v44 = vmov 0 }
 0x142   : > { %v15829_v27 = vsel %vm12734_vm1, 4294967295, %v15828_v27  ;;  %vm12738_vm10 = vmpackc.low %vm1608_vm4, %vm1606_vm9  ;;  %8956 = vmatprep.mubr.msk.bf16.mxu1 %vm12734_vm1, %v15777_v35  ;;  %v779_v51 = vpop.permute.xlu1 %778  ;;  %vm916_vm9 = vcmp.eq.s32.totalorder %v11652_v36, %v767_v4  ;;  %v15840_v4 = vmov 0 }
 0x143   : > { %15830 = vst [vmem:[#allocation57_spill] sm:$0xff] %v15829_v27  ;;  %v15832_v29 = vsel %vm12738_vm10, 4294967295, %v15831_v29  ;;  %8838 = vmatmul.mubr.msk.bf16.gmra.mrb[76].mxu0 %vm12726_vm5, %v15777_v35  ;;  %8958 = vmatmul.mubr.msk.bf16.gmra.mrb[68].mxu1 %vm12738_vm10, %v15777_v35  ;;  %v776_v47 = vpop.permute.xlu0 %775  ;;  %vm12762_vm2 = vmpackc.low %vm916_vm9, %vm914_vm0  ;;  %vm925_vm0 = vcmp.eq.s32.totalorder %v11657_v41, %v779_v51 }
 0x144   : > { %15833 = vst [vmem:[#allocation58_spill] sm:$0xff] %v15832_v29  ;;  %8840 = vmatprep.mubr.msk.bf16.mxu0 %vm12745_vm12, %v15777_v35  ;;  %v15838_v7 = vsel %vm12762_vm2, 4294967295, %v15837_v7  ;;  %vm12781_vm9 = vmpackc.low %vm921_vm15, %vm919_vm11  ;;  %v15846_v29 = vmov 0  ;;  %vm923_vm15 = vcmp.eq.s32.totalorder %v11657_v41, %v776_v47 }
 0x145   : > { %15839 = vst [vmem:[#allocation60_spill] sm:$0xff] %v15838_v7  ;;  %v15847_v29 = vsel %vm12781_vm9, 4294967295, %v15846_v29 }
 0x146   : > { %v1459_v27 = vpop.permute.xlu1 %1458  ;;  %15848 = vst [vmem:[#allocation63_spill] sm:$0xff] %v15847_v29  ;;  %v15942_v29 = vmov 0 }
 0x147   : > { %v1456_v25 = vpop.permute.xlu0 %1455  ;;  %vm1612_vm4 = vcmp.eq.s32.totalorder %v11652_v36, %v1459_v27  ;;  %vm1613_vm3 = vcmp.eq.s32.totalorder %v11657_v41, %v1459_v27 }
 0x148   : > { %vm1610_vm10 = vcmp.eq.s32.totalorder %v11652_v36, %v1456_v25  ;;  %vm1611_vm1 = vcmp.eq.s32.totalorder %v11657_v41, %v1456_v25 }
 0x149   : > { %vm12770_vm12 = vmpackc.low %vm1613_vm3, %vm1611_vm1  ;;  %vm918_vm1 = vcmp.eq.s32.totalorder %v11652_v36, %v770_v18  ;;  %v15855_v18 = vmov 0 }
 0x14a   : > { %v15841_v4 = vsel %vm12770_vm12, 4294967295, %v15840_v4  ;;  %vm12774_vm5 = vmpackc.low %vm1612_vm4, %vm1610_vm10  ;;  %8960 = vmatprep.mubr.msk.bf16.mxu1 %vm12770_vm12, %v15777_v35  ;;  %v785_v27 = vpop.permute.xlu1 %784  ;;  %vm920_vm10 = vcmp.eq.s32.totalorder %v11652_v36, %v773_v19  ;;  %v15852_v19 = vmov 0 }
 0x14b   : > { %15842 = vst [vmem:[#allocation61_spill] sm:$0xff] %v15841_v4  ;;  %v15844_v44 = vsel %vm12774_vm5, 4294967295, %v15843_v44  ;;  %8842 = vmatmul.mubr.msk.bf16.gmra.mrb[80].mxu0 %vm12762_vm2, %v15777_v35  ;;  %8962 = vmatmul.mubr.msk.bf16.gmra.mrb[72].mxu1 %vm12774_vm5, %v15777_v35  ;;  %v782_v25 = vpop.permute.xlu0 %781  ;;  %vm12798_vm11 = vmpackc.low %vm920_vm10, %vm918_vm1  ;;  %vm929_vm1 = vcmp.eq.s32.totalorder %v11657_v41, %v785_v27 }
 0x14c   : > { %15845 = vst [vmem:[#allocation62_spill] sm:$0xff] %v15844_v44  ;;  %8844 = vmatprep.mubr.msk.bf16.mxu0 %vm12781_vm9, %v15777_v35  ;;  %v15850_v56 = vsel %vm12798_vm11, 4294967295, %v15849_v56  ;;  %vm12817_vm10 = vmpackc.low %vm925_vm0, %vm923_vm15  ;;  %v15858_v44 = vmov 0  ;;  %vm927_vm0 = vcmp.eq.s32.totalorder %v11657_v41, %v782_v25 }
 0x14d   : > { %15851 = vst [vmem:[#allocation64_spill] sm:$0xff] %v15850_v56  ;;  %v15859_v44 = vsel %vm12817_vm10, 4294967295, %v15858_v44  ;;  %v15939_v56 = vmov 0 }
 0x14e   : > { %v1465_v4 = vpop.permute.xlu1 %1464  ;;  %15860 = vst [vmem:[#allocation67_spill] sm:$0xff] %v15859_v44 }
 0x14f   : > { %v1462_v6 = vpop.permute.xlu0 %1461  ;;  %vm1616_vm4 = vcmp.eq.s32.totalorder %v11652_v36, %v1465_v4  ;;  %vm1617_vm3 = vcmp.eq.s32.totalorder %v11657_v41, %v1465_v4 }
 0x150   : > { %vm1614_vm5 = vcmp.eq.s32.totalorder %v11652_v36, %v1462_v6  ;;  %vm1615_vm12 = vcmp.eq.s32.totalorder %v11657_v41, %v1462_v6 }
 0x151   : > { %vm12806_vm9 = vmpackc.low %vm1617_vm3, %vm1615_vm12  ;;  %vm922_vm12 = vcmp.eq.s32.totalorder %v11652_v36, %v776_v47  ;;  %v15867_v47 = vmov 0 }
 0x152   : > { %v15853_v19 = vsel %vm12806_vm9, 4294967295, %v15852_v19  ;;  %vm12810_vm2 = vmpackc.low %vm1616_vm4, %vm1614_vm5  ;;  %8964 = vmatprep.mubr.msk.bf16.mxu1 %vm12806_vm9, %v15777_v35  ;;  %v791_v4 = vpop.permute.xlu1 %790  ;;  %vm924_vm5 = vcmp.eq.s32.totalorder %v11652_v36, %v779_v51  ;;  %v15864_v51 = vmov 0 }
 0x153   : > { %15854 = vst [vmem:[#allocation65_spill] sm:$0xff] %v15853_v19  ;;  %v15856_v18 = vsel %vm12810_vm2, 4294967295, %v15855_v18  ;;  %8846 = vmatmul.mubr.msk.bf16.gmra.mrb[84].mxu0 %vm12798_vm11, %v15777_v35  ;;  %8966 = vmatmul.mubr.msk.bf16.gmra.mrb[76].mxu1 %vm12810_vm2, %v15777_v35  ;;  %v788_v6 = vpop.permute.xlu0 %787  ;;  %vm12834_vm15 = vmpackc.low %vm924_vm5, %vm922_vm12  ;;  %vm933_vm12 = vcmp.eq.s32.totalorder %v11657_v41, %v791_v4 }
 0x154   : > { %15857 = vst [vmem:[#allocation66_spill] sm:$0xff] %v15856_v18  ;;  %8848 = vmatprep.mubr.msk.bf16.mxu0 %vm12817_vm10, %v15777_v35  ;;  %v15862_v38 = vsel %vm12834_vm15, 4294967295, %v15861_v38  ;;  %vm12853_vm5 = vmpackc.low %vm929_vm1, %vm927_vm0  ;;  %v15870_v18 = vmov 0  ;;  %vm931_vm1 = vcmp.eq.s32.totalorder %v11657_v41, %v788_v6 }
 0x155   : > { %15863 = vst [vmem:[#allocation68_spill] sm:$0xff] %v15862_v38  ;;  %v15871_v18 = vsel %vm12853_vm5, 4294967295, %v15870_v18 }
 0x156   : > { %v1471_v19 = vpop.permute.xlu1 %1470  ;;  %15872 = vst [vmem:[#allocation71_spill] sm:$0xff] %v15871_v18  ;;  %v15930_v18 = vmov 0 }
 0x157   : > { %v1468_v55 = vpop.permute.xlu0 %1467  ;;  %vm1620_vm4 = vcmp.eq.s32.totalorder %v11652_v36, %v1471_v19  ;;  %vm1621_vm3 = vcmp.eq.s32.totalorder %v11657_v41, %v1471_v19 }
 0x158   : > { %vm1618_vm2 = vcmp.eq.s32.totalorder %v11652_v36, %v1468_v55  ;;  %vm1619_vm9 = vcmp.eq.s32.totalorder %v11657_v41, %v1468_v55 }
 0x159   : > { %vm12842_vm10 = vmpackc.low %vm1621_vm3, %vm1619_vm9  ;;  %vm926_vm9 = vcmp.eq.s32.totalorder %v11652_v36, %v782_v25  ;;  %v15879_v25 = vmov 0 }
 0x15a   : > { %v15865_v51 = vsel %vm12842_vm10, 4294967295, %v15864_v51  ;;  %vm12846_vm11 = vmpackc.low %vm1620_vm4, %vm1618_vm2  ;;  %8968 = vmatprep.mubr.msk.bf16.mxu1 %vm12842_vm10, %v15777_v35  ;;  %v797_v19 = vpop.permute.xlu1 %796  ;;  %vm928_vm2 = vcmp.eq.s32.totalorder %v11652_v36, %v785_v27  ;;  %v15876_v27 = vmov 0 }
 0x15b   : > { %15866 = vst [vmem:[#allocation69_spill] sm:$0xff] %v15865_v51  ;;  %v15868_v47 = vsel %vm12846_vm11, 4294967295, %v15867_v47  ;;  %8850 = vmatmul.mubr.msk.bf16.gmra.mrb[88].mxu0 %vm12834_vm15, %v15777_v35  ;;  %8970 = vmatmul.mubr.msk.bf16.gmra.mrb[80].mxu1 %vm12846_vm11, %v15777_v35  ;;  %v794_v55 = vpop.permute.xlu0 %793  ;;  %vm12870_vm0 = vmpackc.low %vm928_vm2, %vm926_vm9  ;;  %vm937_vm9 = vcmp.eq.s32.totalorder %v11657_v41, %v797_v19 }
 0x15c   : > { %15869 = vst [vmem:[#allocation70_spill] sm:$0xff] %v15868_v47  ;;  %8852 = vmatprep.mubr.msk.bf16.mxu0 %vm12853_vm5, %v15777_v35  ;;  %v15874_v24 = vsel %vm12870_vm0, 4294967295, %v15873_v24  ;;  %vm12889_vm2 = vmpackc.low %vm933_vm12, %vm931_vm1  ;;  %v15882_v47 = vmov 0  ;;  %vm935_vm12 = vcmp.eq.s32.totalorder %v11657_v41, %v794_v55 }
 0x15d   : > { %15875 = vst [vmem:[#allocation72_spill] sm:$0xff] %v15874_v24  ;;  %v15883_v47 = vsel %vm12889_vm2, 4294967295, %v15882_v47  ;;  %v15927_v24 = vmov 0 }
 0x15e   : > { %v1477_v51 = vpop.permute.xlu1 %1476  ;;  %15884 = vst [vmem:[#allocation75_spill] sm:$0xff] %v15883_v47  ;;  %v15921_v47 = vmov 0 }
 0x15f   : > { %v1474_v37 = vpop.permute.xlu0 %1473  ;;  %vm1624_vm4 = vcmp.eq.s32.totalorder %v11652_v36, %v1477_v51  ;;  %vm1625_vm3 = vcmp.eq.s32.totalorder %v11657_v41, %v1477_v51 }
 0x160   : > { %vm1622_vm11 = vcmp.eq.s32.totalorder %v11652_v36, %v1474_v37  ;;  %vm1623_vm10 = vcmp.eq.s32.totalorder %v11657_v41, %v1474_v37 }
 0x161   : > { %vm12878_vm5 = vmpackc.low %vm1625_vm3, %vm1623_vm10  ;;  %vm930_vm10 = vcmp.eq.s32.totalorder %v11652_v36, %v788_v6  ;;  %v15891_v6 = vmov 0 }
 0x162   : > { %v15877_v27 = vsel %vm12878_vm5, 4294967295, %v15876_v27  ;;  %vm12882_vm15 = vmpackc.low %vm1624_vm4, %vm1622_vm11  ;;  %8972 = vmatprep.mubr.msk.bf16.mxu1 %vm12878_vm5, %v15777_v35  ;;  %v803_v51 = vpop.permute.xlu1 %802  ;;  %vm932_vm11 = vcmp.eq.s32.totalorder %v11652_v36, %v791_v4  ;;  %v15888_v4 = vmov 0 }
 0x163   : > { %15878 = vst [vmem:[#allocation73_spill] sm:$0xff] %v15877_v27  ;;  %v15880_v25 = vsel %vm12882_vm15, 4294967295, %v15879_v25  ;;  %8854 = vmatmul.mubr.msk.bf16.gmra.mrb[92].mxu0 %vm12870_vm0, %v15777_v35  ;;  %8974 = vmatmul.mubr.msk.bf16.gmra.mrb[84].mxu1 %vm12882_vm15, %v15777_v35  ;;  %v800_v37 = vpop.permute.xlu0 %799  ;;  %vm12906_vm1 = vmpackc.low %vm932_vm11, %vm930_vm10  ;;  %vm941_vm10 = vcmp.eq.s32.totalorder %v11657_v41, %v803_v51 }
 0x164   : > { %15881 = vst [vmem:[#allocation74_spill] sm:$0xff] %v15880_v25  ;;  %8856 = vmatprep.mubr.msk.bf16.mxu0 %vm12889_vm2, %v15777_v35  ;;  %v15886_v11 = vsel %vm12906_vm1, 4294967295, %v15885_v11  ;;  %vm12925_vm11 = vmpackc.low %vm937_vm9, %vm935_vm12  ;;  %v15894_v25 = vmov 0  ;;  %vm939_vm9 = vcmp.eq.s32.totalorder %v11657_v41, %v800_v37 }
 0x165   : > { %15887 = vst [vmem:[#allocation76_spill] sm:$0xff] %v15886_v11  ;;  %v15895_v25 = vsel %vm12925_vm11, 4294967295, %v15894_v25  ;;  %v15897_v11 = vmov 0 }
 0x166   : > { %v1483_v27 = vpop.permute.xlu1 %1482  ;;  %15896 = vst [vmem:[#allocation79_spill] sm:$0xff] %v15895_v25  ;;  %v15909_v25 = vmov 0 }
 0x167   : > { %v1480_v23 = vpop.permute.xlu0 %1479  ;;  %vm1628_vm4 = vcmp.eq.s32.totalorder %v11652_v36, %v1483_v27  ;;  %vm1629_vm3 = vcmp.eq.s32.totalorder %v11657_v41, %v1483_v27 }
 0x168   : > { %vm1626_vm15 = vcmp.eq.s32.totalorder %v11652_v36, %v1480_v23  ;;  %vm1627_vm5 = vcmp.eq.s32.totalorder %v11657_v41, %v1480_v23 }
 0x169   : > { %vm12914_vm2 = vmpackc.low %vm1629_vm3, %vm1627_vm5  ;;  %vm934_vm5 = vcmp.eq.s32.totalorder %v11652_v36, %v794_v55  ;;  %v15903_v55 = vmov 0 }
 0x16a   : > { %v15889_v4 = vsel %vm12914_vm2, 4294967295, %v15888_v4  ;;  %vm12918_vm0 = vmpackc.low %vm1628_vm4, %vm1626_vm15  ;;  %8976 = vmatprep.mubr.msk.bf16.mxu1 %vm12914_vm2, %v15777_v35  ;;  %v809_v27 = vpop.permute.xlu1 %808  ;;  %vm936_vm15 = vcmp.eq.s32.totalorder %v11652_v36, %v797_v19  ;;  %v15900_v19 = vmov 0 }
 0x16b   : > { %15890 = vst [vmem:[#allocation77_spill] sm:$0xff] %v15889_v4  ;;  %v15892_v6 = vsel %vm12918_vm0, 4294967295, %v15891_v6  ;;  %8858 = vmatmul.mubr.msk.bf16.gmra.mrb[96].mxu0 %vm12906_vm1, %v15777_v35  ;;  %8978 = vmatmul.mubr.msk.bf16.gmra.mrb[88].mxu1 %vm12918_vm0, %v15777_v35  ;;  %v806_v23 = vpop.permute.xlu0 %805  ;;  %vm12942_vm12 = vmpackc.low %vm936_vm15, %vm934_vm5  ;;  %vm945_vm5 = vcmp.eq.s32.totalorder %v11657_v41, %v809_v27 }
 0x16c   : > { %15893 = vst [vmem:[#allocation78_spill] sm:$0xff] %v15892_v6  ;;  %8860 = vmatprep.mubr.msk.bf16.mxu0 %vm12925_vm11, %v15777_v35  ;;  %v15898_v11 = vsel %vm12942_vm12, 4294967295, %v15897_v11  ;;  %vm12961_vm15 = vmpackc.low %vm941_vm10, %vm939_vm9  ;;  %v15906_v6 = vmov 0  ;;  %vm943_vm10 = vcmp.eq.s32.totalorder %v11657_v41, %v806_v23 }
 0x16d   : > { %15899 = vst [vmem:[#allocation80_spill] sm:$0xff] %v15898_v11  ;;  %v15907_v6 = vsel %vm12961_vm15, 4294967295, %v15906_v6 }
 0x16e   : > { %v1489_v4 = vpop.permute.xlu1 %1488  ;;  %15908 = vst [vmem:[#allocation83_spill] sm:$0xff] %v15907_v6 }
 0x16f   : > { %v1486_v9 = vpop.permute.xlu0 %1485  ;;  %vm1632_vm4 = vcmp.eq.s32.totalorder %v11652_v36, %v1489_v4  ;;  %vm1633_vm3 = vcmp.eq.s32.totalorder %v11657_v41, %v1489_v4 }
 0x170   : > { %vm1630_vm0 = vcmp.eq.s32.totalorder %v11652_v36, %v1486_v9  ;;  %vm1631_vm2 = vcmp.eq.s32.totalorder %v11657_v41, %v1486_v9 }
 0x171   : > { %vm12950_vm11 = vmpackc.low %vm1633_vm3, %vm1631_vm2  ;;  %vm938_vm2 = vcmp.eq.s32.totalorder %v11652_v36, %v800_v37  ;;  %v15915_v37 = vmov 0 }
 0x172   : > { %v15901_v19 = vsel %vm12950_vm11, 4294967295, %v15900_v19  ;;  %vm12954_vm1 = vmpackc.low %vm1632_vm4, %vm1630_vm0  ;;  %8980 = vmatprep.mubr.msk.bf16.mxu1 %vm12950_vm11, %v15777_v35  ;;  %v815_v4 = vpop.permute.xlu1 %814  ;;  %vm940_vm0 = vcmp.eq.s32.totalorder %v11652_v36, %v803_v51  ;;  %v15912_v51 = vmov 0 }
 0x173   : > { %15902 = vst [vmem:[#allocation81_spill] sm:$0xff] %v15901_v19  ;;  %v15904_v55 = vsel %vm12954_vm1, 4294967295, %v15903_v55  ;;  %8862 = vmatmul.mubr.msk.bf16.gmra.mrb[100].mxu0 %vm12942_vm12, %v15777_v35  ;;  %8982 = vmatmul.mubr.msk.bf16.gmra.mrb[92].mxu1 %vm12954_vm1, %v15777_v35  ;;  %v812_v9 = vpop.permute.xlu0 %811  ;;  %vm12978_vm9 = vmpackc.low %vm940_vm0, %vm938_vm2  ;;  %vm949_vm2 = vcmp.eq.s32.totalorder %v11657_v41, %v815_v4 }
 0x174   : > { %15905 = vst [vmem:[#allocation82_spill] sm:$0xff] %v15904_v55  ;;  %8864 = vmatprep.mubr.msk.bf16.mxu0 %vm12961_vm15, %v15777_v35  ;;  %v15910_v25 = vsel %vm12978_vm9, 4294967295, %v15909_v25  ;;  %vm12997_vm0 = vmpackc.low %vm945_vm5, %vm943_vm10  ;;  %v15918_v55 = vmov 0  ;;  %vm947_vm5 = vcmp.eq.s32.totalorder %v11657_v41, %v812_v9 }
 0x175   : > { %15911 = vst [vmem:[#allocation84_spill] sm:$0xff] %v15910_v25  ;;  %v15919_v55 = vsel %vm12997_vm0, 4294967295, %v15918_v55 }
 0x176   : > { %v1495_v19 = vpop.permute.xlu1 %1494  ;;  %15920 = vst [vmem:[#allocation87_spill] sm:$0xff] %v15919_v55 }
 0x177   : > { %v1492_v11 = vpop.permute.xlu0 %1491  ;;  %vm1636_vm4 = vcmp.eq.s32.totalorder %v11652_v36, %v1495_v19  ;;  %vm1637_vm3 = vcmp.eq.s32.totalorder %v11657_v41, %v1495_v19 }
 0x178   : > { %vm1634_vm1 = vcmp.eq.s32.totalorder %v11652_v36, %v1492_v11  ;;  %vm1635_vm11 = vcmp.eq.s32.totalorder %v11657_v41, %v1492_v11 }
 0x179   : > { %vm12986_vm15 = vmpackc.low %vm1637_vm3, %vm1635_vm11  ;;  %vm942_vm11 = vcmp.eq.s32.totalorder %v11652_v36, %v806_v23 }
 0x17a   : > { %v15913_v51 = vsel %vm12986_vm15, 4294967295, %v15912_v51  ;;  %vm12990_vm12 = vmpackc.low %vm1636_vm4, %vm1634_vm1  ;;  %8984 = vmatprep.mubr.msk.bf16.mxu1 %vm12986_vm15, %v15777_v35  ;;  %v13001_v19 = vpop.permute.xlu1 %820  ;;  %vm944_vm1 = vcmp.eq.s32.totalorder %v11652_v36, %v809_v27  ;;  %v15924_v27 = vmov 0 }
 0x17b   : > { %15914 = vst [vmem:[#allocation85_spill] sm:$0xff] %v15913_v51  ;;  %v15916_v37 = vsel %vm12990_vm12, 4294967295, %v15915_v37  ;;  %8866 = vmatmul.mubr.msk.bf16.gmra.mrb[104].mxu0 %vm12978_vm9, %v15777_v35  ;;  %8986 = vmatmul.mubr.msk.bf16.gmra.mrb[96].mxu1 %vm12990_vm12, %v15777_v35  ;;  %v818_v11 = vpop.permute.xlu0 %817  ;;  %vm13016_vm10 = vmpackc.low %vm944_vm1, %vm942_vm11  ;;  %vm953_vm11 = vcmp.eq.s32.totalorder %v11657_v41, %v13001_v19 }
 0x17c   : > { %15917 = vst [vmem:[#allocation86_spill] sm:$0xff] %v15916_v37  ;;  %8868 = vmatprep.mubr.msk.bf16.mxu0 %vm12997_vm0, %v15777_v35  ;;  %v15922_v47 = vsel %vm13016_vm10, 4294967295, %v15921_v47  ;;  %vm13022_vm12 = vmpackc.low %vm949_vm2, %vm947_vm5  ;;  %vm951_vm2 = vcmp.eq.s32.totalorder %v11657_v41, %v818_v11 }
 0x17d   : > { %15923 = vst [vmem:[#allocation88_spill] sm:$0xff] %v15922_v47  ;;  %v15925_v27 = vsel %vm13022_vm12, 4294967295, %v15924_v27 }
 0x17e   : > { %v2212_v51 = vpop.f32.mrb[0].mxu0  ;;  %v1501_v25 = vpop.permute.xlu1 %1500  ;;  %15926 = vst [vmem:[#allocation89_spill] sm:$0xff] %v15925_v27 }
 0x17f   : > { %v2214_v6 = vpop.f32.mrb[1].mxu0  ;;  %vm1640_vm4 = vcmp.eq.s32.totalorder %v11652_v36, %v1501_v25  ;;  %vm1641_vm3 = vcmp.eq.s32.totalorder %v11657_v41, %v1501_v25  ;;  %v1498_v37 = vpop.permute.xlu0 %1497 }
 0x180   : > { %v2216_v55 = vpop.f32.mrb[2].mxu0  ;;  %vm1638_vm15 = vcmp.eq.s32.totalorder %v11652_v36, %v1498_v37  ;;  %vm1639_vm0 = vcmp.eq.s32.totalorder %v11657_v41, %v1498_v37 }
 0x181   : > { %v2218_v23 = vpop.f32.mrb[3].mxu0  ;;  %vm13028_vm9 = vmpackc.low %vm1641_vm3, %vm1639_vm0  ;;  %vm946_vm0 = vcmp.eq.s32.totalorder %v11652_v36, %v812_v9  ;;  %v15936_v9 = vmov 0 }
 0x182   : > { %v15928_v24 = vsel %vm13028_vm9, 4294967295, %v15927_v24  ;;  %vm13032_vm1 = vmpackc.low %vm1640_vm4, %vm1638_vm15  ;;  %8988 = vmatprep.mubr.msk.bf16.mxu1 %vm13028_vm9, %v15777_v35  ;;  %v13039_v25 = vpop.permute.xlu1 %826  ;;  %vm948_vm15 = vcmp.eq.s32.totalorder %v11652_v36, %v815_v4 }
 0x183   : > { %15929 = vst [vmem:[#allocation90_spill] sm:$0xff] %v15928_v24  ;;  %v15931_v18 = vsel %vm13032_vm1, 4294967295, %v15930_v18  ;;  %8870 = vmatmul.mubr.msk.bf16.gmra.mrb[108].mxu0 %vm13016_vm10, %v15777_v35  ;;  %8990 = vmatmul.mubr.msk.bf16.gmra.mrb[100].mxu1 %vm13032_vm1, %v15777_v35  ;;  %v13047_v37 = vpop.permute.xlu0 %823  ;;  %vm13059_vm5 = vmpackc.low %vm948_vm15, %vm946_vm0 }
 0x184   : > { %15932 = vst [vmem:[#allocation91_spill] sm:$0xff] %v15931_v18  ;;  %8872 = vmatprep.mubr.msk.bf16.mxu0 %vm13022_vm12, %v15777_v35  ;;  %v15933_v18 = vmov 0  ;;  %vm13067_vm1 = vmpackc.low %vm953_vm11, %vm951_vm2  ;;  %vm957_vm11 = vcmp.eq.s32.totalorder %v11657_v41, %v13039_v25  ;;  %vm955_vm2 = vcmp.eq.s32.totalorder %v11657_v41, %v13047_v37 }
 0x185   : > { %v15934_v18 = vsel %vm13059_vm5, 4294967295, %v15933_v18  ;;  %v15937_v9 = vsel %vm13067_vm1, 4294967295, %v15936_v9 }
 0x186   : > { %v2222_v24 = vpop.f32.mrb[4].mxu0  ;;  %v1507_v47 = vpop.permute.xlu1 %1506  ;;  %15935 = vst [vmem:[#allocation92_spill] sm:$0xff] %v15934_v18  ;;  %15938 = vst [vmem:[#allocation93_spill] sm:$0xff] %v15937_v9 }
 0x187   : > { %v13057_v38 = vpop.f32.mrb[5].mxu0  ;;  %vm1644_vm4 = vcmp.eq.s32.totalorder %v11652_v36, %v1507_v47  ;;  %vm1645_vm3 = vcmp.eq.s32.totalorder %v11657_v41, %v1507_v47  ;;  %v1504_v4 = vpop.permute.xlu0 %1503 }
 0x188   : > { %v13065_v27 = vpop.f32.mrb[6].mxu0  ;;  %vm1642_vm9 = vcmp.eq.s32.totalorder %v11652_v36, %v1504_v4  ;;  %vm1643_vm12 = vcmp.eq.s32.totalorder %v11657_v41, %v1504_v4 }
 0x189   : > { %v13073_v44 = vpop.f32.mrb[7].mxu0  ;;  %vm13075_vm15 = vmpackc.low %vm1645_vm3, %vm1643_vm12  ;;  %vm952_vm12 = vcmp.eq.s32.totalorder %v11652_v36, %v13001_v19  ;;  %v15945_v19 = vmov 0 }
 0x18a   : > { %v15940_v56 = vsel %vm13075_vm15, 4294967295, %v15939_v56  ;;  %vm13079_vm0 = vmpackc.low %vm1644_vm4, %vm1642_vm9  ;;  %8992 = vmatprep.mubr.msk.bf16.mxu1 %vm13075_vm15, %v15777_v35  ;;  %v13086_v47 = vpop.permute.xlu1 %832  ;;  %vm950_vm9 = vcmp.eq.s32.totalorder %v11652_v36, %v818_v11 }
 0x18b   : > { %15941 = vst [vmem:[#allocation94_spill] sm:$0xff] %v15940_v56  ;;  %v15943_v29 = vsel %vm13079_vm0, 4294967295, %v15942_v29  ;;  %8874 = vmatmul.mubr.msk.bf16.gmra.mrb[112].mxu0 %vm13059_vm5, %v15777_v35  ;;  %8994 = vmatmul.mubr.msk.bf16.gmra.mrb[104].mxu1 %vm13079_vm0, %v15777_v35  ;;  %v13094_v4 = vpop.permute.xlu0 %829  ;;  %vm13114_vm4 = vmpackc.low %vm952_vm12, %vm950_vm9 }
 0x18c   : > { %15944 = vst [vmem:[#allocation95_spill] sm:$0xff] %v15943_v29  ;;  %8876 = vmatprep.mubr.msk.bf16.mxu0 %vm13067_vm1, %v15777_v35  ;;  %v15946_v19 = vsel %vm13114_vm4, 4294967295, %v15945_v19  ;;  %vm13122_vm15 = vmpackc.low %vm957_vm11, %vm955_vm2  ;;  %vm954_vm11 = vcmp.eq.s32.totalorder %v11652_v36, %v13047_v37 }
 0x18d   : > { %v2565_v56 = vpop.f32.mrb[0].mxu1  ;;  %15947 = vst [vmem:[#allocation96_spill] sm:$0xff] %v15946_v19 }
 0x18e   : > { %v13106_v29 = vpop.f32.mrb[8].mxu0  ;;  %v13108_v18 = vmul.f32 %v2565_v56, %v2212_v51  ;;  %v2567_v7 = vpop.f32.mrb[1].mxu1  ;;  %v15948_v56 = vmov 0  ;;  %v15951_v51 = vmov 0 }
 0x18f   : > { %v1513_v12 = vpop.permute.xlu1 %1512  ;;  %v13110_v9 = vpop.f32.mrb[9].mxu0  ;;  %v13112_v26 = vmul.f32 %v2567_v7, %v2214_v6  ;;  %v15949_v56 = vsel %vm13122_vm15, 4294967295, %v15948_v56 }
 0x190   : > { %vm1648_vm3 = vcmp.eq.s32.totalorder %v11652_v36, %v1513_v12  ;;  %vm1649_vm0 = vcmp.eq.s32.totalorder %v11657_v41, %v1513_v12  ;;  %v1510_v11 = vpop.permute.xlu0 %1509  ;;  %v13120_v49 = vpop.f32.mrb[10].mxu0  ;;  %15950 = vst [vmem:[#allocation97_spill] sm:$0xff] %v15949_v56 }
 0x191   : > { %vm1646_vm1 = vcmp.eq.s32.totalorder %v11652_v36, %v1510_v11  ;;  %vm1647_vm5 = vcmp.eq.s32.totalorder %v11657_v41, %v1510_v11  ;;  %v2569_v7 = vpop.f32.mrb[2].mxu1  ;;  %v13128_v6 = vpop.f32.mrb[11].mxu0 }
 0x192   : > { %vm13130_vm12 = vmpackc.low %vm1649_vm0, %vm1647_vm5  ;;  %v13134_v63 = vmul.f32 %v2569_v7, %v2216_v55  ;;  %v2571_v12 = vpop.f32.mrb[3].mxu1  ;;  %vm956_vm0 = vcmp.eq.s32.totalorder %v11652_v36, %v13039_v25  ;;  %v15957_v55 = vmov 0 }
 0x193   : > { %v15952_v51 = vsel %vm13130_vm12, 4294967295, %v15951_v51  ;;  %vm13136_vm9 = vmpackc.low %vm1648_vm3, %vm1646_vm1  ;;  %v13140_v40 = vmul.f32 %v2571_v12, %v2218_v23  ;;  %8996 = vmatprep.mubr.msk.bf16.mxu1 %vm13130_vm12, %v15777_v35  ;;  %v1519_v11 = vpop.permute.xlu1 %1518  ;;  %8878 = vmatmul.mubr.msk.bf16.gmra.mrb[116].mxu0 %vm13114_vm4, %v15777_v35 }
 0x194   : > { %15953 = vst [vmem:[#allocation98_spill] sm:$0xff] %v15952_v51  ;;  %v15955_v31 = vsel %vm13136_vm9, 4294967295, %v15954_v31  ;;  %vm1653_vm5 = vcmp.eq.s32.totalorder %v11657_v41, %v1519_v11  ;;  %8998 = vmatmul.mubr.msk.bf16.gmra.mrb[108].mxu1 %vm13136_vm9, %v15777_v35  ;;  %v1516_v23 = vpop.permute.xlu0 %1515  ;;  %8880 = vmatprep.mubr.msk.bf16.mxu0 %vm13122_vm15, %v15777_v35  ;;  %vm959_vm9 = vcmp.eq.s32.totalorder %v11657_v41, %v13094_v4  ;;  %vm13190_vm3 = vmpackc.low %vm956_vm0, %vm954_vm11 }
 0x195   : > { %15956 = vst [vmem:[#allocation99_spill] sm:$0xff] %v15955_v31  ;;  %vm1651_vm1 = vcmp.eq.s32.totalorder %v11657_v41, %v1516_v23  ;;  %v2575_v7 = vpop.f32.mrb[4].mxu1  ;;  %v3013_v12 = vpack.c.bf16 %v13140_v40, %v13112_v26  ;;  %vm15963_vm15 = vcmp.eq.s32.totalorder %v11657_v41, %v13086_v47 }
 0x196   : > { %vm13164_vm2 = vmpackc.low %vm1653_vm5, %vm1651_vm1  ;;  %v13168_v31 = vpop.f32.mrb[12].mxu0  ;;  %v13170_v51 = vmul.f32 %v2575_v7, %v2222_v24  ;;  %v2577_v56 = vpop.f32.mrb[5].mxu1  ;;  %vm1652_vm5 = vcmp.eq.s32.totalorder %v11652_v36, %v1519_v11  ;;  %vm1650_vm1 = vcmp.eq.s32.totalorder %v11652_v36, %v1516_v23  ;;  %v15964_v11 = vmov 0 }
 0x197   : > { %v15958_v55 = vsel %vm13164_vm2, 4294967295, %v15957_v55  ;;  %9000 = vmatprep.mubr.msk.bf16.mxu1 %vm13164_vm2, %v15777_v35  ;;  %v1525_v26 = vpop.permute.xlu1 %1524  ;;  %v2244_v40 = vpop.f32.mrb[13].mxu0  ;;  %v13180_v19 = vmul.f32 %v2577_v56, %v13057_v38  ;;  %vm13199_vm4 = vmpackc.low %vm15963_vm15, %vm959_vm9  ;;  %v15967_v23 = vmov 0  ;;  %vm960_vm15 = vcmp.eq.s32.totalorder %v11652_v36, %v13086_v47 }
 0x198   : > { %15959 = vst [vmem:[#allocation100_spill] sm:$0xff] %v15958_v55  ;;  %v1522_v24 = vpop.permute.xlu0 %1521  ;;  %v2246_v7 = vpop.f32.mrb[14].mxu0  ;;  %v15960_v55 = vmov 0  ;;  %vm1657_vm2 = vcmp.eq.s32.totalorder %v11657_v41, %v1525_v26  ;;  %v15965_v11 = vsel %vm13199_vm4, 4294967295, %v15964_v11  ;;  %vm13206_vm0 = vmpackc.low %vm1652_vm5, %vm1650_vm1  ;;  %vm1656_vm9 = vcmp.eq.s32.totalorder %v11652_v36, %v1525_v26 }
 0x199   : > { %v15961_v55 = vsel %vm13190_vm3, 4294967295, %v15960_v55  ;;  %vm1655_vm12 = vcmp.eq.s32.totalorder %v11657_v41, %v1522_v24  ;;  %v2579_v38 = vpop.f32.mrb[6].mxu1  ;;  %v2248_v56 = vpop.f32.mrb[15].mxu0  ;;  %15966 = vst [vmem:[#allocation102_spill] sm:$0xff] %v15965_v11  ;;  %v15968_v23 = vsel %vm13206_vm0, 4294967295, %v15967_v23  ;;  %v15973_v47 = vmov 0 }
 0x19a   : > { %15962 = vst [vmem:[#allocation101_spill] sm:$0xff] %v15961_v55  ;;  %v13204_v37 = vmul.f32 %v2579_v38, %v13065_v27  ;;  %v2581_v25 = vpop.f32.mrb[7].mxu1  ;;  %15969 = vst [vmem:[#allocation103_spill] sm:$0xff] %v15968_v23 }
 0x19b   : > { %v2891_v8 = vmul.f32 %v2581_v25, %v13073_v44  ;;  %8882 = vmatmul.mubr.msk.bf16.gmra.mrb[120].mxu0 %vm13190_vm3, %v15777_v35  ;;  %vm13214_vm11 = vmpackc.low %vm1657_vm2, %vm1655_vm12  ;;  %v1531_v1 = vpop.permute.xlu1 %1530  ;;  %vm958_vm12 = vcmp.eq.s32.totalorder %v11652_v36, %v13094_v4  ;;  %vm1654_vm2 = vcmp.eq.s32.totalorder %v11652_v36, %v1522_v24  ;;  %v15979_v24 = vmov 0 }
 0x19c   : > { %v15971_v10 = vsel %vm13214_vm11, 4294967295, %v15970_v10  ;;  %9002 = vmatmul.mubr.msk.bf16.gmra.mrb[112].mxu1 %vm13206_vm0, %v15777_v35  ;;  %8884 = vmatprep.mubr.msk.bf16.mxu0 %vm13199_vm4, %v15777_v35  ;;  %v1528_v27 = vpop.permute.xlu0 %1527  ;;  %vm1661_vm5 = vcmp.eq.s32.totalorder %v11657_v41, %v1531_v1  ;;  %vm13251_vm0 = vmpackc.low %vm1656_vm9, %vm1654_vm2 }
 0x19d   : > { %15972 = vst [vmem:[#allocation104_spill] sm:$0xff] %v15971_v10  ;;  %9004 = vmatprep.mubr.msk.bf16.mxu1 %vm13214_vm11, %v15777_v35  ;;  %v2585_v38 = vpop.f32.mrb[8].mxu1  ;;  %v3015_v25 = vpack.c.bf16 %v2891_v8, %v13180_v19  ;;  %vm1659_vm1 = vcmp.eq.s32.totalorder %v11657_v41, %v1528_v27  ;;  %vm13244_vm11 = vmpackc.low %vm960_vm15, %vm958_vm12  ;;  %vm1660_vm15 = vcmp.eq.s32.totalorder %v11652_v36, %v1531_v1 }
 0x19e   : > { %v2252_v55 = vpop.f32.mrb[16].mxu0  ;;  %v13231_v42 = vmul.f32 %v2585_v38, %v13106_v29  ;;  %v2587_v23 = vpop.f32.mrb[9].mxu1  ;;  %v15974_v47 = vsel %vm13244_vm11, 4294967295, %v15973_v47  ;;  %vm13259_vm4 = vmpackc.low %vm1661_vm5, %vm1659_vm1  ;;  %vm1658_vm12 = vcmp.eq.s32.totalorder %v11652_v36, %v1528_v27  ;;  %v15984_v1 = vpack.c.bf16 %v13134_v63, %v13108_v18  ;;  %v11244_v63 = vld [vmem:[%s15349_s3] sm:$0xff]  }
 0x19f   : > { %v2254_v44 = vpop.f32.mrb[17].mxu0  ;;  %v13238_v11 = vmul.f32 %v2587_v23, %v13110_v9  ;;  %v2589_v29 = vpop.f32.mrb[10].mxu1  ;;  %15975 = vst [vmem:[#allocation105_spill] sm:$0xff] %v15974_v47  ;;  %v15976_v23 = vmov 0  ;;  %v15980_v24 = vsel %vm13259_vm4, 4294967295, %v15979_v24  ;;  %vm13285_vm5 = vmpackc.low %vm1660_vm15, %vm1658_vm12 }
 0x1a0   : > { %v2256_v8 = vpop.f32.mrb[18].mxu0  ;;  %v13249_v4 = vmul.f32 %v2589_v29, %v13120_v49  ;;  %v2591_v9 = vpop.f32.mrb[11].mxu1  ;;  %v15977_v23 = vsel %vm13251_vm0, 4294967295, %v15976_v23  ;;  %15981 = vst [vmem:[#allocation107_spill] sm:$0xff] %v15980_v24 }
 0x1a1   : > { %v2258_v19 = vpop.f32.mrb[19].mxu0  ;;  %15978 = vst [vmem:[#allocation106_spill] sm:$0xff] %v15977_v23  ;;  %v2895_v26 = vmul.f32 %v2591_v9, %v13128_v6  ;;  %v1537_v38 = vpop.permute.xlu1 %1536 }
 0x1a2   : > { %v1534_v29 = vpop.permute.xlu0 %1533  ;;  %vm1665_vm9 = vcmp.eq.s32.totalorder %v11657_v41, %v1537_v38  ;;  %vm1664_vm15 = vcmp.eq.s32.totalorder %v11652_v36, %v1537_v38 }
 0x1a3   : > { %8886 = vmatmul.mubr.msk.bf16.gmra.mrb[124].mxu0 %vm13244_vm11, %v15777_v35  ;;  %v3017_v9 = vpack.c.bf16 %v2895_v26, %v13238_v11  ;;  %vm1663_vm2 = vcmp.eq.s32.totalorder %v11657_v41, %v1534_v29  ;;  %vm1662_vm12 = vcmp.eq.s32.totalorder %v11652_v36, %v1534_v29  ;;  %v15989_v36 = vpack.c.bf16 %v13204_v37, %v13170_v51  ;;  %v11246_v29 = vld [vmem:[%s15349_s3 + $0x10] sm:$0xff]  }
 0x1a4   : > { %9006 = vmatmul.mubr.msk.bf16.gmra.mrb[116].mxu1 %vm13251_vm0, %v15777_v35  ;;  %3236 = vmatprep.mubr.bf16.mxu0 %v3013_v12  ;;  %vm13293_vm1 = vmpackc.low %vm1665_vm9, %vm1663_vm2  ;;  %vm15996_vm2 = vnez %v15643_v45 }
 0x1a5   : > { %9008 = vmatprep.mubr.msk.bf16.mxu1 %vm13259_vm4, %v15777_v35  ;;  %v2595_v6 = vpop.f32.mrb[12].mxu1  ;;  %vm13321_vm9 = vmpackc.low %vm1664_vm15, %vm1662_vm12  ;;  %vm15997_vm15 = vnez %v15653_v60  ;;  %vm15998_vm12 = vnez %v15656_v62 }
 0x1a6   : > { %v2262_v10 = vpop.f32.mrb[20].mxu0  ;;  %v13273_v47 = vmul.f32 %v2595_v6, %v13168_v31  ;;  %v2597_v50 = vpop.f32.mrb[13].mxu1 }
 0x1a7   : > { %v2264_v2 = vpop.f32.mrb[21].mxu0  ;;  %v13275_v23 = vmul.f32 %v2597_v50, %v2244_v40  ;;  %v2599_v12 = vpop.f32.mrb[14].mxu1 }
 0x1a8   : > { %v2266_v49 = vpop.f32.mrb[22].mxu0  ;;  %v13279_v59 = vmul.f32 %v2599_v12, %v2246_v7  ;;  %v2601_v24 = vpop.f32.mrb[15].mxu1 }
 0x1a9   : > { %v2268_v11 = vpop.f32.mrb[23].mxu0  ;;  %v2899_v31 = vmul.f32 %v2601_v24, %v2248_v56 }
 0x1aa   : > { %v3018_v26 = vpack.c.bf16 %v13279_v59, %v13273_v47 }
 0x1ab   : > { %3237 = vmatmul.mubr.bf16.vlgmr.msra.gmra.mrb[128].mxu0 %v15984_v1  ;;  %v3019_v40 = vpack.c.bf16 %v2899_v31, %v13275_v23 }
 0x1ac   : > { %9010 = vmatmul.mubr.msk.bf16.gmra.mrb[120].mxu1 %vm13285_vm5, %v15777_v35  ;;  %3244 = vmatprep.mubr.bf16.mxu0 %v3015_v25 }
 0x1ad   : > { %9012 = vmatprep.mubr.msk.bf16.mxu1 %vm13293_vm1, %v15777_v35  ;;  %v2605_v41 = vpop.f32.mrb[16].mxu1  ;;  %3783 = vmatpush1.bf16.msra.mxu0 %v11244_v63 }
 0x1ae   : > { %v2272_v18 = vpop.f32.mrb[24].mxu0  ;;  %v13306_v56 = vmul.f32 %v2605_v41, %v2252_v55  ;;  %v2607_v27 = vpop.f32.mrb[17].mxu1  ;;  %3784 = vmatprep.subr.bf16.mxu0 %v15753_v5  ;;  %v11245_v55 = vld [vmem:[%s15349_s3 + $0x8] sm:$0xff]  }
 0x1af   : > { %v2274_v23 = vpop.f32.mrb[25].mxu0  ;;  %v13309_v24 = vmul.f32 %v2607_v27, %v2254_v44  ;;  %v2609_v25 = vpop.f32.mrb[18].mxu1 }
 0x1b0   : > { %v2276_v6 = vpop.f32.mrb[26].mxu0  ;;  %v13313_v12 = vmul.f32 %v2609_v25, %v2256_v8  ;;  %v2611_v31 = vpop.f32.mrb[19].mxu1 }
 0x1b1   : > { %v2278_v1 = vpop.f32.mrb[27].mxu0  ;;  %v2903_v63 = vmul.f32 %v2611_v31, %v2258_v19  ;;  %3785 = vmatpush1.bf16.msra.mxu0 %v11245_v55 }
 0x1b2   : > { %v3020_v44 = vpack.c.bf16 %v13313_v12, %v13306_v56  ;;  %3786 = vmatprep.subr.bf16.mxu0 %v15753_v5 }
 0x1b3   : > { %3245 = vmatmul.mubr.bf16.gmra.mrb[132].mxu0 %v15989_v36  ;;  %v3021_v8 = vpack.c.bf16 %v2903_v63, %v13309_v24  ;;  %v11247_v36 = vld [vmem:[%s15349_s3 + $0x18] sm:$0xff]  }
 0x1b4   : > { %9014 = vmatmul.mubr.msk.bf16.gmra.mrb[124].mxu1 %vm13321_vm9, %v15777_v35  ;;  %3252 = vmatprep.mubr.bf16.mxu0 %v3017_v9 }
 0x1b5   : > { %9032 = vmatprep.mubr.msk.bf16.mxu1 %vm11672_vm7, %v15777_v35  ;;  %v2615_v19 = vpop.f32.mrb[20].mxu1  ;;  %3787 = vmatpush1.bf16.msra.mxu0 %v11246_v29  ;;  %vm15992_vm7 = vnez %v15617_v17 }
 0x1b6   : > { %v2282_v41 = vpop.f32.mrb[28].mxu0  ;;  %v13338_v51 = vmul.f32 %v2615_v19, %v2262_v10  ;;  %v2617_v37 = vpop.f32.mrb[21].mxu1  ;;  %3788 = vmatprep.subr.bf16.mxu0 %v15753_v5 }
 0x1b7   : > { %v2284_v27 = vpop.f32.mrb[29].mxu0  ;;  %v2905_v24 = vmul.f32 %v2617_v37, %v2264_v2  ;;  %v2619_v25 = vpop.f32.mrb[22].mxu1  ;;  %v15990_v2 = vpack.c.bf16 %v13249_v4, %v13231_v42 }
 0x1b8   : > { %v2286_v9 = vpop.f32.mrb[30].mxu0  ;;  %v13341_v31 = vmul.f32 %v2619_v25, %v2266_v49  ;;  %v2621_v48 = vpop.f32.mrb[23].mxu1 }
 0x1b9   : > { %v2288_v63 = vpop.f32.mrb[31].mxu0  ;;  %v2907_v55 = vmul.f32 %v2621_v48, %v2268_v11  ;;  %3789 = vmatpush1.bf16.msra.mxu0 %v11247_v36  ;;  %v11248_v11 = vld [vmem:[%s15349_s3 + $0x20] sm:$0xff]   ;;  %v11249_v36 = vld [vmem:[%s15349_s3 + $0x28] sm:$0xff]  }
 0x1ba   : > { %v3022_v10 = vpack.c.bf16 %v13341_v31, %v13338_v51  ;;  %3790 = vmatprep.subr.bf16.mxu0 %v15753_v5 }
 0x1bb   : > { %3253 = vmatmul.mubr.bf16.gmra.mrb[136].mxu0 %v15990_v2  ;;  %v3023_v19 = vpack.c.bf16 %v2907_v55, %v2905_v24 }
 0x1bc   : > { %9034 = vmatmul.mubr.msk.bf16.vlgmr.msra.gmra.mrb[128].mxu1 %vm11667_vm6, %v15777_v35  ;;  %3260 = vmatprep.mubr.bf16.mxu0 %v3019_v40  ;;  %vm15991_vm6 = vnez %v15615_v15 }
 0x1bd   : > { %9036 = vmatprep.mubr.msk.bf16.mxu1 %vm11689_vm8, %v15777_v35  ;;  %v2625_v49 = vpop.f32.mrb[24].mxu1  ;;  %3791 = vmatpush1.bf16.msra.mxu0 %v11248_v11  ;;  %vm15993_vm8 = vnez %v15627_v28 }
 0x1be   : > { %v2292_v29 = vpop.f32.mrb[32].mxu0  ;;  %v13361_v37 = vmul.f32 %v2625_v49, %v2272_v18  ;;  %v2627_v42 = vpop.f32.mrb[25].mxu1  ;;  %3792 = vmatprep.subr.bf16.mxu0 %v15753_v5 }
 0x1bf   : > { %v2294_v4 = vpop.f32.mrb[33].mxu0  ;;  %v2909_v46 = vmul.f32 %v2627_v42, %v2274_v23  ;;  %v2629_v24 = vpop.f32.mrb[26].mxu1 }
 0x1c0   : > { %v2296_v40 = vpop.f32.mrb[34].mxu0  ;;  %v13364_v25 = vmul.f32 %v2629_v24, %v2276_v6  ;;  %v2631_v54 = vpop.f32.mrb[27].mxu1  ;;  %v11251_v24 = vld [vmem:[%s15349_s3 + $0x38] sm:$0xff]  }
 0x1c1   : > { %v2298_v48 = vpop.f32.mrb[35].mxu0  ;;  %v2911_v55 = vmul.f32 %v2631_v54, %v2278_v1  ;;  %3793 = vmatpush1.bf16.msra.mxu0 %v11249_v36  ;;  %v11250_v1 = vld [vmem:[%s15349_s3 + $0x30] sm:$0xff]  }
 0x1c2   : > { %v3024_v18 = vpack.c.bf16 %v13364_v25, %v13361_v37  ;;  %3794 = vmatprep.subr.bf16.mxu0 %v15753_v5 }
 0x1c3   : > { %3261 = vmatmul.mubr.bf16.gmra.mrb[140].mxu0 %v3018_v26  ;;  %v3025_v23 = vpack.c.bf16 %v2911_v55, %v2909_v46 }
 0x1c4   : > { %9038 = vmatmul.mubr.msk.bf16.gmra.mrb[132].mxu1 %vm11726_vm13, %v15777_v35  ;;  %3268 = vmatprep.mubr.bf16.mxu0 %v3021_v8  ;;  %vm15994_vm13 = vnez %v15630_v30 }
 0x1c5   : > { %9040 = vmatprep.mubr.msk.bf16.mxu1 %vm11736_vm14, %v15777_v35  ;;  %v2635_v6 = vpop.f32.mrb[28].mxu1  ;;  %3795 = vmatpush1.bf16.msra.mxu0 %v11250_v1  ;;  %vm15995_vm14 = vnez %v15640_v43 }
 0x1c6   : > { %v2302_v2 = vpop.f32.mrb[36].mxu0  ;;  %v13384_v49 = vmul.f32 %v2635_v6, %v2282_v41  ;;  %v2637_v59 = vpop.f32.mrb[29].mxu1  ;;  %3796 = vmatprep.subr.bf16.mxu0 %v15753_v5 }
 0x1c7   : > { %v2304_v47 = vpop.f32.mrb[37].mxu0  ;;  %v2913_v0 = vmul.f32 %v2637_v59, %v2284_v27  ;;  %v2639_v26 = vpop.f32.mrb[30].mxu1  ;;  %v11253_v59 = vld [vmem:[%s15349_s3 + $0x48] sm:$0xff]  }
 0x1c8   : > { %v2306_v8 = vpop.f32.mrb[38].mxu0  ;;  %v13387_v11 = vmul.f32 %v2639_v26, %v2286_v9  ;;  %v2641_v3 = vpop.f32.mrb[31].mxu1 }
 0x1c9   : > { %v2308_v42 = vpop.f32.mrb[39].mxu0  ;;  %v2915_v46 = vmul.f32 %v2641_v3, %v2288_v63  ;;  %3797 = vmatpush1.bf16.msra.mxu0 %v11251_v24  ;;  %v11252_v63 = vld [vmem:[%s15349_s3 + $0x40] sm:$0xff]  }
 0x1ca   : > { %v3026_v41 = vpack.c.bf16 %v13387_v11, %v13384_v49  ;;  %3798 = vmatprep.subr.bf16.mxu0 %v15753_v5 }
 0x1cb   : > { %3269 = vmatmul.mubr.bf16.gmra.mrb[144].mxu0 %v3020_v44  ;;  %v3027_v27 = vpack.c.bf16 %v2915_v46, %v2913_v0 }
 0x1cc   : > { %9042 = vmatmul.mubr.msk.bf16.gmra.mrb[136].mxu1 %vm15991_vm6, %v15777_v35  ;;  %3276 = vmatprep.mubr.bf16.mxu0 %v3023_v19  ;;  %vm15999_vm6 = vnez %v15666_v13 }
 0x1cd   : > { %9044 = vmatprep.mubr.msk.bf16.mxu1 %vm15992_vm7, %v15777_v35  ;;  %v2645_v9 = vpop.f32.mrb[32].mxu1  ;;  %3799 = vmatpush1.bf16.msra.mxu0 %v11252_v63  ;;  %vm16000_vm7 = vnez %v15669_v16 }
 0x1ce   : > { %v2312_v54 = vpop.f32.mrb[40].mxu0  ;;  %v13407_v55 = vmul.f32 %v2645_v9, %v2292_v29  ;;  %v2647_v56 = vpop.f32.mrb[33].mxu1  ;;  %3800 = vmatprep.subr.bf16.mxu0 %v15753_v5  ;;  %v11255_v9 = vld [vmem:[%s15349_s3 + $0x58] sm:$0xff]  }
 0x1cf   : > { %v2314_v12 = vpop.f32.mrb[41].mxu0  ;;  %v2917_v15 = vmul.f32 %v2647_v56, %v2294_v4  ;;  %v2649_v44 = vpop.f32.mrb[34].mxu1 }
 0x1d0   : > { %v2316_v19 = vpop.f32.mrb[42].mxu0  ;;  %v13410_v36 = vmul.f32 %v2649_v44, %v2296_v40  ;;  %v2651_v17 = vpop.f32.mrb[35].mxu1 }
 0x1d1   : > { %v2318_v6 = vpop.f32.mrb[43].mxu0  ;;  %v2919_v1 = vmul.f32 %v2651_v17, %v2298_v48  ;;  %3801 = vmatpush1.bf16.msra.mxu0 %v11253_v59  ;;  %v11254_v48 = vld [vmem:[%s15349_s3 + $0x50] sm:$0xff]  }
 0x1d2   : > { %v3028_v29 = vpack.c.bf16 %v13410_v36, %v13407_v55  ;;  %3802 = vmatprep.subr.bf16.mxu0 %v15753_v5 }
 0x1d3   : > { %3277 = vmatmul.mubr.bf16.gmra.mrb[148].mxu0 %v3022_v10  ;;  %v3029_v4 = vpack.c.bf16 %v2919_v1, %v2917_v15  ;;  %v11257_v1 = vld [vmem:[%s15349_s3 + $0x68] sm:$0xff]  }
 0x1d4   : > { %9046 = vmatmul.mubr.msk.bf16.gmra.mrb[140].mxu1 %vm15993_vm8, %v15777_v35  ;;  %3284 = vmatprep.mubr.bf16.mxu0 %v3025_v23  ;;  %vm16001_vm8 = vnez %v15679_v32 }
 0x1d5   : > { %9048 = vmatprep.mubr.msk.bf16.mxu1 %vm15994_vm13, %v15777_v35  ;;  %v2655_v40 = vpop.f32.mrb[36].mxu1  ;;  %3803 = vmatpush1.bf16.msra.mxu0 %v11254_v48  ;;  %vm16002_vm13 = vnez %v15682_v34 }
 0x1d6   : > { %v2322_v0 = vpop.f32.mrb[44].mxu0  ;;  %v13430_v26 = vmul.f32 %v2655_v40, %v2302_v2  ;;  %v2657_v51 = vpop.f32.mrb[37].mxu1  ;;  %3804 = vmatprep.subr.bf16.mxu0 %v15753_v5 }
 0x1d7   : > { %v2324_v31 = vpop.f32.mrb[45].mxu0  ;;  %v2921_v28 = vmul.f32 %v2657_v51, %v2304_v47  ;;  %v2659_v10 = vpop.f32.mrb[38].mxu1 }
 0x1d8   : > { %v2326_v23 = vpop.f32.mrb[46].mxu0  ;;  %v13433_v3 = vmul.f32 %v2659_v10, %v2306_v8  ;;  %v2661_v30 = vpop.f32.mrb[39].mxu1  ;;  %v11259_v10 = vld [vmem:[%s15349_s3 + $0x78] sm:$0xff]  }
 0x1d9   : > { %v2328_v46 = vpop.f32.mrb[47].mxu0  ;;  %v2923_v24 = vmul.f32 %v2661_v30, %v2308_v42  ;;  %3805 = vmatpush1.bf16.msra.mxu0 %v11255_v9  ;;  %v11256_v42 = vld [vmem:[%s15349_s3 + $0x60] sm:$0xff]  }
 0x1da   : > { %v3030_v2 = vpack.c.bf16 %v13433_v3, %v13430_v26  ;;  %3806 = vmatprep.subr.bf16.mxu0 %v15753_v5 }
 0x1db   : > { %3285 = vmatmul.mubr.bf16.gmra.mrb[152].mxu0 %v3024_v18  ;;  %v3031_v47 = vpack.c.bf16 %v2923_v24, %v2921_v28 }
 0x1dc   : > { %9050 = vmatmul.mubr.msk.bf16.gmra.mrb[144].mxu1 %vm15995_vm14, %v15777_v35  ;;  %3292 = vmatprep.mubr.bf16.mxu0 %v3027_v27  ;;  %vm16003_vm14 = vnez %v15692_v57 }
 0x1dd   : > { %9052 = vmatprep.mubr.msk.bf16.mxu1 %vm15996_vm2, %v15777_v35  ;;  %v2665_v8 = vpop.f32.mrb[40].mxu1  ;;  %3807 = vmatpush1.bf16.msra.mxu0 %v11256_v42  ;;  %vm16004_vm2 = vnez %v15694_v61 }
 0x1de   : > { %v2332_v63 = vpop.f32.mrb[48].mxu0  ;;  %v13453_v56 = vmul.f32 %v2665_v8, %v2312_v54  ;;  %v2667_v37 = vpop.f32.mrb[41].mxu1  ;;  %3808 = vmatprep.subr.bf16.mxu0 %v15753_v5 }
 0x1df   : > { %v2334_v25 = vpop.f32.mrb[49].mxu0  ;;  %v2925_v43 = vmul.f32 %v2667_v37, %v2314_v12  ;;  %v2669_v18 = vpop.f32.mrb[42].mxu1 }
 0x1e0   : > { %v2336_v27 = vpop.f32.mrb[50].mxu0  ;;  %v13456_v15 = vmul.f32 %v2669_v18, %v2316_v19  ;;  %v2671_v45 = vpop.f32.mrb[43].mxu1 }
 0x1e1   : > { %v2338_v44 = vpop.f32.mrb[51].mxu0  ;;  %v2927_v17 = vmul.f32 %v2671_v45, %v2318_v6  ;;  %3809 = vmatpush1.bf16.msra.mxu0 %v11257_v1  ;;  %v11258_v6 = vld [vmem:[%s15349_s3 + $0x70] sm:$0xff]  }
 0x1e2   : > { %v3032_v54 = vpack.c.bf16 %v13456_v15, %v13453_v56  ;;  %3810 = vmatprep.subr.bf16.mxu0 %v15753_v5 }
 0x1e3   : > { %3293 = vmatmul.mubr.bf16.gmra.mrb[156].mxu0 %v3026_v41  ;;  %v3033_v12 = vpack.c.bf16 %v2927_v17, %v2925_v43 }
 0x1e4   : > { %9054 = vmatmul.mubr.msk.bf16.gmra.mrb[148].mxu1 %vm15997_vm15, %v15777_v35  ;;  %3300 = vmatprep.mubr.bf16.mxu0 %v3029_v4  ;;  %vm16005_vm15 = vnez %v15704_v21 }
 0x1e5   : > { %9056 = vmatprep.mubr.msk.bf16.mxu1 %vm15998_vm12, %v15777_v35  ;;  %v2675_v19 = vpop.f32.mrb[44].mxu1  ;;  %3811 = vmatpush1.bf16.msra.mxu0 %v11258_v6  ;;  %vm16006_vm12 = vnez %v15706_v14 }
 0x1e6   : > { %v2342_v59 = vpop.f32.mrb[52].mxu0  ;;  %v13476_v40 = vmul.f32 %v2675_v19, %v2322_v0  ;;  %v2677_v49 = vpop.f32.mrb[45].mxu1  ;;  %3812 = vmatprep.subr.bf16.mxu0 %v15753_v5 }
 0x1e7   : > { %v2344_v11 = vpop.f32.mrb[53].mxu0  ;;  %v2929_v60 = vmul.f32 %v2677_v49, %v2324_v31  ;;  %v2679_v41 = vpop.f32.mrb[46].mxu1 }
 0x1e8   : > { %v2346_v4 = vpop.f32.mrb[54].mxu0  ;;  %v2930_v48 = vmul.f32 %v2679_v41, %v2326_v23  ;;  %v2681_v51 = vpop.f32.mrb[47].mxu1 }
 0x1e9   : > { %v2348_v62 = vpop.f32.mrb[55].mxu0  ;;  %v2931_v28 = vmul.f32 %v2681_v51, %v2328_v46  ;;  %3813 = vmatpush1.bf16.msra.mxu0 %v11259_v10 }
 0x1ea   : > { %v3034_v30 = vpack.c.bf16 %v2930_v48, %v13476_v40 }
 0x1eb   : > { %3301 = vmatmul.mubr.bf16.gmra.mrb[160].mxu0 %v3028_v29  ;;  %v3035_v5 = vpack.c.bf16 %v2931_v28, %v2929_v60 }
 0x1ec   : > { %9058 = vmatmul.mubr.msk.bf16.gmra.mrb[152].mxu1 %vm15999_vm6, %v15777_v35  ;;  %3308 = vmatprep.mubr.bf16.mxu0 %v3031_v47  ;;  %vm16007_vm6 = vnez %v15716_v52 }
 0x1ed   : > { %9060 = vmatprep.mubr.msk.bf16.mxu1 %vm16000_vm7, %v15777_v35  ;;  %v2685_v0 = vpop.f32.mrb[48].mxu1  ;;  %vm16008_vm7 = vnez %v15718_v33 }
 0x1ee   : > { %v2352_v31 = vpop.f32.mrb[56].mxu0  ;;  %v13492_v23 = vmul.f32 %v2685_v0, %v2332_v63  ;;  %v2687_v46 = vpop.f32.mrb[49].mxu1 }
 0x1ef   : > { %v2354_v24 = vpop.f32.mrb[57].mxu0  ;;  %v2933_v9 = vmul.f32 %v2687_v46, %v2334_v25  ;;  %v2689_v8 = vpop.f32.mrb[50].mxu1 }
 0x1f0   : > { %v2356_v55 = vpop.f32.mrb[58].mxu0  ;;  %v2934_v36 = vmul.f32 %v2689_v8, %v2336_v27  ;;  %v2691_v29 = vpop.f32.mrb[51].mxu1 }
 0x1f1   : > { %v2358_v42 = vpop.f32.mrb[59].mxu0  ;;  %v2935_v56 = vmul.f32 %v2691_v29, %v2338_v44 }
 0x1f2   : > { %v3036_v13 = vpack.c.bf16 %v2934_v36, %v13492_v23 }
 0x1f3   : > { %3309 = vmatmul.mubr.bf16.gmra.mrb[164].mxu0 %v3030_v2  ;;  %v3037_v16 = vpack.c.bf16 %v2935_v56, %v2933_v9 }
 0x1f4   : > { %9062 = vmatmul.mubr.msk.bf16.gmra.mrb[156].mxu1 %vm16001_vm8, %v15777_v35  ;;  %3316 = vmatprep.mubr.bf16.mxu0 %v3033_v12  ;;  %vm16009_vm8 = vnez %v15728_v39 }
 0x1f5   : > { %9064 = vmatprep.mubr.msk.bf16.mxu1 %vm16002_vm13, %v15777_v35  ;;  %v2695_v47 = vpop.f32.mrb[52].mxu1  ;;  %vm16010_vm13 = vnez %v15730_v53 }
 0x1f6   : > { %v2362_v63 = vpop.f32.mrb[60].mxu0  ;;  %v13504_v37 = vmul.f32 %v2695_v47, %v2342_v59  ;;  %v2697_v25 = vpop.f32.mrb[53].mxu1 }
 0x1f7   : > { %v2364_v43 = vpop.f32.mrb[61].mxu0  ;;  %v2937_v18 = vmul.f32 %v2697_v25, %v2344_v11  ;;  %v2699_v27 = vpop.f32.mrb[54].mxu1 }
 0x1f8   : > { %v2366_v26 = vpop.f32.mrb[62].mxu0  ;;  %v2938_v3 = vmul.f32 %v2699_v27, %v2346_v4  ;;  %v2701_v2 = vpop.f32.mrb[55].mxu1 }
 0x1f9   : > { %v2368_v15 = vpop.f32.mrb[63].mxu0  ;;  %v2939_v45 = vmul.f32 %v2701_v2, %v2348_v62 }
 0x1fa   : > { %v3038_v32 = vpack.c.bf16 %v2938_v3, %v13504_v37 }
 0x1fb   : > { %3317 = vmatmul.mubr.bf16.gmra.mrb[168].mxu0 %v3032_v54  ;;  %v3039_v44 = vpack.c.bf16 %v2939_v45, %v2937_v18 }
 0x1fc   : > { %9066 = vmatmul.mubr.msk.bf16.gmra.mrb[160].mxu1 %vm16003_vm14, %v15777_v35  ;;  %3324 = vmatprep.mubr.bf16.mxu0 %v3035_v5  ;;  %vm16011_vm14 = vnez %v15740_v58 }
 0x1fd   : > { %9068 = vmatprep.mubr.msk.bf16.mxu1 %vm16004_vm2, %v15777_v35  ;;  %v2705_v34 = vpop.f32.mrb[56].mxu1  ;;  %vm16012_vm2 = vnez %v15742_v22 }
 0x1fe   : > { %v2372_v17 = vpop.f32.mrb[64].mxu0  ;;  %v13513_v1 = vmul.f32 %v2705_v34, %v2352_v31  ;;  %v2707_v12 = vpop.f32.mrb[57].mxu1 }
 0x1ff   : > { %v2374_v19 = vpop.f32.mrb[65].mxu0  ;;  %v2941_v6 = vmul.f32 %v2707_v12, %v2354_v24  ;;  %v2709_v59 = vpop.f32.mrb[58].mxu1 }
 0x200   : > { %v2376_v40 = vpop.f32.mrb[66].mxu0  ;;  %v2942_v54 = vmul.f32 %v2709_v59, %v2356_v55  ;;  %v2711_v49 = vpop.f32.mrb[59].mxu1 }
 0x201   : > { %v2378_v11 = vpop.f32.mrb[67].mxu0  ;;  %v2943_v60 = vmul.f32 %v2711_v49, %v2358_v42 }
 0x202   : > { %v3040_v57 = vpack.c.bf16 %v2942_v54, %v13513_v1 }
 0x203   : > { %3325 = vmatmul.mubr.bf16.gmra.mrb[172].mxu0 %v3034_v30  ;;  %v3041_v41 = vpack.c.bf16 %v2943_v60, %v2941_v6  ;;  %v16014_v60 = vld [vmem:[#allocation35_spill] sm:$0xff] }
 0x204   : > { %9070 = vmatmul.mubr.msk.bf16.gmra.mrb[164].mxu1 %vm16005_vm15, %v15777_v35  ;;  %3332 = vmatprep.mubr.bf16.mxu0 %v3037_v16  ;;  %vm16013_vm15 = vnez %v15752_v20 }
 0x205   : > { %9072 = vmatprep.mubr.msk.bf16.mxu1 %vm16006_vm12, %v15777_v35  ;;  %vm16015_vm12 = vnez %v16014_v60 }
 0x206   : > { %v2382_v61 = vpop.f32.mrb[68].mxu0  ;;  %v2715_v4 = vpop.f32.mrb[60].mxu1 }
 0x207   : > { %v13522_v48 = vmul.f32 %v2715_v4, %v2362_v63  ;;  %v2384_v51 = vpop.f32.mrb[69].mxu0  ;;  %v2717_v62 = vpop.f32.mrb[61].mxu1 }
 0x208   : > { %v2945_v28 = vmul.f32 %v2717_v62, %v2364_v43  ;;  %v2386_v10 = vpop.f32.mrb[70].mxu0  ;;  %v2719_v5 = vpop.f32.mrb[62].mxu1 }
 0x209   : > { %v2946_v30 = vmul.f32 %v2719_v5, %v2366_v26  ;;  %v2388_v0 = vpop.f32.mrb[71].mxu0  ;;  %v2721_v31 = vpop.f32.mrb[63].mxu1 }
 0x20a   : > { %v2947_v23 = vmul.f32 %v2721_v31, %v2368_v15  ;;  %v16016_v31 = vld [vmem:[#allocation38_spill] sm:$0xff] }
 0x20b   : > { %3333 = vmatmul.mubr.bf16.gmra.mrb[176].mxu0 %v3036_v13  ;;  %v3042_v21 = vpack.c.bf16 %v2946_v30, %v13522_v48 }
 0x20c   : > { %9074 = vmatmul.mubr.msk.bf16.gmra.mrb[168].mxu1 %vm16007_vm6, %v15777_v35  ;;  %3340 = vmatprep.mubr.bf16.mxu0 %v3039_v44  ;;  %v3043_v14 = vpack.c.bf16 %v2947_v23, %v2945_v28  ;;  %vm16017_vm6 = vnez %v16016_v31 }
 0x20d   : > { %9076 = vmatprep.mubr.msk.bf16.mxu1 %vm16008_vm7, %v15777_v35 }
 0x20e   : > { %v2392_v46 = vpop.f32.mrb[72].mxu0  ;;  %v2725_v24 = vpop.f32.mrb[64].mxu1 }
 0x20f   : > { %v13531_v9 = vmul.f32 %v2725_v24, %v2372_v17  ;;  %v2394_v8 = vpop.f32.mrb[73].mxu0  ;;  %v2727_v55 = vpop.f32.mrb[65].mxu1 }
 0x210   : > { %v2949_v36 = vmul.f32 %v2727_v55, %v2374_v19  ;;  %v2396_v29 = vpop.f32.mrb[74].mxu0  ;;  %v2729_v42 = vpop.f32.mrb[66].mxu1 }
 0x211   : > { %v2950_v56 = vmul.f32 %v2729_v42, %v2376_v40  ;;  %v2398_v13 = vpop.f32.mrb[75].mxu0  ;;  %v2731_v16 = vpop.f32.mrb[67].mxu1 }
 0x212   : > { %v2951_v52 = vmul.f32 %v2731_v16, %v2378_v11 }
 0x213   : > { %3341 = vmatmul.mubr.bf16.gmra.mrb[180].mxu0 %v3038_v32  ;;  %v3044_v47 = vpack.c.bf16 %v2950_v56, %v13531_v9 }
 0x214   : > { %9078 = vmatmul.mubr.msk.bf16.gmra.mrb[172].mxu1 %vm16009_vm8, %v15777_v35  ;;  %3348 = vmatprep.mubr.bf16.mxu0 %v3041_v41  ;;  %v3045_v33 = vpack.c.bf16 %v2951_v52, %v2949_v36  ;;  %v4135_v52 = vld [vmem:[%s15350_s4] sm:$0xff] }
 0x215   : > { %9080 = vmatprep.mubr.msk.bf16.mxu1 %vm16010_vm13, %v15777_v35 }
 0x216   : > { %v2402_v63 = vpop.f32.mrb[76].mxu0  ;;  %v2735_v37 = vpop.f32.mrb[68].mxu1 }
 0x217   : > { %v13540_v25 = vmul.f32 %v2735_v37, %v2382_v61  ;;  %v2404_v43 = vpop.f32.mrb[77].mxu0  ;;  %v2737_v18 = vpop.f32.mrb[69].mxu1  ;;  %v16020_v37 = vld [vmem:[#allocation42_spill] sm:$0xff] }
 0x218   : > { %v2953_v27 = vmul.f32 %v2737_v18, %v2384_v51  ;;  %v2406_v26 = vpop.f32.mrb[78].mxu0  ;;  %v2739_v3 = vpop.f32.mrb[70].mxu1  ;;  %vm16021_vm8 = vnez %v16020_v37 }
 0x219   : > { %v2954_v2 = vmul.f32 %v2739_v3, %v2386_v10  ;;  %v2408_v15 = vpop.f32.mrb[79].mxu0  ;;  %v2741_v45 = vpop.f32.mrb[71].mxu1  ;;  %v4138_v3 = vld [vmem:[%s15350_s4 + $0x18] sm:$0xff] }
 0x21a   : > { %v2955_v39 = vmul.f32 %v2741_v45, %v2388_v0 }
 0x21b   : > { %3349 = vmatmul.mubr.bf16.gmra.mrb[184].mxu0 %v3040_v57  ;;  %v3046_v32 = vpack.c.bf16 %v2954_v2, %v13540_v25 }
 0x21c   : > { %9082 = vmatmul.mubr.msk.bf16.gmra.mrb[176].mxu1 %vm16011_vm14, %v15777_v35  ;;  %3356 = vmatprep.mubr.bf16.mxu0 %v3043_v14  ;;  %v3047_v53 = vpack.c.bf16 %v2955_v39, %v2953_v27 }
 0x21d   : > { %9084 = vmatprep.mubr.msk.bf16.mxu1 %vm16012_vm2, %v15777_v35 }
 0x21e   : > { %v2412_v44 = vpop.f32.mrb[80].mxu0  ;;  %v2745_v34 = vpop.f32.mrb[72].mxu1 }
 0x21f   : > { %v13549_v17 = vmul.f32 %v2745_v34, %v2392_v46  ;;  %v2414_v1 = vpop.f32.mrb[81].mxu0  ;;  %v2747_v12 = vpop.f32.mrb[73].mxu1 }
 0x220   : > { %v2957_v19 = vmul.f32 %v2747_v12, %v2394_v8  ;;  %v2416_v6 = vpop.f32.mrb[82].mxu0  ;;  %v2749_v59 = vpop.f32.mrb[74].mxu1 }
 0x221   : > { %v13551_v40 = vmul.f32 %v2749_v59, %v2396_v29  ;;  %v2418_v54 = vpop.f32.mrb[83].mxu0  ;;  %v2751_v58 = vpop.f32.mrb[75].mxu1 }
 0x222   : > { %v2959_v49 = vmul.f32 %v2751_v58, %v2398_v13 }
 0x223   : > { %3357 = vmatmul.mubr.bf16.gmra.mrb[188].mxu0 %v3042_v21  ;;  %v3048_v11 = vpack.c.bf16 %v13551_v40, %v13549_v17  ;;  %v16018_v21 = vld [vmem:[#allocation39_spill] sm:$0xff] }
 0x224   : > { %9086 = vmatmul.mubr.msk.bf16.gmra.mrb[180].mxu1 %vm16013_vm15, %v15777_v35  ;;  %3364 = vmatprep.mubr.bf16.mxu0 %v3045_v33  ;;  %v3049_v22 = vpack.c.bf16 %v2959_v49, %v2957_v19  ;;  %vm16019_vm7 = vnez %v16018_v21  ;;  %v16026_v40 = vld [vmem:[#allocation47_spill] sm:$0xff] }
 0x225   : > { %9088 = vmatprep.mubr.msk.bf16.mxu1 %vm16015_vm12, %v15777_v35  ;;  %vm16027_vm2 = vnez %v16026_v40 }
 0x226   : > { %v2422_v57 = vpop.f32.mrb[84].mxu0  ;;  %v2755_v41 = vpop.f32.mrb[76].mxu1 }
 0x227   : > { %v13561_v61 = vmul.f32 %v2755_v41, %v2402_v63  ;;  %v2424_v4 = vpop.f32.mrb[85].mxu0  ;;  %v2757_v48 = vpop.f32.mrb[77].mxu1 }
 0x228   : > { %v2961_v51 = vmul.f32 %v2757_v48, %v2404_v43  ;;  %v2426_v62 = vpop.f32.mrb[86].mxu0  ;;  %v2759_v28 = vpop.f32.mrb[78].mxu1  ;;  %v16022_v43 = vld [vmem:[#allocation43_spill] sm:$0xff] }
 0x229   : > { %v13563_v10 = vmul.f32 %v2759_v28, %v2406_v26  ;;  %v2428_v5 = vpop.f32.mrb[87].mxu0  ;;  %v2761_v20 = vpop.f32.mrb[79].mxu1  ;;  %vm16023_vm13 = vnez %v16022_v43  ;;  %v4137_v26 = vld [vmem:[%s15350_s4 + $0x10] sm:$0xff] }
 0x22a   : > { %v2963_v30 = vmul.f32 %v2761_v20, %v2408_v15  ;;  %v10900_v39 = vpack.c.bf16 %v4138_v3, %v4137_v26 }
 0x22b   : > { %3365 = vmatmul.mubr.bf16.gmra.mrb[192].mxu0 %v3044_v47  ;;  %v3050_v0 = vpack.c.bf16 %v13563_v10, %v13561_v61  ;;  %v4136_v47 = vld [vmem:[%s15350_s4 + $0x8] sm:$0xff] }
 0x22c   : > { %9090 = vmatmul.mubr.msk.bf16.gmra.mrb[184].mxu1 %vm16017_vm6, %v15777_v35  ;;  %3372 = vmatprep.mubr.bf16.mxu0 %v3047_v53  ;;  %v3051_v23 = vpack.c.bf16 %v2963_v30, %v2961_v51  ;;  %v10896_v63 = vpack.c.bf16 %v4136_v47, %v4135_v52  ;;  %v16030_v30 = vld [vmem:[#allocation51_spill] sm:$0xff] }
 0x22d   : > { %9092 = vmatprep.mubr.msk.bf16.mxu1 %vm16019_vm7, %v15777_v35  ;;  %vm16031_vm12 = vnez %v16030_v30 }
 0x22e   : > { %v2432_v14 = vpop.f32.mrb[88].mxu0  ;;  %v2765_v46 = vpop.f32.mrb[80].mxu1  ;;  %10897 = vmatprep.subr.bf16.mxu1 %v10896_v63 }
 0x22f   : > { %v13573_v24 = vmul.f32 %v2765_v46, %v2412_v44  ;;  %v2434_v9 = vpop.f32.mrb[89].mxu0  ;;  %v2767_v8 = vpop.f32.mrb[81].mxu1  ;;  %10899 = vmatpush3.bf16.msra.mxu1 %v10896_v63 }
 0x230   : > { %v2965_v55 = vmul.f32 %v2767_v8, %v2414_v1  ;;  %v2436_v36 = vpop.f32.mrb[90].mxu0  ;;  %v2769_v29 = vpop.f32.mrb[82].mxu1  ;;  %10901 = vmatprep.subr.bf16.mxu1 %v10900_v39 }
 0x231   : > { %v13575_v42 = vmul.f32 %v2769_v29, %v2416_v6  ;;  %v2438_v56 = vpop.f32.mrb[91].mxu0  ;;  %v2771_v13 = vpop.f32.mrb[83].mxu1  ;;  %v16024_v6 = vld [vmem:[#allocation46_spill] sm:$0xff]  ;;  %v16032_v29 = vld [vmem:[#allocation52_spill] sm:$0xff] }
 0x232   : > { %v2967_v16 = vmul.f32 %v2771_v13, %v2418_v54  ;;  %vm16025_vm14 = vnez %v16024_v6  ;;  %vm16033_vm6 = vnez %v16032_v29 }
 0x233   : > { %3373 = vmatmul.mubr.bf16.gmra.mrb[196].mxu0 %v3046_v32  ;;  %v3052_v33 = vpack.c.bf16 %v13575_v42, %v13573_v24  ;;  %10903 = vmatpush3.bf16.msra.mxu1 %v10900_v39 }
 0x234   : > { %9094 = vmatmul.mubr.msk.bf16.gmra.mrb[188].mxu1 %vm16021_vm8, %v15777_v35  ;;  %3380 = vmatprep.mubr.bf16.mxu0 %v3049_v22  ;;  %v3053_v25 = vpack.c.bf16 %v2967_v16, %v2965_v55 }
 0x235   : > { %9096 = vmatprep.mubr.msk.bf16.mxu1 %vm16023_vm13, %v15777_v35 }
 0x236   : > { %v2442_v18 = vpop.f32.mrb[92].mxu0  ;;  %v2775_v27 = vpop.f32.mrb[84].mxu1 }
 0x237   : > { %v13597_v2 = vmul.f32 %v2775_v27, %v2422_v57  ;;  %v2444_v15 = vpop.f32.mrb[93].mxu0  ;;  %v2777_v45 = vpop.f32.mrb[85].mxu1 }
 0x238   : > { %v2969_v32 = vmul.f32 %v2777_v45, %v2424_v4  ;;  %v2446_v53 = vpop.f32.mrb[94].mxu0  ;;  %v2779_v44 = vpop.f32.mrb[86].mxu1  ;;  %v16038_v45 = vld [vmem:[#allocation59_spill] sm:$0xff] }
 0x239   : > { %v2970_v34 = vmul.f32 %v2779_v44, %v2426_v62  ;;  %v2448_v17 = vpop.f32.mrb[95].mxu0  ;;  %v2781_v1 = vpop.f32.mrb[87].mxu1  ;;  %vm16039_vm13 = vnez %v16038_v45 }
 0x23a   : > { %v2971_v12 = vmul.f32 %v2781_v1, %v2428_v5  ;;  %v16028_v5 = vld [vmem:[#allocation48_spill] sm:$0xff] }
 0x23b   : > { %3381 = vmatmul.mubr.bf16.gmra.mrb[200].mxu0 %v3048_v11  ;;  %v3054_v19 = vpack.c.bf16 %v2970_v34, %v13597_v2  ;;  %vm16029_vm15 = vnez %v16028_v5  ;;  %v16036_v2 = vld [vmem:[#allocation56_spill] sm:$0xff] }
 0x23c   : > { %9098 = vmatmul.mubr.msk.bf16.gmra.mrb[192].mxu1 %vm16025_vm14, %v15777_v35  ;;  %3388 = vmatprep.mubr.bf16.mxu0 %v3051_v23  ;;  %v3055_v59 = vpack.c.bf16 %v2971_v12, %v2969_v32  ;;  %vm16037_vm8 = vnez %v16036_v2 }
 0x23d   : > { %9100 = vmatprep.mubr.msk.bf16.mxu1 %vm16027_vm2, %v15777_v35 }
 0x23e   : > { %v2452_v54 = vpop.f32.mrb[96].mxu0  ;;  %v2785_v58 = vpop.f32.mrb[88].mxu1 }
 0x23f   : > { %v13606_v49 = vmul.f32 %v2785_v58, %v2432_v14  ;;  %v2454_v22 = vpop.f32.mrb[97].mxu0  ;;  %v2787_v60 = vpop.f32.mrb[89].mxu1 }
 0x240   : > { %v2973_v57 = vmul.f32 %v2787_v60, %v2434_v9  ;;  %v2456_v11 = vpop.f32.mrb[98].mxu0  ;;  %v2789_v41 = vpop.f32.mrb[90].mxu1 }
 0x241   : > { %v2974_v4 = vmul.f32 %v2789_v41, %v2436_v36  ;;  %v2458_v48 = vpop.f32.mrb[99].mxu0  ;;  %v2791_v51 = vpop.f32.mrb[91].mxu1 }
 0x242   : > { %v2975_v62 = vmul.f32 %v2791_v51, %v2438_v56  ;;  %v16034_v56 = vld [vmem:[#allocation55_spill] sm:$0xff] }
 0x243   : > { %3389 = vmatmul.mubr.bf16.gmra.mrb[204].mxu0 %v3050_v0  ;;  %v3056_v28 = vpack.c.bf16 %v2974_v4, %v13606_v49  ;;  %vm16035_vm7 = vnez %v16034_v56  ;;  %v16042_v49 = vld [vmem:[#allocation63_spill] sm:$0xff] }
 0x244   : > { %9102 = vmatmul.mubr.msk.bf16.gmra.mrb[196].mxu1 %vm16029_vm15, %v15777_v35  ;;  %3396 = vmatprep.mubr.bf16.mxu0 %v3053_v25  ;;  %v3057_v20 = vpack.c.bf16 %v2975_v62, %v2973_v57  ;;  %vm16043_vm2 = vnez %v16042_v49 }
 0x245   : > { %9104 = vmatprep.mubr.msk.bf16.mxu1 %vm16031_vm12, %v15777_v35 }
 0x246   : > { %v2462_v31 = vpop.f32.mrb[100].mxu0  ;;  %v2795_v23 = vpop.f32.mrb[92].mxu1 }
 0x247   : > { %v13618_v21 = vmul.f32 %v2795_v23, %v2442_v18  ;;  %v2464_v14 = vpop.f32.mrb[101].mxu0  ;;  %v2797_v46 = vpop.f32.mrb[93].mxu1 }
 0x248   : > { %v2977_v61 = vmul.f32 %v2797_v46, %v2444_v15  ;;  %v2466_v10 = vpop.f32.mrb[102].mxu0  ;;  %v2799_v0 = vpop.f32.mrb[94].mxu1 }
 0x249   : > { %v2978_v24 = vmul.f32 %v2799_v0, %v2446_v53  ;;  %v2468_v9 = vpop.f32.mrb[103].mxu0  ;;  %v2801_v8 = vpop.f32.mrb[95].mxu1 }
 0x24a   : > { %v2979_v55 = vmul.f32 %v2801_v8, %v2448_v17 }
 0x24b   : > { %3397 = vmatmul.mubr.bf16.gmra.mrb[208].mxu0 %v3052_v33  ;;  %v3058_v36 = vpack.c.bf16 %v2978_v24, %v13618_v21  ;;  %v16046_v21 = vld [vmem:[#allocation67_spill] sm:$0xff] }
 0x24c   : > { %9106 = vmatmul.mubr.msk.bf16.gmra.mrb[200].mxu1 %vm16033_vm6, %v15777_v35  ;;  %3404 = vmatprep.mubr.bf16.mxu0 %v3055_v59  ;;  %v3059_v42 = vpack.c.bf16 %v2979_v55, %v2977_v61  ;;  %vm16047_vm12 = vnez %v16046_v21 }
 0x24d   : > { %9108 = vmatprep.mubr.msk.bf16.mxu1 %vm16035_vm7, %v15777_v35 }
 0x24e   : > { %v2472_v13 = vpop.f32.mrb[104].mxu0  ;;  %v2805_v16 = vpop.f32.mrb[96].mxu1 }
 0x24f   : > { %v13627_v52 = vmul.f32 %v2805_v16, %v2452_v54  ;;  %v2474_v47 = vpop.f32.mrb[105].mxu0  ;;  %v2807_v63 = vpop.f32.mrb[97].mxu1  ;;  %v16040_v54 = vld [vmem:[#allocation60_spill] sm:$0xff] }
 0x250   : > { %v2981_v37 = vmul.f32 %v2807_v63, %v2454_v22  ;;  %v2476_v33 = vpop.f32.mrb[106].mxu0  ;;  %v2809_v25 = vpop.f32.mrb[98].mxu1  ;;  %vm16041_vm14 = vnez %v16040_v54 }
 0x251   : > { %v2982_v43 = vmul.f32 %v2809_v25, %v2456_v11  ;;  %v2478_v18 = vpop.f32.mrb[107].mxu0  ;;  %v2811_v27 = vpop.f32.mrb[99].mxu1 }
 0x252   : > { %v2983_v26 = vmul.f32 %v2811_v27, %v2458_v48 }
 0x253   : > { %3405 = vmatmul.mubr.bf16.gmra.mrb[212].mxu0 %v3054_v19  ;;  %v3060_v3 = vpack.c.bf16 %v2982_v43, %v13627_v52  ;;  %v16050_v52 = vld [vmem:[#allocation71_spill] sm:$0xff] }
 0x254   : > { %9110 = vmatmul.mubr.msk.bf16.gmra.mrb[204].mxu1 %vm16037_vm8, %v15777_v35  ;;  %3412 = vmatprep.mubr.bf16.mxu0 %v3057_v20  ;;  %v3061_v15 = vpack.c.bf16 %v2983_v26, %v2981_v37  ;;  %vm16051_vm7 = vnez %v16050_v52 }
 0x255   : > { %9112 = vmatprep.mubr.msk.bf16.mxu1 %vm16039_vm13, %v15777_v35 }
 0x256   : > { %v2482_v39 = vpop.f32.mrb[108].mxu0  ;;  %v2815_v32 = vpop.f32.mrb[100].mxu1 }
 0x257   : > { %v2484_v53 = vpop.f32.mrb[109].mxu0  ;;  %v13636_v44 = vmul.f32 %v2815_v32, %v2462_v31  ;;  %v2817_v34 = vpop.f32.mrb[101].mxu1  ;;  %v16044_v31 = vld [vmem:[#allocation64_spill] sm:$0xff] }
 0x258   : > { %v2486_v17 = vpop.f32.mrb[110].mxu0  ;;  %v2985_v1 = vmul.f32 %v2817_v34, %v2464_v14  ;;  %v2819_v12 = vpop.f32.mrb[102].mxu1  ;;  %vm16045_vm15 = vnez %v16044_v31 }
 0x259   : > { %v2488_v19 = vpop.f32.mrb[111].mxu0  ;;  %v2986_v6 = vmul.f32 %v2819_v12, %v2466_v10  ;;  %v2821_v59 = vpop.f32.mrb[103].mxu1 }
 0x25a   : > { %v2987_v40 = vmul.f32 %v2821_v59, %v2468_v9 }
 0x25b   : > { %3413 = vmatmul.mubr.bf16.gmra.mrb[216].mxu0 %v3056_v28  ;;  %v3062_v58 = vpack.c.bf16 %v2986_v6, %v13636_v44 }
 0x25c   : > { %9114 = vmatmul.mubr.msk.bf16.gmra.mrb[208].mxu1 %vm16041_vm14, %v15777_v35  ;;  %3420 = vmatprep.mubr.bf16.mxu0 %v3059_v42  ;;  %v3063_v22 = vpack.c.bf16 %v2987_v40, %v2985_v1 }
 0x25d   : > { %9116 = vmatprep.mubr.msk.bf16.mxu1 %vm16043_vm2, %v15777_v35 }
 0x25e   : > { %v2492_v60 = vpop.f32.mrb[112].mxu0  ;;  %v2825_v57 = vpop.f32.mrb[104].mxu1 }
 0x25f   : > { %v2494_v11 = vpop.f32.mrb[113].mxu0  ;;  %v13645_v41 = vmul.f32 %v2825_v57, %v2472_v13  ;;  %v2827_v4 = vpop.f32.mrb[105].mxu1  ;;  %v16048_v13 = vld [vmem:[#allocation68_spill] sm:$0xff] }
 0x260   : > { %v2496_v48 = vpop.f32.mrb[114].mxu0  ;;  %v2989_v51 = vmul.f32 %v2827_v4, %v2474_v47  ;;  %v2829_v62 = vpop.f32.mrb[106].mxu1  ;;  %vm16049_vm6 = vnez %v16048_v13 }
 0x261   : > { %v2498_v28 = vpop.f32.mrb[115].mxu0  ;;  %v2990_v5 = vmul.f32 %v2829_v62, %v2476_v33  ;;  %v2831_v20 = vpop.f32.mrb[107].mxu1 }
 0x262   : > { %v2991_v30 = vmul.f32 %v2831_v20, %v2478_v18 }
 0x263   : > { %3421 = vmatmul.mubr.bf16.gmra.mrb[220].mxu0 %v3058_v36  ;;  %v3064_v23 = vpack.c.bf16 %v2990_v5, %v13645_v41 }
 0x264   : > { %9118 = vmatmul.mubr.msk.bf16.gmra.mrb[212].mxu1 %vm16045_vm15, %v15777_v35  ;;  %3428 = vmatprep.mubr.bf16.mxu0 %v3061_v15  ;;  %v3065_v14 = vpack.c.bf16 %v2991_v30, %v2989_v51 }
 0x265   : > { %9120 = vmatprep.mubr.msk.bf16.mxu1 %vm16047_vm12, %v15777_v35 }
 0x266   : > { %v2502_v46 = vpop.f32.mrb[116].mxu0 }
 0x267   : > { %v2835_v61 = vpop.f32.mrb[108].mxu1  ;;  %v2504_v10 = vpop.f32.mrb[117].mxu0 }
 0x268   : > { %v13654_v0 = vmul.f32 %v2835_v61, %v2482_v39  ;;  %v2837_v24 = vpop.f32.mrb[109].mxu1  ;;  %v2506_v9 = vpop.f32.mrb[118].mxu0  ;;  %v16052_v39 = vld [vmem:[#allocation72_spill] sm:$0xff] }
 0x269   : > { %v2993_v8 = vmul.f32 %v2837_v24, %v2484_v53  ;;  %v2839_v55 = vpop.f32.mrb[110].mxu1  ;;  %v2508_v36 = vpop.f32.mrb[119].mxu0  ;;  %vm16053_vm8 = vnez %v16052_v39  ;;  %v16054_v53 = vld [vmem:[#allocation75_spill] sm:$0xff] }
 0x26a   : > { %v2994_v29 = vmul.f32 %v2839_v55, %v2486_v17  ;;  %v2841_v42 = vpop.f32.mrb[111].mxu1  ;;  %vm16055_vm13 = vnez %v16054_v53 }
 0x26b   : > { %v2995_v56 = vmul.f32 %v2841_v42, %v2488_v19  ;;  %3429 = vmatmul.mubr.bf16.gmra.mrb[224].mxu0 %v3060_v3 }
 0x26c   : > { %9122 = vmatmul.mubr.msk.bf16.gmra.mrb[216].mxu1 %vm16049_vm6, %v15777_v35  ;;  %3436 = vmatprep.mubr.bf16.mxu0 %v3063_v22  ;;  %v3066_v16 = vpack.c.bf16 %v2994_v29, %v13654_v0 }
 0x26d   : > { %9124 = vmatprep.mubr.msk.bf16.mxu1 %vm16051_vm7, %v15777_v35  ;;  %v3067_v47 = vpack.c.bf16 %v2995_v56, %v2993_v8 }
 0x26e   : > { %v2512_v63 = vpop.f32.mrb[120].mxu0 }
 0x26f   : > { %v2845_v37 = vpop.f32.mrb[112].mxu1  ;;  %v2514_v33 = vpop.f32.mrb[121].mxu0 }
 0x270   : > { %v13663_v25 = vmul.f32 %v2845_v37, %v2492_v60  ;;  %v2847_v43 = vpop.f32.mrb[113].mxu1  ;;  %v2516_v18 = vpop.f32.mrb[122].mxu0  ;;  %v16056_v60 = vld [vmem:[#allocation76_spill] sm:$0xff] }
 0x271   : > { %v2997_v27 = vmul.f32 %v2847_v43, %v2494_v11  ;;  %v2849_v26 = vpop.f32.mrb[114].mxu1  ;;  %v2518_v3 = vpop.f32.mrb[123].mxu0  ;;  %vm16057_vm14 = vnez %v16056_v60  ;;  %v16058_v11 = vld [vmem:[#allocation79_spill] sm:$0xff] }
 0x272   : > { %v2998_v2 = vmul.f32 %v2849_v26, %v2496_v48  ;;  %v2851_v15 = vpop.f32.mrb[115].mxu1  ;;  %vm16059_vm2 = vnez %v16058_v11 }
 0x273   : > { %v2999_v45 = vmul.f32 %v2851_v15, %v2498_v28  ;;  %3437 = vmatmul.mubr.bf16.gmra.mrb[228].mxu0 %v3062_v58 }
 0x274   : > { %9126 = vmatmul.mubr.msk.bf16.gmra.mrb[220].mxu1 %vm16053_vm8, %v15777_v35  ;;  %3444 = vmatprep.mubr.bf16.mxu0 %v3065_v14  ;;  %v3068_v32 = vpack.c.bf16 %v2998_v2, %v13663_v25 }
 0x275   : > { %9128 = vmatprep.mubr.msk.bf16.mxu1 %vm16055_vm13, %v15777_v35  ;;  %v3069_v44 = vpack.c.bf16 %v2999_v45, %v2997_v27 }
 0x276   : > { %v2522_v34 = vpop.f32.mrb[124].mxu0 }
 0x277   : > { %v2855_v17 = vpop.f32.mrb[116].mxu1  ;;  %v2524_v1 = vpop.f32.mrb[125].mxu0 }
 0x278   : > { %v3000_v12 = vmul.f32 %v2855_v17, %v2502_v46  ;;  %v2857_v19 = vpop.f32.mrb[117].mxu1  ;;  %v2526_v6 = vpop.f32.mrb[126].mxu0  ;;  %v16060_v46 = vld [vmem:[#allocation80_spill] sm:$0xff] }
 0x279   : > { %v3001_v59 = vmul.f32 %v2857_v19, %v2504_v10  ;;  %v2859_v40 = vpop.f32.mrb[118].mxu1  ;;  %v2528_v54 = vpop.f32.mrb[127].mxu0  ;;  %vm16061_vm15 = vnez %v16060_v46  ;;  %v16062_v10 = vld [vmem:[#allocation83_spill] sm:$0xff] }
 0x27a   : > { %v3002_v58 = vmul.f32 %v2859_v40, %v2506_v9  ;;  %v2861_v49 = vpop.f32.mrb[119].mxu1  ;;  %vm16063_vm12 = vnez %v16062_v10  ;;  %v16073_v40 = vld [vmem:[#allocation93_spill] sm:$0xff] }
 0x27b   : > { %v3003_v22 = vmul.f32 %v2861_v49, %v2508_v36  ;;  %3445 = vmatmul.mubr.bf16.gmra.mrb[232].mxu0 %v3064_v23  ;;  %vm16074_vm13 = vnez %v16073_v40 }
 0x27c   : > { %9130 = vmatmul.mubr.msk.bf16.gmra.mrb[224].mxu1 %vm16057_vm14, %v15777_v35  ;;  %3452 = vmatprep.mubr.bf16.mxu0 %v3067_v47  ;;  %v3070_v57 = vpack.c.bf16 %v3002_v58, %v3000_v12 }
 0x27d   : > { %9132 = vmatprep.mubr.msk.bf16.mxu1 %vm16059_vm2, %v15777_v35  ;;  %v3071_v41 = vpack.c.bf16 %v3003_v22, %v3001_v59  ;;  %v16071_v59 = vld [vmem:[#allocation92_spill] sm:$0xff] }
 0x27e   : > { %v13678_v4 = vpop.f32.mrb[128].mxu0 }
 0x27f   : > { %v2865_v48 = vpop.f32.mrb[120].mxu1  ;;  %v3240_v51 = vpop.f32.mrb[129].mxu0 }
 0x280   : > { %v3004_v62 = vmul.f32 %v2865_v48, %v2512_v63  ;;  %v2867_v28 = vpop.f32.mrb[121].mxu1  ;;  %v13680_v5 = vpop.f32.mrb[130].mxu0  ;;  %v16064_v63 = vld [vmem:[#allocation84_spill] sm:$0xff]  ;;  %v16077_v51 = vld [vmem:[#allocation11_spill] sm:$0xff] }
 0x281   : > { %v3005_v20 = vmul.f32 %v2867_v28, %v2514_v33  ;;  %v2869_v30 = vpop.f32.mrb[122].mxu1  ;;  %v3243_v31 = vpop.f32.mrb[131].mxu0  ;;  %vm16065_vm6 = vnez %v16064_v63  ;;  %v16066_v33 = vld [vmem:[#allocation87_spill] sm:$0xff]  ;;  %v16075_v48 = vld [vmem:[#allocation96_spill] sm:$0xff]  ;;  %vm16078_vm2 = vnez %v16077_v51 }
 0x282   : > { %v3006_v23 = vmul.f32 %v2869_v30, %v2516_v18  ;;  %v2871_v21 = vpop.f32.mrb[123].mxu1  ;;  %vm16067_vm7 = vnez %v16066_v33  ;;  %vm16076_vm14 = vnez %v16075_v48  ;;  %v16109_v63 = vld [vmem:[#allocation24_spill] sm:$0xff] }
 0x283   : > { %v3007_v14 = vmul.f32 %v2871_v21, %v2518_v3  ;;  %3453 = vmatmul.mubr.bf16.gmra.mrb[236].mxu0 %v3066_v16 }
 0x284   : > { %9134 = vmatmul.mubr.msk.bf16.gmra.mrb[228].mxu1 %vm16061_vm15, %v15777_v35  ;;  %3460 = vmatprep.mubr.bf16.mxu0 %v3069_v44  ;;  %v3072_v61 = vpack.c.bf16 %v3006_v23, %v3004_v62  ;;  %v16079_v62 = vld [vmem:[#allocation97_spill] sm:$0xff] }
 0x285   : > { %9136 = vmatprep.mubr.msk.bf16.mxu1 %vm16063_vm12, %v15777_v35  ;;  %v3073_v0 = vpack.c.bf16 %v3007_v14, %v3005_v20  ;;  %vm16080_vm15 = vnez %v16079_v62 }
 0x286   : > { %v13688_v24 = vpop.f32.mrb[132].mxu0 }
 0x287   : > { %v2875_v9 = vpop.f32.mrb[124].mxu1  ;;  %v3248_v8 = vpop.f32.mrb[133].mxu0 }
 0x288   : > { %v3008_v55 = vmul.f32 %v2875_v9, %v2522_v34  ;;  %v2877_v36 = vpop.f32.mrb[125].mxu1  ;;  %v13690_v29 = vpop.f32.mrb[134].mxu0  ;;  %v16086_v9 = vld [vmem:[#allocation102_spill] sm:$0xff] }
 0x289   : > { %v3009_v42 = vmul.f32 %v2877_v36, %v2524_v1  ;;  %v2879_v56 = vpop.f32.mrb[126].mxu1  ;;  %v3251_v13 = vpop.f32.mrb[135].mxu0 }
 0x28a   : > { %v3010_v16 = vmul.f32 %v2879_v56, %v2526_v6  ;;  %v2881_v52 = vpop.f32.mrb[127].mxu1 }
 0x28b   : > { %v3011_v47 = vmul.f32 %v2881_v52, %v2528_v54  ;;  %3461 = vmatmul.mubr.bf16.gmra.mrb[240].mxu0 %v3068_v32  ;;  %v16069_v32 = vld [vmem:[#allocation89_spill] sm:$0xff] }
 0x28c   : > { %9138 = vmatmul.mubr.msk.bf16.gmra.mrb[232].mxu1 %vm16065_vm6, %v15777_v35  ;;  %3468 = vmatprep.mubr.bf16.mxu0 %v3071_v41  ;;  %v3074_v37 = vpack.c.bf16 %v3010_v16, %v3008_v55  ;;  %vm16070_vm8 = vnez %v16069_v32 }
 0x28d   : > { %9140 = vmatprep.mubr.msk.bf16.mxu1 %vm16067_vm7, %v15777_v35  ;;  %v3075_v25 = vpack.c.bf16 %v3011_v47, %v3009_v42  ;;  %vm16087_vm7 = vnez %v16086_v9  ;;  %v16088_v47 = vld [vmem:[#allocation14_spill] sm:$0xff] }
 0x28e   : > { %v13698_v43 = vpop.f32.mrb[136].mxu0  ;;  %v16105_v9 = vld [vmem:[#allocation22_spill] sm:$0xff] }
 0x28f   : > { %v13700_v18 = vpop.f32.mrb[128].mxu1  ;;  %v3256_v27 = vpop.f32.mrb[137].mxu0 }
 0x290   : > { %v3529_v26 = vpop.f32.mrb[129].mxu1  ;;  %v13702_v3 = vpop.f32.mrb[138].mxu0 }
 0x291   : > { %v13704_v2 = vpop.f32.mrb[130].mxu1  ;;  %v3259_v15 = vpop.f32.mrb[139].mxu0 }
 0x292   : > { %v3532_v45 = vpop.f32.mrb[131].mxu1 }
 0x293   : > { %3469 = vmatmul.mubr.bf16.gmra.mrb[244].mxu0 %v3070_v57 }
 0x294   : > { %9142 = vmatmul.mubr.msk.bf16.gmra.mrb[236].mxu1 %vm13016_vm10, %v15777_v35  ;;  %3476 = vmatprep.mubr.bf16.mxu0 %v3073_v0  ;;  %vm16072_vm10 = vnez %v16071_v59  ;;  %v16084_v0 = vld [vmem:[#allocation13_spill] sm:$0xff] }
 0x295   : > { %9144 = vmatprep.mubr.msk.bf16.mxu1 %vm16070_vm8, %v15777_v35  ;;  %vm16085_vm6 = vnez %v16084_v0  ;;  %vm4146_vm8 = vcmask 261120  }
 0x296   : > { %v13712_v53 = vpop.f32.mrb[140].mxu0 }
 0x297   : > { %v13714_v44 = vpop.f32.mrb[132].mxu1  ;;  %v3264_v34 = vpop.f32.mrb[141].mxu0 }
 0x298   : > { %v3537_v17 = vpop.f32.mrb[133].mxu1  ;;  %v13716_v1 = vpop.f32.mrb[142].mxu0  ;;  %v16093_v34 = vld [vmem:[#allocation16_spill] sm:$0xff] }
 0x299   : > { %v13718_v12 = vpop.f32.mrb[134].mxu1  ;;  %v3267_v19 = vpop.f32.mrb[143].mxu0  ;;  %v16095_v17 = vld [vmem:[#allocation17_spill] sm:$0xff] }
 0x29a   : > { %v3540_v6 = vpop.f32.mrb[135].mxu1 }
 0x29b   : > { %3477 = vmatmul.mubr.bf16.gmra.mrb[248].mxu0 %v3072_v61  ;;  %v16081_v61 = vld [vmem:[#allocation12_spill] sm:$0xff] }
 0x29c   : > { %9146 = vmatmul.mubr.msk.bf16.gmra.mrb[240].mxu1 %vm16072_vm10, %v15777_v35  ;;  %3484 = vmatprep.mubr.bf16.mxu0 %v3075_v25  ;;  %vm16082_vm12 = vnez %v16081_v61 }
 0x29d   : > { %9148 = vmatprep.mubr.msk.bf16.mxu1 %vm16074_vm13, %v15777_v35  ;;  %vm16096_vm13 = vnez %v16095_v17 }
 0x29e   : > { %v13726_v54 = vpop.f32.mrb[144].mxu0 }
 0x29f   : > { %v13728_v58 = vpop.f32.mrb[136].mxu1  ;;  %v3272_v49 = vpop.f32.mrb[145].mxu0 }
 0x2a0   : > { %v3545_v22 = vpop.f32.mrb[137].mxu1  ;;  %v13730_v60 = vpop.f32.mrb[146].mxu0 }
 0x2a1   : > { %v13732_v57 = vpop.f32.mrb[138].mxu1  ;;  %v3275_v11 = vpop.f32.mrb[147].mxu0 }
 0x2a2   : > { %v3548_v41 = vpop.f32.mrb[139].mxu1  ;;  %v16097_v11 = vld [vmem:[#allocation18_spill] sm:$0xff] }
 0x2a3   : > { %3485 = vmatmul.mubr.bf16.gmra.mrb[252].mxu0 %v3074_v37  ;;  %v16091_v37 = vld [vmem:[#allocation15_spill] sm:$0xff] }
 0x2a4   : > { %9150 = vmatmul.mubr.msk.bf16.gmra.mrb[244].mxu1 %vm16076_vm14, %v15777_v35  ;;  %9160 = vmatprep.mubr.msk.bf16.mxu0 %vm16078_vm2, %v15777_v35  ;;  %vm16092_vm10 = vnez %v16091_v37  ;;  %vm16098_vm14 = vnez %v16097_v11  ;;  %v16111_v37 = vld [vmem:[#allocation25_spill] sm:$0xff] }
 0x2a5   : > { %9152 = vmatprep.mubr.msk.bf16.mxu1 %vm16080_vm15, %v15777_v35 }
 0x2a6   : > { %v13743_v28 = vpop.f32.mrb[148].mxu0 }
 0x2a7   : > { %v13745_v20 = vpop.f32.mrb[140].mxu1  ;;  %v3280_v30 = vpop.f32.mrb[149].mxu0 }
 0x2a8   : > { %v3553_v31 = vpop.f32.mrb[141].mxu1  ;;  %v13747_v23 = vpop.f32.mrb[150].mxu0 }
 0x2a9   : > { %v13749_v21 = vpop.f32.mrb[142].mxu1  ;;  %v3283_v14 = vpop.f32.mrb[151].mxu0  ;;  %v16101_v31 = vld [vmem:[#allocation20_spill] sm:$0xff] }
 0x2aa   : > { %v3556_v46 = vpop.f32.mrb[143].mxu1  ;;  %vm16102_vm15 = vnez %v16101_v31 }
 0x2ab   : > { %9162 = vmatmul.mubr.msk.bf16.vlgmr.msra.gmra.mrb[0].mxu0 %vm16082_vm12, %v15777_v35 }
 0x2ac   : > { %9154 = vmatmul.mubr.msk.bf16.gmra.mrb[248].mxu1 %vm13190_vm3, %v15777_v35  ;;  %9164 = vmatprep.mubr.msk.bf16.mxu0 %vm16085_vm6, %v15777_v35  ;;  %vm16089_vm3 = vnez %v16088_v47  ;;  %vm16106_vm6 = vnez %v16105_v9 }
 0x2ad   : > { %9156 = vmatprep.mubr.msk.bf16.mxu1 %vm16087_vm7, %v15777_v35 }
 0x2ae   : > { %v3286_v8 = vpop.f32.mrb[152].mxu0 }
 0x2af   : > { %v13763_v55 = vpop.f32.mrb[144].mxu1  ;;  %v3288_v36 = vpop.f32.mrb[153].mxu0 }
 0x2b0   : > { %v3561_v42 = vpop.f32.mrb[145].mxu1  ;;  %v3289_v56 = vpop.f32.mrb[154].mxu0 }
 0x2b1   : > { %v13765_v13 = vpop.f32.mrb[146].mxu1  ;;  %v3291_v16 = vpop.f32.mrb[155].mxu0 }
 0x2b2   : > { %v3564_v52 = vpop.f32.mrb[147].mxu1 }
 0x2b3   : > { %9166 = vmatmul.mubr.msk.bf16.gmra.mrb[4].mxu0 %vm16089_vm3, %v15777_v35  ;;  %vm16110_vm3 = vnez %v16109_v63  ;;  %v4788_v63 = vld [vmem:[%s15352_s6] sm:$0xff] }
 0x2b4   : > { %9158 = vmatmul.mubr.msk.bf16.gmra.mrb[252].mxu1 %vm13244_vm11, %v15777_v35  ;;  %9168 = vmatprep.mubr.msk.bf16.mxu0 %vm16092_vm10, %v15777_v35  ;;  %vm16094_vm11 = vnez %v16093_v34  ;;  %vm16112_vm10 = vnez %v16111_v37  ;;  %v4789_v37 = vld [vmem:[%s15352_s6 + $0x8] sm:$0xff] }
 0x2b5   : > { %10248 = vmatprep.mubr.msk.f32.mxu1 %vm4146_vm8, %v13678_v4 }
 0x2b6   : > { %v3294_v33 = vpop.f32.mrb[156].mxu0 }
 0x2b7   : > { %v13778_v25 = vpop.f32.mrb[148].mxu1  ;;  %v3296_v27 = vpop.f32.mrb[157].mxu0 }
 0x2b8   : > { %v3569_v26 = vpop.f32.mrb[149].mxu1  ;;  %v3297_v15 = vpop.f32.mrb[158].mxu0 }
 0x2b9   : > { %v13780_v45 = vpop.f32.mrb[150].mxu1  ;;  %v3299_v39 = vpop.f32.mrb[159].mxu0 }
 0x2ba   : > { %v3572_v32 = vpop.f32.mrb[151].mxu1 }
 0x2bb   : > { %9170 = vmatmul.mubr.msk.bf16.gmra.mrb[8].mxu0 %vm16094_vm11, %v15777_v35 }
 0x2bc   : > { %10249 = vmatmul.mubr.msk.f32.vlgmr.msra.gmra.mrb[0].mxu1 %vm4146_vm8, %v13680_v5  ;;  %9172 = vmatprep.mubr.msk.bf16.mxu0 %vm16096_vm13, %v15777_v35 }
 0x2bd   : > { %10251 = vmatprep.mubr.msk.f32.mxu1 %vm4146_vm8, %v13688_v24  ;;  %v16099_v24 = vld [vmem:[#allocation19_spill] sm:$0xff] }
 0x2be   : > { %v3302_v4 = vpop.f32.mrb[160].mxu0  ;;  %vm16100_vm2 = vnez %v16099_v24 }
 0x2bf   : > { %v13792_v19 = vpop.f32.mrb[152].mxu1  ;;  %v3304_v6 = vpop.f32.mrb[161].mxu0 }
 0x2c0   : > { %v3577_v59 = vpop.f32.mrb[153].mxu1  ;;  %10252 = vmatmul.mubr.msk.f32.gmra.mrb[2].mxu1 %vm4146_vm8, %v13690_v29  ;;  %v3305_v40 = vpop.f32.mrb[162].mxu0  ;;  %v16115_v6 = vld [vmem:[#allocation27_spill] sm:$0xff] }
 0x2c1   : > { %v13796_v49 = vpop.f32.mrb[154].mxu1  ;;  %10254 = vmatprep.mubr.msk.f32.mxu1 %vm4146_vm8, %v13698_v43  ;;  %v3307_v5 = vpop.f32.mrb[163].mxu0  ;;  %vm16116_vm13 = vnez %v16115_v6 }
 0x2c2   : > { %v3580_v22 = vpop.f32.mrb[155].mxu1 }
 0x2c3   : > { %9174 = vmatmul.mubr.msk.bf16.gmra.mrb[12].mxu0 %vm16098_vm14, %v15777_v35 }
 0x2c4   : > { %10255 = vmatmul.mubr.msk.f32.gmra.mrb[4].mxu1 %vm4146_vm8, %v13702_v3  ;;  %9176 = vmatprep.mubr.msk.bf16.mxu0 %vm16100_vm2, %v15777_v35 }
 0x2c5   : > { %10257 = vmatprep.mubr.msk.f32.mxu1 %vm4146_vm8, %v13712_v53  ;;  %v16103_v53 = vld [vmem:[#allocation21_spill] sm:$0xff] }
 0x2c6   : > { %v3310_v29 = vpop.f32.mrb[164].mxu0  ;;  %vm16104_vm12 = vnez %v16103_v53 }
 0x2c7   : > { %v13810_v41 = vpop.f32.mrb[156].mxu1  ;;  %v3312_v43 = vpop.f32.mrb[165].mxu0 }
 0x2c8   : > { %v3585_v48 = vpop.f32.mrb[157].mxu1  ;;  %10258 = vmatmul.mubr.msk.f32.gmra.mrb[6].mxu1 %vm4146_vm8, %v13716_v1  ;;  %v3313_v51 = vpop.f32.mrb[166].mxu0 }
 0x2c9   : > { %v13814_v62 = vpop.f32.mrb[158].mxu1  ;;  %10260 = vmatprep.mubr.msk.f32.mxu1 %vm4146_vm8, %v13726_v54  ;;  %v3315_v3 = vpop.f32.mrb[167].mxu0  ;;  %v16117_v48 = vld [vmem:[#allocation28_spill] sm:$0xff] }
 0x2ca   : > { %v3588_v30 = vpop.f32.mrb[159].mxu1  ;;  %vm16118_vm14 = vnez %v16117_v48  ;;  %v16129_v48 = vld [vmem:[#allocation34_spill] sm:$0xff] }
 0x2cb   : > { %9178 = vmatmul.mubr.msk.bf16.gmra.mrb[16].mxu0 %vm16102_vm15, %v15777_v35 }
 0x2cc   : > { %10261 = vmatmul.mubr.msk.f32.gmra.mrb[8].mxu1 %vm4146_vm8, %v13730_v60  ;;  %9180 = vmatprep.mubr.msk.bf16.mxu0 %vm16104_vm12, %v15777_v35 }
 0x2cd   : > { %10263 = vmatprep.mubr.msk.f32.mxu1 %vm4146_vm8, %v13743_v28  ;;  %v16107_v28 = vld [vmem:[#allocation23_spill] sm:$0xff] }
 0x2ce   : > { %v3318_v1 = vpop.f32.mrb[168].mxu0  ;;  %vm16108_vm7 = vnez %v16107_v28 }
 0x2cf   : > { %v13828_v14 = vpop.f32.mrb[160].mxu1  ;;  %v3320_v54 = vpop.f32.mrb[169].mxu0 }
 0x2d0   : > { %v3593_v46 = vpop.f32.mrb[161].mxu1  ;;  %10264 = vmatmul.mubr.msk.f32.gmra.mrb[10].mxu1 %vm4146_vm8, %v13747_v23  ;;  %v3321_v61 = vpop.f32.mrb[170].mxu0 }
 0x2d1   : > { %v13832_v10 = vpop.f32.mrb[162].mxu1  ;;  %10266 = vmatprep.mubr.msk.f32.mxu1 %vm4146_vm8, %v3286_v8  ;;  %v3323_v60 = vpop.f32.mrb[171].mxu0 }
 0x2d2   : > { %v3596_v0 = vpop.f32.mrb[163].mxu1  ;;  %v16121_v60 = vld [vmem:[#allocation30_spill] sm:$0xff] }
 0x2d3   : > { %9182 = vmatmul.mubr.msk.bf16.gmra.mrb[20].mxu0 %vm16106_vm6, %v15777_v35  ;;  %vm16122_vm15 = vnez %v16121_v60  ;;  %v16123_v0 = vld [vmem:[#allocation31_spill] sm:$0xff] }
 0x2d4   : > { %10267 = vmatmul.mubr.msk.f32.gmra.mrb[12].mxu1 %vm4146_vm8, %v3289_v56  ;;  %9184 = vmatprep.mubr.msk.bf16.mxu0 %vm16108_vm7, %v15777_v35  ;;  %vm16124_vm12 = vnez %v16123_v0 }
 0x2d5   : > { %10269 = vmatprep.mubr.msk.f32.mxu1 %vm4146_vm8, %v3294_v33 }
 0x2d6   : > { %v3326_v23 = vpop.f32.mrb[172].mxu0 }
 0x2d7   : > { %v13843_v36 = vpop.f32.mrb[164].mxu1  ;;  %v3328_v42 = vpop.f32.mrb[173].mxu0 }
 0x2d8   : > { %v3601_v16 = vpop.f32.mrb[165].mxu1  ;;  %10270 = vmatmul.mubr.msk.f32.gmra.mrb[14].mxu1 %vm4146_vm8, %v3297_v15  ;;  %v3329_v8 = vpop.f32.mrb[174].mxu0 }
 0x2d9   : > { %v13846_v52 = vpop.f32.mrb[166].mxu1  ;;  %10272 = vmatprep.mubr.msk.f32.mxu1 %vm4146_vm8, %v3302_v4  ;;  %v3331_v47 = vpop.f32.mrb[175].mxu0  ;;  %v16113_v4 = vld [vmem:[#allocation26_spill] sm:$0xff] }
 0x2da   : > { %v3604_v56 = vpop.f32.mrb[167].mxu1  ;;  %vm16114_vm11 = vnez %v16113_v4 }
 0x2db   : > { %9186 = vmatmul.mubr.msk.bf16.gmra.mrb[24].mxu0 %vm16110_vm3, %v15777_v35  ;;  %vm16130_vm3 = vnez %v16129_v48  ;;  %v16141_v48 = vld [vmem:[#allocation45_spill] sm:$0xff] }
 0x2dc   : > { %10273 = vmatmul.mubr.msk.f32.gmra.mrb[16].mxu1 %vm4146_vm8, %v3305_v40  ;;  %9188 = vmatprep.mubr.msk.bf16.mxu0 %vm16112_vm10, %v15777_v35 }
 0x2dd   : > { %10275 = vmatprep.mubr.msk.f32.mxu1 %vm4146_vm8, %v3310_v29 }
 0x2de   : > { %v3334_v33 = vpop.f32.mrb[176].mxu0 }
 0x2df   : > { %v13857_v27 = vpop.f32.mrb[168].mxu1  ;;  %v3336_v26 = vpop.f32.mrb[177].mxu0 }
 0x2e0   : > { %v3609_v15 = vpop.f32.mrb[169].mxu1  ;;  %10276 = vmatmul.mubr.msk.f32.gmra.mrb[18].mxu1 %vm4146_vm8, %v3313_v51  ;;  %v3337_v39 = vpop.f32.mrb[178].mxu0  ;;  %v16119_v51 = vld [vmem:[#allocation29_spill] sm:$0xff]  ;;  %v10904_v26 = vpack.c.bf16 %v4789_v37, %v4788_v63 }
 0x2e1   : > { %v13860_v32 = vpop.f32.mrb[170].mxu1  ;;  %10278 = vmatprep.mubr.msk.f32.mxu1 %vm4146_vm8, %v3318_v1  ;;  %v3339_v34 = vpop.f32.mrb[179].mxu0  ;;  %vm16120_vm2 = vnez %v16119_v51  ;;  %v16127_v15 = vld [vmem:[#allocation33_spill] sm:$0xff]  ;;  %v16131_v51 = vld [vmem:[#allocation36_spill] sm:$0xff] }
 0x2e2   : > { %v3612_v17 = vpop.f32.mrb[171].mxu1  ;;  %vm16128_vm7 = vnez %v16127_v15  ;;  %10905 = vmatprep.subr.bf16.mxu1 %v10904_v26  ;;  %v4790_v34 = vld [vmem:[%s15352_s6 + $0x10] sm:$0xff]  ;;  %vm16132_vm10 = vnez %v16131_v51  ;;  %v16137_v15 = vld [vmem:[#allocation41_spill] sm:$0xff] }
 0x2e3   : > { %9190 = vmatmul.mubr.msk.bf16.gmra.mrb[28].mxu0 %vm16114_vm11, %v15777_v35  ;;  %10907 = vmatpush3.bf16.msra.mxu1 %v10904_v26  ;;  %v4791_v17 = vld [vmem:[%s15352_s6 + $0x18] sm:$0xff] }
 0x2e4   : > { %10279 = vmatmul.mubr.msk.f32.gmra.mrb[20].mxu1 %vm4146_vm8, %v3321_v61  ;;  %9192 = vmatprep.mubr.msk.bf16.mxu0 %vm16116_vm13, %v15777_v35  ;;  %v16143_v51 = vld [vmem:[#allocation49_spill] sm:$0xff] }
 0x2e5   : > { %10281 = vmatprep.mubr.msk.f32.mxu1 %vm4146_vm8, %v3326_v23 }
 0x2e6   : > { %v3342_v59 = vpop.f32.mrb[180].mxu0 }
 0x2e7   : > { %v13871_v40 = vpop.f32.mrb[172].mxu1  ;;  %v3344_v5 = vpop.f32.mrb[181].mxu0 }
 0x2e8   : > { %v3617_v22 = vpop.f32.mrb[173].mxu1  ;;  %10282 = vmatmul.mubr.msk.f32.gmra.mrb[22].mxu1 %vm4146_vm8, %v3329_v8  ;;  %v3345_v11 = vpop.f32.mrb[182].mxu0 }
 0x2e9   : > { %v13874_v24 = vpop.f32.mrb[174].mxu1  ;;  %10284 = vmatprep.mubr.msk.f32.mxu1 %vm4146_vm8, %v3334_v33  ;;  %v3347_v29 = vpop.f32.mrb[183].mxu0  ;;  %v16125_v33 = vld [vmem:[#allocation32_spill] sm:$0xff] }
 0x2ea   : > { %v3620_v43 = vpop.f32.mrb[175].mxu1  ;;  %vm16126_vm6 = vnez %v16125_v33 }
 0x2eb   : > { %9194 = vmatmul.mubr.msk.bf16.gmra.mrb[32].mxu0 %vm16118_vm14, %v15777_v35  ;;  %vm16138_vm14 = vnez %v16137_v15 }
 0x2ec   : > { %10285 = vmatmul.mubr.msk.f32.gmra.mrb[24].mxu1 %vm4146_vm8, %v3337_v39  ;;  %9196 = vmatprep.mubr.msk.bf16.mxu0 %vm16120_vm2, %v15777_v35 }
 0x2ed   : > { %10287 = vmatprep.mubr.msk.f32.mxu1 %vm4146_vm8, %v3342_v59  ;;  %v10908_v59 = vpack.c.bf16 %v4791_v17, %v4790_v34 }
 0x2ee   : > { %v3350_v3 = vpop.f32.mrb[184].mxu0 }
 0x2ef   : > { %v13885_v30 = vpop.f32.mrb[176].mxu1  ;;  %v3352_v31 = vpop.f32.mrb[185].mxu0  ;;  %10909 = vmatprep.subr.bf16.mxu1 %v10908_v59 }
 0x2f0   : > { %v3625_v53 = vpop.f32.mrb[177].mxu1  ;;  %10288 = vmatmul.mubr.msk.f32.gmra.mrb[26].mxu1 %vm4146_vm8, %v3345_v11  ;;  %v3353_v1 = vpop.f32.mrb[186].mxu0 }
 0x2f1   : > { %v13888_v54 = vpop.f32.mrb[178].mxu1  ;;  %10290 = vmatprep.mubr.msk.f32.mxu1 %vm4146_vm8, %v3350_v3  ;;  %v3355_v46 = vpop.f32.mrb[187].mxu0  ;;  %10911 = vmatpush3.bf16.msra.mxu1 %v10908_v59 }
 0x2f2   : > { %v3628_v61 = vpop.f32.mrb[179].mxu1 }
 0x2f3   : > { %9198 = vmatmul.mubr.msk.bf16.gmra.mrb[36].mxu0 %vm16122_vm15, %v15777_v35  ;;  %vm16142_vm15 = vnez %v16141_v48 }
 0x2f4   : > { %10291 = vmatmul.mubr.msk.f32.gmra.mrb[28].mxu1 %vm4146_vm8, %v3353_v1  ;;  %9200 = vmatprep.mubr.msk.bf16.mxu0 %vm16124_vm12, %v15777_v35  ;;  %vm16144_vm12 = vnez %v16143_v51 }
 0x2f6   : > { %v3358_v9 = vpop.f32.mrb[188].mxu0 }
 0x2f7   : > { %v13898_v28 = vpop.f32.mrb[180].mxu1  ;;  %v3360_v23 = vpop.f32.mrb[189].mxu0  ;;  %10293 = vmatprep.mubr.msk.f32.mxu1 %vm4146_vm8, %v3358_v9  ;;  %v16133_v9 = vld [vmem:[#allocation37_spill] sm:$0xff] }
 0x2f8   : > { %v3633_v42 = vpop.f32.mrb[181].mxu1  ;;  %v3361_v16 = vpop.f32.mrb[190].mxu0  ;;  %vm16134_vm11 = vnez %v16133_v9  ;;  %v16135_v23 = vld [vmem:[#allocation40_spill] sm:$0xff] }
 0x2f9   : > { %v13901_v8 = vpop.f32.mrb[182].mxu1  ;;  %v3363_v47 = vpop.f32.mrb[191].mxu0  ;;  %10294 = vmatmul.mubr.msk.f32.gmra.mrb[30].mxu1 %vm4146_vm8, %v3361_v16  ;;  %vm16136_vm13 = vnez %v16135_v23 }
 0x2fa   : > { %v3636_v56 = vpop.f32.mrb[183].mxu1 }
 0x2fb   : > { %9202 = vmatmul.mubr.msk.bf16.gmra.mrb[40].mxu0 %vm16126_vm6, %v15777_v35 }
 0x2fc   : > { %9204 = vmatprep.mubr.msk.bf16.mxu0 %vm16128_vm7, %v15777_v35 }
 0x2fe   : > { %v3366_v39 = vpop.f32.mrb[192].mxu0 }
 0x2ff   : > { %v13922_v4 = vpop.f32.mrb[184].mxu1  ;;  %v3368_v6 = vpop.f32.mrb[193].mxu0  ;;  %10296 = vmatprep.mubr.msk.f32.mxu1 %vm4146_vm8, %v3366_v39  ;;  %v16139_v39 = vld [vmem:[#allocation44_spill] sm:$0xff] }
 0x300   : > { %v3641_v5 = vpop.f32.mrb[185].mxu1  ;;  %v3369_v22 = vpop.f32.mrb[194].mxu0  ;;  %vm16140_vm2 = vnez %v16139_v39 }
 0x301   : > { %v13925_v11 = vpop.f32.mrb[186].mxu1  ;;  %v3371_v29 = vpop.f32.mrb[195].mxu0  ;;  %10297 = vmatmul.mubr.msk.f32.gmra.mrb[32].mxu1 %vm4146_vm8, %v3369_v22 }
 0x302   : > { %v3644_v43 = vpop.f32.mrb[187].mxu1 }
 0x303   : > { %9206 = vmatmul.mubr.msk.bf16.gmra.mrb[44].mxu0 %vm16130_vm3, %v15777_v35 }
 0x304   : > { %9208 = vmatprep.mubr.msk.bf16.mxu0 %vm16132_vm10, %v15777_v35 }
 0x306   : > { %v3374_v3 = vpop.f32.mrb[196].mxu0 }
 0x307   : > { %v13934_v31 = vpop.f32.mrb[188].mxu1  ;;  %v3376_v53 = vpop.f32.mrb[197].mxu0  ;;  %10299 = vmatprep.mubr.msk.f32.mxu1 %vm4146_vm8, %v3374_v3 }
 0x308   : > { %v3649_v1 = vpop.f32.mrb[189].mxu1  ;;  %v3377_v46 = vpop.f32.mrb[198].mxu0 }
 0x309   : > { %v13937_v61 = vpop.f32.mrb[190].mxu1  ;;  %v3379_v60 = vpop.f32.mrb[199].mxu0  ;;  %10300 = vmatmul.mubr.msk.f32.gmra.mrb[34].mxu1 %vm4146_vm8, %v3377_v46 }
 0x30a   : > { %v3652_v0 = vpop.f32.mrb[191].mxu1 }
 0x30b   : > { %9210 = vmatmul.mubr.msk.bf16.gmra.mrb[48].mxu0 %vm16134_vm11, %v15777_v35 }
 0x30c   : > { %9212 = vmatprep.mubr.msk.bf16.mxu0 %vm16136_vm13, %v15777_v35 }
 0x30e   : > { %v3382_v42 = vpop.f32.mrb[200].mxu0 }
 0x30f   : > { %v13946_v16 = vpop.f32.mrb[192].mxu1  ;;  %v3384_v47 = vpop.f32.mrb[201].mxu0  ;;  %10302 = vmatprep.mubr.msk.f32.mxu1 %vm4146_vm8, %v3382_v42  ;;  %v16145_v42 = vld [vmem:[#allocation50_spill] sm:$0xff] }
 0x310   : > { %v3657_v56 = vpop.f32.mrb[193].mxu1  ;;  %v3385_v63 = vpop.f32.mrb[202].mxu0  ;;  %vm16146_vm6 = vnez %v16145_v42  ;;  %v16147_v47 = vld [vmem:[#allocation53_spill] sm:$0xff] }
 0x311   : > { %v13949_v37 = vpop.f32.mrb[194].mxu1  ;;  %v3387_v33 = vpop.f32.mrb[203].mxu0  ;;  %10303 = vmatmul.mubr.msk.f32.gmra.mrb[36].mxu1 %vm4146_vm8, %v3385_v63  ;;  %vm16148_vm7 = vnez %v16147_v47 }
 0x312   : > { %v3660_v26 = vpop.f32.mrb[195].mxu1 }
 0x313   : > { %9214 = vmatmul.mubr.msk.bf16.gmra.mrb[52].mxu0 %vm16138_vm14, %v15777_v35 }
 0x314   : > { %9216 = vmatprep.mubr.msk.bf16.mxu0 %vm16140_vm2, %v15777_v35 }
 0x316   : > { %v3390_v34 = vpop.f32.mrb[204].mxu0 }
 0x317   : > { %v13958_v17 = vpop.f32.mrb[196].mxu1  ;;  %v3392_v6 = vpop.f32.mrb[205].mxu0  ;;  %10305 = vmatprep.mubr.msk.f32.mxu1 %vm4146_vm8, %v3390_v34 }
 0x318   : > { %v3665_v59 = vpop.f32.mrb[197].mxu1  ;;  %v3393_v5 = vpop.f32.mrb[206].mxu0 }
 0x319   : > { %v13961_v22 = vpop.f32.mrb[198].mxu1  ;;  %v3395_v29 = vpop.f32.mrb[207].mxu0  ;;  %10306 = vmatmul.mubr.msk.f32.gmra.mrb[38].mxu1 %vm4146_vm8, %v3393_v5  ;;  %v16149_v59 = vld [vmem:[#allocation54_spill] sm:$0xff]  ;;  %v16151_v5 = vld [vmem:[#allocation57_spill] sm:$0xff] }
 0x31a   : > { %v3668_v43 = vpop.f32.mrb[199].mxu1  ;;  %vm16150_vm3 = vnez %v16149_v59  ;;  %vm16152_vm10 = vnez %v16151_v5  ;;  %v16157_v59 = vld [vmem:[#allocation62_spill] sm:$0xff]  ;;  %v16159_v5 = vld [vmem:[#allocation65_spill] sm:$0xff] }
 0x31b   : > { %9218 = vmatmul.mubr.msk.bf16.gmra.mrb[56].mxu0 %vm16142_vm15, %v15777_v35  ;;  %vm16158_vm14 = vnez %v16157_v59  ;;  %vm16160_vm2 = vnez %v16159_v5 }
 0x31c   : > { %9220 = vmatprep.mubr.msk.bf16.mxu0 %vm16144_vm12, %v15777_v35 }
 0x31e   : > { %v3398_v3 = vpop.f32.mrb[208].mxu0 }
 0x31f   : > { %v13970_v53 = vpop.f32.mrb[200].mxu1  ;;  %v3400_v1 = vpop.f32.mrb[209].mxu0  ;;  %10308 = vmatprep.mubr.msk.f32.mxu1 %vm4146_vm8, %v3398_v3 }
 0x320   : > { %v3673_v46 = vpop.f32.mrb[201].mxu1  ;;  %v3401_v60 = vpop.f32.mrb[210].mxu0 }
 0x321   : > { %v13973_v0 = vpop.f32.mrb[202].mxu1  ;;  %v3403_v9 = vpop.f32.mrb[211].mxu0  ;;  %10309 = vmatmul.mubr.msk.f32.gmra.mrb[40].mxu1 %vm4146_vm8, %v3401_v60 }
 0x322   : > { %v3676_v23 = vpop.f32.mrb[203].mxu1  ;;  %v16153_v9 = vld [vmem:[#allocation58_spill] sm:$0xff] }
 0x323   : > { %9222 = vmatmul.mubr.msk.bf16.gmra.mrb[60].mxu0 %vm16146_vm6, %v15777_v35  ;;  %vm16154_vm11 = vnez %v16153_v9  ;;  %v16155_v23 = vld [vmem:[#allocation61_spill] sm:$0xff] }
 0x324   : > { %9224 = vmatprep.mubr.msk.bf16.mxu0 %vm16148_vm7, %v15777_v35  ;;  %vm16156_vm13 = vnez %v16155_v23 }
 0x326   : > { %v3406_v56 = vpop.f32.mrb[212].mxu0 }
 0x327   : > { %v13982_v63 = vpop.f32.mrb[204].mxu1  ;;  %v3408_v33 = vpop.f32.mrb[213].mxu0  ;;  %10311 = vmatprep.mubr.msk.f32.mxu1 %vm4146_vm8, %v3406_v56 }
 0x328   : > { %v3681_v26 = vpop.f32.mrb[205].mxu1  ;;  %v3409_v15 = vpop.f32.mrb[214].mxu0 }
 0x329   : > { %v13985_v39 = vpop.f32.mrb[206].mxu1  ;;  %v3411_v34 = vpop.f32.mrb[215].mxu0  ;;  %10312 = vmatmul.mubr.msk.f32.gmra.mrb[42].mxu1 %vm4146_vm8, %v3409_v15 }
 0x32a   : > { %v3684_v6 = vpop.f32.mrb[207].mxu1 }
 0x32b   : > { %9226 = vmatmul.mubr.msk.bf16.gmra.mrb[64].mxu0 %vm16150_vm3, %v15777_v35 }
 0x32c   : > { %9228 = vmatprep.mubr.msk.bf16.mxu0 %vm16152_vm10, %v15777_v35 }
 0x32e   : > { %v3414_v29 = vpop.f32.mrb[216].mxu0 }
 0x32f   : > { %v13994_v43 = vpop.f32.mrb[208].mxu1  ;;  %v3416_v48 = vpop.f32.mrb[217].mxu0  ;;  %10314 = vmatprep.mubr.msk.f32.mxu1 %vm4146_vm8, %v3414_v29 }
 0x330   : > { %v3689_v51 = vpop.f32.mrb[209].mxu1  ;;  %v3417_v3 = vpop.f32.mrb[218].mxu0 }
 0x331   : > { %v13997_v1 = vpop.f32.mrb[210].mxu1  ;;  %v3419_v46 = vpop.f32.mrb[219].mxu0  ;;  %10315 = vmatmul.mubr.msk.f32.gmra.mrb[44].mxu1 %vm4146_vm8, %v3417_v3 }
 0x332   : > { %v3692_v60 = vpop.f32.mrb[211].mxu1 }
 0x333   : > { %9230 = vmatmul.mubr.msk.bf16.gmra.mrb[68].mxu0 %vm16154_vm11, %v15777_v35 }
 0x334   : > { %9232 = vmatprep.mubr.msk.bf16.mxu0 %vm16156_vm13, %v15777_v35 }
 0x336   : > { %v3422_v42 = vpop.f32.mrb[220].mxu0 }
 0x337   : > { %v14006_v47 = vpop.f32.mrb[212].mxu1  ;;  %v3424_v56 = vpop.f32.mrb[221].mxu0  ;;  %10317 = vmatprep.mubr.msk.f32.mxu1 %vm4146_vm8, %v3422_v42  ;;  %v16161_v42 = vld [vmem:[#allocation66_spill] sm:$0xff] }
 0x338   : > { %v3697_v33 = vpop.f32.mrb[213].mxu1  ;;  %v3425_v26 = vpop.f32.mrb[222].mxu0  ;;  %vm16162_vm15 = vnez %v16161_v42  ;;  %v16163_v56 = vld [vmem:[#allocation69_spill] sm:$0xff] }
 0x339   : > { %v14009_v15 = vpop.f32.mrb[214].mxu1  ;;  %v3427_v34 = vpop.f32.mrb[223].mxu0  ;;  %10318 = vmatmul.mubr.msk.f32.gmra.mrb[46].mxu1 %vm4146_vm8, %v3425_v26  ;;  %vm16164_vm12 = vnez %v16163_v56 }
 0x33a   : > { %v3700_v6 = vpop.f32.mrb[215].mxu1 }
 0x33b   : > { %9234 = vmatmul.mubr.msk.bf16.gmra.mrb[72].mxu0 %vm16158_vm14, %v15777_v35 }
 0x33c   : > { %9236 = vmatprep.mubr.msk.bf16.mxu0 %vm16160_vm2, %v15777_v35 }
 0x33e   : > { %v3430_v29 = vpop.f32.mrb[224].mxu0 }
 0x33f   : > { %v14018_v48 = vpop.f32.mrb[216].mxu1  ;;  %v3432_v51 = vpop.f32.mrb[225].mxu0  ;;  %10320 = vmatprep.mubr.msk.f32.mxu1 %vm4146_vm8, %v3430_v29 }
 0x340   : > { %v3705_v3 = vpop.f32.mrb[217].mxu1  ;;  %v3433_v46 = vpop.f32.mrb[226].mxu0 }
 0x341   : > { %v14021_v60 = vpop.f32.mrb[218].mxu1  ;;  %v3435_v9 = vpop.f32.mrb[227].mxu0  ;;  %10321 = vmatmul.mubr.msk.f32.gmra.mrb[48].mxu1 %vm4146_vm8, %v3433_v46  ;;  %v16165_v3 = vld [vmem:[#allocation70_spill] sm:$0xff]  ;;  %v16167_v46 = vld [vmem:[#allocation73_spill] sm:$0xff] }
 0x342   : > { %v3708_v23 = vpop.f32.mrb[219].mxu1  ;;  %vm16166_vm6 = vnez %v16165_v3  ;;  %vm16168_vm7 = vnez %v16167_v46 }
 0x343   : > { %9238 = vmatmul.mubr.msk.bf16.gmra.mrb[76].mxu0 %vm16162_vm15, %v15777_v35 }
 0x344   : > { %9240 = vmatprep.mubr.msk.bf16.mxu0 %vm16164_vm12, %v15777_v35 }
 0x346   : > { %v3438_v33 = vpop.f32.mrb[228].mxu0 }
 0x347   : > { %v14030_v26 = vpop.f32.mrb[220].mxu1  ;;  %v3440_v34 = vpop.f32.mrb[229].mxu0  ;;  %10323 = vmatprep.mubr.msk.f32.mxu1 %vm4146_vm8, %v3438_v33 }
 0x348   : > { %v3713_v6 = vpop.f32.mrb[221].mxu1  ;;  %v3441_v59 = vpop.f32.mrb[230].mxu0 }
 0x349   : > { %v14033_v5 = vpop.f32.mrb[222].mxu1  ;;  %v3443_v29 = vpop.f32.mrb[231].mxu0  ;;  %10324 = vmatmul.mubr.msk.f32.gmra.mrb[50].mxu1 %vm4146_vm8, %v3441_v59 }
 0x34a   : > { %v3716_v51 = vpop.f32.mrb[223].mxu1  ;;  %v16171_v29 = vld [vmem:[#allocation74_spill] sm:$0xff] }
 0x34b   : > { %9242 = vmatmul.mubr.msk.bf16.gmra.mrb[80].mxu0 %vm16166_vm6, %v15777_v35  ;;  %vm16172_vm3 = vnez %v16171_v29  ;;  %v16173_v51 = vld [vmem:[#allocation77_spill] sm:$0xff]  ;;  %v16177_v29 = vld [vmem:[#allocation78_spill] sm:$0xff] }
 0x34c   : > { %9244 = vmatprep.mubr.msk.bf16.mxu0 %vm16168_vm7, %v15777_v35  ;;  %vm16174_vm10 = vnez %v16173_v51  ;;  %vm16178_vm11 = vnez %v16177_v29  ;;  %v16179_v51 = vld [vmem:[#allocation81_spill] sm:$0xff]  ;;  %v16183_v29 = vld [vmem:[#allocation82_spill] sm:$0xff] }
 0x34d   : > { %vm16180_vm13 = vnez %v16179_v51  ;;  %vm16184_vm14 = vnez %v16183_v29  ;;  %v16185_v51 = vld [vmem:[#allocation85_spill] sm:$0xff]  ;;  %v16189_v29 = vld [vmem:[#allocation86_spill] sm:$0xff] }
 0x34e   : > { %v3446_v9 = vpop.f32.mrb[232].mxu0  ;;  %vm16186_vm2 = vnez %v16185_v51  ;;  %vm16190_vm15 = vnez %v16189_v29  ;;  %v16191_v51 = vld [vmem:[#allocation90_spill] sm:$0xff]  ;;  %v16195_v29 = vld [vmem:[#allocation91_spill] sm:$0xff] }
 0x34f   : > { %v14042_v23 = vpop.f32.mrb[224].mxu1  ;;  %v3448_v42 = vpop.f32.mrb[233].mxu0  ;;  %10326 = vmatprep.mubr.msk.f32.mxu1 %vm4146_vm8, %v3446_v9  ;;  %vm16192_vm12 = vnez %v16191_v51  ;;  %vm16196_vm6 = vnez %v16195_v29  ;;  %v16197_v51 = vld [vmem:[#allocation94_spill] sm:$0xff]  ;;  %v16201_v29 = vld [vmem:[#allocation95_spill] sm:$0xff] }
 0x350   : > { %16169 = vst [vmem:[#allocation35_spill] sm:$0xff] %v14042_v23  ;;  %v3721_v56 = vpop.f32.mrb[225].mxu1  ;;  %v3449_v33 = vpop.f32.mrb[234].mxu0  ;;  %vm16198_vm7 = vnez %v16197_v51  ;;  %v16203_v51 = vld [vmem:[#allocation98_spill] sm:$0xff]  ;;  %v16205_v23 = vld [vmem:[#allocation99_spill] sm:$0xff] }
 0x351   : > { %v14045_v34 = vpop.f32.mrb[226].mxu1  ;;  %v3451_v6 = vpop.f32.mrb[235].mxu0  ;;  %10327 = vmatmul.mubr.msk.f32.gmra.mrb[52].mxu1 %vm4146_vm8, %v3449_v33 }
 0x352   : > { %16170 = vst [vmem:[#allocation38_spill] sm:$0xff] %v14045_v34  ;;  %v3724_v59 = vpop.f32.mrb[227].mxu1 }
 0x353   : > { %9246 = vmatmul.mubr.msk.bf16.gmra.mrb[84].mxu0 %vm16172_vm3, %v15777_v35  ;;  %vm16202_vm3 = vnez %v16201_v29 }
 0x354   : > { %9248 = vmatprep.mubr.msk.bf16.mxu0 %vm16174_vm10, %v15777_v35  ;;  %vm16204_vm10 = vnez %v16203_v51  ;;  %v16207_v51 = vld [vmem:[#allocation100_spill] sm:$0xff] }
 0x356   : > { %v3454_v3 = vpop.f32.mrb[236].mxu0 }
 0x357   : > { %v14054_v46 = vpop.f32.mrb[228].mxu1  ;;  %v3456_v9 = vpop.f32.mrb[237].mxu0  ;;  %10329 = vmatprep.mubr.msk.f32.mxu1 %vm4146_vm8, %v3454_v3 }
 0x358   : > { %16175 = vst [vmem:[#allocation39_spill] sm:$0xff] %v14054_v46  ;;  %v3729_v42 = vpop.f32.mrb[229].mxu1  ;;  %v3457_v56 = vpop.f32.mrb[238].mxu0 }
 0x359   : > { %v14057_v6 = vpop.f32.mrb[230].mxu1  ;;  %v3459_v33 = vpop.f32.mrb[239].mxu0  ;;  %10330 = vmatmul.mubr.msk.f32.gmra.mrb[54].mxu1 %vm4146_vm8, %v3457_v56 }
 0x35a   : > { %16176 = vst [vmem:[#allocation42_spill] sm:$0xff] %v14057_v6  ;;  %v3732_v59 = vpop.f32.mrb[231].mxu1 }
 0x35b   : > { %9250 = vmatmul.mubr.msk.bf16.gmra.mrb[88].mxu0 %vm16178_vm11, %v15777_v35  ;;  %vm16206_vm11 = vnez %v16205_v23 }
 0x35c   : > { %9252 = vmatprep.mubr.msk.bf16.mxu0 %vm16180_vm13, %v15777_v35  ;;  %vm16208_vm13 = vnez %v16207_v51  ;;  %v16211_v51 = vld [vmem:[#allocation104_spill] sm:$0xff] }
 0x35e   : > { %v3462_v46 = vpop.f32.mrb[240].mxu0 }
 0x35f   : > { %v14066_v9 = vpop.f32.mrb[232].mxu1  ;;  %v3464_v3 = vpop.f32.mrb[241].mxu0  ;;  %10332 = vmatprep.mubr.msk.f32.mxu1 %vm4146_vm8, %v3462_v46 }
 0x360   : > { %16181 = vst [vmem:[#allocation43_spill] sm:$0xff] %v14066_v9  ;;  %v3737_v42 = vpop.f32.mrb[233].mxu1  ;;  %v3465_v6 = vpop.f32.mrb[242].mxu0 }
 0x361   : > { %v14069_v33 = vpop.f32.mrb[234].mxu1  ;;  %v3467_v56 = vpop.f32.mrb[243].mxu0  ;;  %10333 = vmatmul.mubr.msk.f32.gmra.mrb[56].mxu1 %vm4146_vm8, %v3465_v6 }
 0x362   : > { %16182 = vst [vmem:[#allocation46_spill] sm:$0xff] %v14069_v33  ;;  %v3740_v59 = vpop.f32.mrb[235].mxu1 }
 0x363   : > { %9254 = vmatmul.mubr.msk.bf16.gmra.mrb[92].mxu0 %vm16184_vm14, %v15777_v35 }
 0x364   : > { %9256 = vmatprep.mubr.msk.bf16.mxu0 %vm16186_vm2, %v15777_v35  ;;  %vm16212_vm2 = vnez %v16211_v51 }
 0x366   : > { %v3470_v9 = vpop.f32.mrb[244].mxu0 }
 0x367   : > { %v14078_v3 = vpop.f32.mrb[236].mxu1  ;;  %v3472_v46 = vpop.f32.mrb[245].mxu0  ;;  %10335 = vmatprep.mubr.msk.f32.mxu1 %vm4146_vm8, %v3470_v9 }
 0x368   : > { %16187 = vst [vmem:[#allocation47_spill] sm:$0xff] %v14078_v3  ;;  %v3745_v42 = vpop.f32.mrb[237].mxu1  ;;  %v3473_v33 = vpop.f32.mrb[246].mxu0 }
 0x369   : > { %v14081_v56 = vpop.f32.mrb[238].mxu1  ;;  %v3475_v6 = vpop.f32.mrb[247].mxu0  ;;  %10336 = vmatmul.mubr.msk.f32.gmra.mrb[58].mxu1 %vm4146_vm8, %v3473_v33 }
 0x36a   : > { %16188 = vst [vmem:[#allocation48_spill] sm:$0xff] %v14081_v56  ;;  %v3748_v59 = vpop.f32.mrb[239].mxu1 }
 0x36b   : > { %9258 = vmatmul.mubr.msk.bf16.gmra.mrb[96].mxu0 %vm16190_vm15, %v15777_v35 }
 0x36c   : > { %9260 = vmatprep.mubr.msk.bf16.mxu0 %vm16192_vm12, %v15777_v35 }
 0x36e   : > { %v3478_v3 = vpop.f32.mrb[248].mxu0 }
 0x36f   : > { %v14090_v46 = vpop.f32.mrb[240].mxu1  ;;  %v3480_v9 = vpop.f32.mrb[249].mxu0  ;;  %10338 = vmatprep.mubr.msk.f32.mxu1 %vm4146_vm8, %v3478_v3 }
 0x370   : > { %16193 = vst [vmem:[#allocation51_spill] sm:$0xff] %v14090_v46  ;;  %v3753_v42 = vpop.f32.mrb[241].mxu1  ;;  %v3481_v56 = vpop.f32.mrb[250].mxu0 }
 0x371   : > { %v14093_v6 = vpop.f32.mrb[242].mxu1  ;;  %v3483_v33 = vpop.f32.mrb[251].mxu0  ;;  %10339 = vmatmul.mubr.msk.f32.gmra.mrb[60].mxu1 %vm4146_vm8, %v3481_v56 }
 0x372   : > { %16194 = vst [vmem:[#allocation52_spill] sm:$0xff] %v14093_v6  ;;  %v3756_v59 = vpop.f32.mrb[243].mxu1 }
 0x373   : > { %9262 = vmatmul.mubr.msk.bf16.gmra.mrb[100].mxu0 %vm16196_vm6, %v15777_v35 }
 0x374   : > { %9264 = vmatprep.mubr.msk.bf16.mxu0 %vm16198_vm7, %v15777_v35 }
 0x376   : > { %v3486_v46 = vpop.f32.mrb[252].mxu0 }
 0x377   : > { %v14102_v9 = vpop.f32.mrb[244].mxu1  ;;  %v3488_v3 = vpop.f32.mrb[253].mxu0  ;;  %10341 = vmatprep.mubr.msk.f32.mxu1 %vm4146_vm8, %v3486_v46 }
 0x378   : > { %16199 = vst [vmem:[#allocation55_spill] sm:$0xff] %v14102_v9  ;;  %v3761_v42 = vpop.f32.mrb[245].mxu1  ;;  %v3489_v6 = vpop.f32.mrb[254].mxu0 }
 0x379   : > { %v14105_v33 = vpop.f32.mrb[246].mxu1  ;;  %v3491_v56 = vpop.f32.mrb[255].mxu0  ;;  %10342 = vmatmul.mubr.msk.f32.gmra.mrb[62].mxu1 %vm4146_vm8, %v3489_v6 }
 0x37a   : > { %16200 = vst [vmem:[#allocation56_spill] sm:$0xff] %v14105_v33  ;;  %v3764_v59 = vpop.f32.mrb[247].mxu1 }
 0x37b   : > { %9266 = vmatmul.mubr.msk.bf16.gmra.mrb[104].mxu0 %vm16202_vm3, %v15777_v35 }
 0x37c   : > { %9268 = vmatprep.mubr.msk.bf16.mxu0 %vm16204_vm10, %v15777_v35 }
 0x37e   : > { %v3816_v9 = vpop.f32.mrb[0].mxu0 }
 0x37f   : > { %v14114_v3 = vpop.f32.mrb[248].mxu1  ;;  %v4071_v46 = vmul.f32 %v3816_v9, %v13700_v18  ;;  %v3818_v42 = vpop.f32.mrb[1].mxu0 }
 0x380   : > { %v3769_v34 = vpop.f32.mrb[249].mxu1  ;;  %v3819_v33 = vpop.f32.mrb[2].mxu0 }
 0x381   : > { %v14117_v56 = vpop.f32.mrb[250].mxu1  ;;  %v4072_v6 = vmul.f32 %v3819_v33, %v13704_v2  ;;  %v3821_v59 = vpop.f32.mrb[3].mxu0  ;;  %10352 = vmatprep.mubr.msk.f32.mxu1 %vm4146_vm8, %v4071_v46 }
 0x382   : > { %v3772_v29 = vpop.f32.mrb[251].mxu1 }
 0x383   : > { %9270 = vmatmul.mubr.msk.bf16.gmra.mrb[108].mxu0 %vm16206_vm11, %v15777_v35  ;;  %10353 = vmatmul.mubr.msk.f32.vlgmr.msra.gmra.mrb[64].mxu1 %vm4146_vm8, %v4072_v6  ;;  %v16209_v29 = vld [vmem:[#allocation103_spill] sm:$0xff] }
 0x384   : > { %9272 = vmatprep.mubr.msk.bf16.mxu0 %vm16208_vm13, %v15777_v35  ;;  %vm16210_vm14 = vnez %v16209_v29  ;;  %v5449_v29 = vld [vmem:[%s15355_s9 + $0x8] sm:$0xff] }
 0x386   : > { %v3824_v18 = vpop.f32.mrb[4].mxu0 }
 0x387   : > { %v14128_v34 = vpop.f32.mrb[252].mxu1  ;;  %v4073_v9 = vmul.f32 %v3824_v18, %v13714_v44  ;;  %v3826_v2 = vpop.f32.mrb[5].mxu0 }
 0x388   : > { %v3777_v33 = vpop.f32.mrb[253].mxu1  ;;  %v3827_v42 = vpop.f32.mrb[6].mxu0 }
 0x389   : > { %v14131_v46 = vpop.f32.mrb[254].mxu1  ;;  %v4074_v59 = vmul.f32 %v3827_v42, %v13718_v12  ;;  %v3829_v23 = vpop.f32.mrb[7].mxu0  ;;  %10355 = vmatprep.mubr.msk.f32.mxu1 %vm4146_vm8, %v4073_v9 }
 0x38a   : > { %v3780_v6 = vpop.f32.mrb[255].mxu1 }
 0x38b   : > { %9274 = vmatmul.mubr.msk.bf16.gmra.mrb[112].mxu0 %vm16210_vm14, %v15777_v35  ;;  %10356 = vmatmul.mubr.msk.f32.gmra.mrb[66].mxu1 %vm4146_vm8, %v4074_v59 }
 0x38c   : > { %9276 = vmatprep.mubr.msk.bf16.mxu0 %vm16212_vm2, %v15777_v35 }
 0x38e   : > { %v3832_v44 = vpop.f32.mrb[8].mxu0 }
 0x38f   : > { %v4075_v18 = vmul.f32 %v3832_v44, %v13728_v58  ;;  %v14143_v2 = vpop.f32.mrb[0].mxu1  ;;  %v3834_v12 = vpop.f32.mrb[9].mxu0 }
 0x390   : > { %v14145_v33 = vpop.f32.mrb[1].mxu1  ;;  %v3835_v9 = vpop.f32.mrb[10].mxu0 }
 0x391   : > { %v4076_v42 = vmul.f32 %v3835_v9, %v13732_v57  ;;  %v3837_v23 = vpop.f32.mrb[11].mxu0  ;;  %10358 = vmatprep.mubr.msk.f32.mxu1 %vm4146_vm8, %v4075_v18 }
 0x393   : > { %v14149_v6 = vpop.f32.mrb[2].mxu1  ;;  %9278 = vmatmul.mubr.msk.bf16.gmra.mrb[116].mxu0 %vm13251_vm0, %v15777_v35  ;;  %10359 = vmatmul.mubr.msk.f32.gmra.mrb[68].mxu1 %vm4146_vm8, %v4076_v42  ;;  %v5448_v42 = vld [vmem:[%s15355_s9] sm:$0xff] }
 0x394   : > { %v14155_v58 = vpop.f32.mrb[3].mxu1  ;;  %9280 = vmatprep.mubr.msk.bf16.mxu0 %vm13259_vm4, %v15777_v35  ;;  %vm5456_vm4 = vcmask 523264  }
 0x395   : > { %vm15148_vm0 = vmpackc.low %vm5456_vm4, %vm5456_vm4 }
 0x396   : > { %v3840_v51 = vpop.f32.mrb[12].mxu0 }
 0x397   : > { %v4077_v57 = vmul.f32 %v3840_v51, %v13745_v20  ;;  %v14161_v44 = vpop.f32.mrb[4].mxu1  ;;  %v3842_v18 = vpop.f32.mrb[13].mxu0  ;;  %v10912_v20 = vpack.c.bf16 %v5449_v29, %v5448_v42 }
 0x398   : > { %v14163_v12 = vpop.f32.mrb[5].mxu1  ;;  %v3843_v9 = vpop.f32.mrb[14].mxu0 }
 0x399   : > { %v4078_v23 = vmul.f32 %v3843_v9, %v13749_v21  ;;  %v3845_v59 = vpop.f32.mrb[15].mxu0  ;;  %10361 = vmatprep.mubr.msk.f32.mxu1 %vm4146_vm8, %v4077_v57  ;;  %10913 = vmatprep.subr.bf16.mxu0 %v10912_v20 }
 0x39a   : > { %10915 = vmatpush3.bf16.msra.mxu0 %v10912_v20 }
 0x39b   : > { %v14173_v51 = vpop.f32.mrb[6].mxu1  ;;  %9282 = vmatmul.mubr.msk.bf16.gmra.mrb[120].mxu0 %vm13285_vm5, %v15777_v35  ;;  %10362 = vmatmul.mubr.msk.f32.gmra.mrb[70].mxu1 %vm4146_vm8, %v4078_v23 }
 0x39c   : > { %16215 = vst [vmem:[#allocation59_spill] sm:$0xff] %v14173_v51  ;;  %v14179_v21 = vpop.f32.mrb[7].mxu1  ;;  %9284 = vmatprep.mubr.msk.bf16.mxu0 %vm13293_vm1, %v15777_v35 }
 0x39e   : > { %v3848_v57 = vpop.f32.mrb[16].mxu0 }
 0x39f   : > { %v4079_v18 = vmul.f32 %v3848_v57, %v13763_v55  ;;  %v14185_v9 = vpop.f32.mrb[8].mxu1  ;;  %v3850_v59 = vpop.f32.mrb[17].mxu0 }
 0x3a0   : > { %v14187_v42 = vpop.f32.mrb[9].mxu1  ;;  %v3851_v50 = vpop.f32.mrb[18].mxu0 }
 0x3a1   : > { %v4080_v29 = vmul.f32 %v3851_v50, %v13765_v13  ;;  %v3853_v23 = vpop.f32.mrb[19].mxu0  ;;  %10364 = vmatprep.mubr.msk.f32.mxu1 %vm4146_vm8, %v4079_v18 }
 0x3a3   : > { %v14191_v51 = vpop.f32.mrb[10].mxu1  ;;  %9286 = vmatmul.mubr.msk.bf16.gmra.mrb[124].mxu0 %vm13321_vm9, %v15777_v35  ;;  %10365 = vmatmul.mubr.msk.f32.gmra.mrb[72].mxu1 %vm4146_vm8, %v4080_v29 }
 0x3a4   : > { %v14197_v7 = vpop.f32.mrb[11].mxu1 }
 0x3a6   : > { %v3856_v55 = vpop.f32.mrb[20].mxu0 }
 0x3a7   : > { %v4081_v20 = vmul.f32 %v3856_v55, %v13778_v25  ;;  %v14200_v57 = vpop.f32.mrb[12].mxu1  ;;  %v3858_v59 = vpop.f32.mrb[21].mxu0 }
 0x3a8   : > { %16216 = vst [vmem:[#allocation60_spill] sm:$0xff] %v14200_v57  ;;  %v14202_v13 = vpop.f32.mrb[13].mxu1  ;;  %v3859_v50 = vpop.f32.mrb[22].mxu0 }
 0x3a9   : > { %16217 = vst [vmem:[#allocation63_spill] sm:$0xff] %v14202_v13  ;;  %v4082_v18 = vmul.f32 %v3859_v50, %v13780_v45  ;;  %v3861_v23 = vpop.f32.mrb[23].mxu0  ;;  %10367 = vmatprep.mubr.msk.f32.mxu1 %vm4146_vm8, %v4081_v20 }
 0x3ab   : > { %v14206_v38 = vpop.f32.mrb[14].mxu1  ;;  %10368 = vmatmul.mubr.msk.f32.gmra.mrb[74].mxu1 %vm4146_vm8, %v4082_v18 }
 0x3ac   : > { %v14209_v35 = vpop.f32.mrb[15].mxu1 }
 0x3ae   : > { %v3864_v29 = vpop.f32.mrb[24].mxu0 }
 0x3af   : > { %v4083_v25 = vmul.f32 %v3864_v29, %v13792_v19  ;;  %v14212_v55 = vpop.f32.mrb[16].mxu1  ;;  %v3866_v59 = vpop.f32.mrb[25].mxu0 }
 0x3b0   : > { %16218 = vst [vmem:[#allocation64_spill] sm:$0xff] %v14212_v55  ;;  %v14214_v57 = vpop.f32.mrb[17].mxu1  ;;  %v3867_v13 = vpop.f32.mrb[26].mxu0 }
 0x3b1   : > { %16219 = vst [vmem:[#allocation67_spill] sm:$0xff] %v14214_v57  ;;  %v4084_v45 = vmul.f32 %v3867_v13, %v13796_v49  ;;  %v3869_v50 = vpop.f32.mrb[27].mxu0  ;;  %10370 = vmatprep.mubr.msk.f32.mxu1 %vm4146_vm8, %v4083_v25 }
 0x3b3   : > { %v14218_v20 = vpop.f32.mrb[18].mxu1  ;;  %10371 = vmatmul.mubr.msk.f32.gmra.mrb[76].mxu1 %vm4146_vm8, %v4084_v45 }
 0x3b4   : > { %v14221_v18 = vpop.f32.mrb[19].mxu1 }
 0x3b6   : > { %v3872_v23 = vpop.f32.mrb[28].mxu0 }
 0x3b7   : > { %v4085_v19 = vmul.f32 %v3872_v23, %v13810_v41  ;;  %v14224_v29 = vpop.f32.mrb[20].mxu1  ;;  %v3874_v59 = vpop.f32.mrb[29].mxu0 }
 0x3b8   : > { %16220 = vst [vmem:[#allocation68_spill] sm:$0xff] %v14224_v29  ;;  %v14226_v55 = vpop.f32.mrb[21].mxu1  ;;  %v3875_v57 = vpop.f32.mrb[30].mxu0 }
 0x3b9   : > { %16221 = vst [vmem:[#allocation71_spill] sm:$0xff] %v14226_v55  ;;  %v4086_v49 = vmul.f32 %v3875_v57, %v13814_v62  ;;  %v3877_v13 = vpop.f32.mrb[31].mxu0  ;;  %10373 = vmatprep.mubr.msk.f32.mxu1 %vm4146_vm8, %v4085_v19 }
 0x3bb   : > { %v14230_v25 = vpop.f32.mrb[22].mxu1  ;;  %10374 = vmatmul.mubr.msk.f32.gmra.mrb[78].mxu1 %vm4146_vm8, %v4086_v49 }
 0x3bc   : > { %v14233_v45 = vpop.f32.mrb[23].mxu1 }
 0x3be   : > { %v3880_v50 = vpop.f32.mrb[32].mxu0 }
 0x3bf   : > { %v4087_v41 = vmul.f32 %v3880_v50, %v13828_v14  ;;  %v14236_v23 = vpop.f32.mrb[24].mxu1  ;;  %v3882_v59 = vpop.f32.mrb[33].mxu0 }
 0x3c0   : > { %16222 = vst [vmem:[#allocation72_spill] sm:$0xff] %v14236_v23  ;;  %v14238_v29 = vpop.f32.mrb[25].mxu1  ;;  %v3883_v55 = vpop.f32.mrb[34].mxu0 }
 0x3c1   : > { %16223 = vst [vmem:[#allocation75_spill] sm:$0xff] %v14238_v29  ;;  %v4088_v62 = vmul.f32 %v3883_v55, %v13832_v10  ;;  %v3885_v57 = vpop.f32.mrb[35].mxu0  ;;  %10376 = vmatprep.mubr.msk.f32.mxu1 %vm4146_vm8, %v4087_v41 }
 0x3c3   : > { %v14242_v19 = vpop.f32.mrb[26].mxu1  ;;  %10377 = vmatmul.mubr.msk.f32.gmra.mrb[80].mxu1 %vm4146_vm8, %v4088_v62 }
 0x3c4   : > { %v14245_v49 = vpop.f32.mrb[27].mxu1 }
 0x3c6   : > { %v3888_v13 = vpop.f32.mrb[36].mxu0 }
 0x3c7   : > { %v4089_v14 = vmul.f32 %v3888_v13, %v13843_v36  ;;  %v14248_v50 = vpop.f32.mrb[28].mxu1  ;;  %v3890_v59 = vpop.f32.mrb[37].mxu0 }
 0x3c8   : > { %16224 = vst [vmem:[#allocation76_spill] sm:$0xff] %v14248_v50  ;;  %v14250_v23 = vpop.f32.mrb[29].mxu1  ;;  %v3891_v29 = vpop.f32.mrb[38].mxu0  ;;  %v5450_v59 = vld [vmem:[%s15355_s9 + $0x10] sm:$0xff] }
 0x3c9   : > { %v4090_v10 = vmul.f32 %v3891_v29, %v13846_v52  ;;  %v3893_v55 = vpop.f32.mrb[39].mxu0  ;;  %10379 = vmatprep.mubr.msk.f32.mxu1 %vm4146_vm8, %v4089_v14  ;;  %v5451_v52 = vld [vmem:[%s15355_s9 + $0x18] sm:$0xff] }
 0x3ca   : > { %v5453_v55 = vld [vmem:[%s15355_s9 + $0x28] sm:$0xff] }
 0x3cb   : > { %10380 = vmatmul.mubr.msk.f32.gmra.mrb[82].mxu1 %vm4146_vm8, %v4090_v10  ;;  %v10916_v10 = vpack.c.bf16 %v5451_v52, %v5450_v59 }
 0x3cc   : > { %v14255_v41 = vpop.f32.mrb[30].mxu1 }
 0x3cd   : > { %16225 = vst [vmem:[#allocation79_spill] sm:$0xff] %v14255_v41  ;;  %v14257_v62 = vpop.f32.mrb[31].mxu1  ;;  %10917 = vmatprep.subr.bf16.mxu0 %v10916_v10 }
 0x3ce   : > { %v3896_v57 = vpop.f32.mrb[40].mxu0  ;;  %10919 = vmatpush3.bf16.msra.mxu0 %v10916_v10 }
 0x3cf   : > { %v4091_v36 = vmul.f32 %v3896_v57, %v13857_v27  ;;  %v3898_v13 = vpop.f32.mrb[41].mxu0  ;;  %v5452_v27 = vld [vmem:[%s15355_s9 + $0x20] sm:$0xff] }
 0x3d0   : > { %v3899_v50 = vpop.f32.mrb[42].mxu0  ;;  %v10920_v13 = vpack.c.bf16 %v5453_v55, %v5452_v27 }
 0x3d1   : > { %v4092_v29 = vmul.f32 %v3899_v50, %v13860_v32  ;;  %v3901_v14 = vpop.f32.mrb[43].mxu0  ;;  %10382 = vmatprep.mubr.msk.f32.mxu1 %vm4146_vm8, %v4091_v36 }
 0x3d2   : > { %10921 = vmatprep.subr.bf16.mxu0 %v10920_v13  ;;  %v5455_v14 = vld [vmem:[%s15355_s9 + $0x38] sm:$0xff] }
 0x3d3   : > { %10383 = vmatmul.mubr.msk.f32.gmra.mrb[84].mxu1 %vm4146_vm8, %v4092_v29  ;;  %10923 = vmatpush3.bf16.msra.mxu0 %v10920_v13  ;;  %v5454_v29 = vld [vmem:[%s15355_s9 + $0x30] sm:$0xff] }
 0x3d4   : > { %v14275_v57 = vpop.f32.mrb[32].mxu1  ;;  %v10924_v55 = vpack.c.bf16 %v5455_v14, %v5454_v29 }
 0x3d5   : > { %16226 = vst [vmem:[#allocation80_spill] sm:$0xff] %v14275_v57  ;;  %v14277_v32 = vpop.f32.mrb[33].mxu1 }
 0x3d6   : > { %16227 = vst [vmem:[#allocation83_spill] sm:$0xff] %v14277_v32  ;;  %v3904_v50 = vpop.f32.mrb[44].mxu0  ;;  %10925 = vmatprep.subr.bf16.mxu0 %v10924_v55 }
 0x3d7   : > { %v4093_v36 = vmul.f32 %v3904_v50, %v13871_v40  ;;  %v3906_v59 = vpop.f32.mrb[45].mxu0  ;;  %10927 = vmatpush3.bf16.msra.mxu0 %v10924_v55 }
 0x3d8   : > { %v3907_v52 = vpop.f32.mrb[46].mxu0 }
 0x3d9   : > { %v4094_v10 = vmul.f32 %v3907_v52, %v13874_v24  ;;  %v3909_v27 = vpop.f32.mrb[47].mxu0  ;;  %10385 = vmatprep.mubr.msk.f32.mxu1 %vm4146_vm8, %v4093_v36 }
 0x3db   : > { %10386 = vmatmul.mubr.msk.f32.gmra.mrb[86].mxu1 %vm4146_vm8, %v4094_v10 }
 0x3dc   : > { %v14289_v40 = vpop.f32.mrb[34].mxu1 }
 0x3dd   : > { %v14291_v13 = vpop.f32.mrb[35].mxu1 }
 0x3de   : > { %v3912_v50 = vpop.f32.mrb[48].mxu0 }
 0x3df   : > { %v4095_v59 = vmul.f32 %v3912_v50, %v13885_v30  ;;  %v3914_v57 = vpop.f32.mrb[49].mxu0 }
 0x3e0   : > { %v3915_v32 = vpop.f32.mrb[50].mxu0 }
 0x3e1   : > { %v4096_v41 = vmul.f32 %v3915_v32, %v13888_v54  ;;  %v3917_v24 = vpop.f32.mrb[51].mxu0  ;;  %10388 = vmatprep.mubr.msk.f32.mxu1 %vm4146_vm8, %v4095_v59 }
 0x3e3   : > { %10389 = vmatmul.mubr.msk.f32.gmra.mrb[88].mxu1 %vm4146_vm8, %v4096_v41 }
 0x3e4   : > { %v14297_v36 = vpop.f32.mrb[36].mxu1 }
 0x3e5   : > { %v14299_v52 = vpop.f32.mrb[37].mxu1 }
 0x3e6   : > { %v3920_v29 = vpop.f32.mrb[52].mxu0 }
 0x3e7   : > { %v4097_v14 = vmul.f32 %v3920_v29, %v13898_v28  ;;  %v3922_v10 = vpop.f32.mrb[53].mxu0 }
 0x3e8   : > { %v3923_v27 = vpop.f32.mrb[54].mxu0 }
 0x3e9   : > { %v4098_v30 = vmul.f32 %v3923_v27, %v13901_v8  ;;  %v3925_v57 = vpop.f32.mrb[55].mxu0  ;;  %10391 = vmatprep.mubr.msk.f32.mxu1 %vm4146_vm8, %v4097_v14 }
 0x3eb   : > { %10392 = vmatmul.mubr.msk.f32.gmra.mrb[90].mxu1 %vm4146_vm8, %v4098_v30 }
 0x3ec   : > { %v14305_v54 = vpop.f32.mrb[38].mxu1 }
 0x3ed   : > { %v14307_v32 = vpop.f32.mrb[39].mxu1 }
 0x3ee   : > { %v3928_v41 = vpop.f32.mrb[56].mxu0 }
 0x3ef   : > { %v4099_v55 = vmul.f32 %v3928_v41, %v13922_v4  ;;  %v3930_v50 = vpop.f32.mrb[57].mxu0 }
 0x3f0   : > { %v3931_v59 = vpop.f32.mrb[58].mxu0 }
 0x3f1   : > { %v4100_v28 = vmul.f32 %v3931_v59, %v13925_v11  ;;  %v3933_v24 = vpop.f32.mrb[59].mxu0  ;;  %10394 = vmatprep.mubr.msk.f32.mxu1 %vm4146_vm8, %v4099_v55 }
 0x3f3   : > { %10395 = vmatmul.mubr.msk.f32.gmra.mrb[92].mxu1 %vm4146_vm8, %v4100_v28 }
 0x3f4   : > { %v14313_v8 = vpop.f32.mrb[40].mxu1 }
 0x3f5   : > { %v14315_v29 = vpop.f32.mrb[41].mxu1 }
 0x3f6   : > { %v3936_v14 = vpop.f32.mrb[60].mxu0 }
 0x3f7   : > { %v4101_v10 = vmul.f32 %v3936_v14, %v13934_v31  ;;  %v3938_v27 = vpop.f32.mrb[61].mxu0 }
 0x3f8   : > { %v3939_v30 = vpop.f32.mrb[62].mxu0 }
 0x3f9   : > { %v4102_v4 = vmul.f32 %v3939_v30, %v13937_v61  ;;  %v3941_v57 = vpop.f32.mrb[63].mxu0  ;;  %10397 = vmatprep.mubr.msk.f32.mxu1 %vm4146_vm8, %v4101_v10 }
 0x3fb   : > { %10398 = vmatmul.mubr.msk.f32.gmra.mrb[94].mxu1 %vm4146_vm8, %v4102_v4 }
 0x3fc   : > { %v14321_v11 = vpop.f32.mrb[42].mxu1 }
 0x3fd   : > { %v14323_v41 = vpop.f32.mrb[43].mxu1 }
 0x3fe   : > { %v3944_v55 = vpop.f32.mrb[64].mxu0 }
 0x3ff   : > { %v4103_v50 = vmul.f32 %v3944_v55, %v13946_v16  ;;  %v3946_v59 = vpop.f32.mrb[65].mxu0 }
 0x400   : > { %v3947_v28 = vpop.f32.mrb[66].mxu0 }
 0x401   : > { %v4104_v31 = vmul.f32 %v3947_v28, %v13949_v37  ;;  %v3949_v24 = vpop.f32.mrb[67].mxu0  ;;  %10400 = vmatprep.mubr.msk.f32.mxu1 %vm4146_vm8, %v4103_v50 }
 0x403   : > { %10401 = vmatmul.mubr.msk.f32.gmra.mrb[96].mxu1 %vm4146_vm8, %v4104_v31 }
 0x404   : > { %v14329_v61 = vpop.f32.mrb[44].mxu1 }
 0x405   : > { %v14331_v14 = vpop.f32.mrb[45].mxu1 }
 0x406   : > { %v3952_v10 = vpop.f32.mrb[68].mxu0 }
 0x407   : > { %v4105_v27 = vmul.f32 %v3952_v10, %v13958_v17  ;;  %v3954_v30 = vpop.f32.mrb[69].mxu0 }
 0x408   : > { %v3955_v4 = vpop.f32.mrb[70].mxu0 }
 0x409   : > { %v4106_v16 = vmul.f32 %v3955_v4, %v13961_v22  ;;  %v3957_v57 = vpop.f32.mrb[71].mxu0  ;;  %10403 = vmatprep.mubr.msk.f32.mxu1 %vm4146_vm8, %v4105_v27 }
 0x40b   : > { %10404 = vmatmul.mubr.msk.f32.gmra.mrb[98].mxu1 %vm4146_vm8, %v4106_v16 }
 0x40c   : > { %v14337_v37 = vpop.f32.mrb[46].mxu1 }
 0x40d   : > { %v14339_v55 = vpop.f32.mrb[47].mxu1 }
 0x40e   : > { %v3960_v50 = vpop.f32.mrb[72].mxu0 }
 0x40f   : > { %v4107_v59 = vmul.f32 %v3960_v50, %v13970_v53  ;;  %v3962_v28 = vpop.f32.mrb[73].mxu0 }
 0x410   : > { %v3963_v31 = vpop.f32.mrb[74].mxu0 }
 0x411   : > { %v4108_v17 = vmul.f32 %v3963_v31, %v13973_v0  ;;  %v3965_v24 = vpop.f32.mrb[75].mxu0  ;;  %10406 = vmatprep.mubr.msk.f32.mxu1 %vm4146_vm8, %v4107_v59 }
 0x413   : > { %10407 = vmatmul.mubr.msk.f32.gmra.mrb[100].mxu1 %vm4146_vm8, %v4108_v17 }
 0x414   : > { %v14345_v22 = vpop.f32.mrb[48].mxu1 }
 0x415   : > { %v14347_v10 = vpop.f32.mrb[49].mxu1 }
 0x416   : > { %v3968_v27 = vpop.f32.mrb[76].mxu0 }
 0x417   : > { %v4109_v30 = vmul.f32 %v3968_v27, %v13982_v63  ;;  %v3970_v4 = vpop.f32.mrb[77].mxu0 }
 0x418   : > { %v3971_v16 = vpop.f32.mrb[78].mxu0 }
 0x419   : > { %v4110_v53 = vmul.f32 %v3971_v16, %v13985_v39  ;;  %v3973_v57 = vpop.f32.mrb[79].mxu0  ;;  %10409 = vmatprep.mubr.msk.f32.mxu1 %vm4146_vm8, %v4109_v30 }
 0x41b   : > { %10410 = vmatmul.mubr.msk.f32.gmra.mrb[102].mxu1 %vm4146_vm8, %v4110_v53 }
 0x41c   : > { %v14353_v0 = vpop.f32.mrb[50].mxu1 }
 0x41d   : > { %v14355_v50 = vpop.f32.mrb[51].mxu1 }
 0x41e   : > { %v3976_v59 = vpop.f32.mrb[80].mxu0 }
 0x41f   : > { %v4111_v28 = vmul.f32 %v3976_v59, %v13994_v43  ;;  %v3978_v31 = vpop.f32.mrb[81].mxu0 }
 0x420   : > { %v3979_v17 = vpop.f32.mrb[82].mxu0 }
 0x421   : > { %v4112_v63 = vmul.f32 %v3979_v17, %v13997_v1  ;;  %v3981_v24 = vpop.f32.mrb[83].mxu0  ;;  %10412 = vmatprep.mubr.msk.f32.mxu1 %vm4146_vm8, %v4111_v28 }
 0x423   : > { %10413 = vmatmul.mubr.msk.f32.gmra.mrb[104].mxu1 %vm4146_vm8, %v4112_v63 }
 0x424   : > { %v14361_v39 = vpop.f32.mrb[52].mxu1 }
 0x425   : > { %v14363_v27 = vpop.f32.mrb[53].mxu1 }
 0x426   : > { %v3984_v30 = vpop.f32.mrb[84].mxu0 }
 0x427   : > { %v4113_v4 = vmul.f32 %v3984_v30, %v14006_v47  ;;  %v3986_v16 = vpop.f32.mrb[85].mxu0 }
 0x428   : > { %v3987_v53 = vpop.f32.mrb[86].mxu0 }
 0x429   : > { %v4114_v43 = vmul.f32 %v3987_v53, %v14009_v15  ;;  %v3989_v57 = vpop.f32.mrb[87].mxu0  ;;  %10415 = vmatprep.mubr.msk.f32.mxu1 %vm4146_vm8, %v4113_v4 }
 0x42b   : > { %10416 = vmatmul.mubr.msk.f32.gmra.mrb[106].mxu1 %vm4146_vm8, %v4114_v43 }
 0x42c   : > { %v14369_v1 = vpop.f32.mrb[54].mxu1 }
 0x42d   : > { %v14371_v59 = vpop.f32.mrb[55].mxu1 }
 0x42e   : > { %v3992_v28 = vpop.f32.mrb[88].mxu0 }
 0x42f   : > { %v4115_v31 = vmul.f32 %v3992_v28, %v14018_v48  ;;  %v3994_v17 = vpop.f32.mrb[89].mxu0 }
 0x430   : > { %v3995_v63 = vpop.f32.mrb[90].mxu0  ;;  %v16232_v17 = vld [vmem:[#allocation35_spill] sm:$0xff] }
 0x431   : > { %v4116_v47 = vmul.f32 %v3995_v63, %v14021_v60  ;;  %v3997_v24 = vpop.f32.mrb[91].mxu0  ;;  %10418 = vmatprep.mubr.msk.f32.mxu1 %vm4146_vm8, %v4115_v31 }
 0x433   : > { %10419 = vmatmul.mubr.msk.f32.gmra.mrb[108].mxu1 %vm4146_vm8, %v4116_v47 }
 0x434   : > { %v14377_v15 = vpop.f32.mrb[56].mxu1 }
 0x435   : > { %16228 = vst [vmem:[#allocation84_spill] sm:$0xff] %v14377_v15  ;;  %v14379_v30 = vpop.f32.mrb[57].mxu1  ;;  %v16233_v15 = vld [vmem:[#allocation38_spill] sm:$0xff] }
 0x436   : > { %16229 = vst [vmem:[#allocation87_spill] sm:$0xff] %v14379_v30  ;;  %v4000_v4 = vpop.f32.mrb[92].mxu0 }
 0x437   : > { %v4117_v16 = vmul.f32 %v4000_v4, %v14030_v26  ;;  %v4002_v53 = vpop.f32.mrb[93].mxu0 }
 0x438   : > { %v4003_v43 = vpop.f32.mrb[94].mxu0 }
 0x439   : > { %v4118_v48 = vmul.f32 %v4003_v43, %v14033_v5  ;;  %v4005_v57 = vpop.f32.mrb[95].mxu0  ;;  %10421 = vmatprep.mubr.msk.f32.mxu1 %vm4146_vm8, %v4117_v16  ;;  %v16236_v43 = vld [vmem:[#allocation39_spill] sm:$0xff] }
 0x43b   : > { %10422 = vmatmul.mubr.msk.f32.gmra.mrb[110].mxu1 %vm4146_vm8, %v4118_v48 }
 0x43c   : > { %v14385_v60 = vpop.f32.mrb[58].mxu1 }
 0x43d   : > { %16230 = vst [vmem:[#allocation88_spill] sm:$0xff] %v14385_v60  ;;  %v14387_v28 = vpop.f32.mrb[59].mxu1 }
 0x43e   : > { %16231 = vst [vmem:[#allocation89_spill] sm:$0xff] %v14387_v28  ;;  %v4008_v31 = vpop.f32.mrb[96].mxu0  ;;  %v16237_v28 = vld [vmem:[#allocation42_spill] sm:$0xff] }
 0x43f   : > { %v4119_v63 = vmul.f32 %v4008_v31, %v16232_v17  ;;  %v4010_v47 = vpop.f32.mrb[97].mxu0 }
 0x440   : > { %v4011_v24 = vpop.f32.mrb[98].mxu0 }
 0x441   : > { %v4120_v26 = vmul.f32 %v4011_v24, %v16233_v15  ;;  %v4013_v4 = vpop.f32.mrb[99].mxu0  ;;  %10424 = vmatprep.mubr.msk.f32.mxu1 %vm4146_vm8, %v4119_v63  ;;  %v16240_v24 = vld [vmem:[#allocation43_spill] sm:$0xff] }
 0x443   : > { %10425 = vmatmul.mubr.msk.f32.gmra.mrb[112].mxu1 %vm4146_vm8, %v4120_v26 }
 0x444   : > { %v14393_v5 = vpop.f32.mrb[60].mxu1 }
 0x445   : > { %16234 = vst [vmem:[#allocation92_spill] sm:$0xff] %v14393_v5  ;;  %v14395_v16 = vpop.f32.mrb[61].mxu1 }
 0x446   : > { %16235 = vst [vmem:[#allocation93_spill] sm:$0xff] %v14395_v16  ;;  %v4016_v53 = vpop.f32.mrb[100].mxu0  ;;  %v16241_v16 = vld [vmem:[#allocation46_spill] sm:$0xff] }
 0x447   : > { %v4121_v48 = vmul.f32 %v4016_v53, %v16236_v43  ;;  %v4018_v57 = vpop.f32.mrb[101].mxu0 }
 0x448   : > { %v4019_v60 = vpop.f32.mrb[102].mxu0  ;;  %v16242_v57 = vld [vmem:[#allocation47_spill] sm:$0xff] }
 0x449   : > { %v4122_v31 = vmul.f32 %v4019_v60, %v16237_v28  ;;  %v4021_v17 = vpop.f32.mrb[103].mxu0  ;;  %10427 = vmatprep.mubr.msk.f32.mxu1 %vm4146_vm8, %v4121_v48  ;;  %v14412_v60 = vld [vmem:[%s15353_s7] ss:$0 sm:$0xff] }
 0x44b   : > { %10428 = vmatmul.mubr.msk.f32.gmra.mrb[114].mxu1 %vm4146_vm8, %v4122_v31 }
 0x44c   : > { %v14401_v15 = vpop.f32.mrb[62].mxu1 }
 0x44d   : > { %16238 = vst [vmem:[#allocation96_spill] sm:$0xff] %v14401_v15  ;;  %v14403_v63 = vpop.f32.mrb[63].mxu1 }
 0x44e   : > { %16239 = vst [vmem:[#allocation11_spill] sm:$0xff] %v14403_v63  ;;  %v4024_v47 = vpop.f32.mrb[104].mxu0 }
 0x44f   : > { %v4123_v26 = vmul.f32 %v4024_v47, %v16240_v24  ;;  %v4026_v4 = vpop.f32.mrb[105].mxu0 }
 0x450   : > { %v4027_v5 = vpop.f32.mrb[106].mxu0  ;;  %v16243_v4 = vld [vmem:[#allocation48_spill] sm:$0xff] }
 0x451   : > { %v4124_v53 = vmul.f32 %v4027_v5, %v16241_v16  ;;  %v4029_v43 = vpop.f32.mrb[107].mxu0  ;;  %10430 = vmatprep.mubr.msk.f32.mxu1 %vm4146_vm8, %v4123_v26 }
 0x453   : > { %10431 = vmatmul.mubr.msk.f32.gmra.mrb[116].mxu1 %vm4146_vm8, %v4124_v53 }
 0x456   : > { %v4032_v28 = vpop.f32.mrb[108].mxu0  ;;  %v10354_v48 = vpop.f32.mrb[64].mxu1 }
 0x457   : > { %v4125_v31 = vmul.f32 %v4032_v28, %v16242_v57  ;;  %v5063_v17 = vadd.f32 %v10354_v48, %v14412_v60  ;;  %v4034_v47 = vpop.f32.mrb[109].mxu0  ;;  %v5057_v24 = vpop.f32.mrb[65].mxu1  ;;  %v16244_v57 = vld [vmem:[#allocation51_spill] sm:$0xff] }
 0x458   : > { %v5058_v5 = vadd.f32 %v14412_v60, %v5057_v24  ;;  %v4035_v16 = vpop.f32.mrb[110].mxu0 }
 0x459   : > { %v4126_v26 = vmul.f32 %v4035_v16, %v16243_v4  ;;  %v4037_v43 = vpop.f32.mrb[111].mxu0  ;;  %10433 = vmatprep.mubr.msk.f32.mxu1 %vm4146_vm8, %v4125_v31  ;;  %v5377_v15 = vmax.f32 %v5063_v17, 0.0 }
 0x45a   : > { %v5376_v53 = vmax.f32 %v5058_v5, 0.0  ;;  %v16245_v43 = vld [vmem:[#allocation52_spill] sm:$0xff] }
 0x45b   : > { %10434 = vmatmul.mubr.msk.f32.gmra.mrb[118].mxu1 %vm4146_vm8, %v4126_v26 }
 0x45c   : > { %10464 = vmatprep.mubr.msk.f32.mxu0 %vm5456_vm4, %v5376_v53 }
 0x45d   : > { %10465 = vmatmul.mubr.msk.f32.vlgmr.msra.gmra.mrb[128].mxu0 %vm5456_vm4, %v5377_v15 }
 0x45e   : > { %v4040_v28 = vpop.f32.mrb[112].mxu0  ;;  %v10357_v48 = vpop.f32.mrb[66].mxu1 }
 0x45f   : > { %v4127_v47 = vmul.f32 %v4040_v28, %v16244_v57  ;;  %v5073_v24 = vadd.f32 %v10357_v48, %v14412_v60  ;;  %v4042_v63 = vpop.f32.mrb[113].mxu0  ;;  %v5067_v16 = vpop.f32.mrb[67].mxu1 }
 0x460   : > { %v5068_v4 = vadd.f32 %v14412_v60, %v5067_v16  ;;  %v4043_v31 = vpop.f32.mrb[114].mxu0  ;;  %v16246_v63 = vld [vmem:[#allocation55_spill] sm:$0xff] }
 0x461   : > { %v4128_v5 = vmul.f32 %v4043_v31, %v16245_v43  ;;  %v4045_v17 = vpop.f32.mrb[115].mxu0  ;;  %10436 = vmatprep.mubr.msk.f32.mxu1 %vm4146_vm8, %v4127_v47  ;;  %v5379_v53 = vmax.f32 %v5073_v24, 0.0  ;;  %v16247_v47 = vld [vmem:[#allocation56_spill] sm:$0xff] }
 0x462   : > { %v5378_v26 = vmax.f32 %v5068_v4, 0.0 }
 0x463   : > { %10437 = vmatmul.mubr.msk.f32.gmra.mrb[120].mxu1 %vm4146_vm8, %v4128_v5 }
 0x464   : > { %10467 = vmatprep.mubr.msk.f32.mxu0 %vm5456_vm4, %v5378_v26 }
 0x465   : > { %10468 = vmatmul.mubr.msk.f32.gmra.mrb[130].mxu0 %vm5456_vm4, %v5379_v53 }
 0x466   : > { %v4048_v15 = vpop.f32.mrb[116].mxu0  ;;  %v10360_v28 = vpop.f32.mrb[68].mxu1 }
 0x467   : > { %v4129_v48 = vmul.f32 %v4048_v15, %v16246_v63  ;;  %v5083_v57 = vadd.f32 %v10360_v28, %v14412_v60  ;;  %v4050_v16 = vpop.f32.mrb[117].mxu0  ;;  %v5077_v30 = vpop.f32.mrb[69].mxu1 }
 0x468   : > { %v5078_v31 = vadd.f32 %v14412_v60, %v5077_v30  ;;  %v4051_v43 = vpop.f32.mrb[118].mxu0 }
 0x469   : > { %v4130_v4 = vmul.f32 %v4051_v43, %v16247_v47  ;;  %v4053_v24 = vpop.f32.mrb[119].mxu0  ;;  %10439 = vmatprep.mubr.msk.f32.mxu1 %vm4146_vm8, %v4129_v48  ;;  %v5381_v17 = vmax.f32 %v5083_v57, 0.0 }
 0x46a   : > { %v5380_v5 = vmax.f32 %v5078_v31, 0.0 }
 0x46b   : > { %10440 = vmatmul.mubr.msk.f32.gmra.mrb[122].mxu1 %vm4146_vm8, %v4130_v4 }
 0x46c   : > { %10470 = vmatprep.mubr.msk.f32.mxu0 %vm5456_vm4, %v5380_v5 }
 0x46d   : > { %10471 = vmatmul.mubr.msk.f32.gmra.mrb[132].mxu0 %vm5456_vm4, %v5381_v17 }
 0x46e   : > { %v4056_v26 = vpop.f32.mrb[120].mxu0  ;;  %v10363_v53 = vpop.f32.mrb[70].mxu1 }
 0x46f   : > { %v4131_v15 = vmul.f32 %v4056_v26, %v14114_v3  ;;  %v5093_v30 = vadd.f32 %v10363_v53, %v14412_v60  ;;  %v4058_v28 = vpop.f32.mrb[121].mxu0  ;;  %v5087_v63 = vpop.f32.mrb[71].mxu1 }
 0x470   : > { %v5088_v16 = vadd.f32 %v14412_v60, %v5087_v63  ;;  %v4059_v43 = vpop.f32.mrb[122].mxu0 }
 0x471   : > { %v4132_v48 = vmul.f32 %v4059_v43, %v14117_v56  ;;  %v4061_v57 = vpop.f32.mrb[123].mxu0  ;;  %10442 = vmatprep.mubr.msk.f32.mxu1 %vm4146_vm8, %v4131_v15  ;;  %v5383_v47 = vmax.f32 %v5093_v30, 0.0 }
 0x472   : > { %v5382_v31 = vmax.f32 %v5088_v16, 0.0 }
 0x473   : > { %10443 = vmatmul.mubr.msk.f32.gmra.mrb[124].mxu1 %vm4146_vm8, %v4132_v48 }
 0x474   : > { %10473 = vmatprep.mubr.msk.f32.mxu0 %vm5456_vm4, %v5382_v31 }
 0x475   : > { %10474 = vmatmul.mubr.msk.f32.gmra.mrb[134].mxu0 %vm5456_vm4, %v5383_v47 }
 0x476   : > { %v4064_v3 = vpop.f32.mrb[124].mxu0  ;;  %v10366_v4 = vpop.f32.mrb[72].mxu1 }
 0x477   : > { %v4133_v24 = vmul.f32 %v4064_v3, %v14128_v34  ;;  %v5103_v5 = vadd.f32 %v10366_v4, %v14412_v60  ;;  %v4066_v17 = vpop.f32.mrb[125].mxu0  ;;  %v5097_v26 = vpop.f32.mrb[73].mxu1 }
 0x478   : > { %v5098_v56 = vadd.f32 %v14412_v60, %v5097_v26  ;;  %v4067_v53 = vpop.f32.mrb[126].mxu0 }
 0x479   : > { %v4134_v15 = vmul.f32 %v4067_v53, %v14131_v46  ;;  %v4069_v30 = vpop.f32.mrb[127].mxu0  ;;  %10445 = vmatprep.mubr.msk.f32.mxu1 %vm4146_vm8, %v4133_v24  ;;  %v5385_v63 = vmax.f32 %v5103_v5, 0.0 }
 0x47a   : > { %v5384_v28 = vmax.f32 %v5098_v56, 0.0 }
 0x47b   : > { %10446 = vmatmul.mubr.msk.f32.gmra.mrb[126].mxu1 %vm4146_vm8, %v4134_v15 }
 0x47c   : > { %10476 = vmatprep.mubr.msk.f32.mxu0 %vm5456_vm4, %v5384_v28 }
 0x47d   : > { %10477 = vmatmul.mubr.msk.f32.gmra.mrb[136].mxu0 %vm5456_vm4, %v5385_v63 }
 0x47e   : > { %v10369_v34 = vpop.f32.mrb[74].mxu1 }
 0x47f   : > { %v5113_v16 = vadd.f32 %v10369_v34, %v14412_v60  ;;  %v5107_v43 = vpop.f32.mrb[75].mxu1 }
 0x480   : > { %v5108_v48 = vadd.f32 %v14412_v60, %v5107_v43 }
 0x481   : > { %v5387_v31 = vmax.f32 %v5113_v16, 0.0 }
 0x482   : > { %v5386_v57 = vmax.f32 %v5108_v48, 0.0  ;;  %v5440_v48 = vld [vmem:[%s15354_s8] sm:$0xff] }
 0x484   : > { %10479 = vmatprep.mubr.msk.f32.mxu0 %vm5456_vm4, %v5386_v57  ;;  %v5441_v57 = vld [vmem:[%s15354_s8 + $0x8] sm:$0xff] }
 0x485   : > { %10480 = vmatmul.mubr.msk.f32.gmra.mrb[138].mxu0 %vm5456_vm4, %v5387_v31 }
 0x486   : > { %v10372_v46 = vpop.f32.mrb[76].mxu1 }
 0x487   : > { %v5123_v47 = vadd.f32 %v10372_v46, %v14412_v60  ;;  %v5117_v3 = vpop.f32.mrb[77].mxu1  ;;  %v10928_v46 = vpack.c.bf16 %v5441_v57, %v5440_v48 }
 0x488   : > { %v5118_v4 = vadd.f32 %v14412_v60, %v5117_v3 }
 0x489   : > { %v5389_v5 = vmax.f32 %v5123_v47, 0.0  ;;  %10929 = vmatprep.subr.bf16.mxu0 %v10928_v46 }
 0x48a   : > { %v5388_v24 = vmax.f32 %v5118_v4, 0.0  ;;  %10931 = vmatpush3.bf16.msra.mxu0 %v10928_v46 }
 0x48c   : > { %10482 = vmatprep.mubr.msk.f32.mxu0 %vm5456_vm4, %v5388_v24 }
 0x48d   : > { %10483 = vmatmul.mubr.msk.f32.gmra.mrb[140].mxu0 %vm5456_vm4, %v5389_v5 }
 0x48e   : > { %v10375_v17 = vpop.f32.mrb[78].mxu1 }
 0x48f   : > { %v5133_v26 = vadd.f32 %v10375_v17, %v14412_v60  ;;  %v5127_v56 = vpop.f32.mrb[79].mxu1 }
 0x490   : > { %v5128_v53 = vadd.f32 %v14412_v60, %v5127_v56 }
 0x491   : > { %v5391_v30 = vmax.f32 %v5133_v26, 0.0 }
 0x492   : > { %v5390_v15 = vmax.f32 %v5128_v53, 0.0 }
 0x494   : > { %10485 = vmatprep.mubr.msk.f32.mxu0 %vm5456_vm4, %v5390_v15 }
 0x495   : > { %10486 = vmatmul.mubr.msk.f32.gmra.mrb[142].mxu0 %vm5456_vm4, %v5391_v30 }
 0x496   : > { %v10378_v28 = vpop.f32.mrb[80].mxu1 }
 0x497   : > { %v5143_v63 = vadd.f32 %v10378_v28, %v14412_v60  ;;  %v5137_v34 = vpop.f32.mrb[81].mxu1 }
 0x498   : > { %v5138_v16 = vadd.f32 %v14412_v60, %v5137_v34 }
 0x499   : > { %v5393_v31 = vmax.f32 %v5143_v63, 0.0 }
 0x49a   : > { %v5392_v43 = vmax.f32 %v5138_v16, 0.0 }
 0x49c   : > { %10488 = vmatprep.mubr.msk.f32.mxu0 %vm5456_vm4, %v5392_v43 }
 0x49d   : > { %10489 = vmatmul.mubr.msk.f32.gmra.mrb[144].mxu0 %vm5456_vm4, %v5393_v31 }
 0x49e   : > { %v10381_v47 = vpop.f32.mrb[82].mxu1 }
 0x49f   : > { %v5153_v3 = vadd.f32 %v10381_v47, %v14412_v60  ;;  %v5147_v4 = vpop.f32.mrb[83].mxu1 }
 0x4a0   : > { %v5148_v24 = vadd.f32 %v14412_v60, %v5147_v4 }
 0x4a1   : > { %v5395_v17 = vmax.f32 %v5153_v3, 0.0 }
 0x4a2   : > { %v5394_v5 = vmax.f32 %v5148_v24, 0.0  ;;  %v5442_v24 = vld [vmem:[%s15354_s8 + $0x10] sm:$0xff] }
 0x4a4   : > { %10491 = vmatprep.mubr.msk.f32.mxu0 %vm5456_vm4, %v5394_v5  ;;  %v5443_v5 = vld [vmem:[%s15354_s8 + $0x18] sm:$0xff] }
 0x4a5   : > { %10492 = vmatmul.mubr.msk.f32.gmra.mrb[146].mxu0 %vm5456_vm4, %v5395_v17 }
 0x4a6   : > { %v10384_v26 = vpop.f32.mrb[84].mxu1 }
 0x4a7   : > { %v5163_v56 = vadd.f32 %v10384_v26, %v14412_v60  ;;  %v5157_v53 = vpop.f32.mrb[85].mxu1  ;;  %v10932_v26 = vpack.c.bf16 %v5443_v5, %v5442_v24  ;;  %v5444_v24 = vld [vmem:[%s15354_s8 + $0x20] sm:$0xff]  ;;  %v5445_v5 = vld [vmem:[%s15354_s8 + $0x28] sm:$0xff] }
 0x4a8   : > { %v5158_v15 = vadd.f32 %v14412_v60, %v5157_v53 }
 0x4a9   : > { %v5397_v28 = vmax.f32 %v5163_v56, 0.0  ;;  %10933 = vmatprep.subr.bf16.mxu0 %v10932_v26 }
 0x4aa   : > { %v5396_v30 = vmax.f32 %v5158_v15, 0.0  ;;  %10935 = vmatpush3.bf16.msra.mxu0 %v10932_v26 }
 0x4ac   : > { %10494 = vmatprep.mubr.msk.f32.mxu0 %vm5456_vm4, %v5396_v30 }
 0x4ad   : > { %10495 = vmatmul.mubr.msk.f32.gmra.mrb[148].mxu0 %vm5456_vm4, %v5397_v28 }
 0x4ae   : > { %v10387_v63 = vpop.f32.mrb[86].mxu1 }
 0x4af   : > { %v5173_v34 = vadd.f32 %v10387_v63, %v14412_v60  ;;  %v5167_v16 = vpop.f32.mrb[87].mxu1 }
 0x4b0   : > { %v5168_v43 = vadd.f32 %v14412_v60, %v5167_v16 }
 0x4b1   : > { %v5399_v57 = vmax.f32 %v5173_v34, 0.0 }
 0x4b2   : > { %v5398_v48 = vmax.f32 %v5168_v43, 0.0 }
 0x4b4   : > { %10497 = vmatprep.mubr.msk.f32.mxu0 %vm5456_vm4, %v5398_v48 }
 0x4b5   : > { %10498 = vmatmul.mubr.msk.f32.gmra.mrb[150].mxu0 %vm5456_vm4, %v5399_v57 }
 0x4b6   : > { %v10390_v31 = vpop.f32.mrb[88].mxu1 }
 0x4b7   : > { %v5183_v46 = vadd.f32 %v10390_v31, %v14412_v60  ;;  %v5177_v47 = vpop.f32.mrb[89].mxu1 }
 0x4b8   : > { %v5178_v3 = vadd.f32 %v14412_v60, %v5177_v47 }
 0x4b9   : > { %v5401_v17 = vmax.f32 %v5183_v46, 0.0 }
 0x4ba   : > { %v5400_v4 = vmax.f32 %v5178_v3, 0.0 }
 0x4bc   : > { %10500 = vmatprep.mubr.msk.f32.mxu0 %vm5456_vm4, %v5400_v4 }
 0x4bd   : > { %10501 = vmatmul.mubr.msk.f32.gmra.mrb[152].mxu0 %vm5456_vm4, %v5401_v17  ;;  %v10936_v17 = vpack.c.bf16 %v5445_v5, %v5444_v24 }
 0x4be   : > { %v10393_v56 = vpop.f32.mrb[90].mxu1 }
 0x4bf   : > { %v5193_v53 = vadd.f32 %v10393_v56, %v14412_v60  ;;  %v5187_v15 = vpop.f32.mrb[91].mxu1  ;;  %10937 = vmatprep.subr.bf16.mxu0 %v10936_v17 }
 0x4c0   : > { %v5188_v30 = vadd.f32 %v14412_v60, %v5187_v15  ;;  %10939 = vmatpush3.bf16.msra.mxu0 %v10936_v17  ;;  %v5447_v15 = vld [vmem:[%s15354_s8 + $0x38] sm:$0xff] }
 0x4c1   : > { %v5403_v63 = vmax.f32 %v5193_v53, 0.0  ;;  %v5446_v53 = vld [vmem:[%s15354_s8 + $0x30] sm:$0xff] }
 0x4c2   : > { %v5402_v28 = vmax.f32 %v5188_v30, 0.0  ;;  %v10940_v30 = vpack.c.bf16 %v5447_v15, %v5446_v53 }
 0x4c4   : > { %10503 = vmatprep.mubr.msk.f32.mxu0 %vm5456_vm4, %v5402_v28  ;;  %10941 = vmatprep.subr.bf16.mxu0 %v10940_v30 }
 0x4c5   : > { %10504 = vmatmul.mubr.msk.f32.gmra.mrb[154].mxu0 %vm5456_vm4, %v5403_v63 }
 0x4c6   : > { %v10396_v34 = vpop.f32.mrb[92].mxu1  ;;  %10943 = vmatpush3.bf16.msra.mxu0 %v10940_v30 }
 0x4c7   : > { %v5203_v16 = vadd.f32 %v10396_v34, %v14412_v60  ;;  %v5197_v43 = vpop.f32.mrb[93].mxu1 }
 0x4c8   : > { %v5198_v48 = vadd.f32 %v14412_v60, %v5197_v43 }
 0x4c9   : > { %v5405_v31 = vmax.f32 %v5203_v16, 0.0 }
 0x4ca   : > { %v5404_v57 = vmax.f32 %v5198_v48, 0.0 }
 0x4cc   : > { %10506 = vmatprep.mubr.msk.f32.mxu0 %vm5456_vm4, %v5404_v57 }
 0x4cd   : > { %10507 = vmatmul.mubr.msk.f32.gmra.mrb[156].mxu0 %vm5456_vm4, %v5405_v31 }
 0x4ce   : > { %v10399_v46 = vpop.f32.mrb[94].mxu1 }
 0x4cf   : > { %v5213_v47 = vadd.f32 %v10399_v46, %v14412_v60  ;;  %v5207_v3 = vpop.f32.mrb[95].mxu1 }
 0x4d0   : > { %v5208_v4 = vadd.f32 %v14412_v60, %v5207_v3 }
 0x4d1   : > { %v5407_v56 = vmax.f32 %v5213_v47, 0.0 }
 0x4d2   : > { %v5406_v26 = vmax.f32 %v5208_v4, 0.0 }
 0x4d4   : > { %10509 = vmatprep.mubr.msk.f32.mxu0 %vm5456_vm4, %v5406_v26 }
 0x4d5   : > { %10510 = vmatmul.mubr.msk.f32.gmra.mrb[158].mxu0 %vm5456_vm4, %v5407_v56 }
 0x4d6   : > { %v10402_v28 = vpop.f32.mrb[96].mxu1 }
 0x4d7   : > { %v5223_v63 = vadd.f32 %v10402_v28, %v14412_v60  ;;  %v5217_v34 = vpop.f32.mrb[97].mxu1 }
 0x4d8   : > { %v5218_v16 = vadd.f32 %v14412_v60, %v5217_v34 }
 0x4d9   : > { %v5409_v48 = vmax.f32 %v5223_v63, 0.0 }
 0x4da   : > { %v5408_v43 = vmax.f32 %v5218_v16, 0.0 }
 0x4dc   : > { %10512 = vmatprep.mubr.msk.f32.mxu0 %vm5456_vm4, %v5408_v43 }
 0x4dd   : > { %10513 = vmatmul.mubr.msk.f32.gmra.mrb[160].mxu0 %vm5456_vm4, %v5409_v48 }
 0x4de   : > { %v10405_v57 = vpop.f32.mrb[98].mxu1 }
 0x4df   : > { %v5233_v31 = vadd.f32 %v10405_v57, %v14412_v60  ;;  %v5227_v46 = vpop.f32.mrb[99].mxu1 }
 0x4e0   : > { %v5228_v47 = vadd.f32 %v14412_v60, %v5227_v46 }
 0x4e1   : > { %v5411_v4 = vmax.f32 %v5233_v31, 0.0 }
 0x4e2   : > { %v5410_v3 = vmax.f32 %v5228_v47, 0.0 }
 0x4e4   : > { %10515 = vmatprep.mubr.msk.f32.mxu0 %vm5456_vm4, %v5410_v3 }
 0x4e5   : > { %10516 = vmatmul.mubr.msk.f32.gmra.mrb[162].mxu0 %vm5456_vm4, %v5411_v4 }
 0x4e6   : > { %v10408_v24 = vpop.f32.mrb[100].mxu1 }
 0x4e7   : > { %v5243_v5 = vadd.f32 %v10408_v24, %v14412_v60  ;;  %v5237_v17 = vpop.f32.mrb[101].mxu1 }
 0x4e8   : > { %v5238_v26 = vadd.f32 %v14412_v60, %v5237_v17 }
 0x4e9   : > { %v5413_v53 = vmax.f32 %v5243_v5, 0.0 }
 0x4ea   : > { %v5412_v56 = vmax.f32 %v5238_v26, 0.0 }
 0x4ec   : > { %10518 = vmatprep.mubr.msk.f32.mxu0 %vm5456_vm4, %v5412_v56 }
 0x4ed   : > { %10519 = vmatmul.mubr.msk.f32.gmra.mrb[164].mxu0 %vm5456_vm4, %v5413_v53 }
 0x4ee   : > { %v10411_v15 = vpop.f32.mrb[102].mxu1 }
 0x4ef   : > { %v5253_v30 = vadd.f32 %v10411_v15, %v14412_v60  ;;  %v5247_v28 = vpop.f32.mrb[103].mxu1 }
 0x4f0   : > { %v5248_v63 = vadd.f32 %v14412_v60, %v5247_v28 }
 0x4f1   : > { %v5415_v16 = vmax.f32 %v5253_v30, 0.0 }
 0x4f2   : > { %v5414_v34 = vmax.f32 %v5248_v63, 0.0 }
 0x4f4   : > { %10521 = vmatprep.mubr.msk.f32.mxu0 %vm5456_vm4, %v5414_v34 }
 0x4f5   : > { %10522 = vmatmul.mubr.msk.f32.gmra.mrb[166].mxu0 %vm5456_vm4, %v5415_v16 }
 0x4f6   : > { %v10414_v43 = vpop.f32.mrb[104].mxu1 }
 0x4f7   : > { %v5263_v48 = vadd.f32 %v10414_v43, %v14412_v60  ;;  %v5257_v57 = vpop.f32.mrb[105].mxu1 }
 0x4f8   : > { %v5258_v31 = vadd.f32 %v14412_v60, %v5257_v57 }
 0x4f9   : > { %v5417_v47 = vmax.f32 %v5263_v48, 0.0 }
 0x4fa   : > { %v5416_v46 = vmax.f32 %v5258_v31, 0.0 }
 0x4fc   : > { %10524 = vmatprep.mubr.msk.f32.mxu0 %vm5456_vm4, %v5416_v46 }
 0x4fd   : > { %10525 = vmatmul.mubr.msk.f32.gmra.mrb[168].mxu0 %vm5456_vm4, %v5417_v47 }
 0x4fe   : > { %v10417_v3 = vpop.f32.mrb[106].mxu1 }
 0x4ff   : > { %v5273_v4 = vadd.f32 %v10417_v3, %v14412_v60  ;;  %v5267_v24 = vpop.f32.mrb[107].mxu1 }
 0x500   : > { %v5268_v5 = vadd.f32 %v14412_v60, %v5267_v24 }
 0x501   : > { %v5419_v26 = vmax.f32 %v5273_v4, 0.0 }
 0x502   : > { %v5418_v17 = vmax.f32 %v5268_v5, 0.0 }
 0x504   : > { %10527 = vmatprep.mubr.msk.f32.mxu0 %vm5456_vm4, %v5418_v17 }
 0x505   : > { %10528 = vmatmul.mubr.msk.f32.gmra.mrb[170].mxu0 %vm5456_vm4, %v5419_v26 }
 0x506   : > { %v10420_v56 = vpop.f32.mrb[108].mxu1 }
 0x507   : > { %v5283_v53 = vadd.f32 %v10420_v56, %v14412_v60  ;;  %v5277_v15 = vpop.f32.mrb[109].mxu1 }
 0x508   : > { %v5278_v30 = vadd.f32 %v14412_v60, %v5277_v15 }
 0x509   : > { %v5421_v63 = vmax.f32 %v5283_v53, 0.0 }
 0x50a   : > { %v5420_v28 = vmax.f32 %v5278_v30, 0.0 }
 0x50c   : > { %10530 = vmatprep.mubr.msk.f32.mxu0 %vm5456_vm4, %v5420_v28 }
 0x50d   : > { %10531 = vmatmul.mubr.msk.f32.gmra.mrb[172].mxu0 %vm5456_vm4, %v5421_v63 }
 0x50e   : > { %v10423_v34 = vpop.f32.mrb[110].mxu1 }
 0x50f   : > { %v5293_v16 = vadd.f32 %v10423_v34, %v14412_v60  ;;  %v5287_v43 = vpop.f32.mrb[111].mxu1 }
 0x510   : > { %v5288_v48 = vadd.f32 %v14412_v60, %v5287_v43 }
 0x511   : > { %v5423_v31 = vmax.f32 %v5293_v16, 0.0 }
 0x512   : > { %v5422_v57 = vmax.f32 %v5288_v48, 0.0 }
 0x514   : > { %10533 = vmatprep.mubr.msk.f32.mxu0 %vm5456_vm4, %v5422_v57 }
 0x515   : > { %10534 = vmatmul.mubr.msk.f32.gmra.mrb[174].mxu0 %vm5456_vm4, %v5423_v31 }
 0x516   : > { %v10426_v46 = vpop.f32.mrb[112].mxu1 }
 0x517   : > { %v5303_v47 = vadd.f32 %v10426_v46, %v14412_v60  ;;  %v5297_v3 = vpop.f32.mrb[113].mxu1 }
 0x518   : > { %v5298_v4 = vadd.f32 %v14412_v60, %v5297_v3 }
 0x519   : > { %v5425_v5 = vmax.f32 %v5303_v47, 0.0 }
 0x51a   : > { %v5424_v24 = vmax.f32 %v5298_v4, 0.0 }
 0x51c   : > { %10536 = vmatprep.mubr.msk.f32.mxu0 %vm5456_vm4, %v5424_v24 }
 0x51d   : > { %10537 = vmatmul.mubr.msk.f32.gmra.mrb[176].mxu0 %vm5456_vm4, %v5425_v5 }
 0x51e   : > { %v10429_v17 = vpop.f32.mrb[114].mxu1 }
 0x51f   : > { %v5313_v26 = vadd.f32 %v10429_v17, %v14412_v60  ;;  %v5307_v56 = vpop.f32.mrb[115].mxu1 }
 0x520   : > { %v5308_v53 = vadd.f32 %v14412_v60, %v5307_v56 }
 0x521   : > { %v5427_v30 = vmax.f32 %v5313_v26, 0.0 }
 0x522   : > { %v5426_v15 = vmax.f32 %v5308_v53, 0.0 }
 0x524   : > { %10539 = vmatprep.mubr.msk.f32.mxu0 %vm5456_vm4, %v5426_v15 }
 0x525   : > { %10540 = vmatmul.mubr.msk.f32.gmra.mrb[178].mxu0 %vm5456_vm4, %v5427_v30 }
 0x526   : > { %v10432_v28 = vpop.f32.mrb[116].mxu1 }
 0x527   : > { %v5323_v63 = vadd.f32 %v10432_v28, %v14412_v60  ;;  %v5317_v34 = vpop.f32.mrb[117].mxu1 }
 0x528   : > { %v5318_v16 = vadd.f32 %v14412_v60, %v5317_v34 }
 0x529   : > { %v5429_v48 = vmax.f32 %v5323_v63, 0.0 }
 0x52a   : > { %v5428_v43 = vmax.f32 %v5318_v16, 0.0 }
 0x52c   : > { %10542 = vmatprep.mubr.msk.f32.mxu0 %vm5456_vm4, %v5428_v43 }
 0x52d   : > { %10543 = vmatmul.mubr.msk.f32.gmra.mrb[180].mxu0 %vm5456_vm4, %v5429_v48 }
 0x52e   : > { %v10435_v57 = vpop.f32.mrb[118].mxu1 }
 0x52f   : > { %v5333_v31 = vadd.f32 %v10435_v57, %v14412_v60  ;;  %v5327_v46 = vpop.f32.mrb[119].mxu1 }
 0x530   : > { %v5328_v47 = vadd.f32 %v14412_v60, %v5327_v46 }
 0x531   : > { %v5431_v4 = vmax.f32 %v5333_v31, 0.0 }
 0x532   : > { %v5430_v3 = vmax.f32 %v5328_v47, 0.0 }
 0x534   : > { %10545 = vmatprep.mubr.msk.f32.mxu0 %vm5456_vm4, %v5430_v3  ;;  %v14584_v3 = vld [vmem:[%s15351_s5] ss:$0 sm:$0xff] }
 0x535   : > { %10546 = vmatmul.mubr.msk.f32.gmra.mrb[182].mxu0 %vm5456_vm4, %v5431_v4 }
 0x536   : > { %v10438_v24 = vpop.f32.mrb[120].mxu1 }
 0x537   : > { %v5343_v5 = vadd.f32 %v10438_v24, %v14412_v60  ;;  %v5337_v17 = vpop.f32.mrb[121].mxu1 }
 0x538   : > { %v5338_v26 = vadd.f32 %v14412_v60, %v5337_v17  ;;  %v4406_v17 = vadd.f32 %v14584_v3, %v14145_v33  ;;  %v6683_v33 = vld [vmem:[%s15357_s11 + $0x8] sm:$0xff] }
 0x539   : > { %v5433_v53 = vmax.f32 %v5343_v5, 0.0 }
 0x53a   : > { %v5432_v56 = vmax.f32 %v5338_v26, 0.0 }
 0x53c   : > { %10548 = vmatprep.mubr.msk.f32.mxu0 %vm5456_vm4, %v5432_v56 }
 0x53d   : > { %10549 = vmatmul.mubr.msk.f32.gmra.mrb[184].mxu0 %vm5456_vm4, %v5433_v53  ;;  %v4411_v53 = vadd.f32 %v14143_v2, %v14584_v3  ;;  %v6684_v2 = vld [vmem:[%s15357_s11 + $0x10] sm:$0xff] }
 0x53e   : > { %v10441_v15 = vpop.f32.mrb[122].mxu1 }
 0x53f   : > { %v5353_v30 = vadd.f32 %v10441_v15, %v14412_v60  ;;  %v5347_v28 = vpop.f32.mrb[123].mxu1 }
 0x540   : > { %v5348_v63 = vadd.f32 %v14412_v60, %v5347_v28  ;;  %v4416_v28 = vadd.f32 %v14584_v3, %v14155_v58  ;;  %v6685_v58 = vld [vmem:[%s15357_s11 + $0x18] sm:$0xff] }
 0x541   : > { %v5435_v16 = vmax.f32 %v5353_v30, 0.0  ;;  %v4724_v30 = vmax.f32 %v4406_v17, 0.0  ;;  %v16248_v17 = vld [vmem:[#allocation59_spill] sm:$0xff] }
 0x542   : > { %v5434_v34 = vmax.f32 %v5348_v63, 0.0  ;;  %v6682_v63 = vld [vmem:[%s15357_s11] sm:$0xff] }
 0x544   : > { %10551 = vmatprep.mubr.msk.f32.mxu0 %vm5456_vm4, %v5434_v34  ;;  %v4725_v34 = vmax.f32 %v4411_v53, 0.0  ;;  %v4446_v53 = vadd.f32 %v14584_v3, %v14187_v42  ;;  %v4461_v42 = vadd.f32 %v14191_v51, %v14584_v3 }
 0x545   : > { %10552 = vmatmul.mubr.msk.f32.gmra.mrb[186].mxu0 %vm5456_vm4, %v5435_v16  ;;  %v4421_v16 = vadd.f32 %v14149_v6, %v14584_v3 }
 0x546   : > { %v10444_v43 = vpop.f32.mrb[124].mxu1 }
 0x547   : > { %v5363_v48 = vadd.f32 %v10444_v43, %v14412_v60  ;;  %v5357_v57 = vpop.f32.mrb[125].mxu1  ;;  %v10948_v43 = vpack.c.bf16 %v6685_v58, %v6684_v2 }
 0x548   : > { %v5358_v31 = vadd.f32 %v14412_v60, %v5357_v57  ;;  %v6687_v57 = vld [vmem:[%s15357_s11 + $0x28] sm:$0xff] }
 0x549   : > { %v5437_v47 = vmax.f32 %v5363_v48, 0.0  ;;  %v6686_v48 = vld [vmem:[%s15357_s11 + $0x20] sm:$0xff] }
 0x54a   : > { %v5436_v46 = vmax.f32 %v5358_v31, 0.0  ;;  %v4726_v31 = vmax.f32 %v4416_v28, 0.0  ;;  %v10952_v6 = vpack.c.bf16 %v6687_v57, %v6686_v48  ;;  %v16251_v48 = vld [vmem:[#allocation67_spill] sm:$0xff] }
 0x54b   : > { %v4486_v57 = vadd.f32 %v14584_v3, %v16251_v48  ;;  %v16259_v48 = vld [vmem:[#allocation83_spill] sm:$0xff] }
 0x54c   : > { %10554 = vmatprep.mubr.msk.f32.mxu0 %vm5456_vm4, %v5436_v46  ;;  %v4426_v46 = vadd.f32 %v14584_v3, %v14163_v12 }
 0x54d   : > { %10555 = vmatmul.mubr.msk.f32.gmra.mrb[188].mxu0 %vm5456_vm4, %v5437_v47  ;;  %v4727_v47 = vmax.f32 %v4421_v16, 0.0  ;;  %v4481_v16 = vadd.f32 %v14206_v38, %v14584_v3 }
 0x54e   : > { %v10447_v4 = vpop.f32.mrb[126].mxu1 }
 0x54f   : > { %v5373_v24 = vadd.f32 %v10447_v4, %v14412_v60  ;;  %v5367_v5 = vpop.f32.mrb[127].mxu1  ;;  %v4431_v4 = vadd.f32 %v14161_v44, %v14584_v3 }
 0x550   : > { %v5368_v26 = vadd.f32 %v14412_v60, %v5367_v5  ;;  %v10944_v60 = vpack.c.bf16 %v6683_v33, %v6682_v63  ;;  %v4436_v5 = vadd.f32 %v14584_v3, %v14179_v21  ;;  %v4451_v21 = vadd.f32 %v14185_v9, %v14584_v3  ;;  %v16249_v33 = vld [vmem:[#allocation63_spill] sm:$0xff] }
 0x551   : > { %v5439_v15 = vmax.f32 %v5373_v24, 0.0  ;;  %v4728_v24 = vmax.f32 %v4426_v46, 0.0  ;;  %v4729_v12 = vmax.f32 %v4431_v4, 0.0  ;;  %v4466_v2 = vadd.f32 %v14584_v3, %v16249_v33  ;;  %v16252_v46 = vld [vmem:[#allocation64_spill] sm:$0xff] }
 0x552   : > { %v5438_v56 = vmax.f32 %v5368_v26, 0.0  ;;  %10945 = vmatprep.subr.bf16.mxu1 %v10944_v60  ;;  %v4441_v26 = vadd.f32 %v16248_v17, %v14584_v3  ;;  %v4733_v28 = vmax.f32 %v4451_v21, 0.0  ;;  %v4735_v9 = vmax.f32 %v4461_v42, 0.0  ;;  %v16256_v42 = vld [vmem:[#allocation72_spill] sm:$0xff] }
 0x553   : > { %10947 = vmatpush3.bf16.msra.mxu1 %v10944_v60  ;;  %v16250_v60 = vld [vmem:[#allocation60_spill] sm:$0xff]  ;;  %v4736_v58 = vmax.f32 %v4466_v2, 0.0  ;;  %v4501_v4 = vadd.f32 %v14218_v20, %v14584_v3  ;;  %v4536_v33 = vadd.f32 %v14584_v3, %v14245_v49  ;;  %v4541_v2 = vadd.f32 %v14242_v19, %v14584_v3 }
 0x554   : > { %10557 = vmatprep.mubr.msk.f32.mxu0 %vm5456_vm4, %v5438_v56  ;;  %10949 = vmatprep.subr.bf16.mxu1 %v10948_v43  ;;  %v4730_v56 = vmax.f32 %v4436_v5, 0.0  ;;  %v4731_v44 = vmax.f32 %v4441_v26, 0.0  ;;  %v16253_v5 = vld [vmem:[#allocation71_spill] sm:$0xff]  ;;  %v16254_v26 = vld [vmem:[#allocation68_spill] sm:$0xff] }
 0x555   : > { %10558 = vmatmul.mubr.msk.f32.gmra.mrb[190].mxu0 %vm5456_vm4, %v5439_v15  ;;  %v4732_v15 = vmax.f32 %v4446_v53, 0.0  ;;  %v4743_v17 = vmax.f32 %v4501_v4, 0.0  ;;  %v4516_v53 = vadd.f32 %v14584_v3, %v14233_v45  ;;  %v4531_v45 = vadd.f32 %v16256_v42, %v14584_v3 }
 0x556   : > { %10576 = vmatprep.mubr.msk.f32.mxu0 %vm5456_vm4, %v4724_v30  ;;  %v4456_v30 = vadd.f32 %v14584_v3, %v14197_v7  ;;  %v4471_v7 = vadd.f32 %v16250_v60, %v14584_v3  ;;  %v4546_v60 = vadd.f32 %v14584_v3, %v14250_v23 }
 0x557   : > { %10951 = vmatpush3.bf16.msra.mxu1 %v10948_v43  ;;  %v4746_v21 = vmax.f32 %v4516_v53, 0.0  ;;  %v4616_v53 = vadd.f32 %v14584_v3, %v14323_v41  ;;  %v4631_v41 = vadd.f32 %v14329_v61, %v14584_v3  ;;  %v4641_v61 = vadd.f32 %v14337_v37, %v14584_v3 }
 0x558   : > { %10953 = vmatprep.subr.bf16.mxu1 %v10952_v6  ;;  %v4734_v63 = vmax.f32 %v4456_v30, 0.0  ;;  %v4737_v51 = vmax.f32 %v4471_v7, 0.0  ;;  %v4751_v7 = vmax.f32 %v4541_v2, 0.0 }
 0x559   : > { %10577 = vmatmul.mubr.msk.f32.vlgmr.msra.gmra.mrb[128].mxu0 %vm5456_vm4, %v4725_v34  ;;  %v4476_v34 = vadd.f32 %v14584_v3, %v14209_v35  ;;  %v4491_v35 = vadd.f32 %v16252_v46, %v14584_v3  ;;  %v16260_v46 = vld [vmem:[#allocation80_spill] sm:$0xff] }
 0x55a   : > { %10579 = vmatprep.mubr.msk.f32.mxu0 %vm5456_vm4, %v4726_v31  ;;  %v4739_v31 = vmax.f32 %v4481_v16, 0.0  ;;  %v16258_v16 = vld [vmem:[#allocation79_spill] sm:$0xff] }
 0x55b   : > { %10955 = vmatpush3.bf16.msra.mxu1 %v10952_v6  ;;  %v4738_v43 = vmax.f32 %v4476_v34, 0.0  ;;  %v4740_v6 = vmax.f32 %v4486_v57, 0.0  ;;  %v4741_v38 = vmax.f32 %v4491_v35, 0.0  ;;  %v4752_v34 = vmax.f32 %v4546_v60, 0.0 }
 0x55c   : > { %v4561_v23 = vadd.f32 %v16258_v16, %v14584_v3  ;;  %v4566_v57 = vadd.f32 %v14584_v3, %v16259_v48  ;;  %v16263_v16 = vld [vmem:[#allocation89_spill] sm:$0xff] }
 0x55d   : > { %10580 = vmatmul.mubr.msk.f32.gmra.mrb[130].mxu0 %vm5456_vm4, %v4727_v47  ;;  %v4496_v47 = vadd.f32 %v14584_v3, %v14221_v18  ;;  %v4511_v18 = vadd.f32 %v16254_v26, %v14584_v3 }
 0x55e   : > { %10582 = vmatprep.mubr.msk.f32.mxu0 %vm5456_vm4, %v4728_v24  ;;  %v4756_v35 = vmax.f32 %v4566_v57, 0.0 }
 0x55f   : > { %v4742_v24 = vmax.f32 %v4496_v47, 0.0  ;;  %v4745_v20 = vmax.f32 %v4511_v18, 0.0  ;;  %v4606_v18 = vadd.f32 %v14584_v3, %v14315_v29  ;;  %v4621_v29 = vadd.f32 %v14321_v11, %v14584_v3  ;;  %v6688_v11 = vld [vmem:[%s15357_s11 + $0x30] sm:$0xff] }
 0x561   : > { %10583 = vmatmul.mubr.msk.f32.gmra.mrb[132].mxu0 %vm5456_vm4, %v4729_v12  ;;  %v4506_v12 = vadd.f32 %v14584_v3, %v16253_v5 }
 0x562   : > { %10585 = vmatprep.mubr.msk.f32.mxu0 %vm5456_vm4, %v4730_v56 }
 0x563   : > { %v4744_v56 = vmax.f32 %v4506_v12, 0.0 }
 0x565   : > { %10586 = vmatmul.mubr.msk.f32.gmra.mrb[134].mxu0 %vm5456_vm4, %v4731_v44  ;;  %v4521_v44 = vadd.f32 %v14230_v25, %v14584_v3  ;;  %v4749_v25 = vmax.f32 %v4531_v45, 0.0  ;;  %v4771_v45 = vmax.f32 %v4641_v61, 0.0 }
 0x566   : > { %10588 = vmatprep.mubr.msk.f32.mxu0 %vm5456_vm4, %v4732_v15  ;;  %v16255_v15 = vld [vmem:[#allocation75_spill] sm:$0xff] }
 0x567   : > { %v4526_v30 = vadd.f32 %v14584_v3, %v16255_v15  ;;  %v4636_v15 = vadd.f32 %v14584_v3, %v14339_v55  ;;  %v4646_v55 = vadd.f32 %v14584_v3, %v14347_v10  ;;  %v4661_v10 = vadd.f32 %v14353_v0, %v14584_v3 }
 0x569   : > { %10589 = vmatmul.mubr.msk.f32.gmra.mrb[136].mxu0 %vm5456_vm4, %v4733_v28  ;;  %v4747_v28 = vmax.f32 %v4521_v44, 0.0  ;;  %v4626_v44 = vadd.f32 %v14584_v3, %v14331_v14  ;;  %v6689_v14 = vld [vmem:[%s15357_s11 + $0x38] sm:$0xff]  ;;  %v4770_v42 = vmax.f32 %v4636_v15, 0.0 }
 0x56a   : > { %10591 = vmatprep.mubr.msk.f32.mxu0 %vm5456_vm4, %v4734_v63  ;;  %v4748_v63 = vmax.f32 %v4526_v30, 0.0  ;;  %v10956_v30 = vpack.c.bf16 %v6689_v14, %v6688_v11 }
 0x56c   : > { %10957 = vmatprep.subr.bf16.mxu1 %v10956_v30 }
 0x56d   : > { %10592 = vmatmul.mubr.msk.f32.gmra.mrb[138].mxu0 %vm5456_vm4, %v4735_v9  ;;  %v4750_v9 = vmax.f32 %v4536_v33, 0.0  ;;  %10959 = vmatpush3.bf16.msra.mxu1 %v10956_v30  ;;  %v4772_v33 = vmax.f32 %v4646_v55, 0.0 }
 0x56e   : > { %10594 = vmatprep.mubr.msk.f32.mxu0 %vm5456_vm4, %v4736_v58  ;;  %v16257_v58 = vld [vmem:[#allocation76_spill] sm:$0xff] }
 0x56f   : > { %v4551_v49 = vadd.f32 %v16257_v58, %v14584_v3 }
 0x571   : > { %10595 = vmatmul.mubr.msk.f32.gmra.mrb[140].mxu0 %vm5456_vm4, %v4737_v51  ;;  %v4556_v51 = vadd.f32 %v14584_v3, %v14257_v62  ;;  %v4753_v19 = vmax.f32 %v4551_v49, 0.0  ;;  %v4571_v62 = vadd.f32 %v16260_v46, %v14584_v3  ;;  %v16261_v49 = vld [vmem:[#allocation87_spill] sm:$0xff] }
 0x572   : > { %10597 = vmatprep.mubr.msk.f32.mxu0 %vm5456_vm4, %v4738_v43 }
 0x573   : > { %v4754_v43 = vmax.f32 %v4556_v51, 0.0  ;;  %v4757_v47 = vmax.f32 %v4571_v62, 0.0  ;;  %v16262_v51 = vld [vmem:[#allocation84_spill] sm:$0xff] }
 0x575   : > { %10598 = vmatmul.mubr.msk.f32.gmra.mrb[142].mxu0 %vm5456_vm4, %v4739_v31  ;;  %v4755_v31 = vmax.f32 %v4561_v23, 0.0  ;;  %v4696_v23 = vadd.f32 %v14584_v3, %v16263_v16 }
 0x576   : > { %10600 = vmatprep.mubr.msk.f32.mxu0 %vm5456_vm4, %v4740_v6  ;;  %v4576_v6 = vadd.f32 %v14584_v3, %v14291_v13  ;;  %v4591_v13 = vadd.f32 %v14297_v36, %v14584_v3 }
 0x577   : > { %v4782_v57 = vmax.f32 %v4696_v23, 0.0 }
 0x578   : > { %v4758_v4 = vmax.f32 %v4576_v6, 0.0 }
 0x579   : > { %10601 = vmatmul.mubr.msk.f32.gmra.mrb[144].mxu0 %vm5456_vm4, %v4741_v38  ;;  %v4581_v38 = vadd.f32 %v14289_v40, %v14584_v3  ;;  %v4761_v40 = vmax.f32 %v4591_v13, 0.0 }
 0x57a   : > { %10603 = vmatprep.mubr.msk.f32.mxu0 %vm5456_vm4, %v4742_v24  ;;  %v4586_v24 = vadd.f32 %v14584_v3, %v14299_v52  ;;  %v4601_v52 = vadd.f32 %v14305_v54, %v14584_v3 }
 0x57b   : > { %v4759_v5 = vmax.f32 %v4581_v38, 0.0  ;;  %v16267_v38 = vld [vmem:[#allocation11_spill] sm:$0xff] }
 0x57c   : > { %v4760_v12 = vmax.f32 %v4586_v24, 0.0  ;;  %v4763_v36 = vmax.f32 %v4601_v52, 0.0 }
 0x57d   : > { %10604 = vmatmul.mubr.msk.f32.gmra.mrb[146].mxu0 %vm5456_vm4, %v4743_v17  ;;  %v4596_v17 = vadd.f32 %v14584_v3, %v14307_v32  ;;  %v4611_v32 = vadd.f32 %v14313_v8, %v14584_v3  ;;  %v4767_v8 = vmax.f32 %v4621_v29, 0.0 }
 0x57e   : > { %10606 = vmatprep.mubr.msk.f32.mxu0 %vm5456_vm4, %v4744_v56  ;;  %v4764_v56 = vmax.f32 %v4606_v18, 0.0  ;;  %v7338_v18 = vld [vmem:[%s15359_s13] sm:$0xff] }
 0x57f   : > { %v4762_v26 = vmax.f32 %v4596_v17, 0.0  ;;  %v4765_v54 = vmax.f32 %v4611_v32, 0.0 }
 0x581   : > { %10607 = vmatmul.mubr.msk.f32.gmra.mrb[148].mxu0 %vm5456_vm4, %v4745_v20  ;;  %v4766_v20 = vmax.f32 %v4616_v53, 0.0  ;;  %v7341_v53 = vld [vmem:[%s15359_s13 + $0x18] sm:$0xff] }
 0x582   : > { %10609 = vmatprep.mubr.msk.f32.mxu0 %vm5456_vm4, %v4746_v21  ;;  %v4768_v21 = vmax.f32 %v4626_v44, 0.0  ;;  %v7342_v44 = vld [vmem:[%s15359_s13 + $0x20] sm:$0xff] }
 0x585   : > { %10610 = vmatmul.mubr.msk.f32.gmra.mrb[150].mxu0 %vm5456_vm4, %v4747_v28  ;;  %v4769_v28 = vmax.f32 %v4631_v41, 0.0 }
 0x586   : > { %10612 = vmatprep.mubr.msk.f32.mxu0 %vm5456_vm4, %v4748_v63  ;;  %v4651_v63 = vadd.f32 %v14345_v22, %v14584_v3  ;;  %v4775_v22 = vmax.f32 %v4661_v10, 0.0 }
 0x588   : > { %v4773_v37 = vmax.f32 %v4651_v63, 0.0 }
 0x589   : > { %10613 = vmatmul.mubr.msk.f32.gmra.mrb[152].mxu0 %vm5456_vm4, %v4749_v25  ;;  %v4656_v25 = vadd.f32 %v14584_v3, %v14355_v50  ;;  %v4671_v50 = vadd.f32 %v14361_v39, %v14584_v3 }
 0x58a   : > { %10615 = vmatprep.mubr.msk.f32.mxu0 %vm5456_vm4, %v4750_v9  ;;  %v4666_v9 = vadd.f32 %v14584_v3, %v14363_v27  ;;  %v4681_v27 = vadd.f32 %v14369_v1, %v14584_v3 }
 0x58b   : > { %v4774_v2 = vmax.f32 %v4656_v25, 0.0  ;;  %v4777_v0 = vmax.f32 %v4671_v50, 0.0 }
 0x58c   : > { %v4776_v60 = vmax.f32 %v4666_v9, 0.0  ;;  %v4779_v39 = vmax.f32 %v4681_v27, 0.0 }
 0x58d   : > { %10616 = vmatmul.mubr.msk.f32.gmra.mrb[154].mxu0 %vm5456_vm4, %v4751_v7  ;;  %v4676_v7 = vadd.f32 %v14584_v3, %v14371_v59  ;;  %v4691_v59 = vadd.f32 %v16262_v51, %v14584_v3 }
 0x58e   : > { %10618 = vmatprep.mubr.msk.f32.mxu0 %vm5456_vm4, %v4752_v34  ;;  %v4686_v34 = vadd.f32 %v14584_v3, %v16261_v49 }
 0x58f   : > { %v4778_v58 = vmax.f32 %v4676_v7, 0.0  ;;  %v4781_v1 = vmax.f32 %v4691_v59, 0.0 }
 0x591   : > { %10619 = vmatmul.mubr.msk.f32.gmra.mrb[156].mxu0 %vm5456_vm4, %v4753_v19  ;;  %v4780_v19 = vmax.f32 %v4686_v34, 0.0 }
 0x592   : > { %10621 = vmatprep.mubr.msk.f32.mxu0 %vm5456_vm4, %v4754_v43  ;;  %v16264_v43 = vld [vmem:[#allocation88_spill] sm:$0xff] }
 0x593   : > { %v4701_v48 = vadd.f32 %v16264_v43, %v14584_v3 }
 0x595   : > { %10622 = vmatmul.mubr.msk.f32.gmra.mrb[158].mxu0 %vm5456_vm4, %v4755_v31  ;;  %v16265_v31 = vld [vmem:[#allocation93_spill] sm:$0xff]  ;;  %v4783_v62 = vmax.f32 %v4701_v48, 0.0 }
 0x596   : > { %10624 = vmatprep.mubr.msk.f32.mxu0 %vm5456_vm4, %v4756_v35  ;;  %v4706_v46 = vadd.f32 %v14584_v3, %v16265_v31  ;;  %v16266_v35 = vld [vmem:[#allocation92_spill] sm:$0xff] }
 0x597   : > { %v4711_v6 = vadd.f32 %v16266_v35, %v14584_v3 }
 0x599   : > { %10625 = vmatmul.mubr.msk.f32.gmra.mrb[160].mxu0 %vm5456_vm4, %v4757_v47  ;;  %v4784_v47 = vmax.f32 %v4706_v46, 0.0  ;;  %v4785_v24 = vmax.f32 %v4711_v6, 0.0 }
 0x59a   : > { %10627 = vmatprep.mubr.msk.f32.mxu0 %vm5456_vm4, %v4758_v4  ;;  %v4716_v4 = vadd.f32 %v14584_v3, %v16267_v38 }
 0x59d   : > { %10628 = vmatmul.mubr.msk.f32.gmra.mrb[162].mxu0 %vm5456_vm4, %v4759_v5  ;;  %v16268_v5 = vld [vmem:[#allocation96_spill] sm:$0xff] }
 0x59e   : > { %10630 = vmatprep.mubr.msk.f32.mxu0 %vm5456_vm4, %v4760_v12  ;;  %v4721_v13 = vadd.f32 %v16268_v5, %v14584_v3  ;;  %v4786_v12 = vmax.f32 %v4716_v4, 0.0  ;;  %v7339_v3 = vld [vmem:[%s15359_s13 + $0x8] sm:$0xff] }
 0x5a0   : > { %v4787_v17 = vmax.f32 %v4721_v13, 0.0 }
 0x5a1   : > { %10631 = vmatmul.mubr.msk.f32.gmra.mrb[164].mxu0 %vm5456_vm4, %v4761_v40  ;;  %v14810_v40 = vld [vmem:[%s15356_s10] ss:$0 sm:$0xff] }
 0x5a2   : > { %10633 = vmatprep.mubr.msk.f32.mxu0 %vm5456_vm4, %v4762_v26 }
 0x5a5   : > { %10634 = vmatmul.mubr.msk.f32.gmra.mrb[166].mxu0 %vm5456_vm4, %v4763_v36  ;;  %v7340_v36 = vld [vmem:[%s15359_s13 + $0x10] sm:$0xff] }
 0x5a6   : > { %10636 = vmatprep.mubr.msk.f32.mxu0 %vm5456_vm4, %v4764_v56  ;;  %v10960_v56 = vpack.c.bf16 %v7339_v3, %v7338_v18  ;;  %v10964_v29 = vpack.c.bf16 %v7341_v53, %v7340_v36 }
 0x5a8   : > { %10961 = vmatprep.subr.bf16.mxu1 %v10960_v56 }
 0x5a9   : > { %10637 = vmatmul.mubr.msk.f32.gmra.mrb[168].mxu0 %vm5456_vm4, %v4765_v54 }
 0x5aa   : > { %10639 = vmatprep.mubr.msk.f32.mxu0 %vm5456_vm4, %v4766_v20 }
 0x5ad   : > { %10640 = vmatmul.mubr.msk.f32.gmra.mrb[170].mxu0 %vm5456_vm4, %v4767_v8  ;;  %v7343_v8 = vld [vmem:[%s15359_s13 + $0x28] sm:$0xff] }
 0x5ae   : > { %10642 = vmatprep.mubr.msk.f32.mxu0 %vm5456_vm4, %v4768_v21  ;;  %v10968_v11 = vpack.c.bf16 %v7343_v8, %v7342_v44 }
 0x5b1   : > { %10643 = vmatmul.mubr.msk.f32.gmra.mrb[172].mxu0 %vm5456_vm4, %v4769_v28 }
 0x5b2   : > { %10645 = vmatprep.mubr.msk.f32.mxu0 %vm5456_vm4, %v4770_v42 }
 0x5b5   : > { %10646 = vmatmul.mubr.msk.f32.gmra.mrb[174].mxu0 %vm5456_vm4, %v4771_v45 }
 0x5b6   : > { %10648 = vmatprep.mubr.msk.f32.mxu0 %vm5456_vm4, %v4772_v33 }
 0x5b9   : > { %10649 = vmatmul.mubr.msk.f32.gmra.mrb[176].mxu0 %vm5456_vm4, %v4773_v37 }
 0x5ba   : > { %10651 = vmatprep.mubr.msk.f32.mxu0 %vm5456_vm4, %v4774_v2 }
 0x5bd   : > { %10652 = vmatmul.mubr.msk.f32.gmra.mrb[178].mxu0 %vm5456_vm4, %v4775_v22 }
 0x5be   : > { %10654 = vmatprep.mubr.msk.f32.mxu0 %vm5456_vm4, %v4776_v60 }
 0x5c1   : > { %10655 = vmatmul.mubr.msk.f32.gmra.mrb[180].mxu0 %vm5456_vm4, %v4777_v0 }
 0x5c2   : > { %10657 = vmatprep.mubr.msk.f32.mxu0 %vm5456_vm4, %v4778_v58 }
 0x5c5   : > { %10658 = vmatmul.mubr.msk.f32.gmra.mrb[182].mxu0 %vm5456_vm4, %v4779_v39 }
 0x5c6   : > { %10660 = vmatprep.mubr.msk.f32.mxu0 %vm5456_vm4, %v4780_v19 }
 0x5c9   : > { %10661 = vmatmul.mubr.msk.f32.gmra.mrb[184].mxu0 %vm5456_vm4, %v4781_v1 }
 0x5ca   : > { %10663 = vmatprep.mubr.msk.f32.mxu0 %vm5456_vm4, %v4782_v57 }
 0x5cd   : > { %10664 = vmatmul.mubr.msk.f32.gmra.mrb[186].mxu0 %vm5456_vm4, %v4783_v62 }
 0x5ce   : > { %10666 = vmatprep.mubr.msk.f32.mxu0 %vm5456_vm4, %v4784_v47 }
 0x5d1   : > { %10667 = vmatmul.mubr.msk.f32.gmra.mrb[188].mxu0 %vm5456_vm4, %v4785_v24 }
 0x5d2   : > { %10669 = vmatprep.mubr.msk.f32.mxu0 %vm5456_vm4, %v4786_v12 }
 0x5d5   : > { %10670 = vmatmul.mubr.msk.f32.gmra.mrb[190].mxu0 %vm5456_vm4, %v4787_v17 }
 0x62c   : > { %v10578_v52 = vpop.f32.mrb[128].mxu0 }
 0x62d   : > { %v6292_v26 = vpop.f32.mrb[129].mxu0  ;;  %v6619_v54 = vadd.f32 %v10578_v52, %v14810_v40 }
 0x62e   : > { %v6618_v32 = vadd.f32 %v14810_v40, %v6292_v26 }
 0x630   : > { %v10581_v20 = vpop.f32.mrb[130].mxu0  ;;  %10688 = vmatprep.mubr.msk.f32.mxu1 %vm5456_vm4, %v6618_v32 }
 0x631   : > { %v6302_v41 = vpop.f32.mrb[131].mxu0  ;;  %10689 = vmatmul.mubr.msk.f32.vlgmr.msra.gmra.mrb[128].mxu1 %vm5456_vm4, %v6619_v54  ;;  %v6621_v15 = vadd.f32 %v10581_v20, %v14810_v40 }
 0x632   : > { %v6620_v21 = vadd.f32 %v14810_v40, %v6302_v41  ;;  %10963 = vmatpush3.bf16.msra.mxu1 %v10960_v56 }
 0x633   : > { %10965 = vmatprep.subr.bf16.mxu1 %v10964_v29 }
 0x634   : > { %v10584_v14 = vpop.f32.mrb[132].mxu0  ;;  %10691 = vmatprep.mubr.msk.f32.mxu1 %vm5456_vm4, %v6620_v21 }
 0x635   : > { %v6312_v30 = vpop.f32.mrb[133].mxu0  ;;  %10692 = vmatmul.mubr.msk.f32.gmra.mrb[130].mxu1 %vm5456_vm4, %v6621_v15  ;;  %v6623_v61 = vadd.f32 %v10584_v14, %v14810_v40 }
 0x636   : > { %v6622_v28 = vadd.f32 %v14810_v40, %v6312_v30  ;;  %10967 = vmatpush3.bf16.msra.mxu1 %v10964_v29 }
 0x637   : > { %10969 = vmatprep.subr.bf16.mxu1 %v10968_v11 }
 0x638   : > { %v10587_v42 = vpop.f32.mrb[134].mxu0  ;;  %10694 = vmatprep.mubr.msk.f32.mxu1 %vm5456_vm4, %v6622_v28 }
 0x639   : > { %v6322_v55 = vpop.f32.mrb[135].mxu0  ;;  %10695 = vmatmul.mubr.msk.f32.gmra.mrb[132].mxu1 %vm5456_vm4, %v6623_v61  ;;  %v6625_v63 = vadd.f32 %v10587_v42, %v14810_v40 }
 0x63a   : > { %v6624_v45 = vadd.f32 %v14810_v40, %v6322_v55  ;;  %10971 = vmatpush3.bf16.msra.mxu1 %v10968_v11 }
 0x63c   : > { %v10590_v33 = vpop.f32.mrb[136].mxu0  ;;  %10697 = vmatprep.mubr.msk.f32.mxu1 %vm5456_vm4, %v6624_v45 }
 0x63d   : > { %v6332_v25 = vpop.f32.mrb[137].mxu0  ;;  %10698 = vmatmul.mubr.msk.f32.gmra.mrb[134].mxu1 %vm5456_vm4, %v6625_v63  ;;  %v6627_v10 = vadd.f32 %v10590_v33, %v14810_v40 }
 0x63e   : > { %v6626_v37 = vadd.f32 %v14810_v40, %v6332_v25 }
 0x640   : > { %v10593_v2 = vpop.f32.mrb[138].mxu0  ;;  %10700 = vmatprep.mubr.msk.f32.mxu1 %vm5456_vm4, %v6626_v37 }
 0x641   : > { %v6342_v9 = vpop.f32.mrb[139].mxu0  ;;  %10701 = vmatmul.mubr.msk.f32.gmra.mrb[136].mxu1 %vm5456_vm4, %v6627_v10  ;;  %v6629_v50 = vadd.f32 %v10593_v2, %v14810_v40 }
 0x642   : > { %v6628_v22 = vadd.f32 %v14810_v40, %v6342_v9 }
 0x644   : > { %v10596_v60 = vpop.f32.mrb[140].mxu0  ;;  %10703 = vmatprep.mubr.msk.f32.mxu1 %vm5456_vm4, %v6628_v22 }
 0x645   : > { %v6352_v7 = vpop.f32.mrb[141].mxu0  ;;  %10704 = vmatmul.mubr.msk.f32.gmra.mrb[138].mxu1 %vm5456_vm4, %v6629_v50  ;;  %v6631_v27 = vadd.f32 %v10596_v60, %v14810_v40 }
 0x646   : > { %v6630_v0 = vadd.f32 %v14810_v40, %v6352_v7 }
 0x648   : > { %v10599_v58 = vpop.f32.mrb[142].mxu0  ;;  %10706 = vmatprep.mubr.msk.f32.mxu1 %vm5456_vm4, %v6630_v0 }
 0x649   : > { %v6362_v49 = vpop.f32.mrb[143].mxu0  ;;  %10707 = vmatmul.mubr.msk.f32.gmra.mrb[140].mxu1 %vm5456_vm4, %v6631_v27  ;;  %v6633_v39 = vadd.f32 %v10599_v58, %v14810_v40  ;;  %v7344_v58 = vld [vmem:[%s15359_s13 + $0x30] sm:$0xff] }
 0x64a   : > { %v6632_v34 = vadd.f32 %v14810_v40, %v6362_v49  ;;  %v7345_v49 = vld [vmem:[%s15359_s13 + $0x38] sm:$0xff] }
 0x64c   : > { %v10602_v51 = vpop.f32.mrb[144].mxu0  ;;  %10709 = vmatprep.mubr.msk.f32.mxu1 %vm5456_vm4, %v6632_v34 }
 0x64d   : > { %v6372_v59 = vpop.f32.mrb[145].mxu0  ;;  %10710 = vmatmul.mubr.msk.f32.gmra.mrb[142].mxu1 %vm5456_vm4, %v6633_v39  ;;  %v6635_v16 = vadd.f32 %v10602_v51, %v14810_v40  ;;  %v10972_v39 = vpack.c.bf16 %v7345_v49, %v7344_v58 }
 0x64e   : > { %v6634_v19 = vadd.f32 %v14810_v40, %v6372_v59 }
 0x64f   : > { %10973 = vmatprep.subr.bf16.mxu1 %v10972_v39 }
 0x650   : > { %v10605_v23 = vpop.f32.mrb[146].mxu0  ;;  %10712 = vmatprep.mubr.msk.f32.mxu1 %vm5456_vm4, %v6634_v19  ;;  %10975 = vmatpush3.bf16.msra.mxu1 %v10972_v39 }
 0x651   : > { %v6382_v1 = vpop.f32.mrb[147].mxu0  ;;  %10713 = vmatmul.mubr.msk.f32.gmra.mrb[144].mxu1 %vm5456_vm4, %v6635_v16  ;;  %v6637_v48 = vadd.f32 %v10605_v23, %v14810_v40 }
 0x652   : > { %v6636_v43 = vadd.f32 %v14810_v40, %v6382_v1 }
 0x654   : > { %v10608_v57 = vpop.f32.mrb[148].mxu0  ;;  %10715 = vmatprep.mubr.msk.f32.mxu1 %vm5456_vm4, %v6636_v43 }
 0x655   : > { %v6392_v31 = vpop.f32.mrb[149].mxu0  ;;  %10716 = vmatmul.mubr.msk.f32.gmra.mrb[146].mxu1 %vm5456_vm4, %v6637_v48  ;;  %v6639_v62 = vadd.f32 %v10608_v57, %v14810_v40 }
 0x656   : > { %v6638_v46 = vadd.f32 %v14810_v40, %v6392_v31 }
 0x658   : > { %v10611_v35 = vpop.f32.mrb[150].mxu0  ;;  %10718 = vmatprep.mubr.msk.f32.mxu1 %vm5456_vm4, %v6638_v46 }
 0x659   : > { %v6402_v6 = vpop.f32.mrb[151].mxu0  ;;  %10719 = vmatmul.mubr.msk.f32.gmra.mrb[148].mxu1 %vm5456_vm4, %v6639_v62  ;;  %v6641_v38 = vadd.f32 %v10611_v35, %v14810_v40 }
 0x65a   : > { %v6640_v47 = vadd.f32 %v14810_v40, %v6402_v6 }
 0x65c   : > { %v10614_v4 = vpop.f32.mrb[152].mxu0  ;;  %10721 = vmatprep.mubr.msk.f32.mxu1 %vm5456_vm4, %v6640_v47 }
 0x65d   : > { %v6412_v24 = vpop.f32.mrb[153].mxu0  ;;  %10722 = vmatmul.mubr.msk.f32.gmra.mrb[150].mxu1 %vm5456_vm4, %v6641_v38  ;;  %v6643_v13 = vadd.f32 %v10614_v4, %v14810_v40 }
 0x65e   : > { %v6642_v5 = vadd.f32 %v14810_v40, %v6412_v24 }
 0x660   : > { %v10617_v12 = vpop.f32.mrb[154].mxu0  ;;  %10724 = vmatprep.mubr.msk.f32.mxu1 %vm5456_vm4, %v6642_v5 }
 0x661   : > { %v6422_v17 = vpop.f32.mrb[155].mxu0  ;;  %10725 = vmatmul.mubr.msk.f32.gmra.mrb[152].mxu1 %vm5456_vm4, %v6643_v13  ;;  %v6645_v26 = vadd.f32 %v10617_v12, %v14810_v40 }
 0x662   : > { %v6644_v52 = vadd.f32 %v14810_v40, %v6422_v17 }
 0x664   : > { %v10620_v18 = vpop.f32.mrb[156].mxu0  ;;  %10727 = vmatprep.mubr.msk.f32.mxu1 %vm5456_vm4, %v6644_v52 }
 0x665   : > { %v6432_v3 = vpop.f32.mrb[157].mxu0  ;;  %10728 = vmatmul.mubr.msk.f32.gmra.mrb[154].mxu1 %vm5456_vm4, %v6645_v26  ;;  %v6647_v32 = vadd.f32 %v10620_v18, %v14810_v40 }
 0x666   : > { %v6646_v36 = vadd.f32 %v14810_v40, %v6432_v3 }
 0x668   : > { %v10623_v56 = vpop.f32.mrb[158].mxu0  ;;  %10730 = vmatprep.mubr.msk.f32.mxu1 %vm5456_vm4, %v6646_v36 }
 0x669   : > { %v6442_v53 = vpop.f32.mrb[159].mxu0  ;;  %10731 = vmatmul.mubr.msk.f32.gmra.mrb[156].mxu1 %vm5456_vm4, %v6647_v32  ;;  %v6649_v29 = vadd.f32 %v10623_v56, %v14810_v40 }
 0x66a   : > { %v6648_v54 = vadd.f32 %v14810_v40, %v6442_v53 }
 0x66c   : > { %v10626_v20 = vpop.f32.mrb[160].mxu0  ;;  %10733 = vmatprep.mubr.msk.f32.mxu1 %vm5456_vm4, %v6648_v54 }
 0x66d   : > { %v6452_v44 = vpop.f32.mrb[161].mxu0  ;;  %10734 = vmatmul.mubr.msk.f32.gmra.mrb[158].mxu1 %vm5456_vm4, %v6649_v29  ;;  %v6651_v41 = vadd.f32 %v10626_v20, %v14810_v40 }
 0x66e   : > { %v6650_v8 = vadd.f32 %v14810_v40, %v6452_v44 }
 0x670   : > { %v10629_v21 = vpop.f32.mrb[162].mxu0  ;;  %10736 = vmatprep.mubr.msk.f32.mxu1 %vm5456_vm4, %v6650_v8 }
 0x671   : > { %v6462_v15 = vpop.f32.mrb[163].mxu0  ;;  %10737 = vmatmul.mubr.msk.f32.gmra.mrb[160].mxu1 %vm5456_vm4, %v6651_v41  ;;  %v6653_v14 = vadd.f32 %v10629_v21, %v14810_v40  ;;  %v14967_v21 = vld [vmem:[%s15358_s12] ss:$0 sm:$0xff] }
 0x672   : > { %v6652_v11 = vadd.f32 %v14810_v40, %v6462_v15 }
 0x674   : > { %v10632_v30 = vpop.f32.mrb[164].mxu0  ;;  %10739 = vmatprep.mubr.msk.f32.mxu1 %vm5456_vm4, %v6652_v11 }
 0x675   : > { %v6472_v28 = vpop.f32.mrb[165].mxu0  ;;  %10740 = vmatmul.mubr.msk.f32.gmra.mrb[162].mxu1 %vm5456_vm4, %v6653_v14  ;;  %v6655_v42 = vadd.f32 %v10632_v30, %v14810_v40 }
 0x676   : > { %v6654_v61 = vadd.f32 %v14810_v40, %v6472_v28 }
 0x678   : > { %v10635_v55 = vpop.f32.mrb[166].mxu0  ;;  %10742 = vmatprep.mubr.msk.f32.mxu1 %vm5456_vm4, %v6654_v61 }
 0x679   : > { %v6482_v45 = vpop.f32.mrb[167].mxu0  ;;  %10743 = vmatmul.mubr.msk.f32.gmra.mrb[164].mxu1 %vm5456_vm4, %v6655_v42  ;;  %v6657_v33 = vadd.f32 %v10635_v55, %v14810_v40 }
 0x67a   : > { %v6656_v63 = vadd.f32 %v14810_v40, %v6482_v45 }
 0x67c   : > { %v10638_v25 = vpop.f32.mrb[168].mxu0  ;;  %10745 = vmatprep.mubr.msk.f32.mxu1 %vm5456_vm4, %v6656_v63 }
 0x67d   : > { %v6492_v37 = vpop.f32.mrb[169].mxu0  ;;  %10746 = vmatmul.mubr.msk.f32.gmra.mrb[166].mxu1 %vm5456_vm4, %v6657_v33  ;;  %v6659_v2 = vadd.f32 %v10638_v25, %v14810_v40 }
 0x67e   : > { %v6658_v10 = vadd.f32 %v14810_v40, %v6492_v37 }
 0x680   : > { %v10641_v9 = vpop.f32.mrb[170].mxu0  ;;  %10748 = vmatprep.mubr.msk.f32.mxu1 %vm5456_vm4, %v6658_v10 }
 0x681   : > { %v6502_v22 = vpop.f32.mrb[171].mxu0  ;;  %10749 = vmatmul.mubr.msk.f32.gmra.mrb[168].mxu1 %vm5456_vm4, %v6659_v2  ;;  %v6661_v60 = vadd.f32 %v10641_v9, %v14810_v40 }
 0x682   : > { %v6660_v50 = vadd.f32 %v14810_v40, %v6502_v22 }
 0x684   : > { %v10644_v7 = vpop.f32.mrb[172].mxu0  ;;  %10751 = vmatprep.mubr.msk.f32.mxu1 %vm5456_vm4, %v6660_v50 }
 0x685   : > { %v6512_v0 = vpop.f32.mrb[173].mxu0  ;;  %10752 = vmatmul.mubr.msk.f32.gmra.mrb[170].mxu1 %vm5456_vm4, %v6661_v60  ;;  %v6663_v34 = vadd.f32 %v10644_v7, %v14810_v40 }
 0x686   : > { %v6662_v27 = vadd.f32 %v14810_v40, %v6512_v0 }
 0x688   : > { %v10647_v51 = vpop.f32.mrb[174].mxu0  ;;  %10754 = vmatprep.mubr.msk.f32.mxu1 %vm5456_vm4, %v6662_v27 }
 0x689   : > { %v6522_v59 = vpop.f32.mrb[175].mxu0  ;;  %10755 = vmatmul.mubr.msk.f32.gmra.mrb[172].mxu1 %vm5456_vm4, %v6663_v34  ;;  %v6665_v16 = vadd.f32 %v10647_v51, %v14810_v40 }
 0x68a   : > { %v6664_v19 = vadd.f32 %v14810_v40, %v6522_v59 }
 0x68c   : > { %v10650_v23 = vpop.f32.mrb[176].mxu0  ;;  %10757 = vmatprep.mubr.msk.f32.mxu1 %vm5456_vm4, %v6664_v19 }
 0x68d   : > { %v6532_v1 = vpop.f32.mrb[177].mxu0  ;;  %10758 = vmatmul.mubr.msk.f32.gmra.mrb[174].mxu1 %vm5456_vm4, %v6665_v16  ;;  %v6667_v48 = vadd.f32 %v10650_v23, %v14810_v40 }
 0x68e   : > { %v6666_v43 = vadd.f32 %v14810_v40, %v6532_v1 }
 0x690   : > { %v10653_v57 = vpop.f32.mrb[178].mxu0  ;;  %10760 = vmatprep.mubr.msk.f32.mxu1 %vm5456_vm4, %v6666_v43 }
 0x691   : > { %v6542_v31 = vpop.f32.mrb[179].mxu0  ;;  %10761 = vmatmul.mubr.msk.f32.gmra.mrb[176].mxu1 %vm5456_vm4, %v6667_v48  ;;  %v6669_v62 = vadd.f32 %v10653_v57, %v14810_v40 }
 0x692   : > { %v6668_v46 = vadd.f32 %v14810_v40, %v6542_v31 }
 0x694   : > { %v10656_v35 = vpop.f32.mrb[180].mxu0  ;;  %10763 = vmatprep.mubr.msk.f32.mxu1 %vm5456_vm4, %v6668_v46 }
 0x695   : > { %v6552_v6 = vpop.f32.mrb[181].mxu0  ;;  %10764 = vmatmul.mubr.msk.f32.gmra.mrb[178].mxu1 %vm5456_vm4, %v6669_v62  ;;  %v6671_v38 = vadd.f32 %v10656_v35, %v14810_v40 }
 0x696   : > { %v6670_v47 = vadd.f32 %v14810_v40, %v6552_v6 }
 0x698   : > { %v10659_v4 = vpop.f32.mrb[182].mxu0  ;;  %10766 = vmatprep.mubr.msk.f32.mxu1 %vm5456_vm4, %v6670_v47 }
 0x699   : > { %v6562_v24 = vpop.f32.mrb[183].mxu0  ;;  %10767 = vmatmul.mubr.msk.f32.gmra.mrb[180].mxu1 %vm5456_vm4, %v6671_v38  ;;  %v6673_v13 = vadd.f32 %v10659_v4, %v14810_v40 }
 0x69a   : > { %v6672_v5 = vadd.f32 %v14810_v40, %v6562_v24 }
 0x69c   : > { %v10662_v12 = vpop.f32.mrb[184].mxu0  ;;  %10769 = vmatprep.mubr.msk.f32.mxu1 %vm5456_vm4, %v6672_v5 }
 0x69d   : > { %v6572_v17 = vpop.f32.mrb[185].mxu0  ;;  %10770 = vmatmul.mubr.msk.f32.gmra.mrb[182].mxu1 %vm5456_vm4, %v6673_v13  ;;  %v6675_v26 = vadd.f32 %v10662_v12, %v14810_v40 }
 0x69e   : > { %v6674_v52 = vadd.f32 %v14810_v40, %v6572_v17 }
 0x6a0   : > { %v10665_v18 = vpop.f32.mrb[186].mxu0  ;;  %10772 = vmatprep.mubr.msk.f32.mxu1 %vm5456_vm4, %v6674_v52 }
 0x6a1   : > { %v6582_v3 = vpop.f32.mrb[187].mxu0  ;;  %10773 = vmatmul.mubr.msk.f32.gmra.mrb[184].mxu1 %vm5456_vm4, %v6675_v26  ;;  %v6677_v32 = vadd.f32 %v10665_v18, %v14810_v40 }
 0x6a2   : > { %v6676_v36 = vadd.f32 %v14810_v40, %v6582_v3 }
 0x6a4   : > { %v10668_v56 = vpop.f32.mrb[188].mxu0  ;;  %10775 = vmatprep.mubr.msk.f32.mxu1 %vm5456_vm4, %v6676_v36 }
 0x6a5   : > { %v6592_v53 = vpop.f32.mrb[189].mxu0  ;;  %10776 = vmatmul.mubr.msk.f32.gmra.mrb[186].mxu1 %vm5456_vm4, %v6677_v32  ;;  %v6679_v29 = vadd.f32 %v10668_v56, %v14810_v40 }
 0x6a6   : > { %v6678_v54 = vadd.f32 %v14810_v40, %v6592_v53 }
 0x6a8   : > { %v10671_v20 = vpop.f32.mrb[190].mxu0  ;;  %10778 = vmatprep.mubr.msk.f32.mxu1 %vm5456_vm4, %v6678_v54 }
 0x6a9   : > { %v6602_v44 = vpop.f32.mrb[191].mxu0  ;;  %10779 = vmatmul.mubr.msk.f32.gmra.mrb[188].mxu1 %vm5456_vm4, %v6679_v29  ;;  %v6681_v41 = vadd.f32 %v10671_v20, %v14810_v40 }
 0x6aa   : > { %v6680_v8 = vadd.f32 %v14810_v40, %v6602_v44 }
 0x6ac   : > { %10781 = vmatprep.mubr.msk.f32.mxu1 %vm5456_vm4, %v6680_v8 }
 0x6ad   : > { %10782 = vmatmul.mubr.msk.f32.gmra.mrb[190].mxu1 %vm5456_vm4, %v6681_v41 }
 0x704   : > { %v10690_v15 = vpop.f32.mrb[128].mxu1 }
 0x705   : > { %v6961_v11 = vadd.f32 %v10690_v15, %v14967_v21  ;;  %v6955_v14 = vpop.f32.mrb[129].mxu1 }
 0x706   : > { %v6956_v30 = vadd.f32 %v14967_v21, %v6955_v14 }
 0x707   : > { %v7275_v42 = vmax.f32 %v6961_v11, 0.0 }
 0x708   : > { %v7274_v28 = vmax.f32 %v6956_v30, 0.0  ;;  %v10693_v61 = vpop.f32.mrb[130].mxu1 }
 0x709   : > { %v6971_v40 = vadd.f32 %v10693_v61, %v14967_v21  ;;  %v6965_v55 = vpop.f32.mrb[131].mxu1 }
 0x70a   : > { %v6966_v45 = vadd.f32 %v14967_v21, %v6965_v55  ;;  %10800 = vmatprep.mubr.msk.f32.mxu1 %vm5456_vm4, %v7274_v28 }
 0x70b   : > { %10801 = vmatmul.mubr.msk.f32.vlgmr.msra.gmra.mrb[192].mxu1 %vm5456_vm4, %v7275_v42  ;;  %v7277_v25 = vmax.f32 %v6971_v40, 0.0 }
 0x70c   : > { %v7276_v63 = vmax.f32 %v6966_v45, 0.0  ;;  %v10696_v33 = vpop.f32.mrb[132].mxu1 }
 0x70d   : > { %v6981_v37 = vadd.f32 %v10696_v33, %v14967_v21  ;;  %v6975_v10 = vpop.f32.mrb[133].mxu1 }
 0x70e   : > { %v6976_v2 = vadd.f32 %v14967_v21, %v6975_v10  ;;  %10803 = vmatprep.mubr.msk.f32.mxu1 %vm5456_vm4, %v7276_v63 }
 0x70f   : > { %10804 = vmatmul.mubr.msk.f32.gmra.mrb[194].mxu1 %vm5456_vm4, %v7277_v25  ;;  %v7279_v50 = vmax.f32 %v6981_v37, 0.0 }
 0x710   : > { %v7278_v9 = vmax.f32 %v6976_v2, 0.0  ;;  %v10699_v22 = vpop.f32.mrb[134].mxu1 }
 0x711   : > { %v6991_v60 = vadd.f32 %v10699_v22, %v14967_v21  ;;  %v6985_v7 = vpop.f32.mrb[135].mxu1 }
 0x712   : > { %v6986_v0 = vadd.f32 %v14967_v21, %v6985_v7  ;;  %10806 = vmatprep.mubr.msk.f32.mxu1 %vm5456_vm4, %v7278_v9 }
 0x713   : > { %10807 = vmatmul.mubr.msk.f32.gmra.mrb[196].mxu1 %vm5456_vm4, %v7279_v50  ;;  %v7281_v49 = vmax.f32 %v6991_v60, 0.0 }
 0x714   : > { %v7280_v27 = vmax.f32 %v6986_v0, 0.0  ;;  %v10702_v58 = vpop.f32.mrb[136].mxu1 }
 0x715   : > { %v7001_v34 = vadd.f32 %v10702_v58, %v14967_v21  ;;  %v6995_v39 = vpop.f32.mrb[137].mxu1 }
 0x716   : > { %v6996_v51 = vadd.f32 %v14967_v21, %v6995_v39  ;;  %10809 = vmatprep.mubr.msk.f32.mxu1 %vm5456_vm4, %v7280_v27 }
 0x717   : > { %10810 = vmatmul.mubr.msk.f32.gmra.mrb[198].mxu1 %vm5456_vm4, %v7281_v49  ;;  %v7283_v16 = vmax.f32 %v7001_v34, 0.0 }
 0x718   : > { %v7282_v59 = vmax.f32 %v6996_v51, 0.0  ;;  %v10705_v19 = vpop.f32.mrb[138].mxu1 }
 0x719   : > { %v7011_v23 = vadd.f32 %v10705_v19, %v14967_v21  ;;  %v7005_v1 = vpop.f32.mrb[139].mxu1 }
 0x71a   : > { %v7006_v43 = vadd.f32 %v14967_v21, %v7005_v1  ;;  %10812 = vmatprep.mubr.msk.f32.mxu1 %vm5456_vm4, %v7282_v59 }
 0x71b   : > { %10813 = vmatmul.mubr.msk.f32.gmra.mrb[200].mxu1 %vm5456_vm4, %v7283_v16  ;;  %v7285_v31 = vmax.f32 %v7011_v23, 0.0 }
 0x71c   : > { %v7284_v48 = vmax.f32 %v7006_v43, 0.0  ;;  %v10708_v57 = vpop.f32.mrb[140].mxu1 }
 0x71d   : > { %v7021_v46 = vadd.f32 %v10708_v57, %v14967_v21  ;;  %v7015_v62 = vpop.f32.mrb[141].mxu1 }
 0x71e   : > { %v7016_v35 = vadd.f32 %v14967_v21, %v7015_v62  ;;  %10815 = vmatprep.mubr.msk.f32.mxu1 %vm5456_vm4, %v7284_v48 }
 0x71f   : > { %10816 = vmatmul.mubr.msk.f32.gmra.mrb[202].mxu1 %vm5456_vm4, %v7285_v31  ;;  %v7287_v38 = vmax.f32 %v7021_v46, 0.0 }
 0x720   : > { %v7286_v6 = vmax.f32 %v7016_v35, 0.0  ;;  %v10711_v47 = vpop.f32.mrb[142].mxu1 }
 0x721   : > { %v7031_v4 = vadd.f32 %v10711_v47, %v14967_v21  ;;  %v7025_v24 = vpop.f32.mrb[143].mxu1 }
 0x722   : > { %v7026_v5 = vadd.f32 %v14967_v21, %v7025_v24  ;;  %10818 = vmatprep.mubr.msk.f32.mxu1 %vm5456_vm4, %v7286_v6 }
 0x723   : > { %10819 = vmatmul.mubr.msk.f32.gmra.mrb[204].mxu1 %vm5456_vm4, %v7287_v38  ;;  %v7289_v17 = vmax.f32 %v7031_v4, 0.0 }
 0x724   : > { %v7288_v13 = vmax.f32 %v7026_v5, 0.0  ;;  %v10714_v12 = vpop.f32.mrb[144].mxu1 }
 0x725   : > { %v7041_v52 = vadd.f32 %v10714_v12, %v14967_v21  ;;  %v7035_v26 = vpop.f32.mrb[145].mxu1 }
 0x726   : > { %v7036_v18 = vadd.f32 %v14967_v21, %v7035_v26  ;;  %10821 = vmatprep.mubr.msk.f32.mxu1 %vm5456_vm4, %v7288_v13 }
 0x727   : > { %10822 = vmatmul.mubr.msk.f32.gmra.mrb[206].mxu1 %vm5456_vm4, %v7289_v17  ;;  %v7291_v32 = vmax.f32 %v7041_v52, 0.0 }
 0x728   : > { %v7290_v3 = vmax.f32 %v7036_v18, 0.0  ;;  %v10717_v36 = vpop.f32.mrb[146].mxu1 }
 0x729   : > { %v7051_v56 = vadd.f32 %v10717_v36, %v14967_v21  ;;  %v7045_v53 = vpop.f32.mrb[147].mxu1 }
 0x72a   : > { %v7046_v54 = vadd.f32 %v14967_v21, %v7045_v53  ;;  %10824 = vmatprep.mubr.msk.f32.mxu1 %vm5456_vm4, %v7290_v3 }
 0x72b   : > { %10825 = vmatmul.mubr.msk.f32.gmra.mrb[208].mxu1 %vm5456_vm4, %v7291_v32  ;;  %v7293_v44 = vmax.f32 %v7051_v56, 0.0 }
 0x72c   : > { %v7292_v29 = vmax.f32 %v7046_v54, 0.0  ;;  %v10720_v20 = vpop.f32.mrb[148].mxu1 }
 0x72d   : > { %v7061_v8 = vadd.f32 %v10720_v20, %v14967_v21  ;;  %v7055_v41 = vpop.f32.mrb[149].mxu1 }
 0x72e   : > { %v7056_v15 = vadd.f32 %v14967_v21, %v7055_v41  ;;  %10827 = vmatprep.mubr.msk.f32.mxu1 %vm5456_vm4, %v7292_v29 }
 0x72f   : > { %10828 = vmatmul.mubr.msk.f32.gmra.mrb[210].mxu1 %vm5456_vm4, %v7293_v44  ;;  %v7295_v30 = vmax.f32 %v7061_v8, 0.0 }
 0x730   : > { %v7294_v11 = vmax.f32 %v7056_v15, 0.0  ;;  %v10723_v14 = vpop.f32.mrb[150].mxu1 }
 0x731   : > { %v7071_v28 = vadd.f32 %v10723_v14, %v14967_v21  ;;  %v7065_v61 = vpop.f32.mrb[151].mxu1 }
 0x732   : > { %v7066_v42 = vadd.f32 %v14967_v21, %v7065_v61  ;;  %10830 = vmatprep.mubr.msk.f32.mxu1 %vm5456_vm4, %v7294_v11 }
 0x733   : > { %10831 = vmatmul.mubr.msk.f32.gmra.mrb[212].mxu1 %vm5456_vm4, %v7295_v30  ;;  %v7297_v45 = vmax.f32 %v7071_v28, 0.0 }
 0x734   : > { %v7296_v40 = vmax.f32 %v7066_v42, 0.0  ;;  %v10726_v55 = vpop.f32.mrb[152].mxu1 }
 0x735   : > { %v7081_v63 = vadd.f32 %v10726_v55, %v14967_v21  ;;  %v7075_v33 = vpop.f32.mrb[153].mxu1 }
 0x736   : > { %v7076_v25 = vadd.f32 %v14967_v21, %v7075_v33  ;;  %10833 = vmatprep.mubr.msk.f32.mxu1 %vm5456_vm4, %v7296_v40 }
 0x737   : > { %10834 = vmatmul.mubr.msk.f32.gmra.mrb[214].mxu1 %vm5456_vm4, %v7297_v45  ;;  %v7299_v2 = vmax.f32 %v7081_v63, 0.0 }
 0x738   : > { %v7298_v37 = vmax.f32 %v7076_v25, 0.0  ;;  %v10729_v10 = vpop.f32.mrb[154].mxu1 }
 0x739   : > { %v7091_v9 = vadd.f32 %v10729_v10, %v14967_v21  ;;  %v7085_v22 = vpop.f32.mrb[155].mxu1 }
 0x73a   : > { %v7086_v50 = vadd.f32 %v14967_v21, %v7085_v22  ;;  %10836 = vmatprep.mubr.msk.f32.mxu1 %vm5456_vm4, %v7298_v37 }
 0x73b   : > { %10837 = vmatmul.mubr.msk.f32.gmra.mrb[216].mxu1 %vm5456_vm4, %v7299_v2  ;;  %v7301_v0 = vmax.f32 %v7091_v9, 0.0 }
 0x73c   : > { %v7300_v60 = vmax.f32 %v7086_v50, 0.0  ;;  %v10732_v7 = vpop.f32.mrb[156].mxu1 }
 0x73d   : > { %v7101_v27 = vadd.f32 %v10732_v7, %v14967_v21  ;;  %v7095_v58 = vpop.f32.mrb[157].mxu1 }
 0x73e   : > { %v7096_v49 = vadd.f32 %v14967_v21, %v7095_v58  ;;  %10839 = vmatprep.mubr.msk.f32.mxu1 %vm5456_vm4, %v7300_v60 }
 0x73f   : > { %10840 = vmatmul.mubr.msk.f32.gmra.mrb[218].mxu1 %vm5456_vm4, %v7301_v0  ;;  %v7303_v51 = vmax.f32 %v7101_v27, 0.0 }
 0x740   : > { %v7302_v34 = vmax.f32 %v7096_v49, 0.0  ;;  %v10735_v39 = vpop.f32.mrb[158].mxu1 }
 0x741   : > { %v7111_v59 = vadd.f32 %v10735_v39, %v14967_v21  ;;  %v7105_v19 = vpop.f32.mrb[159].mxu1 }
 0x742   : > { %v7106_v16 = vadd.f32 %v14967_v21, %v7105_v19  ;;  %10842 = vmatprep.mubr.msk.f32.mxu1 %vm5456_vm4, %v7302_v34 }
 0x743   : > { %10843 = vmatmul.mubr.msk.f32.gmra.mrb[220].mxu1 %vm5456_vm4, %v7303_v51  ;;  %v7305_v43 = vmax.f32 %v7111_v59, 0.0 }
 0x744   : > { %v7304_v23 = vmax.f32 %v7106_v16, 0.0  ;;  %v10738_v1 = vpop.f32.mrb[160].mxu1 }
 0x745   : > { %v7121_v48 = vadd.f32 %v10738_v1, %v14967_v21  ;;  %v7115_v57 = vpop.f32.mrb[161].mxu1 }
 0x746   : > { %v7116_v31 = vadd.f32 %v14967_v21, %v7115_v57  ;;  %10845 = vmatprep.mubr.msk.f32.mxu1 %vm5456_vm4, %v7304_v23 }
 0x747   : > { %10846 = vmatmul.mubr.msk.f32.gmra.mrb[222].mxu1 %vm5456_vm4, %v7305_v43  ;;  %v7307_v35 = vmax.f32 %v7121_v48, 0.0 }
 0x748   : > { %v7306_v46 = vmax.f32 %v7116_v31, 0.0  ;;  %v10741_v62 = vpop.f32.mrb[162].mxu1 }
 0x749   : > { %v7131_v6 = vadd.f32 %v10741_v62, %v14967_v21  ;;  %v7125_v47 = vpop.f32.mrb[163].mxu1 }
 0x74a   : > { %v7126_v38 = vadd.f32 %v14967_v21, %v7125_v47  ;;  %10848 = vmatprep.mubr.msk.f32.mxu1 %vm5456_vm4, %v7306_v46 }
 0x74b   : > { %10849 = vmatmul.mubr.msk.f32.gmra.mrb[224].mxu1 %vm5456_vm4, %v7307_v35  ;;  %v7309_v5 = vmax.f32 %v7131_v6, 0.0 }
 0x74c   : > { %v7308_v4 = vmax.f32 %v7126_v38, 0.0  ;;  %v10744_v24 = vpop.f32.mrb[164].mxu1 }
 0x74d   : > { %v7141_v13 = vadd.f32 %v10744_v24, %v14967_v21  ;;  %v7135_v12 = vpop.f32.mrb[165].mxu1 }
 0x74e   : > { %v7136_v17 = vadd.f32 %v14967_v21, %v7135_v12  ;;  %10851 = vmatprep.mubr.msk.f32.mxu1 %vm5456_vm4, %v7308_v4 }
 0x74f   : > { %10852 = vmatmul.mubr.msk.f32.gmra.mrb[226].mxu1 %vm5456_vm4, %v7309_v5  ;;  %v7311_v18 = vmax.f32 %v7141_v13, 0.0 }
 0x750   : > { %v7310_v52 = vmax.f32 %v7136_v17, 0.0  ;;  %v10747_v26 = vpop.f32.mrb[166].mxu1 }
 0x751   : > { %v7151_v3 = vadd.f32 %v10747_v26, %v14967_v21  ;;  %v7145_v36 = vpop.f32.mrb[167].mxu1 }
 0x752   : > { %v7146_v32 = vadd.f32 %v14967_v21, %v7145_v36  ;;  %10854 = vmatprep.mubr.msk.f32.mxu1 %vm5456_vm4, %v7310_v52 }
 0x753   : > { %10855 = vmatmul.mubr.msk.f32.gmra.mrb[228].mxu1 %vm5456_vm4, %v7311_v18  ;;  %v7313_v54 = vmax.f32 %v7151_v3, 0.0 }
 0x754   : > { %v7312_v56 = vmax.f32 %v7146_v32, 0.0  ;;  %v10750_v53 = vpop.f32.mrb[168].mxu1 }
 0x755   : > { %v7161_v29 = vadd.f32 %v10750_v53, %v14967_v21  ;;  %v7155_v20 = vpop.f32.mrb[169].mxu1 }
 0x756   : > { %v7156_v44 = vadd.f32 %v14967_v21, %v7155_v20  ;;  %10857 = vmatprep.mubr.msk.f32.mxu1 %vm5456_vm4, %v7312_v56 }
 0x757   : > { %10858 = vmatmul.mubr.msk.f32.gmra.mrb[230].mxu1 %vm5456_vm4, %v7313_v54  ;;  %v7315_v15 = vmax.f32 %v7161_v29, 0.0 }
 0x758   : > { %v7314_v8 = vmax.f32 %v7156_v44, 0.0  ;;  %v10753_v41 = vpop.f32.mrb[170].mxu1 }
 0x759   : > { %v7171_v11 = vadd.f32 %v10753_v41, %v14967_v21  ;;  %v7165_v14 = vpop.f32.mrb[171].mxu1 }
 0x75a   : > { %v7166_v30 = vadd.f32 %v14967_v21, %v7165_v14  ;;  %10860 = vmatprep.mubr.msk.f32.mxu1 %vm5456_vm4, %v7314_v8 }
 0x75b   : > { %10861 = vmatmul.mubr.msk.f32.gmra.mrb[232].mxu1 %vm5456_vm4, %v7315_v15  ;;  %v7317_v42 = vmax.f32 %v7171_v11, 0.0 }
 0x75c   : > { %v7316_v28 = vmax.f32 %v7166_v30, 0.0  ;;  %v10756_v61 = vpop.f32.mrb[172].mxu1  ;;  %v15100_v30 = vld [vmem:[%s15361_s15] sm:$0x1] }
 0x75d   : > { %v7181_v40 = vadd.f32 %v10756_v61, %v14967_v21  ;;  %v7175_v55 = vpop.f32.mrb[173].mxu1  ;;  %10204 = vmatprep.mubr.msk.f32.mxu0 %vm5456_vm4, %v15100_v30 }
 0x75e   : > { %v7176_v45 = vadd.f32 %v14967_v21, %v7175_v55  ;;  %10863 = vmatprep.mubr.msk.f32.mxu1 %vm5456_vm4, %v7316_v28 }
 0x75f   : > { %10864 = vmatmul.mubr.msk.f32.gmra.mrb[234].mxu1 %vm5456_vm4, %v7317_v42  ;;  %v7319_v25 = vmax.f32 %v7181_v40, 0.0 }
 0x760   : > { %v7318_v63 = vmax.f32 %v7176_v45, 0.0  ;;  %v10759_v33 = vpop.f32.mrb[174].mxu1 }
 0x761   : > { %v7191_v37 = vadd.f32 %v10759_v33, %v14967_v21  ;;  %v7185_v10 = vpop.f32.mrb[175].mxu1 }
 0x762   : > { %v7186_v2 = vadd.f32 %v14967_v21, %v7185_v10  ;;  %10866 = vmatprep.mubr.msk.f32.mxu1 %vm5456_vm4, %v7318_v63 }
 0x763   : > { %10867 = vmatmul.mubr.msk.f32.gmra.mrb[236].mxu1 %vm5456_vm4, %v7319_v25  ;;  %v7321_v50 = vmax.f32 %v7191_v37, 0.0 }
 0x764   : > { %v7320_v9 = vmax.f32 %v7186_v2, 0.0  ;;  %v10762_v22 = vpop.f32.mrb[176].mxu1 }
 0x765   : > { %v7201_v60 = vadd.f32 %v10762_v22, %v14967_v21  ;;  %v7195_v7 = vpop.f32.mrb[177].mxu1 }
 0x766   : > { %v7196_v0 = vadd.f32 %v14967_v21, %v7195_v7  ;;  %10869 = vmatprep.mubr.msk.f32.mxu1 %vm5456_vm4, %v7320_v9 }
 0x767   : > { %10870 = vmatmul.mubr.msk.f32.gmra.mrb[238].mxu1 %vm5456_vm4, %v7321_v50  ;;  %v7323_v49 = vmax.f32 %v7201_v60, 0.0 }
 0x768   : > { %v7322_v27 = vmax.f32 %v7196_v0, 0.0  ;;  %v10765_v58 = vpop.f32.mrb[178].mxu1 }
 0x769   : > { %v7211_v34 = vadd.f32 %v10765_v58, %v14967_v21  ;;  %v7205_v39 = vpop.f32.mrb[179].mxu1 }
 0x76a   : > { %v7206_v51 = vadd.f32 %v14967_v21, %v7205_v39  ;;  %10872 = vmatprep.mubr.msk.f32.mxu1 %vm5456_vm4, %v7322_v27 }
 0x76b   : > { %10873 = vmatmul.mubr.msk.f32.gmra.mrb[240].mxu1 %vm5456_vm4, %v7323_v49  ;;  %v7325_v16 = vmax.f32 %v7211_v34, 0.0 }
 0x76c   : > { %v7324_v59 = vmax.f32 %v7206_v51, 0.0  ;;  %v10768_v19 = vpop.f32.mrb[180].mxu1 }
 0x76d   : > { %v7221_v23 = vadd.f32 %v10768_v19, %v14967_v21  ;;  %v7215_v1 = vpop.f32.mrb[181].mxu1 }
 0x76e   : > { %v7216_v43 = vadd.f32 %v14967_v21, %v7215_v1  ;;  %10875 = vmatprep.mubr.msk.f32.mxu1 %vm5456_vm4, %v7324_v59 }
 0x76f   : > { %10876 = vmatmul.mubr.msk.f32.gmra.mrb[242].mxu1 %vm5456_vm4, %v7325_v16  ;;  %v7327_v31 = vmax.f32 %v7221_v23, 0.0 }
 0x770   : > { %v7326_v48 = vmax.f32 %v7216_v43, 0.0  ;;  %v10771_v57 = vpop.f32.mrb[182].mxu1 }
 0x771   : > { %v7231_v46 = vadd.f32 %v10771_v57, %v14967_v21  ;;  %v7225_v62 = vpop.f32.mrb[183].mxu1 }
 0x772   : > { %v7226_v35 = vadd.f32 %v14967_v21, %v7225_v62  ;;  %10878 = vmatprep.mubr.msk.f32.mxu1 %vm5456_vm4, %v7326_v48 }
 0x773   : > { %10879 = vmatmul.mubr.msk.f32.gmra.mrb[244].mxu1 %vm5456_vm4, %v7327_v31  ;;  %v7329_v38 = vmax.f32 %v7231_v46, 0.0 }
 0x774   : > { %v7328_v6 = vmax.f32 %v7226_v35, 0.0  ;;  %v10774_v47 = vpop.f32.mrb[184].mxu1 }
 0x775   : > { %v7241_v4 = vadd.f32 %v10774_v47, %v14967_v21  ;;  %v7235_v24 = vpop.f32.mrb[185].mxu1 }
 0x776   : > { %v7236_v5 = vadd.f32 %v14967_v21, %v7235_v24  ;;  %10881 = vmatprep.mubr.msk.f32.mxu1 %vm5456_vm4, %v7328_v6 }
 0x777   : > { %10882 = vmatmul.mubr.msk.f32.gmra.mrb[246].mxu1 %vm5456_vm4, %v7329_v38  ;;  %v7331_v17 = vmax.f32 %v7241_v4, 0.0 }
 0x778   : > { %v7330_v13 = vmax.f32 %v7236_v5, 0.0  ;;  %v10777_v12 = vpop.f32.mrb[186].mxu1 }
 0x779   : > { %v7251_v52 = vadd.f32 %v10777_v12, %v14967_v21  ;;  %v7245_v26 = vpop.f32.mrb[187].mxu1 }
 0x77a   : > { %v7246_v18 = vadd.f32 %v14967_v21, %v7245_v26  ;;  %10884 = vmatprep.mubr.msk.f32.mxu1 %vm5456_vm4, %v7330_v13 }
 0x77b   : > { %10885 = vmatmul.mubr.msk.f32.gmra.mrb[248].mxu1 %vm5456_vm4, %v7331_v17  ;;  %v7333_v32 = vmax.f32 %v7251_v52, 0.0 }
 0x77c   : > { %v7332_v3 = vmax.f32 %v7246_v18, 0.0  ;;  %v10780_v36 = vpop.f32.mrb[188].mxu1 }
 0x77d   : > { %v7261_v56 = vadd.f32 %v10780_v36, %v14967_v21  ;;  %v7255_v53 = vpop.f32.mrb[189].mxu1 }
 0x77e   : > { %v7256_v54 = vadd.f32 %v14967_v21, %v7255_v53  ;;  %10887 = vmatprep.mubr.msk.f32.mxu1 %vm5456_vm4, %v7332_v3 }
 0x77f   : > { %10888 = vmatmul.mubr.msk.f32.gmra.mrb[250].mxu1 %vm5456_vm4, %v7333_v32  ;;  %v7335_v44 = vmax.f32 %v7261_v56, 0.0 }
 0x780   : > { %v7334_v29 = vmax.f32 %v7256_v54, 0.0  ;;  %v10783_v20 = vpop.f32.mrb[190].mxu1 }
 0x781   : > { %v7271_v8 = vadd.f32 %v10783_v20, %v14967_v21  ;;  %v7265_v41 = vpop.f32.mrb[191].mxu1 }
 0x782   : > { %v7266_v15 = vadd.f32 %v14967_v21, %v7265_v41  ;;  %10890 = vmatprep.mubr.msk.f32.mxu1 %vm5456_vm4, %v7334_v29  ;;  %v15109_v21 = vld [vmem:[%s15360_s14] ss:$0 sm:$0xff] }
 0x783   : > { %10891 = vmatmul.mubr.msk.f32.gmra.mrb[252].mxu1 %vm5456_vm4, %v7335_v44  ;;  %v7337_v14 = vmax.f32 %v7271_v8, 0.0 }
 0x784   : > { %v7336_v11 = vmax.f32 %v7266_v15, 0.0 }
 0x786   : > { %10893 = vmatprep.mubr.msk.f32.mxu1 %vm5456_vm4, %v7336_v11 }
 0x787   : > { %10894 = vmatmul.mubr.msk.f32.gmra.mrb[254].mxu1 %vm5456_vm4, %v7337_v14 }
 0x788   : > { %10238 = vmatprep.mubr.msk.f32.mxu1 %vm5456_vm4, %v15100_v30 }
 0x7de   : > { %v10802_v28 = vpop.f32.mrb[192].mxu1 }
 0x7df   : > { %v7617_v61 = vadd.f32 %v10802_v28, %v15109_v21  ;;  %v7611_v42 = vpop.f32.mrb[193].mxu1 }
 0x7e0   : > { %v7612_v40 = vadd.f32 %v15109_v21, %v7611_v42 }
 0x7e1   : > { %v7931_v55 = vmax.f32 %v7617_v61, 0.0 }
 0x7e2   : > { %v7930_v45 = vmax.f32 %v7612_v40, 0.0  ;;  %v10805_v63 = vpop.f32.mrb[194].mxu1 }
 0x7e3   : > { %v7627_v33 = vadd.f32 %v10805_v63, %v15109_v21  ;;  %v7621_v25 = vpop.f32.mrb[195].mxu1 }
 0x7e4   : > { %v15114_v37 = vpack.c.bf16 %v7931_v55, %v7930_v45  ;;  %v7622_v10 = vadd.f32 %v15109_v21, %v7621_v25 }
 0x7e5   : > { %v7933_v2 = vmax.f32 %v7627_v33, 0.0 }
 0x7e6   : > { %v7932_v9 = vmax.f32 %v7622_v10, 0.0  ;;  %v10808_v22 = vpop.f32.mrb[196].mxu1 }
 0x7e7   : > { %v7637_v50 = vadd.f32 %v10808_v22, %v15109_v21  ;;  %v7631_v60 = vpop.f32.mrb[197].mxu1 }
 0x7e8   : > { %v15118_v7 = vpack.c.bf16 %v7933_v2, %v7932_v9  ;;  %v7632_v0 = vadd.f32 %v15109_v21, %v7631_v60 }
 0x7e9   : > { %v7935_v27 = vmax.f32 %v7637_v50, 0.0 }
 0x7ea   : > { %v7934_v58 = vmax.f32 %v7632_v0, 0.0  ;;  %v10811_v49 = vpop.f32.mrb[198].mxu1 }
 0x7eb   : > { %v7647_v34 = vadd.f32 %v10811_v49, %v15109_v21  ;;  %v7641_v39 = vpop.f32.mrb[199].mxu1 }
 0x7ec   : > { %v15122_v51 = vpack.c.bf16 %v7935_v27, %v7934_v58  ;;  %v7642_v59 = vadd.f32 %v15109_v21, %v7641_v39 }
 0x7ed   : > { %v7937_v19 = vmax.f32 %v7647_v34, 0.0 }
 0x7ee   : > { %v7936_v16 = vmax.f32 %v7642_v59, 0.0  ;;  %v10814_v23 = vpop.f32.mrb[200].mxu1 }
 0x7ef   : > { %v7657_v1 = vadd.f32 %v10814_v23, %v15109_v21  ;;  %v7651_v43 = vpop.f32.mrb[201].mxu1 }
 0x7f0   : > { %v15126_v48 = vpack.c.bf16 %v7937_v19, %v7936_v16  ;;  %v7652_v57 = vadd.f32 %v15109_v21, %v7651_v43 }
 0x7f1   : > { %v7939_v31 = vmax.f32 %v7657_v1, 0.0 }
 0x7f2   : > { %v7938_v46 = vmax.f32 %v7652_v57, 0.0  ;;  %v10817_v62 = vpop.f32.mrb[202].mxu1 }
 0x7f3   : > { %v7667_v35 = vadd.f32 %v10817_v62, %v15109_v21  ;;  %v7661_v6 = vpop.f32.mrb[203].mxu1 }
 0x7f4   : > { %v15130_v47 = vpack.c.bf16 %v7939_v31, %v7938_v46  ;;  %v7662_v38 = vadd.f32 %v15109_v21, %v7661_v6 }
 0x7f5   : > { %v7941_v4 = vmax.f32 %v7667_v35, 0.0 }
 0x7f6   : > { %v7940_v24 = vmax.f32 %v7662_v38, 0.0  ;;  %v10820_v5 = vpop.f32.mrb[204].mxu1 }
 0x7f7   : > { %v7677_v13 = vadd.f32 %v10820_v5, %v15109_v21  ;;  %v7671_v12 = vpop.f32.mrb[205].mxu1 }
 0x7f8   : > { %v15134_v17 = vpack.c.bf16 %v7941_v4, %v7940_v24  ;;  %v7672_v52 = vadd.f32 %v15109_v21, %v7671_v12 }
 0x7f9   : > { %v7943_v26 = vmax.f32 %v7677_v13, 0.0 }
 0x7fa   : > { %v7942_v18 = vmax.f32 %v7672_v52, 0.0  ;;  %v10823_v3 = vpop.f32.mrb[206].mxu1 }
 0x7fb   : > { %v7687_v36 = vadd.f32 %v10823_v3, %v15109_v21  ;;  %v7681_v32 = vpop.f32.mrb[207].mxu1 }
 0x7fc   : > { %v15138_v56 = vpack.c.bf16 %v7943_v26, %v7942_v18  ;;  %v7682_v53 = vadd.f32 %v15109_v21, %v7681_v32 }
 0x7fd   : > { %v7945_v54 = vmax.f32 %v7687_v36, 0.0 }
 0x7fe   : > { %v7944_v29 = vmax.f32 %v7682_v53, 0.0  ;;  %v10826_v20 = vpop.f32.mrb[208].mxu1 }
 0x7ff   : > { %v7697_v44 = vadd.f32 %v10826_v20, %v15109_v21  ;;  %v7691_v8 = vpop.f32.mrb[209].mxu1 }
 0x800   : > { %v15142_v41 = vpack.c.bf16 %v7945_v54, %v7944_v29  ;;  %v7692_v15 = vadd.f32 %v15109_v21, %v7691_v8 }
 0x801   : > { %v7947_v11 = vmax.f32 %v7697_v44, 0.0 }
 0x802   : > { %v7946_v14 = vmax.f32 %v7692_v15, 0.0  ;;  %v10829_v28 = vpop.f32.mrb[210].mxu1 }
 0x803   : > { %v7707_v61 = vadd.f32 %v10829_v28, %v15109_v21  ;;  %v7701_v42 = vpop.f32.mrb[211].mxu1 }
 0x804   : > { %v10976_v55 = vpack.c.bf16 %v7947_v11, %v7946_v14  ;;  %v7702_v45 = vadd.f32 %v15109_v21, %v7701_v42 }
 0x805   : > { %v7949_v63 = vmax.f32 %v7707_v61, 0.0 }
 0x806   : > { %v7948_v33 = vmax.f32 %v7702_v45, 0.0  ;;  %v10832_v25 = vpop.f32.mrb[212].mxu1  ;;  %10978 = vmatprep.subr.msk.bf16.mxu0 %vm15148_vm0, %v10976_v55 }
 0x807   : > { %v7717_v10 = vadd.f32 %v10832_v25, %v15109_v21  ;;  %v7711_v2 = vpop.f32.mrb[213].mxu1  ;;  %10981 = vmatpush3.bf16.xpose.msk.msra.mxu0 %vm15148_vm0, %v15114_v37 }
 0x808   : > { %v10982_v9 = vpack.c.bf16 %v7949_v63, %v7948_v33  ;;  %v7712_v22 = vadd.f32 %v15109_v21, %v7711_v2 }
 0x809   : > { %v7951_v50 = vmax.f32 %v7717_v10, 0.0 }
 0x80a   : > { %v7950_v60 = vmax.f32 %v7712_v22, 0.0  ;;  %v10835_v0 = vpop.f32.mrb[214].mxu1  ;;  %10984 = vmatprep.subr.msk.bf16.mxu0 %vm15148_vm0, %v10982_v9 }
 0x80b   : > { %v7727_v27 = vadd.f32 %v10835_v0, %v15109_v21  ;;  %v7721_v58 = vpop.f32.mrb[215].mxu1 }
 0x80c   : > { %v10988_v49 = vpack.c.bf16 %v7951_v50, %v7950_v60  ;;  %v7722_v34 = vadd.f32 %v15109_v21, %v7721_v58 }
 0x80d   : > { %v7953_v39 = vmax.f32 %v7727_v27, 0.0 }
 0x80e   : > { %v7952_v59 = vmax.f32 %v7722_v34, 0.0  ;;  %v10838_v19 = vpop.f32.mrb[216].mxu1 }
 0x80f   : > { %v7737_v37 = vadd.f32 %v10838_v19, %v15109_v21  ;;  %v7731_v16 = vpop.f32.mrb[217].mxu1  ;;  %10987 = vmatpush3.bf16.xpose.msk.msra.mxu0 %vm15148_vm0, %v15118_v7 }
 0x810   : > { %v10994_v23 = vpack.c.bf16 %v7953_v39, %v7952_v59  ;;  %v7732_v1 = vadd.f32 %v15109_v21, %v7731_v16  ;;  %10990 = vmatprep.subr.msk.bf16.mxu0 %vm15148_vm0, %v10988_v49 }
 0x811   : > { %v7955_v43 = vmax.f32 %v7737_v37, 0.0 }
 0x812   : > { %v7954_v57 = vmax.f32 %v7732_v1, 0.0  ;;  %v10841_v31 = vpop.f32.mrb[218].mxu1 }
 0x813   : > { %v7747_v46 = vadd.f32 %v10841_v31, %v15109_v21  ;;  %v7741_v62 = vpop.f32.mrb[219].mxu1 }
 0x814   : > { %v11000_v35 = vpack.c.bf16 %v7955_v43, %v7954_v57  ;;  %v7742_v6 = vadd.f32 %v15109_v21, %v7741_v62 }
 0x815   : > { %v7957_v38 = vmax.f32 %v7747_v46, 0.0 }
 0x816   : > { %v7956_v4 = vmax.f32 %v7742_v6, 0.0  ;;  %v10844_v24 = vpop.f32.mrb[220].mxu1 }
 0x817   : > { %v7757_v7 = vadd.f32 %v10844_v24, %v15109_v21  ;;  %v7751_v5 = vpop.f32.mrb[221].mxu1  ;;  %10993 = vmatpush3.bf16.xpose.msk.msra.mxu0 %vm15148_vm0, %v15122_v51 }
 0x818   : > { %v11006_v13 = vpack.c.bf16 %v7957_v38, %v7956_v4  ;;  %v7752_v12 = vadd.f32 %v15109_v21, %v7751_v5  ;;  %10996 = vmatprep.subr.msk.bf16.mxu0 %vm15148_vm0, %v10994_v23 }
 0x819   : > { %v7959_v52 = vmax.f32 %v7757_v7, 0.0 }
 0x81a   : > { %v7958_v26 = vmax.f32 %v7752_v12, 0.0  ;;  %v10847_v18 = vpop.f32.mrb[222].mxu1 }
 0x81b   : > { %v7767_v3 = vadd.f32 %v10847_v18, %v15109_v21  ;;  %v7761_v36 = vpop.f32.mrb[223].mxu1 }
 0x81c   : > { %v11012_v32 = vpack.c.bf16 %v7959_v52, %v7958_v26  ;;  %v7762_v53 = vadd.f32 %v15109_v21, %v7761_v36 }
 0x81d   : > { %v7961_v54 = vmax.f32 %v7767_v3, 0.0 }
 0x81e   : > { %v7960_v29 = vmax.f32 %v7762_v53, 0.0  ;;  %v10850_v20 = vpop.f32.mrb[224].mxu1 }
 0x81f   : > { %v7777_v51 = vadd.f32 %v10850_v20, %v15109_v21  ;;  %v7771_v44 = vpop.f32.mrb[225].mxu1  ;;  %10999 = vmatpush3.bf16.xpose.msk.msra.mxu0 %vm15148_vm0, %v15126_v48 }
 0x820   : > { %v11018_v8 = vpack.c.bf16 %v7961_v54, %v7960_v29  ;;  %v7772_v15 = vadd.f32 %v15109_v21, %v7771_v44  ;;  %11002 = vmatprep.subr.msk.bf16.mxu0 %vm15148_vm0, %v11000_v35 }
 0x821   : > { %v7963_v11 = vmax.f32 %v7777_v51, 0.0 }
 0x822   : > { %v7962_v14 = vmax.f32 %v7772_v15, 0.0  ;;  %v10853_v28 = vpop.f32.mrb[226].mxu1 }
 0x823   : > { %v7787_v61 = vadd.f32 %v10853_v28, %v15109_v21  ;;  %v7781_v42 = vpop.f32.mrb[227].mxu1 }
 0x824   : > { %v15190_v55 = vpack.c.bf16 %v7963_v11, %v7962_v14  ;;  %v7782_v45 = vadd.f32 %v15109_v21, %v7781_v42 }
 0x825   : > { %v7965_v63 = vmax.f32 %v7787_v61, 0.0 }
 0x826   : > { %v7964_v33 = vmax.f32 %v7782_v45, 0.0  ;;  %v10856_v25 = vpop.f32.mrb[228].mxu1 }
 0x827   : > { %v7797_v48 = vadd.f32 %v10856_v25, %v15109_v21  ;;  %v7791_v10 = vpop.f32.mrb[229].mxu1  ;;  %11005 = vmatpush3.bf16.xpose.msk.msra.mxu0 %vm15148_vm0, %v15130_v47 }
 0x828   : > { %v15197_v2 = vpack.c.bf16 %v7965_v63, %v7964_v33  ;;  %v7792_v9 = vadd.f32 %v15109_v21, %v7791_v10  ;;  %11008 = vmatprep.subr.msk.bf16.mxu0 %vm15148_vm0, %v11006_v13 }
 0x829   : > { %v7967_v22 = vmax.f32 %v7797_v48, 0.0 }
 0x82a   : > { %v7966_v50 = vmax.f32 %v7792_v9, 0.0  ;;  %v10859_v60 = vpop.f32.mrb[230].mxu1 }
 0x82b   : > { %v7807_v0 = vadd.f32 %v10859_v60, %v15109_v21  ;;  %v7801_v27 = vpop.f32.mrb[231].mxu1 }
 0x82c   : > { %v15203_v58 = vpack.c.bf16 %v7967_v22, %v7966_v50  ;;  %v7802_v49 = vadd.f32 %v15109_v21, %v7801_v27 }
 0x82d   : > { %v7969_v34 = vmax.f32 %v7807_v0, 0.0 }
 0x82e   : > { %v7968_v39 = vmax.f32 %v7802_v49, 0.0  ;;  %v10862_v47 = vpop.f32.mrb[232].mxu1 }
 0x82f   : > { %v7817_v59 = vadd.f32 %v10862_v47, %v15109_v21  ;;  %v7811_v19 = vpop.f32.mrb[233].mxu1  ;;  %11011 = vmatpush3.bf16.xpose.msk.msra.mxu0 %vm15148_vm0, %v15134_v17 }
 0x830   : > { %v15210_v37 = vpack.c.bf16 %v7969_v34, %v7968_v39  ;;  %v7812_v16 = vadd.f32 %v15109_v21, %v7811_v19  ;;  %11014 = vmatprep.subr.msk.bf16.mxu0 %vm15148_vm0, %v11012_v32 }
 0x831   : > { %v7971_v23 = vmax.f32 %v7817_v59, 0.0 }
 0x832   : > { %v7970_v1 = vmax.f32 %v7812_v16, 0.0  ;;  %v10865_v43 = vpop.f32.mrb[234].mxu1 }
 0x833   : > { %v7827_v57 = vadd.f32 %v10865_v43, %v15109_v21  ;;  %v7821_v31 = vpop.f32.mrb[235].mxu1 }
 0x834   : > { %v15216_v46 = vpack.c.bf16 %v7971_v23, %v7970_v1  ;;  %v7822_v62 = vadd.f32 %v15109_v21, %v7821_v31 }
 0x835   : > { %v7973_v35 = vmax.f32 %v7827_v57, 0.0 }
 0x836   : > { %v7972_v6 = vmax.f32 %v7822_v62, 0.0  ;;  %v10868_v17 = vpop.f32.mrb[236].mxu1 }
 0x837   : > { %v7837_v38 = vadd.f32 %v10868_v17, %v15109_v21  ;;  %v7831_v4 = vpop.f32.mrb[237].mxu1  ;;  %11017 = vmatpush3.bf16.xpose.msk.msra.mxu0 %vm15148_vm0, %v15138_v56 }
 0x838   : > { %v15223_v24 = vpack.c.bf16 %v7973_v35, %v7972_v6  ;;  %v7832_v7 = vadd.f32 %v15109_v21, %v7831_v4  ;;  %11020 = vmatprep.subr.msk.bf16.mxu0 %vm15148_vm0, %v11018_v8 }
 0x839   : > { %v7975_v5 = vmax.f32 %v7837_v38, 0.0 }
 0x83a   : > { %v7974_v13 = vmax.f32 %v7832_v7, 0.0  ;;  %v10871_v12 = vpop.f32.mrb[238].mxu1 }
 0x83b   : > { %v7847_v52 = vadd.f32 %v10871_v12, %v15109_v21  ;;  %v7841_v26 = vpop.f32.mrb[239].mxu1 }
 0x83c   : > { %v15229_v18 = vpack.c.bf16 %v7975_v5, %v7974_v13  ;;  %v7842_v3 = vadd.f32 %v15109_v21, %v7841_v26 }
 0x83d   : > { %v7977_v36 = vmax.f32 %v7847_v52, 0.0 }
 0x83e   : > { %v7976_v32 = vmax.f32 %v7842_v3, 0.0  ;;  %v10874_v56 = vpop.f32.mrb[240].mxu1 }
 0x83f   : > { %v7857_v53 = vadd.f32 %v10874_v56, %v15109_v21  ;;  %v7851_v54 = vpop.f32.mrb[241].mxu1  ;;  %11023 = vmatpush3.bf16.xpose.msk.msra.mxu0 %vm15148_vm0, %v15142_v41 }
 0x840   : > { %v15236_v29 = vpack.c.bf16 %v7977_v36, %v7976_v32  ;;  %v7852_v20 = vadd.f32 %v15109_v21, %v7851_v54 }
 0x841   : > { %v7979_v51 = vmax.f32 %v7857_v53, 0.0 }
 0x842   : > { %v7978_v44 = vmax.f32 %v7852_v20, 0.0  ;;  %v10877_v8 = vpop.f32.mrb[242].mxu1 }
 0x843   : > { %v7867_v15 = vadd.f32 %v10877_v8, %v15109_v21  ;;  %v7861_v11 = vpop.f32.mrb[243].mxu1 }
 0x844   : > { %v11024_v14 = vpack.c.bf16 %v7979_v51, %v7978_v44  ;;  %v7862_v28 = vadd.f32 %v15109_v21, %v7861_v11  ;;  %v11326_v44 = vmov 1966171168  }
 0x845   : > { %v7981_v61 = vmax.f32 %v7867_v15, 0.0  ;;  %v8349_v8 = vunpack.c.l.s4 %v11326_v44 }
 0x846   : > { %v7980_v42 = vmax.f32 %v7862_v28, 0.0  ;;  %v10880_v45 = vpop.f32.mrb[244].mxu1  ;;  %10205 = vmatmul.mubr.msk.f32.vlgmr.msra.gmra.mrb[192].mxu0 %vm5456_vm4, %v15100_v30  ;;  %11026 = vmatprep.subr.msk.bf16.mxu1 %vm15148_vm0, %v11024_v14 }
 0x847   : > { %v7877_v41 = vadd.f32 %v10880_v45, %v15109_v21  ;;  %v7871_v63 = vpop.f32.mrb[245].mxu1  ;;  %11029 = vmatpush3.bf16.xpose.msk.msra.mxu1 %vm15148_vm0, %v15190_v55  ;;  %v8350_v15 = vunpack.c.0.s8 %v8349_v8 }
 0x848   : > { %v11030_v33 = vpack.c.bf16 %v7981_v61, %v7980_v42  ;;  %v7872_v25 = vadd.f32 %v15109_v21, %v7871_v63 }
 0x849   : > { %v7983_v48 = vmax.f32 %v7877_v41, 0.0 }
 0x84a   : > { %v7982_v10 = vmax.f32 %v7872_v25, 0.0  ;;  %v10883_v9 = vpop.f32.mrb[246].mxu1  ;;  %11032 = vmatprep.subr.msk.bf16.mxu1 %vm15148_vm0, %v11030_v33 }
 0x84b   : > { %v7887_v22 = vadd.f32 %v10883_v9, %v15109_v21  ;;  %v7881_v50 = vpop.f32.mrb[247].mxu1 }
 0x84c   : > { %v11036_v60 = vpack.c.bf16 %v7983_v48, %v7982_v10  ;;  %v7882_v0 = vadd.f32 %v15109_v21, %v7881_v50 }
 0x84d   : > { %v7985_v27 = vmax.f32 %v7887_v22, 0.0 }
 0x84e   : > { %v7984_v49 = vmax.f32 %v7882_v0, 0.0  ;;  %v10886_v34 = vpop.f32.mrb[248].mxu1 }
 0x84f   : > { %v7897_v55 = vadd.f32 %v10886_v34, %v15109_v21  ;;  %v7891_v39 = vpop.f32.mrb[249].mxu1  ;;  %11035 = vmatpush3.bf16.xpose.msk.msra.mxu1 %vm15148_vm0, %v15197_v2 }
 0x850   : > { %v11042_v47 = vpack.c.bf16 %v7985_v27, %v7984_v49  ;;  %v7892_v59 = vadd.f32 %v15109_v21, %v7891_v39  ;;  %11038 = vmatprep.subr.msk.bf16.mxu1 %vm15148_vm0, %v11036_v60 }
 0x851   : > { %v7987_v19 = vmax.f32 %v7897_v55, 0.0 }
 0x852   : > { %v7986_v16 = vmax.f32 %v7892_v59, 0.0  ;;  %v10889_v23 = vpop.f32.mrb[250].mxu1 }
 0x853   : > { %v7907_v1 = vadd.f32 %v10889_v23, %v15109_v21  ;;  %v7901_v43 = vpop.f32.mrb[251].mxu1 }
 0x854   : > { %v11048_v57 = vpack.c.bf16 %v7987_v19, %v7986_v16  ;;  %v7902_v31 = vadd.f32 %v15109_v21, %v7901_v43 }
 0x855   : > { %v7989_v62 = vmax.f32 %v7907_v1, 0.0 }
 0x856   : > { %v7988_v35 = vmax.f32 %v7902_v31, 0.0  ;;  %v10892_v6 = vpop.f32.mrb[252].mxu1 }
 0x857   : > { %v7917_v2 = vadd.f32 %v10892_v6, %v15109_v21  ;;  %v7911_v17 = vpop.f32.mrb[253].mxu1  ;;  %11041 = vmatpush3.bf16.xpose.msk.msra.mxu1 %vm15148_vm0, %v15203_v58 }
 0x858   : > { %v11054_v38 = vpack.c.bf16 %v7989_v62, %v7988_v35  ;;  %v7912_v4 = vadd.f32 %v15109_v21, %v7911_v17  ;;  %11044 = vmatprep.subr.msk.bf16.mxu1 %vm15148_vm0, %v11042_v47 }
 0x859   : > { %v7991_v7 = vmax.f32 %v7917_v2, 0.0 }
 0x85a   : > { %v7990_v5 = vmax.f32 %v7912_v4, 0.0  ;;  %v10895_v13 = vpop.f32.mrb[254].mxu1 }
 0x85b   : > { %v7927_v12 = vadd.f32 %v10895_v13, %v15109_v21  ;;  %v7921_v52 = vpop.f32.mrb[255].mxu1 }
 0x85c   : > { %v11060_v26 = vpack.c.bf16 %v7991_v7, %v7990_v5  ;;  %v7922_v3 = vadd.f32 %v15109_v21, %v7921_v52  ;;  %v16271_v21 = vlaneseq }
 0x85d   : > { %v7993_v36 = vmax.f32 %v7927_v12, 0.0 }
 0x85e   : > { %v7992_v32 = vmax.f32 %v7922_v3, 0.0  ;;  %vm8373_vm5 = vcmp.lt.s32.totalorder %v16271_v21, 512 }
 0x85f   : > { %11047 = vmatpush3.bf16.xpose.msk.msra.mxu1 %vm15148_vm0, %v15210_v37  ;;  %v8002_v37 = vshrl.u32 %v16271_v21, 7 }
 0x860   : > { %v11066_v58 = vpack.c.bf16 %v7993_v36, %v7992_v32  ;;  %11050 = vmatprep.subr.msk.bf16.mxu1 %vm15148_vm0, %v11048_v57 }
 0x867   : > { %11053 = vmatpush3.bf16.xpose.msk.msra.mxu1 %vm15148_vm0, %v15216_v46  ;;  %v8003_v46 = vsub.s32 0, %v8002_v37 }
 0x868   : > { %11056 = vmatprep.subr.msk.bf16.mxu1 %vm15148_vm0, %v11054_v38 }
 0x86f   : > { %11059 = vmatpush3.bf16.xpose.msk.msra.mxu1 %vm15148_vm0, %v15223_v24  ;;  %v7999_v24 = vpop.permute.xlu0 %7998 }
 0x870   : > { %11062 = vmatprep.subr.msk.bf16.mxu1 %vm15148_vm0, %v11060_v26  ;;  %v8004_v56 = vrot.slane %v7999_v24, %v8003_v46 }
 0x877   : > { %11065 = vmatpush3.bf16.xpose.msk.msra.mxu1 %vm15148_vm0, %v15229_v18 }
 0x878   : > { %11068 = vmatprep.subr.msk.bf16.mxu1 %vm15148_vm0, %v11066_v58 }
 0x87f   : > { %11071 = vmatpush3.bf16.xpose.msk.msra.mxu1 %vm15148_vm0, %v15236_v29 }
 0x886   : > { %10239 = vmatmul.mubr.msk.f32.vlgmr.msra.gmra.mrb[0].mxu1 %vm5456_vm4, %v15100_v30  ;;  %v8353_v30 = vsub.s32 %v8350_v15, %v8002_v37 }
 0x919   : > { %v8266_v53 = vpop.f32.mrb[192].mxu0 }
 0x91a   : > { %v8267_v54 = vadd.f32 %v8266_v53, %v8004_v56  ;;  %v8268_v20 = vpop.f32.mrb[193].mxu0 }
 0x91b   : > { %v8269_v18 = vadd.f32 %v8268_v20, %v8004_v56 }
 0x91d   : > { %v8346_v51 = vcombine.low %v8267_v54, %v8269_v18 }
 0x91f   : > { %v8354_v61 = vrot.slane %v8346_v51, %v8353_v30 }
 0x959   : > { %v8337_v40 = vpop.f32.mrb[0].mxu1 }
 0x95a   : > { %v8338_v29 = vadd.f32 %v8337_v40, %v8004_v56  ;;  %v8339_v11 = vpop.f32.mrb[1].mxu1 }
 0x95b   : > { %v8340_v14 = vadd.f32 %v8339_v11, %v8004_v56 }
 0x95d   : > { %v8347_v28 = vcombine.low %v8338_v29, %v8340_v14 }
 0x95f   : > { %v8361_v42 = vrot.slane %v8347_v28, %v8353_v30 }
 0x961   : > { %v8362_v45 = vcombine.low %v8354_v61, %v8361_v42 }
 0x963   : > { %v8369_v41 = vrot.slane %v8362_v45, %v8353_v30 }
 0x965   : > { %8375 = vst.msk [vmem:[%s560_s16] sm:$0xf] %vm8373_vm5, %v8369_v41 }
 0x966   : > { %11273 = shalt.err (!%p11270_p3)
}
 0x967   : > { %s11274_s22 = scalar_lea.hbm %s15304_s23, 64  ;;  %s11278_s16 = scalar_lea.hbm %s15363_s17, 128 }
 0x968   : > { %p11275_p4 = scmp.ne.s32.totalorder %s15304_s23, %s11274_s22  ;;  %p11279_p9 = scmp.lt.u32.totalorder %s15304_s23, %s15363_s17 }
 0x969   : > { %p11280_p10 = scmp.lt.u32.totalorder %s11278_s16, %s11274_s22  ;;  %p11282_p12 = scmp.lt.u32.totalorder %s11274_s22, %s15304_s23 }
 0x96a   : > { %p11276_p7 = pnand %p11275_p4, %p11456_p5 }
 0x96b   : > { %p11281_p11 = por %p11280_p10, %p11279_p9 }
 0x96c   : > { %p11277_p8 = pneg %p11276_p7 }
 0x96d   : > { %p11283_p13 = por %p11282_p12, %p11281_p11 }
 0x96f   : > { %p11284_p0 = pnand %p11283_p13, %p11277_p8 }
 0x971   : > { %11287 = shalt.err (!%p11284_p0)
}
 0x972   : > { %11136 = dma.vmem_to_hbm [thread:$0]  (%p11456_p5), %s15306_s0, 64, %s15304_s23, %s8377_s24  }
 0x973 PF: > { %s16272_s30 = sld [smem:[#allocation6_spill]]  ;;  %p11142_p1 = scmp.ge.s32.totalorder %s11322_s29, 2 }
 0x975   : > { %p11139_p2 = pnand %p11142_p1, %p11460_p6 }
 0x979   : > { %s8403_s19 = sand.u32 1, %s16272_s30  }
 0x97a   : > { %s8404_s25 = scalar_lea.sflag [#allocation4], %s8403_s19 }
 0x97b   : > { %11305 = dma.done.wait (!%p11139_p2), %s8404_s25, 64  }
 0x97c   : > { %11307 = vsyncadd (!%p11139_p2), %s8404_s25, 4294967232  ;;  %s16274_s29 = sld [smem:[#allocation8_spill]]  ;;  %s16275_s22 = sld [smem:[#allocation7_spill]] }
 0x97d   : > { %s16276_s28 = sld [smem:[#allocation9_spill]]  ;;  %s16277_s26 = smov %s11314_s27 }
 0x982   : > { %p29_p3 = scmp.ge.s32.totalorder %s16274_s29, 4   ;;  %s16278_s27 = smov %s16275_s22 }
 0x984   :  { %31 = sbr.rel (!%p29_p3) target bundleno = 6 (0x6), region = 126 }
 0x98b   :  { %8409 = vsyncpa [#allocation4], 1 }
 0x98c   :  { %8411 = vsyncpa [#allocation4 + $0x1], 1 }

</bundles_post_ra>
